<compile_context>
chip_gen: v6e
topology: v6e:2x2x1
jax: 0.10.0
libtpu: 0.0.40
codegen_flags: <defaults>
</compile_context>

<pallas_src>
import math

import jax
import jax.numpy as jnp
from jax import lax
from jax.experimental import pallas as pl
from jax.experimental.pallas import tpu as pltpu


def _pad_hw(v, pad, value):
    """Constant-pad a (H, W, C) value by `pad` along H and W, in registers."""
    H, W, C = v.shape
    col = jnp.full((H, pad, C), value, v.dtype)
    v = jnp.concatenate([col, v, col], axis=1)
    row = jnp.full((pad, W + 2 * pad, C), value, v.dtype)
    return jnp.concatenate([row, v, row], axis=0)


def _im2col(v, k):
    """(H, W, C) -> (H*W, k*k*C) 'same' patches (zero halo).

    Tap-major / channel-minor column order, matching w.reshape(k*k*C, Cout)
    for an HWIO weight.
    """
    H, W, C = v.shape
    pad = (k - 1) // 2
    vp = _pad_hw(v, pad, 0)
    cols = [vp[dy:dy + H, dx:dx + W, :].reshape(H * W, C)
            for dy in range(k) for dx in range(k)]
    return jnp.concatenate(cols, axis=-1)


def _inception_kernel(x_ref, wred_ref, sred_ref, bred_ref,
                      w3_ref, s3_ref, b3_ref,
                      w5_ref, s5_ref, b5_ref,
                      wp_ref, sp_ref, bp_ref,
                      out_ref):
    f32 = jnp.float32
    bf16 = jnp.bfloat16
    _, H, W, Cin = x_ref.shape
    P = H * W
    C3r = w3_ref.shape[0] // 9
    C5r = w5_ref.shape[0] // 25
    C1 = wred_ref.shape[1] - C3r - C5r

    x = x_ref[0]                                   # (H, W, Cin), bf16
    xc = x.reshape(P, Cin)

    # ---- fused 1x1 convs: 1x1 branch + 3x3-reduce + 5x5-reduce share xc ----
    y = jnp.dot(xc, wred_ref[...], preferred_element_type=f32)
    y = jnp.maximum(y * sred_ref[...] + bred_ref[...], 0.0)       # f32 BN+ReLU
    a = y[:, :C1]                                                 # (P, C1)
    r3 = y[:, C1:C1 + C3r].astype(bf16).reshape(H, W, C3r)
    r5 = y[:, C1 + C3r:].astype(bf16).reshape(H, W, C5r)

    # ---- 3x3 branch: one im2col matmul (K = 9*C3r) -> BN -> ReLU ----
    y3 = jnp.dot(_im2col(r3, 3), w3_ref[...], preferred_element_type=f32)
    y3 = jnp.maximum(y3 * s3_ref[...] + b3_ref[...], 0.0)

    # ---- 5x5 branch: one im2col matmul (K = 25*C5r) -> BN -> ReLU ----
    y5 = jnp.dot(_im2col(r5, 5), w5_ref[...], preferred_element_type=f32)
    y5 = jnp.maximum(y5 * s5_ref[...] + b5_ref[...], 0.0)

    # ---- pool branch: 3x3/s1 maxpool (-inf halo, PyTorch semantics) -> 1x1 ----
    xp = _pad_hw(x.astype(f32), 1, -jnp.inf)       # f32 maxima (v5e VPU has no bf16)
    m = xp[0:H, 0:W, :]
    for dy in range(3):
        for dx in range(3):
            if dy == 0 and dx == 0:
                continue
            m = jnp.maximum(m, xp[dy:dy + H, dx:dx + W, :])
    yp = jnp.dot(m.astype(bf16).reshape(P, Cin), wp_ref[...],
                 preferred_element_type=f32)
    yp = jnp.maximum(yp * sp_ref[...] + bp_ref[...], 0.0)

    # ---- single store: channel concat done in registers ----
    out_ref[...] = jnp.concatenate([a, y3, y5, yp], axis=-1)[None]


@jax.jit
def inception_forward(x_nchw, params):
    """x_nchw: (N, Cin, H, W) float32. Returns (N, Ctot, H, W) float32."""
    (w1, s1, b1, w3r, s3r, b3r, w3, s3, b3,
     w5r, s5r, b5r, w5, s5, b5, wp, sp, bp) = params
    bf16, f32 = jnp.bfloat16, jnp.float32

    x = jnp.transpose(x_nchw, (0, 2, 3, 1)).astype(bf16)     # NHWC, bf16
    N, H, W, Cin = x.shape
    C1 = w1.shape[1]
    C3r, C3 = w3.shape[2], w3.shape[3]
    C5r, C5 = w5.shape[2], w5.shape[3]
    Cp = wp.shape[1]
    Ctot = C1 + C3 + C5 + Cp
    P = H * W

    # Fuse the three 1x1 convs that share x into one matmul weight/affine.
    w_red = jnp.concatenate([w1, w3r, w5r], axis=1).astype(bf16)  # (Cin, C1+C3r+C5r)
    s_red = jnp.concatenate([s1, s3r, s5r]).reshape(1, -1).astype(f32)
    b_red = jnp.concatenate([b1, b3r, b5r]).reshape(1, -1).astype(f32)
    # im2col weights: flatten (kh, kw, cin) -> K, tap-major / channel-minor.
    w3_2d = w3.reshape(9 * C3r, C3).astype(bf16)
    w5_2d = w5.reshape(25 * C5r, C5).astype(bf16)
    wp_b = wp.astype(bf16)

    def wspec(shape):
        # Full-array block, constant across the batch grid (stays VMEM-resident).
        return pl.BlockSpec(shape, lambda n: (0,) * len(shape))

    out = pl.pallas_call(
        _inception_kernel,
        out_shape=jax.ShapeDtypeStruct((N, P, Ctot), f32),
        grid=(N,),
        in_specs=[
            pl.BlockSpec((1, H, W, Cin), lambda n: (n, 0, 0, 0)),
            wspec(w_red.shape), wspec(s_red.shape), wspec(b_red.shape),
            wspec(w3_2d.shape), wspec((1, C3)), wspec((1, C3)),
            wspec(w5_2d.shape), wspec((1, C5)), wspec((1, C5)),
            wspec(wp_b.shape), wspec((1, Cp)), wspec((1, Cp)),
        ],
        out_specs=pl.BlockSpec((1, P, Ctot), lambda n: (n, 0, 0)),
        compiler_params=pltpu.CompilerParams(
            dimension_semantics=("parallel",)),
    )(x, w_red, s_red, b_red,
      w3_2d, s3.reshape(1, -1), b3.reshape(1, -1),
      w5_2d, s5.reshape(1, -1), b5.reshape(1, -1),
      wp_b, sp.reshape(1, -1), bp.reshape(1, -1))

    out = out.reshape(N, H, W, Ctot)
    return jnp.transpose(out, (0, 3, 1, 2))                  # back to NCHW


def make_params(key, in_channels, out_1x1, out_3x3_r, out_5x5_r,
                out_3x3, out_5x5, out_pool_proj, eps=1e-5):
    """Deterministic synthetic Conv2d + BatchNorm2d (eval-mode folded) params.

    y = relu(conv(x) * scale + shift),
      scale = gamma / sqrt(var + eps), shift = (bias - mean) * scale + beta.
    """
    def conv_bn(k, kh, kw, cin, cout):
        kw_, kb_, kg, kbt, km, kv = jax.random.split(k, 6)
        bound = 1.0 / math.sqrt(cin * kh * kw)
        w = jax.random.uniform(kw_, (kh, kw, cin, cout), jnp.float32, -bound, bound)
        b = jax.random.uniform(kb_, (cout,), jnp.float32, -bound, bound)
        gamma = jax.random.uniform(kg, (cout,), jnp.float32, 0.5, 1.5)
        beta = 0.1 * jax.random.normal(kbt, (cout,), jnp.float32)
        mean = 0.1 * jax.random.normal(km, (cout,), jnp.float32)
        var = jax.random.uniform(kv, (cout,), jnp.float32, 0.5, 1.5)
        scale = gamma / jnp.sqrt(var + eps)
        shift = (b - mean) * scale + beta
        return w, scale, shift

    k1, k3r, k3, k5r, k5, kp = jax.random.split(key, 6)
    w1, s1, b1 = conv_bn(k1, 1, 1, in_channels, out_1x1)
    w3r, s3r, b3r = conv_bn(k3r, 1, 1, in_channels, out_3x3_r)
    w3, s3, b3 = conv_bn(k3, 3, 3, out_3x3_r, out_3x3)
    w5r, s5r, b5r = conv_bn(k5r, 1, 1, in_channels, out_5x5_r)
    w5, s5, b5 = conv_bn(k5, 5, 5, out_5x5_r, out_5x5)
    wp, sp, bp = conv_bn(kp, 1, 1, in_channels, out_pool_proj)
    # 1x1 convolutions are pure channel matmuls: drop the spatial dims.
    w1 = w1.reshape(in_channels, out_1x1)
    w3r = w3r.reshape(in_channels, out_3x3_r)
    w5r = w5r.reshape(in_channels, out_5x5_r)
    wp = wp.reshape(in_channels, out_pool_proj)
    return (w1, s1, b1, w3r, s3r, b3r, w3, s3, b3,
            w5r, s5r, b5r, w5, s5, b5, wp, sp, bp)


def inception_reference(x_nchw, params):
    """Pure-JAX (XLA) reference mirroring the kernel's bf16-input / f32-accum
    / f32-epilogue precision policy, for tight correctness checking."""
    (w1, s1, b1, w3r, s3r, b3r, w3, s3, b3,
     w5r, s5r, b5r, w5, s5, b5, wp, sp, bp) = params
    x = jnp.transpose(x_nchw, (0, 2, 3, 1)).astype(jnp.float32)
    dn = ('NHWC', 'HWIO', 'NHWC')

    def cbr(inp, w, s, b, pad):
        if w.ndim == 2:
            w = w.reshape(1, 1, *w.shape)
        y = lax.conv_general_dilated(
            inp.astype(jnp.bfloat16), w.astype(jnp.bfloat16), (1, 1),
            [(pad, pad), (pad, pad)], dimension_numbers=dn,
            preferred_element_type=jnp.float32)
        return jnp.maximum(y * s.reshape(1, 1, 1, -1) + b.reshape(1, 1, 1, -1), 0.0)

    a = cbr(x, w1, s1, b1, 0)
    bb = cbr(cbr(x, w3r, s3r, b3r, 0), w3, s3, b3, 1)
    cc = cbr(cbr(x, w5r, s5r, b5r, 0), w5, s5, b5, 2)
    xb = x.astype(jnp.bfloat16).astype(jnp.float32)
    m = lax.reduce_window(xb, -jnp.inf, lax.max, (1, 3, 3, 1), (1, 1, 1, 1),
                          [(0, 0), (1, 1), (1, 1), (0, 0)])
    dd = cbr(m, wp, sp, bp, 0)
    out = jnp.concatenate([a, bb, cc, dd], axis=-1)
    return jnp.transpose(out, (0, 3, 1, 2))


if __name__ == "__main__":
    key = jax.random.PRNGKey(0)
    kx, kp = jax.random.split(key)

    # InceptionModule(in_channels=4, out_1x1=8, out_3x3_r=4, out_5x5_r=4,
    #                 out_3x3=8, out_5x5=8, out_pool_proj=8)
    N, Cin, H, W = 2, 4, 16, 16
    x = jax.random.normal(kx, (N, Cin, H, W), jnp.float32)
    params = make_params(kp, Cin, 8, 4, 4, 8, 8, 8)

    out = jax.block_until_ready(inception_forward(x, params))
    ref = inception_reference(x, params)

    assert out.shape == (N, 8 + 8 + 8 + 8, H, W), out.shape
    max_err = float(jnp.max(jnp.abs(out - ref)))
    assert max_err < 5e-3, f"max abs err {max_err}"
    print("KERNEL_OK")
</pallas_src>

<mosaic_0001>
module attributes {stable_mosaic.version = 11 : i64} {
  func.func @_inception_kernel(%arg0: i32, %arg1: memref<1x16x16x4xbf16, #tpu.memory_space<vmem>>, %arg2: memref<4x16xbf16, #tpu.memory_space<vmem>>, %arg3: memref<1x16xf32, #tpu.memory_space<vmem>>, %arg4: memref<1x16xf32, #tpu.memory_space<vmem>>, %arg5: memref<36x8xbf16, #tpu.memory_space<vmem>>, %arg6: memref<1x8xf32, #tpu.memory_space<vmem>>, %arg7: memref<1x8xf32, #tpu.memory_space<vmem>>, %arg8: memref<100x8xbf16, #tpu.memory_space<vmem>>, %arg9: memref<1x8xf32, #tpu.memory_space<vmem>>, %arg10: memref<1x8xf32, #tpu.memory_space<vmem>>, %arg11: memref<4x8xbf16, #tpu.memory_space<vmem>>, %arg12: memref<1x8xf32, #tpu.memory_space<vmem>>, %arg13: memref<1x8xf32, #tpu.memory_space<vmem>>, %arg14: memref<1x256x32xf32, #tpu.memory_space<vmem>>) attributes {dimension_semantics = [#tpu.dimension_semantics<parallel>], iteration_bounds = array<i64: 2>, scalar_prefetch = 0 : i64, scratch_operands = 0 : i64, tpu.core_type = #tpu.core_type<tc>, window_params = [{transform_indices = @transform_0, window_bounds = array<i64: 1, 16, 16, 4>}, {pipeline_mode = #tpu.pipeline_mode<synchronous>, transform_indices = @transform_1, window_bounds = array<i64: 4, 16>}, {pipeline_mode = #tpu.pipeline_mode<synchronous>, transform_indices = @transform_2, window_bounds = array<i64: 1, 16>}, {pipeline_mode = #tpu.pipeline_mode<synchronous>, transform_indices = @transform_3, window_bounds = array<i64: 1, 16>}, {pipeline_mode = #tpu.pipeline_mode<synchronous>, transform_indices = @transform_4, window_bounds = array<i64: 36, 8>}, {pipeline_mode = #tpu.pipeline_mode<synchronous>, transform_indices = @transform_5, window_bounds = array<i64: 1, 8>}, {pipeline_mode = #tpu.pipeline_mode<synchronous>, transform_indices = @transform_6, window_bounds = array<i64: 1, 8>}, {pipeline_mode = #tpu.pipeline_mode<synchronous>, transform_indices = @transform_7, window_bounds = array<i64: 100, 8>}, {pipeline_mode = #tpu.pipeline_mode<synchronous>, transform_indices = @transform_8, window_bounds = array<i64: 1, 8>}, {pipeline_mode = #tpu.pipeline_mode<synchronous>, transform_indices = @transform_9, window_bounds = array<i64: 1, 8>}, {pipeline_mode = #tpu.pipeline_mode<synchronous>, transform_indices = @transform_10, window_bounds = array<i64: 4, 8>}, {pipeline_mode = #tpu.pipeline_mode<synchronous>, transform_indices = @transform_11, window_bounds = array<i64: 1, 8>}, {pipeline_mode = #tpu.pipeline_mode<synchronous>, transform_indices = @transform_12, window_bounds = array<i64: 1, 8>}, {transform_indices = @transform_13, window_bounds = array<i64: 1, 256, 32>}]} {
    %c0 = arith.constant 0 : index
    %c0_0 = arith.constant 0 : index
    %c0_1 = arith.constant 0 : index
    %c0_2 = arith.constant 0 : index
    %0 = vector.load %arg1[%c0, %c0_0, %c0_1, %c0_2] : memref<1x16x16x4xbf16, #tpu.memory_space<vmem>>, vector<1x16x16x4xbf16>
    %1 = vector.shape_cast %0 : vector<1x16x16x4xbf16> to vector<16x16x4xbf16>
    %2 = vector.shape_cast %1 : vector<16x16x4xbf16> to vector<256x4xbf16>
    %c0_3 = arith.constant 0 : index
    %c0_4 = arith.constant 0 : index
    %3 = vector.load %arg2[%c0_3, %c0_4] : memref<4x16xbf16, #tpu.memory_space<vmem>>, vector<4x16xbf16>
    %cst = arith.constant dense<0.000000e+00> : vector<256x16xf32>
    %4 = tpu.matmul %2, %3, %cst {dimension_numbers = #tpu.dot_dimension_numbers<[1], [0], [0], [1], [0, 0, 1, 1], [], []>} : vector<256x4xbf16>, vector<4x16xbf16>, vector<256x16xf32> -> vector<256x16xf32>
    %c0_5 = arith.constant 0 : index
    %c0_6 = arith.constant 0 : index
    %5 = vector.load %arg3[%c0_5, %c0_6] : memref<1x16xf32, #tpu.memory_space<vmem>>, vector<1x16xf32>
    %6 = vector.broadcast %5 : vector<1x16xf32> to vector<256x16xf32>
    %7 = arith.mulf %4, %6 : vector<256x16xf32>
    %c0_7 = arith.constant 0 : index
    %c0_8 = arith.constant 0 : index
    %8 = vector.load %arg4[%c0_7, %c0_8] : memref<1x16xf32, #tpu.memory_space<vmem>>, vector<1x16xf32>
    %9 = vector.broadcast %8 : vector<1x16xf32> to vector<256x16xf32>
    %10 = arith.addf %7, %9 : vector<256x16xf32>
    %cst_9 = arith.constant 0.000000e+00 : f32
    %11 = vector.broadcast %cst_9 : f32 to vector<256x16xf32>
    %12 = arith.maximumf %10, %11 : vector<256x16xf32>
    %13 = vector.extract_strided_slice %12 {offsets = [0, 0], sizes = [256, 8], strides = [1, 1]} : vector<256x16xf32> to vector<256x8xf32>
    %14 = vector.extract_strided_slice %12 {offsets = [0, 8], sizes = [256, 4], strides = [1, 1]} : vector<256x16xf32> to vector<256x4xf32>
    %15 = arith.truncf %14 : vector<256x4xf32> to vector<256x4xbf16>
    %16 = vector.shape_cast %15 : vector<256x4xbf16> to vector<16x16x4xbf16>
    %17 = vector.extract_strided_slice %12 {offsets = [0, 12], sizes = [256, 4], strides = [1, 1]} : vector<256x16xf32> to vector<256x4xf32>
    %18 = arith.truncf %17 : vector<256x4xf32> to vector<256x4xbf16>
    %19 = vector.shape_cast %18 : vector<256x4xbf16> to vector<16x16x4xbf16>
    %cst_10 = arith.constant 0.000000e+00 : bf16
    %20 = vector.broadcast %cst_10 : bf16 to vector<16x1x4xbf16>
    %21 = tpu.concatenate %20, %16, %20 in 1 : vector<16x1x4xbf16>, vector<16x16x4xbf16>, vector<16x1x4xbf16> -> vector<16x18x4xbf16>
    %cst_11 = arith.constant 0.000000e+00 : bf16
    %22 = vector.broadcast %cst_11 : bf16 to vector<1x18x4xbf16>
    %23 = tpu.concatenate %22, %21, %22 in 0 : vector<1x18x4xbf16>, vector<16x18x4xbf16>, vector<1x18x4xbf16> -> vector<18x18x4xbf16>
    %24 = vector.extract_strided_slice %23 {offsets = [0, 0, 0], sizes = [16, 16, 4], strides = [1, 1, 1]} : vector<18x18x4xbf16> to vector<16x16x4xbf16>
    %25 = vector.shape_cast %24 : vector<16x16x4xbf16> to vector<256x4xbf16>
    %26 = vector.extract_strided_slice %23 {offsets = [0, 1, 0], sizes = [16, 16, 4], strides = [1, 1, 1]} : vector<18x18x4xbf16> to vector<16x16x4xbf16>
    %27 = vector.shape_cast %26 : vector<16x16x4xbf16> to vector<256x4xbf16>
    %28 = vector.extract_strided_slice %23 {offsets = [0, 2, 0], sizes = [16, 16, 4], strides = [1, 1, 1]} : vector<18x18x4xbf16> to vector<16x16x4xbf16>
    %29 = vector.shape_cast %28 : vector<16x16x4xbf16> to vector<256x4xbf16>
    %30 = vector.extract_strided_slice %23 {offsets = [1, 0, 0], sizes = [16, 16, 4], strides = [1, 1, 1]} : vector<18x18x4xbf16> to vector<16x16x4xbf16>
    %31 = vector.shape_cast %30 : vector<16x16x4xbf16> to vector<256x4xbf16>
    %32 = vector.extract_strided_slice %23 {offsets = [1, 1, 0], sizes = [16, 16, 4], strides = [1, 1, 1]} : vector<18x18x4xbf16> to vector<16x16x4xbf16>
    %33 = vector.shape_cast %32 : vector<16x16x4xbf16> to vector<256x4xbf16>
    %34 = vector.extract_strided_slice %23 {offsets = [1, 2, 0], sizes = [16, 16, 4], strides = [1, 1, 1]} : vector<18x18x4xbf16> to vector<16x16x4xbf16>
    %35 = vector.shape_cast %34 : vector<16x16x4xbf16> to vector<256x4xbf16>
    %36 = vector.extract_strided_slice %23 {offsets = [2, 0, 0], sizes = [16, 16, 4], strides = [1, 1, 1]} : vector<18x18x4xbf16> to vector<16x16x4xbf16>
    %37 = vector.shape_cast %36 : vector<16x16x4xbf16> to vector<256x4xbf16>
    %38 = vector.extract_strided_slice %23 {offsets = [2, 1, 0], sizes = [16, 16, 4], strides = [1, 1, 1]} : vector<18x18x4xbf16> to vector<16x16x4xbf16>
    %39 = vector.shape_cast %38 : vector<16x16x4xbf16> to vector<256x4xbf16>
    %40 = vector.extract_strided_slice %23 {offsets = [2, 2, 0], sizes = [16, 16, 4], strides = [1, 1, 1]} : vector<18x18x4xbf16> to vector<16x16x4xbf16>
    %41 = vector.shape_cast %40 : vector<16x16x4xbf16> to vector<256x4xbf16>
    %42 = tpu.concatenate %25, %27, %29, %31, %33, %35, %37, %39, %41 in 1 : vector<256x4xbf16>, vector<256x4xbf16>, vector<256x4xbf16>, vector<256x4xbf16>, vector<256x4xbf16>, vector<256x4xbf16>, vector<256x4xbf16>, vector<256x4xbf16>, vector<256x4xbf16> -> vector<256x36xbf16>
    %c0_12 = arith.constant 0 : index
    %c0_13 = arith.constant 0 : index
    %43 = vector.load %arg5[%c0_12, %c0_13] : memref<36x8xbf16, #tpu.memory_space<vmem>>, vector<36x8xbf16>
    %cst_14 = arith.constant dense<0.000000e+00> : vector<256x8xf32>
    %44 = tpu.matmul %42, %43, %cst_14 {dimension_numbers = #tpu.dot_dimension_numbers<[1], [0], [0], [1], [0, 0, 1, 1], [], []>} : vector<256x36xbf16>, vector<36x8xbf16>, vector<256x8xf32> -> vector<256x8xf32>
    %c0_15 = arith.constant 0 : index
    %c0_16 = arith.constant 0 : index
    %45 = vector.load %arg6[%c0_15, %c0_16] : memref<1x8xf32, #tpu.memory_space<vmem>>, vector<1x8xf32>
    %46 = vector.broadcast %45 : vector<1x8xf32> to vector<256x8xf32>
    %47 = arith.mulf %44, %46 : vector<256x8xf32>
    %c0_17 = arith.constant 0 : index
    %c0_18 = arith.constant 0 : index
    %48 = vector.load %arg7[%c0_17, %c0_18] : memref<1x8xf32, #tpu.memory_space<vmem>>, vector<1x8xf32>
    %49 = vector.broadcast %48 : vector<1x8xf32> to vector<256x8xf32>
    %50 = arith.addf %47, %49 : vector<256x8xf32>
    %cst_19 = arith.constant 0.000000e+00 : f32
    %51 = vector.broadcast %cst_19 : f32 to vector<256x8xf32>
    %52 = arith.maximumf %50, %51 : vector<256x8xf32>
    %cst_20 = arith.constant 0.000000e+00 : bf16
    %53 = vector.broadcast %cst_20 : bf16 to vector<16x2x4xbf16>
    %54 = tpu.concatenate %53, %19, %53 in 1 : vector<16x2x4xbf16>, vector<16x16x4xbf16>, vector<16x2x4xbf16> -> vector<16x20x4xbf16>
    %cst_21 = arith.constant 0.000000e+00 : bf16
    %55 = vector.broadcast %cst_21 : bf16 to vector<2x20x4xbf16>
    %56 = tpu.concatenate %55, %54, %55 in 0 : vector<2x20x4xbf16>, vector<16x20x4xbf16>, vector<2x20x4xbf16> -> vector<20x20x4xbf16>
    %57 = vector.extract_strided_slice %56 {offsets = [0, 0, 0], sizes = [16, 16, 4], strides = [1, 1, 1]} : vector<20x20x4xbf16> to vector<16x16x4xbf16>
    %58 = vector.shape_cast %57 : vector<16x16x4xbf16> to vector<256x4xbf16>
    %59 = vector.extract_strided_slice %56 {offsets = [0, 1, 0], sizes = [16, 16, 4], strides = [1, 1, 1]} : vector<20x20x4xbf16> to vector<16x16x4xbf16>
    %60 = vector.shape_cast %59 : vector<16x16x4xbf16> to vector<256x4xbf16>
    %61 = vector.extract_strided_slice %56 {offsets = [0, 2, 0], sizes = [16, 16, 4], strides = [1, 1, 1]} : vector<20x20x4xbf16> to vector<16x16x4xbf16>
    %62 = vector.shape_cast %61 : vector<16x16x4xbf16> to vector<256x4xbf16>
    %63 = vector.extract_strided_slice %56 {offsets = [0, 3, 0], sizes = [16, 16, 4], strides = [1, 1, 1]} : vector<20x20x4xbf16> to vector<16x16x4xbf16>
    %64 = vector.shape_cast %63 : vector<16x16x4xbf16> to vector<256x4xbf16>
    %65 = vector.extract_strided_slice %56 {offsets = [0, 4, 0], sizes = [16, 16, 4], strides = [1, 1, 1]} : vector<20x20x4xbf16> to vector<16x16x4xbf16>
    %66 = vector.shape_cast %65 : vector<16x16x4xbf16> to vector<256x4xbf16>
    %67 = vector.extract_strided_slice %56 {offsets = [1, 0, 0], sizes = [16, 16, 4], strides = [1, 1, 1]} : vector<20x20x4xbf16> to vector<16x16x4xbf16>
    %68 = vector.shape_cast %67 : vector<16x16x4xbf16> to vector<256x4xbf16>
    %69 = vector.extract_strided_slice %56 {offsets = [1, 1, 0], sizes = [16, 16, 4], strides = [1, 1, 1]} : vector<20x20x4xbf16> to vector<16x16x4xbf16>
    %70 = vector.shape_cast %69 : vector<16x16x4xbf16> to vector<256x4xbf16>
    %71 = vector.extract_strided_slice %56 {offsets = [1, 2, 0], sizes = [16, 16, 4], strides = [1, 1, 1]} : vector<20x20x4xbf16> to vector<16x16x4xbf16>
    %72 = vector.shape_cast %71 : vector<16x16x4xbf16> to vector<256x4xbf16>
    %73 = vector.extract_strided_slice %56 {offsets = [1, 3, 0], sizes = [16, 16, 4], strides = [1, 1, 1]} : vector<20x20x4xbf16> to vector<16x16x4xbf16>
    %74 = vector.shape_cast %73 : vector<16x16x4xbf16> to vector<256x4xbf16>
    %75 = vector.extract_strided_slice %56 {offsets = [1, 4, 0], sizes = [16, 16, 4], strides = [1, 1, 1]} : vector<20x20x4xbf16> to vector<16x16x4xbf16>
    %76 = vector.shape_cast %75 : vector<16x16x4xbf16> to vector<256x4xbf16>
    %77 = vector.extract_strided_slice %56 {offsets = [2, 0, 0], sizes = [16, 16, 4], strides = [1, 1, 1]} : vector<20x20x4xbf16> to vector<16x16x4xbf16>
    %78 = vector.shape_cast %77 : vector<16x16x4xbf16> to vector<256x4xbf16>
    %79 = vector.extract_strided_slice %56 {offsets = [2, 1, 0], sizes = [16, 16, 4], strides = [1, 1, 1]} : vector<20x20x4xbf16> to vector<16x16x4xbf16>
    %80 = vector.shape_cast %79 : vector<16x16x4xbf16> to vector<256x4xbf16>
    %81 = vector.extract_strided_slice %56 {offsets = [2, 2, 0], sizes = [16, 16, 4], strides = [1, 1, 1]} : vector<20x20x4xbf16> to vector<16x16x4xbf16>
    %82 = vector.shape_cast %81 : vector<16x16x4xbf16> to vector<256x4xbf16>
    %83 = vector.extract_strided_slice %56 {offsets = [2, 3, 0], sizes = [16, 16, 4], strides = [1, 1, 1]} : vector<20x20x4xbf16> to vector<16x16x4xbf16>
    %84 = vector.shape_cast %83 : vector<16x16x4xbf16> to vector<256x4xbf16>
    %85 = vector.extract_strided_slice %56 {offsets = [2, 4, 0], sizes = [16, 16, 4], strides = [1, 1, 1]} : vector<20x20x4xbf16> to vector<16x16x4xbf16>
    %86 = vector.shape_cast %85 : vector<16x16x4xbf16> to vector<256x4xbf16>
    %87 = vector.extract_strided_slice %56 {offsets = [3, 0, 0], sizes = [16, 16, 4], strides = [1, 1, 1]} : vector<20x20x4xbf16> to vector<16x16x4xbf16>
    %88 = vector.shape_cast %87 : vector<16x16x4xbf16> to vector<256x4xbf16>
    %89 = vector.extract_strided_slice %56 {offsets = [3, 1, 0], sizes = [16, 16, 4], strides = [1, 1, 1]} : vector<20x20x4xbf16> to vector<16x16x4xbf16>
    %90 = vector.shape_cast %89 : vector<16x16x4xbf16> to vector<256x4xbf16>
    %91 = vector.extract_strided_slice %56 {offsets = [3, 2, 0], sizes = [16, 16, 4], strides = [1, 1, 1]} : vector<20x20x4xbf16> to vector<16x16x4xbf16>
    %92 = vector.shape_cast %91 : vector<16x16x4xbf16> to vector<256x4xbf16>
    %93 = vector.extract_strided_slice %56 {offsets = [3, 3, 0], sizes = [16, 16, 4], strides = [1, 1, 1]} : vector<20x20x4xbf16> to vector<16x16x4xbf16>
    %94 = vector.shape_cast %93 : vector<16x16x4xbf16> to vector<256x4xbf16>
    %95 = vector.extract_strided_slice %56 {offsets = [3, 4, 0], sizes = [16, 16, 4], strides = [1, 1, 1]} : vector<20x20x4xbf16> to vector<16x16x4xbf16>
    %96 = vector.shape_cast %95 : vector<16x16x4xbf16> to vector<256x4xbf16>
    %97 = vector.extract_strided_slice %56 {offsets = [4, 0, 0], sizes = [16, 16, 4], strides = [1, 1, 1]} : vector<20x20x4xbf16> to vector<16x16x4xbf16>
    %98 = vector.shape_cast %97 : vector<16x16x4xbf16> to vector<256x4xbf16>
    %99 = vector.extract_strided_slice %56 {offsets = [4, 1, 0], sizes = [16, 16, 4], strides = [1, 1, 1]} : vector<20x20x4xbf16> to vector<16x16x4xbf16>
    %100 = vector.shape_cast %99 : vector<16x16x4xbf16> to vector<256x4xbf16>
    %101 = vector.extract_strided_slice %56 {offsets = [4, 2, 0], sizes = [16, 16, 4], strides = [1, 1, 1]} : vector<20x20x4xbf16> to vector<16x16x4xbf16>
    %102 = vector.shape_cast %101 : vector<16x16x4xbf16> to vector<256x4xbf16>
    %103 = vector.extract_strided_slice %56 {offsets = [4, 3, 0], sizes = [16, 16, 4], strides = [1, 1, 1]} : vector<20x20x4xbf16> to vector<16x16x4xbf16>
    %104 = vector.shape_cast %103 : vector<16x16x4xbf16> to vector<256x4xbf16>
    %105 = vector.extract_strided_slice %56 {offsets = [4, 4, 0], sizes = [16, 16, 4], strides = [1, 1, 1]} : vector<20x20x4xbf16> to vector<16x16x4xbf16>
    %106 = vector.shape_cast %105 : vector<16x16x4xbf16> to vector<256x4xbf16>
    %107 = tpu.concatenate %58, %60, %62, %64, %66, %68, %70, %72, %74, %76, %78, %80, %82, %84, %86, %88 in 1 : vector<256x4xbf16>, vector<256x4xbf16>, vector<256x4xbf16>, vector<256x4xbf16>, vector<256x4xbf16>, vector<256x4xbf16>, vector<256x4xbf16>, vector<256x4xbf16>, vector<256x4xbf16>, vector<256x4xbf16>, vector<256x4xbf16>, vector<256x4xbf16>, vector<256x4xbf16>, vector<256x4xbf16>, vector<256x4xbf16>, vector<256x4xbf16> -> vector<256x64xbf16>
    %108 = tpu.concatenate %90, %92, %94, %96, %98, %100, %102, %104, %106 in 1 : vector<256x4xbf16>, vector<256x4xbf16>, vector<256x4xbf16>, vector<256x4xbf16>, vector<256x4xbf16>, vector<256x4xbf16>, vector<256x4xbf16>, vector<256x4xbf16>, vector<256x4xbf16> -> vector<256x36xbf16>
    %109 = tpu.concatenate %107, %108 in 1 : vector<256x64xbf16>, vector<256x36xbf16> -> vector<256x100xbf16>
    %c0_22 = arith.constant 0 : index
    %c0_23 = arith.constant 0 : index
    %110 = vector.load %arg8[%c0_22, %c0_23] : memref<100x8xbf16, #tpu.memory_space<vmem>>, vector<100x8xbf16>
    %cst_24 = arith.constant dense<0.000000e+00> : vector<256x8xf32>
    %111 = tpu.matmul %109, %110, %cst_24 {dimension_numbers = #tpu.dot_dimension_numbers<[1], [0], [0], [1], [0, 0, 1, 1], [], []>} : vector<256x100xbf16>, vector<100x8xbf16>, vector<256x8xf32> -> vector<256x8xf32>
    %c0_25 = arith.constant 0 : index
    %c0_26 = arith.constant 0 : index
    %112 = vector.load %arg9[%c0_25, %c0_26] : memref<1x8xf32, #tpu.memory_space<vmem>>, vector<1x8xf32>
    %113 = vector.broadcast %112 : vector<1x8xf32> to vector<256x8xf32>
    %114 = arith.mulf %111, %113 : vector<256x8xf32>
    %c0_27 = arith.constant 0 : index
    %c0_28 = arith.constant 0 : index
    %115 = vector.load %arg10[%c0_27, %c0_28] : memref<1x8xf32, #tpu.memory_space<vmem>>, vector<1x8xf32>
    %116 = vector.broadcast %115 : vector<1x8xf32> to vector<256x8xf32>
    %117 = arith.addf %114, %116 : vector<256x8xf32>
    %cst_29 = arith.constant 0.000000e+00 : f32
    %118 = vector.broadcast %cst_29 : f32 to vector<256x8xf32>
    %119 = arith.maximumf %117, %118 : vector<256x8xf32>
    %120 = arith.extf %1 : vector<16x16x4xbf16> to vector<16x16x4xf32>
    %cst_30 = arith.constant 0xFF800000 : f32
    %121 = vector.broadcast %cst_30 : f32 to vector<16x1x4xf32>
    %122 = tpu.concatenate %121, %120, %121 in 1 : vector<16x1x4xf32>, vector<16x16x4xf32>, vector<16x1x4xf32> -> vector<16x18x4xf32>
    %cst_31 = arith.constant 0xFF800000 : f32
    %123 = vector.broadcast %cst_31 : f32 to vector<1x18x4xf32>
    %124 = tpu.concatenate %123, %122, %123 in 0 : vector<1x18x4xf32>, vector<16x18x4xf32>, vector<1x18x4xf32> -> vector<18x18x4xf32>
    %125 = vector.extract_strided_slice %124 {offsets = [0, 0, 0], sizes = [16, 16, 4], strides = [1, 1, 1]} : vector<18x18x4xf32> to vector<16x16x4xf32>
    %126 = vector.extract_strided_slice %124 {offsets = [0, 1, 0], sizes = [16, 16, 4], strides = [1, 1, 1]} : vector<18x18x4xf32> to vector<16x16x4xf32>
    %127 = arith.maximumf %125, %126 : vector<16x16x4xf32>
    %128 = vector.extract_strided_slice %124 {offsets = [0, 2, 0], sizes = [16, 16, 4], strides = [1, 1, 1]} : vector<18x18x4xf32> to vector<16x16x4xf32>
    %129 = arith.maximumf %127, %128 : vector<16x16x4xf32>
    %130 = vector.extract_strided_slice %124 {offsets = [1, 0, 0], sizes = [16, 16, 4], strides = [1, 1, 1]} : vector<18x18x4xf32> to vector<16x16x4xf32>
    %131 = arith.maximumf %129, %130 : vector<16x16x4xf32>
    %132 = vector.extract_strided_slice %124 {offsets = [1, 1, 0], sizes = [16, 16, 4], strides = [1, 1, 1]} : vector<18x18x4xf32> to vector<16x16x4xf32>
    %133 = arith.maximumf %131, %132 : vector<16x16x4xf32>
    %134 = vector.extract_strided_slice %124 {offsets = [1, 2, 0], sizes = [16, 16, 4], strides = [1, 1, 1]} : vector<18x18x4xf32> to vector<16x16x4xf32>
    %135 = arith.maximumf %133, %134 : vector<16x16x4xf32>
    %136 = vector.extract_strided_slice %124 {offsets = [2, 0, 0], sizes = [16, 16, 4], strides = [1, 1, 1]} : vector<18x18x4xf32> to vector<16x16x4xf32>
    %137 = arith.maximumf %135, %136 : vector<16x16x4xf32>
    %138 = vector.extract_strided_slice %124 {offsets = [2, 1, 0], sizes = [16, 16, 4], strides = [1, 1, 1]} : vector<18x18x4xf32> to vector<16x16x4xf32>
    %139 = arith.maximumf %137, %138 : vector<16x16x4xf32>
    %140 = vector.extract_strided_slice %124 {offsets = [2, 2, 0], sizes = [16, 16, 4], strides = [1, 1, 1]} : vector<18x18x4xf32> to vector<16x16x4xf32>
    %141 = arith.maximumf %139, %140 : vector<16x16x4xf32>
    %142 = arith.truncf %141 : vector<16x16x4xf32> to vector<16x16x4xbf16>
    %143 = vector.shape_cast %142 : vector<16x16x4xbf16> to vector<256x4xbf16>
    %c0_32 = arith.constant 0 : index
    %c0_33 = arith.constant 0 : index
    %144 = vector.load %arg11[%c0_32, %c0_33] : memref<4x8xbf16, #tpu.memory_space<vmem>>, vector<4x8xbf16>
    %cst_34 = arith.constant dense<0.000000e+00> : vector<256x8xf32>
    %145 = tpu.matmul %143, %144, %cst_34 {dimension_numbers = #tpu.dot_dimension_numbers<[1], [0], [0], [1], [0, 0, 1, 1], [], []>} : vector<256x4xbf16>, vector<4x8xbf16>, vector<256x8xf32> -> vector<256x8xf32>
    %c0_35 = arith.constant 0 : index
    %c0_36 = arith.constant 0 : index
    %146 = vector.load %arg12[%c0_35, %c0_36] : memref<1x8xf32, #tpu.memory_space<vmem>>, vector<1x8xf32>
    %147 = vector.broadcast %146 : vector<1x8xf32> to vector<256x8xf32>
    %148 = arith.mulf %145, %147 : vector<256x8xf32>
    %c0_37 = arith.constant 0 : index
    %c0_38 = arith.constant 0 : index
    %149 = vector.load %arg13[%c0_37, %c0_38] : memref<1x8xf32, #tpu.memory_space<vmem>>, vector<1x8xf32>
    %150 = vector.broadcast %149 : vector<1x8xf32> to vector<256x8xf32>
    %151 = arith.addf %148, %150 : vector<256x8xf32>
    %cst_39 = arith.constant 0.000000e+00 : f32
    %152 = vector.broadcast %cst_39 : f32 to vector<256x8xf32>
    %153 = arith.maximumf %151, %152 : vector<256x8xf32>
    %154 = tpu.concatenate %13, %52, %119, %153 in 1 : vector<256x8xf32>, vector<256x8xf32>, vector<256x8xf32>, vector<256x8xf32> -> vector<256x32xf32>
    %155 = vector.shape_cast %154 : vector<256x32xf32> to vector<1x256x32xf32>
    %c0_40 = arith.constant 0 : index
    %c0_41 = arith.constant 0 : index
    %c0_42 = arith.constant 0 : index
    %156 = vector.load %arg14[%c0_40, %c0_41, %c0_42] : memref<1x256x32xf32, #tpu.memory_space<vmem>>, vector<1x256x32xf32>
    tpu.vector_store %arg14[%c0_40, %c0_41, %c0_42], %155 {strides = array<i32>} : memref<1x256x32xf32, #tpu.memory_space<vmem>>, vector<1x256x32xf32>,
    return
  }
  func.func @transform_0(%arg0: i32) -> (i32, i32, i32, i32) {
    %c0_i32 = arith.constant 0 : i32
    %c0_i32_0 = arith.constant 0 : i32
    %c0_i32_1 = arith.constant 0 : i32
    %c0_i32_2 = arith.constant 0 : i32
    return %arg0, %c0_i32, %c0_i32_0, %c0_i32_1 : i32, i32, i32, i32
  }
  func.func @transform_1(%arg0: i32) -> (i32, i32) {
    %c0_i32 = arith.constant 0 : i32
    %c0_i32_0 = arith.constant 0 : i32
    %c0_i32_1 = arith.constant 0 : i32
    return %c0_i32, %c0_i32_0 : i32, i32
  }
  func.func @transform_2(%arg0: i32) -> (i32, i32) {
    %c0_i32 = arith.constant 0 : i32
    %c0_i32_0 = arith.constant 0 : i32
    %c0_i32_1 = arith.constant 0 : i32
    return %c0_i32, %c0_i32_0 : i32, i32
  }
  func.func @transform_3(%arg0: i32) -> (i32, i32) {
    %c0_i32 = arith.constant 0 : i32
    %c0_i32_0 = arith.constant 0 : i32
    %c0_i32_1 = arith.constant 0 : i32
    return %c0_i32, %c0_i32_0 : i32, i32
  }
  func.func @transform_4(%arg0: i32) -> (i32, i32) {
    %c0_i32 = arith.constant 0 : i32
    %c0_i32_0 = arith.constant 0 : i32
    %c0_i32_1 = arith.constant 0 : i32
    return %c0_i32, %c0_i32_0 : i32, i32
  }
  func.func @transform_5(%arg0: i32) -> (i32, i32) {
    %c0_i32 = arith.constant 0 : i32
    %c0_i32_0 = arith.constant 0 : i32
    %c0_i32_1 = arith.constant 0 : i32
    return %c0_i32, %c0_i32_0 : i32, i32
  }
  func.func @transform_6(%arg0: i32) -> (i32, i32) {
    %c0_i32 = arith.constant 0 : i32
    %c0_i32_0 = arith.constant 0 : i32
    %c0_i32_1 = arith.constant 0 : i32
    return %c0_i32, %c0_i32_0 : i32, i32
  }
  func.func @transform_7(%arg0: i32) -> (i32, i32) {
    %c0_i32 = arith.constant 0 : i32
    %c0_i32_0 = arith.constant 0 : i32
    %c0_i32_1 = arith.constant 0 : i32
    return %c0_i32, %c0_i32_0 : i32, i32
  }
  func.func @transform_8(%arg0: i32) -> (i32, i32) {
    %c0_i32 = arith.constant 0 : i32
    %c0_i32_0 = arith.constant 0 : i32
    %c0_i32_1 = arith.constant 0 : i32
    return %c0_i32, %c0_i32_0 : i32, i32
  }
  func.func @transform_9(%arg0: i32) -> (i32, i32) {
    %c0_i32 = arith.constant 0 : i32
    %c0_i32_0 = arith.constant 0 : i32
    %c0_i32_1 = arith.constant 0 : i32
    return %c0_i32, %c0_i32_0 : i32, i32
  }
  func.func @transform_10(%arg0: i32) -> (i32, i32) {
    %c0_i32 = arith.constant 0 : i32
    %c0_i32_0 = arith.constant 0 : i32
    %c0_i32_1 = arith.constant 0 : i32
    return %c0_i32, %c0_i32_0 : i32, i32
  }
  func.func @transform_11(%arg0: i32) -> (i32, i32) {
    %c0_i32 = arith.constant 0 : i32
    %c0_i32_0 = arith.constant 0 : i32
    %c0_i32_1 = arith.constant 0 : i32
    return %c0_i32, %c0_i32_0 : i32, i32
  }
  func.func @transform_12(%arg0: i32) -> (i32, i32) {
    %c0_i32 = arith.constant 0 : i32
    %c0_i32_0 = arith.constant 0 : i32
    %c0_i32_1 = arith.constant 0 : i32
    return %c0_i32, %c0_i32_0 : i32, i32
  }
  func.func @transform_13(%arg0: i32) -> (i32, i32, i32) {
    %c0_i32 = arith.constant 0 : i32
    %c0_i32_0 = arith.constant 0 : i32
    %c0_i32_1 = arith.constant 0 : i32
    return %arg0, %c0_i32, %c0_i32_0 : i32, i32, i32
  }
}

</mosaic_0001>

<bundles_post_ra>
// kernel: inception_forward.1
= control target key start
LH: loop header
LB: loop body
LE: loop exit
PB: predicated region body
PF: predicated region fallthrough
CT: control target
= control target key end

     0   :  { %s12822_s0 = inlined_call_operand.vmem [shape: bf16[2,16,16,4], index: 0, kind: input, shape index: {}]   ;;  %s12823_s1 = inlined_call_operand.vmem [shape: bf16[4,16], index: 1, kind: input, shape index: {}]   ;;  %s12824_s2 = inlined_call_operand.vmem [shape: f32[1,16], index: 2, kind: input, shape index: {}]   ;;  %s12825_s3 = inlined_call_operand.vmem [shape: f32[1,16], index: 3, kind: input, shape index: {}]   ;;  %s12826_s4 = inlined_call_operand.vmem [shape: bf16[36,8], index: 4, kind: input, shape index: {}]   ;;  %s12827_s5 = inlined_call_operand.vmem [shape: f32[1,8], index: 5, kind: input, shape index: {}]   ;;  %s12828_s6 = inlined_call_operand.vmem [shape: f32[1,8], index: 6, kind: input, shape index: {}]   ;;  %s12829_s7 = inlined_call_operand.vmem [shape: bf16[100,8], index: 7, kind: input, shape index: {}]   ;;  %s12830_s8 = inlined_call_operand.vmem [shape: f32[1,8], index: 8, kind: input, shape index: {}]   ;;  %s12831_s9 = inlined_call_operand.vmem [shape: f32[1,8], index: 9, kind: input, shape index: {}]   ;;  %s12832_s10 = inlined_call_operand.vmem [shape: bf16[4,8], index: 10, kind: input, shape index: {}]   ;;  %s12833_s11 = inlined_call_operand.vmem [shape: f32[1,8], index: 11, kind: input, shape index: {}]   ;;  %s12834_s12 = inlined_call_operand.vmem [shape: f32[1,8], index: 12, kind: input, shape index: {}]   ;;  %s12835_s13 = inlined_call_operand.hbm [shape: f32[2,256,32], index: 13, kind: output, shape index: {}]  }
   0x1   :  { %13244 = sst [smem:[#allocation281_spill]] %s12822_s0 }
   0x2   :  { %13245 = sst [smem:[#allocation282_spill]] %s12823_s1 }
   0x3   :  { %13246 = sst [smem:[#allocation283_spill]] %s12824_s2 }
   0x4   :  { %13247 = sst [smem:[#allocation284_spill]] %s12825_s3 }
   0x5   :  { %18 = vsyncpa [#allocation3], 0 }
   0x6   :  { %20 = vsyncpa [#allocation3 + $0x1], 0  ;;  %s6981_s25 = smov 0   ;;  %s6983_s26 = smov 0  }
   0x7   :  { %s6985_s27 = smov 0   ;;  %s6987_s28 = smov 0  }
   0x8 LB: > { %s7002_s29 = sadd.s32 4294967295, %s6887_s28   ;;  %s6350_s30 = sadd.s32 4294967294, %s6887_s28   ;;  %s6887_s28 = sphi %s6987_s28, %s14493_s28   ;;  %s6883_s27 = sphi %s6985_s27, %s14492_s27   ;;  %s6879_s26 = sphi %s6983_s26, %s14491_s26   ;;  %s6875_s25 = sphi %s6981_s25, %s14490_s25  }
   0x9   : > { %s7006_s14 = sadd.s32 1, %s6887_s28   ;;  %s311_s15 = sadd.s32 1, %s6883_s27 }
   0xa   : > { %s308_s16 = ssub.s32 %s6887_s28, %s7006_s14  ;;  %p321_p0 = scmp.ne.s32.totalorder %s6883_s27, %s6879_s26 }
   0xb   : > { %p309_p1 = scmp.eq.s32.totalorder %s308_s16, 0  ;;  %p322_p2 = scmp.eq.s32.totalorder %s7002_s29, 1 }
   0xc   : > { %p327_p3 = scmp.ne.s32.totalorder %s6879_s26, %s6875_s25  ;;  %p328_p4 = scmp.eq.s32.totalorder %s6350_s30, 1 }
   0xd   : > { %s7017_s17 = scalar_select %p309_p1, %s6883_s27, %s311_s15  }
   0xe   : > { %p7019_p5 = por %p322_p2, %p321_p0  ;;  %p7023_p6 = por %p328_p4, %p327_p3 }
   0xf   : > { %p6353_p7 = scmp.ge.s32.totalorder %s6887_s28, 1  ;;  %p390_p8 = scmp.lt.s32.totalorder %s6887_s28, 3 }
  0x11   : > { %p391_p9 = pnand %p6353_p7, %p390_p8 }
  0x13   : > { %394 = sbr.rel (%p391_p9) target bundleno = 1959 (0x7a7), region = 72 }
  0x18   : > { %s13250_s1 = sld [smem:[#allocation282_spill]]  ;;  %vm602_vm0 = vcmask 1041408   ;;  %p434_p10 = scmp.lt.s32.totalorder %s7002_s29, 1  ;;  %vm553_vm1 = vcmask 31744   ;;  %v12874_v18 = vmov 0   ;;  %vm1101_vm2 = vcmask 1040384  }
  0x19   : > { %s13251_s0 = sld [smem:[#allocation281_spill]]  ;;  %v7074_v19 = vrot.slane %v12874_v18, 1  ;;  %s12838_s16 = smov 24   ;;  %vm1102_vm3 = vsmask.f32 256  ;;  %vm1356_vm4 = vcmask 1046528  }
  0x1a   : > { %s435_s22 = scalar_select %p434_p10, %s7002_s29, 1  ;;  %vm7389_vm5 = vmand %vm1101_vm2, %vm1102_vm3  ;;  %vm1136_vm6 = vsmask.f32 7424  ;;  %vm2590_vm7 = vsmask.f32 6400  ;;  %vm1709_vm8 = vcmask 64512  }
  0x1b   : > { %13252 = vst [vmem:[#allocation5_spill] sm:$0xff] %v7074_v19  ;;  %v6754_v20 = vpack.i.bf16 %v7074_v19, %v12874_v18  ;;  %v6759_v21 = vpack.i.bf16 %v7074_v19, %v7074_v19  ;;  %s12836_s20 = smov 28   ;;  %s12932_s21 = smov 4   ;;  %vm1742_vm9 = vcmask 97280   ;;  %vm1775_vm10 = vcmask 130048  }
  0x1c   : > { %s6460_s23 = sshll.u32 %s435_s22, 7  ;;  %1421 = vrot.lane.b32.xlu0 %v7074_v19, %s12932_s21  ;;  %s12964_s22 = smov 32   ;;  %vm1808_vm11 = vcmask 162816   ;;  %vm1874_vm12 = vcmask 228352   ;;  %vm1841_vm13 = vcmask 195584   ;;  %vm13243_vm14 = vcmask 261120  }
  0x1d   : > { %6755 = vrot.lane.b32.xlu1 %v6754_v20, %s12838_s16  ;;  %s13253_s2 = sld [smem:[#allocation283_spill]]  ;;  %s6895_s16 = smov 116   ;;  %vm1960_vm15 = vcmask 293888   ;;  %vm13242_vm3 = vcmask 1045504  }
  0x1e   : > { %v472_v0 = vld [vmem:[%s13250_s1] sm:$0x3]  ;;  %s13254_s3 = sld [smem:[#allocation284_spill]]  ;;  %s12909_s24 = smov 12  }
  0x1f   : > { %6690 = vmatprep.subr.msk.bf16.mxu0 %vm602_vm0, %v472_v0  ;;  %v604_v1 = vsel %vm602_vm0, %v472_v0, 0  ;;  %s7039_s15 = scalar_lea.vmem %s13251_s0, %s6460_s23  ;;  %s12938_s23 = smov 8  }
  0x20   : > { %6539 = vmatpush3.bf16.msra.mxu0 %v604_v1  ;;  %v440_v2 = vld [vmem:[%s7039_s15] sm:$0xff]   ;;  %v442_v3 = vld [vmem:[%s7039_s15 + $0x8] sm:$0xff]   ;;  %v444_v4 = vld [vmem:[%s7039_s15 + $0x10] sm:$0xff]   ;;  %1453 = vrot.lane.b32.xlu0 %v7074_v19, %s12938_s23  ;;  %s13298_s30 = smov 24   ;;  %s13360_s0 = smov 16  }
  0x21   : > { %6540 = vmatprep.mubr.msk.bf16.mxu0 %vm553_vm1, %v440_v2  ;;  %v446_v5 = vld [vmem:[%s7039_s15 + $0x18] sm:$0xff]   ;;  %v448_v6 = vld [vmem:[%s7039_s15 + $0x20] sm:$0xff]   ;;  %v450_v7 = vld [vmem:[%s7039_s15 + $0x28] sm:$0xff]   ;;  %6760 = vrot.lane.b32.xlu1 %v6759_v21, %s12836_s20  ;;  %s6896_s20 = smov 120   ;;  %s6900_s1 = smov 36  }
  0x22   : > { %v452_v8 = vld [vmem:[%s7039_s15 + $0x30] sm:$0xff]   ;;  %v454_v9 = vld [vmem:[%s7039_s15 + $0x38] sm:$0xff]   ;;  %v456_v10 = vld [vmem:[%s7039_s15 + $0x40] sm:$0xff]  }
  0x23   : > { %6541 = vmatmul.mubr.msk.bf16.vlgmr.msra.gmra.mxu0 %vm553_vm1, %v442_v3  ;;  %v458_v11 = vld [vmem:[%s7039_s15 + $0x48] sm:$0xff]   ;;  %v460_v12 = vld [vmem:[%s7039_s15 + $0x50] sm:$0xff]   ;;  %v462_v13 = vld [vmem:[%s7039_s15 + $0x58] sm:$0xff]  }
  0x24   : > { %6544 = vmatprep.mubr.msk.bf16.mxu0 %vm553_vm1, %v444_v4  ;;  %v464_v14 = vld [vmem:[%s7039_s15 + $0x60] sm:$0xff]   ;;  %v466_v15 = vld [vmem:[%s7039_s15 + $0x68] sm:$0xff]   ;;  %v468_v16 = vld [vmem:[%s7039_s15 + $0x70] sm:$0xff]  }
  0x25   : > { %v470_v17 = vld [vmem:[%s7039_s15 + $0x78] sm:$0xff]   ;;  %1675 = vrot.lane.b32.xlu1 %v7074_v19, %s12964_s22  ;;  %v7091_v22 = vld [vmem:[%s13253_s2] ss:$0 sm:$0xff]  ;;  %s6901_s2 = smov 40  }
  0x26   : > { %v7097_v25 = vld [vmem:[%s13254_s3] ss:$0 sm:$0xff] }
  0x2b   : > { %6545 = vmatmul.mubr.msk.bf16.gmra.mxu0 %vm553_vm1, %v446_v5 }
  0x2c   : > { %6548 = vmatprep.mubr.msk.bf16.mxu0 %vm553_vm1, %v448_v6 }
  0x33   : > { %6549 = vmatmul.mubr.msk.bf16.gmra.mxu0 %vm553_vm1, %v450_v7 }
  0x34   : > { %6552 = vmatprep.mubr.msk.bf16.mxu0 %vm553_vm1, %v452_v8 }
  0x3b   : > { %6553 = vmatmul.mubr.msk.bf16.gmra.mxu0 %vm553_vm1, %v454_v9 }
  0x3c   : > { %6556 = vmatprep.mubr.msk.bf16.mxu0 %vm553_vm1, %v456_v10 }
  0x43   : > { %6557 = vmatmul.mubr.msk.bf16.gmra.mxu0 %vm553_vm1, %v458_v11 }
  0x44   : > { %6560 = vmatprep.mubr.msk.bf16.mxu0 %vm553_vm1, %v460_v12 }
  0x4b   : > { %6561 = vmatmul.mubr.msk.bf16.gmra.mxu0 %vm553_vm1, %v462_v13 }
  0x4c   : > { %6564 = vmatprep.mubr.msk.bf16.mxu0 %vm553_vm1, %v464_v14 }
  0x53   : > { %6565 = vmatmul.mubr.msk.bf16.gmra.mxu0 %vm553_vm1, %v466_v15 }
  0x54   : > { %6568 = vmatprep.mubr.msk.bf16.mxu0 %vm553_vm1, %v468_v16 }
  0x5b   : > { %6569 = vmatmul.mubr.msk.bf16.gmra.mxu0 %vm553_vm1, %v470_v17 }
  0xe3   : > { %v6542_v23 = vpop.f32.mrf.mxu0 }
  0xe4   : > { %v776_v24 = vmul.f32 %v6542_v23, %v7091_v22 }
  0xe5   : > { %v640_v26 = vpop.f32.mrf.mxu0 }
  0xe6   : > { %v774_v27 = vmul.f32 %v7091_v22, %v640_v26  ;;  %v7101_v29 = vadd.f32 %v7097_v25, %v776_v24 }
  0xe7   : > { %v6543_v28 = vpop.f32.mrf.mxu0 }
  0xe8   : > { %13255 = vst [vmem:[#allocation6_spill] sm:$0xff] %v7101_v29  ;;  %v777_v30 = vmul.f32 %v6543_v28, %v7091_v22  ;;  %v7105_v32 = vadd.f32 %v7097_v25, %v774_v27  ;;  %v12869_v36 = vmax.f32 %v7101_v29, 0.0 }
  0xe9   : > { %v643_v31 = vpop.f32.mrf.mxu0 }
  0xea   : > { %13256 = vst [vmem:[#allocation7_spill] sm:$0xff] %v7105_v32  ;;  %v7108_v33 = vadd.f32 %v7097_v25, %v777_v30  ;;  %v775_v34 = vmul.f32 %v7091_v22, %v643_v31  ;;  %v12871_v41 = vmax.f32 %v7105_v32, 0.0 }
  0xeb   : > { %v6546_v35 = vpop.f32.mrf.mxu0 }
  0xec   : > { %13257 = vst [vmem:[#allocation8_spill] sm:$0xff] %v7108_v33  ;;  %v12868_v37 = vmax.f32 %v7108_v33, 0.0  ;;  %v7114_v38 = vadd.f32 %v7097_v25, %v775_v34  ;;  %v780_v39 = vmul.f32 %v6546_v35, %v7091_v22 }
  0xed   : > { %v656_v40 = vpop.f32.mrf.mxu0 }
  0xee   : > { %13258 = vst [vmem:[#allocation9_spill] sm:$0xff] %v7114_v38  ;;  %v878_v42 = vpack.c.bf16 %v12868_v37, %v12869_v36  ;;  %v12870_v43 = vmax.f32 %v7114_v38, 0.0  ;;  %v778_v44 = vmul.f32 %v7091_v22, %v656_v40  ;;  %v7125_v45 = vadd.f32 %v7097_v25, %v780_v39 }
  0xef   : > { %v6547_v46 = vpop.f32.mrf.mxu0 }
  0xf0   : > { %13259 = vst [vmem:[#allocation10_spill] sm:$0xff] %v7125_v45  ;;  %v877_v47 = vpack.c.bf16 %v12870_v43, %v12871_v41  ;;  %v2284_v48 = vrot.slane %v878_v42, 7  ;;  %v901_v49 = vshrl.u32 %v878_v42, 16  ;;  %v7132_v50 = vadd.f32 %v7097_v25, %v778_v44 }
  0xf1   : > { %v781_v51 = vmul.f32 %v6547_v46, %v7091_v22  ;;  %v659_v52 = vpop.f32.mrf.mxu0  ;;  %v12865_v55 = vmax.f32 %v7125_v45, 0.0  ;;  %v904_v2 = vshll.u32 %v878_v42, 16 }
  0xf2   : > { %13260 = vst [vmem:[#allocation11_spill] sm:$0xff] %v7132_v50  ;;  %2301 = vrot.lane.b32.xlu1 %v2284_v48, %s6895_s16  ;;  %v2283_v53 = vrot.slane %v877_v47, 7  ;;  %v894_v54 = vshrl.u32 %v877_v47, 16  ;;  %v779_v57 = vmul.f32 %v7091_v22, %v659_v52  ;;  %v903_v59 = vrot.slane %v901_v49, 7 }
  0xf3   : > { %v7138_v56 = vadd.f32 %v7097_v25, %v781_v51  ;;  %v6550_v58 = vpop.f32.mrf.mxu0  ;;  %v12867_v61 = vmax.f32 %v7132_v50, 0.0  ;;  %v897_v9 = vshll.u32 %v877_v47, 16 }
  0xf4   : > { %2299 = vrot.lane.b32.xlu0 %v2283_v53, %s6895_s16  ;;  %v784_v60 = vmul.f32 %v6550_v58, %v7091_v22  ;;  %v7146_v63 = vadd.f32 %v7097_v25, %v779_v57  ;;  %v896_v1 = vrot.slane %v894_v54, 7  ;;  %v906_v8 = vor.u32 %v904_v2, %v903_v59 }
  0xf5   : > { %13261 = vst [vmem:[#allocation12_spill] sm:$0xff] %v7138_v56  ;;  %v12864_v62 = vmax.f32 %v7138_v56, 0.0  ;;  %v672_v0 = vpop.f32.mrf.mxu0 }
  0xf6   : > { %13262 = vst [vmem:[#allocation13_spill] sm:$0xff] %v7146_v63  ;;  %1011 = vrot.lane.b32.xlu1 %v903_v59, %s6896_s20  ;;  %v12866_v4 = vmax.f32 %v7146_v63, 0.0  ;;  %v7155_v5 = vadd.f32 %v7097_v25, %v784_v60  ;;  %v782_v6 = vmul.f32 %v7091_v22, %v672_v0  ;;  %v899_v14 = vor.u32 %v897_v9, %v896_v1 }
  0xf7   : > { %v880_v3 = vpack.c.bf16 %v12864_v62, %v12865_v55  ;;  %v6551_v7 = vpop.f32.mrf.mxu0 }
  0xf8   : > { %13263 = vst [vmem:[#allocation14_spill] sm:$0xff] %v7155_v5  ;;  %1007 = vrot.lane.b32.xlu0 %v896_v1, %s6896_s20  ;;  %v785_v10 = vmul.f32 %v6551_v7, %v7091_v22  ;;  %v879_v11 = vpack.c.bf16 %v12866_v4, %v12867_v61  ;;  %v12861_v20 = vmax.f32 %v7155_v5, 0.0  ;;  %v7171_v23 = vadd.f32 %v7097_v25, %v782_v6 }
  0xf9   : > { %v915_v12 = vshrl.u32 %v880_v3, 16  ;;  %v675_v13 = vpop.f32.mrf.mxu0  ;;  %v2286_v15 = vrot.slane %v880_v3, 7  ;;  %v918_v24 = vshll.u32 %v880_v3, 16 }
  0xfa   : > { %1009 = vrot.lane.b32.xlu1 %v906_v8, %s6896_s20  ;;  %v7166_v16 = vadd.f32 %v7097_v25, %v785_v10  ;;  %v783_v17 = vmul.f32 %v7091_v22, %v675_v13  ;;  %v2285_v21 = vrot.slane %v879_v11, 7  ;;  %13265 = vst [vmem:[#allocation16_spill] sm:$0xff] %v7171_v23  ;;  %v908_v31 = vshrl.u32 %v879_v11, 16 }
  0xfb   : > { %v6554_v26 = vpop.f32.mrf.mxu0  ;;  %v917_v28 = vrot.slane %v915_v12, 7  ;;  %v12863_v35 = vmax.f32 %v7171_v23, 0.0  ;;  %v911_v40 = vshll.u32 %v879_v11, 16 }
  0xfc   : > { %13264 = vst [vmem:[#allocation15_spill] sm:$0xff] %v7166_v16  ;;  %1005 = vrot.lane.b32.xlu0 %v899_v14, %s6896_s20  ;;  %v12860_v27 = vmax.f32 %v7166_v16, 0.0  ;;  %v7176_v30 = vadd.f32 %v7097_v25, %v783_v17  ;;  %v788_v42 = vmul.f32 %v6554_v26, %v7091_v22  ;;  %v910_v48 = vrot.slane %v908_v31, 7 }
  0xfd   : > { %v688_v34 = vpop.f32.mrf.mxu0  ;;  %v920_v47 = vor.u32 %v918_v24, %v917_v28 }
  0xfe   : > { %13266 = vst [vmem:[#allocation17_spill] sm:$0xff] %v7176_v30  ;;  %2305 = vrot.lane.b32.xlu1 %v2286_v15, %s6895_s16  ;;  %v12862_v39 = vmax.f32 %v7176_v30, 0.0  ;;  %v882_v46 = vpack.c.bf16 %v12860_v27, %v12861_v20  ;;  %v7194_v53 = vadd.f32 %v7097_v25, %v788_v42  ;;  %v786_v54 = vmul.f32 %v7091_v22, %v688_v34 }
  0xff   : > { %v6555_v44 = vpop.f32.mrf.mxu0  ;;  %v913_v58 = vor.u32 %v911_v40, %v910_v48 }
 0x100   : > { %2303 = vrot.lane.b32.xlu0 %v2285_v21, %s6895_s16  ;;  %v789_v49 = vmul.f32 %v6555_v44, %v7091_v22  ;;  %v881_v52 = vpack.c.bf16 %v12862_v39, %v12863_v35  ;;  %13267 = vst [vmem:[#allocation18_spill] sm:$0xff] %v7194_v53  ;;  %v929_v0 = vshrl.u32 %v882_v46, 16  ;;  %v2288_v2 = vrot.slane %v882_v46, 7 }
 0x101   : > { %v691_v51 = vpop.f32.mrf.mxu0  ;;  %v12845_v3 = vmax.f32 %v7194_v53, 0.0  ;;  %v7205_v6 = vadd.f32 %v7097_v25, %v786_v54  ;;  %v932_v8 = vshll.u32 %v882_v46, 16 }
 0x102   : > { %1019 = vrot.lane.b32.xlu1 %v917_v28, %s6896_s20  ;;  %v7199_v59 = vadd.f32 %v7097_v25, %v789_v49  ;;  %v787_v60 = vmul.f32 %v7091_v22, %v691_v51  ;;  %v2287_v7 = vrot.slane %v881_v52, 7  ;;  %v931_v12 = vrot.slane %v929_v0, 7 }
 0x103   : > { %v6558_v57 = vpop.f32.mrf.mxu0  ;;  %13269 = vst [vmem:[#allocation20_spill] sm:$0xff] %v7205_v6  ;;  %v922_v13 = vshrl.u32 %v881_v52, 16  ;;  %v12847_v15 = vmax.f32 %v7205_v6, 0.0  ;;  %v925_v21 = vshll.u32 %v881_v52, 16 }
 0x104   : > { %1017 = vrot.lane.b32.xlu0 %v920_v47, %s6896_s20  ;;  %13268 = vst [vmem:[#allocation19_spill] sm:$0xff] %v7199_v59  ;;  %v12840_v10 = vmax.f32 %v7199_v59, 0.0  ;;  %v7210_v11 = vadd.f32 %v7097_v25, %v787_v60  ;;  %v792_v17 = vmul.f32 %v6558_v57, %v7091_v22  ;;  %v934_v34 = vor.u32 %v932_v8, %v931_v12 }
 0x105   : > { %v704_v1 = vpop.f32.mrf.mxu0  ;;  %v924_v40 = vrot.slane %v922_v13, 7 }
 0x106   : > { %1015 = vrot.lane.b32.xlu1 %v910_v48, %s6896_s20  ;;  %13270 = vst [vmem:[#allocation21_spill] sm:$0xff] %v7210_v11  ;;  %v884_v28 = vpack.c.bf16 %v12840_v10, %v12845_v3  ;;  %v12846_v31 = vmax.f32 %v7210_v11, 0.0  ;;  %v790_v44 = vmul.f32 %v7091_v22, %v704_v1  ;;  %v7225_v46 = vadd.f32 %v7097_v25, %v792_v17 }
 0x107   : > { %v6559_v9 = vpop.f32.mrf.mxu0  ;;  %v927_v52 = vor.u32 %v925_v21, %v924_v40 }
 0x108   : > { %1013 = vrot.lane.b32.xlu0 %v913_v58, %s6896_s20  ;;  %v793_v24 = vmul.f32 %v6559_v9, %v7091_v22  ;;  %13271 = vst [vmem:[#allocation22_spill] sm:$0xff] %v7225_v46  ;;  %v883_v51 = vpack.c.bf16 %v12846_v31, %v12847_v15  ;;  %v943_v54 = vshrl.u32 %v884_v28, 16  ;;  %v7237_v58 = vadd.f32 %v7097_v25, %v790_v44 }
 0x109   : > { %v707_v14 = vpop.f32.mrf.mxu0  ;;  %v2290_v60 = vrot.slane %v884_v28, 7  ;;  %v12842_v0 = vmax.f32 %v7225_v46, 0.0  ;;  %v946_v13 = vshll.u32 %v884_v28, 16 }
 0x10a   : > { %2309 = vrot.lane.b32.xlu1 %v2288_v2, %s6895_s16  ;;  %v7228_v47 = vadd.f32 %v7097_v25, %v793_v24  ;;  %v791_v48 = vmul.f32 %v7091_v22, %v707_v14  ;;  %13273 = vst [vmem:[#allocation24_spill] sm:$0xff] %v7237_v58  ;;  %v2289_v9 = vrot.slane %v883_v51, 7  ;;  %v12844_v24 = vmax.f32 %v7237_v58, 0.0 }
 0x10b   : > { %v6562_v26 = vpop.f32.mrf.mxu0 }
 0x10c   : > { %2307 = vrot.lane.b32.xlu0 %v2287_v7, %s6895_s16  ;;  %13272 = vst [vmem:[#allocation23_spill] sm:$0xff] %v7228_v47  ;;  %v12841_v1 = vmax.f32 %v7228_v47, 0.0  ;;  %v7243_v2 = vadd.f32 %v7097_v25, %v791_v48  ;;  %v936_v7 = vshrl.u32 %v883_v51, 16  ;;  %v796_v17 = vmul.f32 %v6562_v26, %v7091_v22 }
 0x10d   : > { %v720_v42 = vpop.f32.mrf.mxu0 }
 0x10e   : > { %1027 = vrot.lane.b32.xlu1 %v931_v12, %s6896_s20  ;;  %13274 = vst [vmem:[#allocation25_spill] sm:$0xff] %v7243_v2  ;;  %v945_v12 = vrot.slane %v943_v54, 7  ;;  %v886_v44 = vpack.c.bf16 %v12841_v1, %v12842_v0  ;;  %v12843_v28 = vmax.f32 %v7243_v2, 0.0  ;;  %v938_v48 = vrot.slane %v936_v7, 7 }
 0x10f   : > { %v6563_v49 = vpop.f32.mrf.mxu0  ;;  %v794_v7 = vmul.f32 %v7091_v22, %v720_v42 }
 0x110   : > { %1025 = vrot.lane.b32.xlu0 %v934_v34, %s6896_s20  ;;  %v948_v54 = vor.u32 %v946_v13, %v945_v12 }
 0x111   : > { %v723_v57 = vpop.f32.mrf.mxu0  ;;  %v7289_v0 = vadd.f32 %v7097_v25, %v794_v7 }
 0x112   : > { %1023 = vrot.lane.b32.xlu1 %v924_v40, %s6896_s20  ;;  %v795_v42 = vmul.f32 %v7091_v22, %v723_v57 }
 0x113   : > { %v6566_v8 = vpop.f32.mrf.mxu0  ;;  %13281 = vst [vmem:[#allocation32_spill] sm:$0xff] %v7289_v0 }
 0x114   : > { %1021 = vrot.lane.b32.xlu0 %v927_v52, %s6896_s20  ;;  %v800_v14 = vmul.f32 %v6566_v8, %v7091_v22  ;;  %v939_v52 = vshll.u32 %v883_v51, 16  ;;  %v7299_v7 = vadd.f32 %v7097_v25, %v795_v42 }
 0x115   : > { %v736_v21 = vpop.f32.mrf.mxu0 }
 0x116   : > { %2313 = vrot.lane.b32.xlu1 %v2290_v60, %s6895_s16  ;;  %v7251_v34 = vadd.f32 %v7097_v25, %v800_v14  ;;  %v798_v40 = vmul.f32 %v7091_v22, %v736_v21  ;;  %v797_v60 = vmul.f32 %v6563_v49, %v7091_v22  ;;  %v7266_v21 = vadd.f32 %v7097_v25, %v796_v17 }
 0x117   : > { %v6567_v26 = vpop.f32.mrf.mxu0  ;;  %v885_v49 = vpack.c.bf16 %v12843_v28, %v12844_v24  ;;  %v941_v13 = vor.u32 %v939_v52, %v938_v48  ;;  %v2292_v52 = vrot.slane %v886_v44, 7  ;;  %13283 = vst [vmem:[#allocation34_spill] sm:$0xff] %v7299_v7 }
 0x118   : > { %13275 = vst [vmem:[#allocation26_spill] sm:$0xff] %v7251_v34  ;;  %2311 = vrot.lane.b32.xlu0 %v2289_v9, %s6895_s16  ;;  %v7262_v8 = vadd.f32 %v7097_v25, %v798_v40  ;;  %v801_v14 = vmul.f32 %v6567_v26, %v7091_v22  ;;  %13277 = vst [vmem:[#allocation28_spill] sm:$0xff] %v7266_v21  ;;  %v957_v40 = vshrl.u32 %v886_v44, 16 }
 0x119   : > { %v739_v10 = vpop.f32.mrf.mxu0  ;;  %v7280_v17 = vadd.f32 %v7097_v25, %v797_v60  ;;  %v2291_v57 = vrot.slane %v885_v49, 7  ;;  %v950_v24 = vshrl.u32 %v885_v49, 16  ;;  %v953_v15 = vshll.u32 %v885_v49, 16 }
 0x11a   : > { %13276 = vst [vmem:[#allocation27_spill] sm:$0xff] %v7262_v8  ;;  %1035 = vrot.lane.b32.xlu1 %v945_v12, %s6896_s20  ;;  %v7271_v51 = vadd.f32 %v7097_v25, %v801_v14  ;;  %v799_v9 = vmul.f32 %v7091_v22, %v739_v10  ;;  %v12851_v14 = vmax.f32 %v7266_v21, 0.0  ;;  %v959_v28 = vrot.slane %v957_v40, 7 }
 0x11b   : > { %v6570_v26 = vpop.f32.mrf.mxu0  ;;  %13279 = vst [vmem:[#allocation30_spill] sm:$0xff] %v7280_v17 }
 0x11c   : > { %13278 = vst [vmem:[#allocation29_spill] sm:$0xff] %v7271_v51  ;;  %1033 = vrot.lane.b32.xlu0 %v948_v54, %s6896_s20  ;;  %v7284_v12 = vadd.f32 %v7097_v25, %v799_v9  ;;  %v804_v10 = vmul.f32 %v6570_v26, %v7091_v22  ;;  %v960_v9 = vshll.u32 %v886_v44, 16  ;;  %v12848_v26 = vmax.f32 %v7280_v17, 0.0 }
 0x11d   : > { %v752_v1 = vpop.f32.mrf.mxu0 }
 0x11e   : > { %13280 = vst [vmem:[#allocation31_spill] sm:$0xff] %v7284_v12  ;;  %1031 = vrot.lane.b32.xlu1 %v938_v48, %s6896_s20  ;;  %v7293_v54 = vadd.f32 %v7097_v25, %v804_v10  ;;  %v802_v60 = vmul.f32 %v7091_v22, %v752_v1  ;;  %v962_v40 = vor.u32 %v960_v9, %v959_v28  ;;  %v12850_v9 = vmax.f32 %v7251_v34, 0.0 }
 0x11f   : > { %v6571_v3 = vpop.f32.mrf.mxu0  ;;  %v888_v42 = vpack.c.bf16 %v12848_v26, %v12851_v14  ;;  %v12855_v26 = vmax.f32 %v7262_v8, 0.0 }
 0x120   : > { %13282 = vst [vmem:[#allocation33_spill] sm:$0xff] %v7293_v54  ;;  %1029 = vrot.lane.b32.xlu0 %v941_v13, %s6896_s20  ;;  %v7302_v48 = vadd.f32 %v7097_v25, %v802_v60  ;;  %v805_v10 = vmul.f32 %v6571_v3, %v7091_v22  ;;  %v12859_v13 = vmax.f32 %v7289_v0, 0.0  ;;  %v12858_v3 = vmax.f32 %v7299_v7, 0.0 }
 0x121   : > { %v755_v31 = vpop.f32.mrf.mxu0  ;;  %v952_v60 = vrot.slane %v950_v24, 7  ;;  %v971_v49 = vshrl.u32 %v888_v42, 16  ;;  %v974_v24 = vshll.u32 %v888_v42, 16 }
 0x122   : > { %13284 = vst [vmem:[#allocation35_spill] sm:$0xff] %v7302_v48  ;;  %2317 = vrot.lane.b32.xlu1 %v2292_v52, %s6895_s16  ;;  %v7307_v1 = vadd.f32 %v7097_v25, %v805_v10  ;;  %v803_v44 = vmul.f32 %v7091_v22, %v755_v31  ;;  %v887_v22 = vpack.c.bf16 %v12858_v3, %v12859_v13 }
 0x123   : > { %v955_v31 = vor.u32 %v953_v15, %v952_v60  ;;  %v973_v10 = vrot.slane %v971_v49, 7 }
 0x124   : > { %13285 = vst [vmem:[#allocation36_spill] sm:$0xff] %v7307_v1  ;;  %2315 = vrot.lane.b32.xlu0 %v2291_v57, %s6895_s16  ;;  %v7318_v52 = vadd.f32 %v7097_v25, %v803_v44  ;;  %v2294_v57 = vrot.slane %v888_v42, 7  ;;  %v12849_v25 = vmax.f32 %v7271_v51, 0.0  ;;  %v964_v44 = vshrl.u32 %v887_v22, 16 }
 0x125   : > { %v12852_v42 = vmax.f32 %v7284_v12, 0.0 }
 0x126   : > { %13286 = vst [vmem:[#allocation37_spill] sm:$0xff] %v7318_v52  ;;  %1043 = vrot.lane.b32.xlu1 %v959_v28, %s6896_s20  ;;  %v2293_v28 = vrot.slane %v887_v22, 7  ;;  %v890_v15 = vpack.c.bf16 %v12849_v25, %v12850_v9 }
 0x127   : > { %v889_v49 = vpack.c.bf16 %v12852_v42, %v12855_v26  ;;  %v12857_v42 = vmax.f32 %v7302_v48, 0.0 }
 0x128   : > { %1041 = vrot.lane.b32.xlu0 %v962_v40, %s6896_s20  ;;  %v967_v40 = vshll.u32 %v887_v22, 16  ;;  %v2296_v25 = vrot.slane %v890_v15, 7  ;;  %v988_v9 = vshll.u32 %v890_v15, 16 }
 0x129   : > { %v978_v14 = vshrl.u32 %v889_v49, 16 }
 0x12a   : > { %1039 = vrot.lane.b32.xlu1 %v952_v60, %s6896_s20  ;;  %v976_v60 = vor.u32 %v974_v24, %v973_v10  ;;  %v12853_v24 = vmax.f32 %v7307_v1, 0.0 }
 0x12c   : > { %1037 = vrot.lane.b32.xlu0 %v955_v31, %s6896_s20  ;;  %v966_v31 = vrot.slane %v964_v44, 7 }
 0x12e   : > { %2321 = vrot.lane.b32.xlu1 %v2294_v57, %s6895_s16  ;;  %v969_v22 = vor.u32 %v967_v40, %v966_v31  ;;  %v985_v57 = vshrl.u32 %v890_v15, 16  ;;  %v12856_v15 = vmax.f32 %v7318_v52, 0.0 }
 0x130   : > { %2319 = vrot.lane.b32.xlu0 %v2293_v28, %s6895_s16  ;;  %v12854_v28 = vmax.f32 %v7293_v54, 0.0  ;;  %v987_v44 = vrot.slane %v985_v57, 7 }
 0x132   : > { %1051 = vrot.lane.b32.xlu1 %v973_v10, %s6896_s20  ;;  %v2295_v10 = vrot.slane %v889_v49, 7  ;;  %v892_v40 = vpack.c.bf16 %v12853_v24, %v12854_v28 }
 0x134   : > { %1049 = vrot.lane.b32.xlu0 %v976_v60, %s6896_s20  ;;  %v981_v60 = vshll.u32 %v889_v49, 16  ;;  %v999_v57 = vshrl.u32 %v892_v40, 16  ;;  %v2298_v24 = vrot.slane %v892_v40, 7 }
 0x136   : > { %1047 = vrot.lane.b32.xlu1 %v966_v31, %s6896_s20  ;;  %v990_v31 = vor.u32 %v988_v9, %v987_v44  ;;  %v1001_v28 = vrot.slane %v999_v57, 7  ;;  %v1002_v9 = vshll.u32 %v892_v40, 16 }
 0x138   : > { %1045 = vrot.lane.b32.xlu0 %v969_v22, %s6896_s20  ;;  %v980_v22 = vrot.slane %v978_v14, 7 }
 0x13a   : > { %2325 = vrot.lane.b32.xlu1 %v2296_v25, %s6895_s16  ;;  %v891_v25 = vpack.c.bf16 %v12856_v15, %v12857_v42  ;;  %v983_v49 = vor.u32 %v981_v60, %v980_v22 }
 0x13c   : > { %2323 = vrot.lane.b32.xlu0 %v2295_v10, %s6895_s16  ;;  %v2297_v10 = vrot.slane %v891_v25, 7  ;;  %v992_v14 = vshrl.u32 %v891_v25, 16  ;;  %v995_v15 = vshll.u32 %v891_v25, 16 }
 0x13e   : > { %1059 = vrot.lane.b32.xlu1 %v987_v44, %s6896_s20  ;;  %v1004_v44 = vor.u32 %v1002_v9, %v1001_v28  ;;  %v994_v26 = vrot.slane %v992_v14, 7 }
 0x140   : > { %1057 = vrot.lane.b32.xlu0 %v990_v31, %s6896_s20  ;;  %v997_v60 = vor.u32 %v995_v15, %v994_v26  ;;  %v7370_v31 = vpop.permute.xlu1 %6755 }
 0x141   : > { %13287 = vst [vmem:[#allocation38_spill] sm:$0xff] %v7370_v31 }
 0x142   : > { %1055 = vrot.lane.b32.xlu1 %v980_v22, %s6896_s20  ;;  %v7374_v22 = vpop.permute.xlu0 %1421 }
 0x144   : > { %1053 = vrot.lane.b32.xlu0 %v983_v49, %s6896_s20  ;;  %v7372_v40 = vpop.permute.xlu1 %6760 }
 0x145   : > { %13288 = vst [vmem:[#allocation39_spill] sm:$0xff] %v7372_v40 }
 0x146   : > { %2329 = vrot.lane.b32.xlu1 %v2298_v24, %s6895_s16  ;;  %v7378_v49 = vpop.permute.xlu0 %1453 }
 0x148   : > { %2327 = vrot.lane.b32.xlu0 %v2297_v10, %s6895_s16  ;;  %v7376_v24 = vpop.permute.xlu1 %1675  ;;  %s12934_s16 = smov 20  }
 0x149   : > { %13289 = vst [vmem:[#allocation40_spill] sm:$0xff] %v7376_v24 }
 0x14a   : > { %1067 = vrot.lane.b32.xlu1 %v1001_v28, %s6896_s20 }
 0x14c   : > { %1065 = vrot.lane.b32.xlu0 %v1004_v44, %s6896_s20 }
 0x14e   : > { %1063 = vrot.lane.b32.xlu1 %v994_v26, %s6896_s20 }
 0x150   : > { %1061 = vrot.lane.b32.xlu0 %v997_v60, %s6896_s20  ;;  %s12982_s20 = smov 16  }
 0x164   : > { %v2302_v25 = vpop.permute.xlu1 %2301 }
 0x165   : > { %v7381_v28 = vsel %vm1101_vm2, 0, %v2302_v25  ;;  %v7384_v15 = vsel %vm1101_vm2, %v2302_v25, 0 }
 0x166   : > { %13290 = vst [vmem:[#allocation41_spill] sm:$0xff] %v7381_v28  ;;  %13291 = vst [vmem:[#allocation42_spill] sm:$0xff] %v7384_v15  ;;  %v2552_v26 = vrot.slane %v7384_v15, 1  ;;  %v2300_v57 = vpop.permute.xlu0 %2299  ;;  %v2551_v10 = vrot.slane %v7381_v28, 1  ;;  %v12872_v13 = vshll.u32 %v7381_v28, 16  ;;  %v12877_v62 = vshll.u32 %v7384_v15, 16 }
 0x167   : > { %v7394_v44 = vsel %vm1101_vm2, 0, %v2300_v57  ;;  %v7397_v60 = vsel %vm1101_vm2, %v2300_v57, 0  ;;  %v12873_v55 = vshrl.u32 %v7381_v28, 16 }
 0x168   : > { %v1012_v14 = vpop.permute.xlu1 %1011  ;;  %13294 = vst [vmem:[#allocation43_spill] sm:$0xff] %v7394_v44  ;;  %13295 = vst [vmem:[#allocation44_spill] sm:$0xff] %v7397_v60  ;;  %v7400_v25 = vsel %vm1356_vm4, %v2551_v10, %v2552_v26  ;;  %v2548_v20 = vrot.slane %v7394_v44, 1  ;;  %v2549_v39 = vrot.slane %v7397_v60, 1  ;;  %v2394_v26 = vrot.slane %v12872_v13, 1 }
 0x169   : > { %13296 = vst [vmem:[#allocation45_spill] sm:$0xff] %v7400_v25  ;;  %2850 = vrot.lane.b32.xlu1 %v7400_v25, %s12938_s23  ;;  %v1121_v3 = vsel %vm7389_vm5, %v1012_v14, 0 }
 0x16a   : > { %v1008_v42 = vpop.permute.xlu0 %1007  ;;  %v1363_v10 = vrot.slane %v1121_v3, 1  ;;  %v7424_v4 = vsel %vm1356_vm4, %v2548_v20, %v2549_v39  ;;  %v2395_v36 = vor.u32 %v2394_v26, %v12873_v55  ;;  %v2398_v26 = vrot.slane %v12877_v62, 1 }
 0x16b   : > { %13299 = vst [vmem:[#allocation47_spill] sm:$0xff] %v7424_v4 }
 0x16c   : > { %v1010_v27 = vpop.permute.xlu1 %1009  ;;  %v7459_v1 = vsel %vm1136_vm6, %v2395_v36, %v2398_v26 }
 0x16d   : > { %v7411_v57 = vsel %vm7389_vm5, 0, %v1010_v27  ;;  %13303 = vst [vmem:[#allocation51_spill] sm:$0xff] %v7459_v1 }
 0x16e   : > { %13297 = vst [vmem:[#allocation46_spill] sm:$0xff] %v7411_v57  ;;  %v1006_v35 = vpop.permute.xlu0 %1005  ;;  %1487 = vrot.lane.b32.xlu1 %v7411_v57, %s12909_s24  ;;  %1581 = vrot.lane.b32.xlu0 %v7411_v57, %s13298_s30  ;;  %v1362_v14 = vrot.slane %v7411_v57, 1  ;;  %v1160_v41 = vshll.u32 %v7411_v57, 16 }
 0x16f   : > { %v7428_v37 = vsel %vm7389_vm5, 0, %v1006_v35 }
 0x170   : > { %v1364_v27 = vsel %vm1356_vm4, %v1362_v14, %v1363_v10  ;;  %v2306_v61 = vpop.permute.xlu1 %2305  ;;  %13300 = vst [vmem:[#allocation48_spill] sm:$0xff] %v7428_v37  ;;  %v7451_v14 = vsel %vm7389_vm5, %v1008_v42, 0  ;;  %v1359_v18 = vrot.slane %v7428_v37, 1  ;;  %v1162_v48 = vrot.slane %v1160_v41, 1 }
 0x171   : > { %v7433_v43 = vsel %vm1101_vm2, %v2306_v61, 0  ;;  %v1360_v26 = vrot.slane %v7451_v14, 1  ;;  %v1158_v41 = vshrl.u32 %v7411_v57, 16  ;;  %v7484_v12 = vsel %vm1101_vm2, 0, %v2306_v61 }
 0x172   : > { %13301 = vst [vmem:[#allocation49_spill] sm:$0xff] %v7433_v43  ;;  %1551 = vrot.lane.b32.xlu1 %v1364_v27, %s12934_s16  ;;  %2848 = vrot.lane.b32.xlu0 %v7424_v4, %s12938_s23  ;;  %v7439_v20 = vpop.permute.xlu0 %2303  ;;  %v2625_v39 = vshrl.u32 %v7433_v43, 16  ;;  %v13305_v54 = vshll.u32 %v7433_v43, 16  ;;  %13309 = vst [vmem:[#allocation56_spill] sm:$0xff] %v7484_v12  ;;  %v2558_v21 = vrot.slane %v7433_v43, 1  ;;  %v2557_v34 = vrot.slane %v7484_v12, 1 }
 0x173   : > { %v7447_v10 = vsel %vm1101_vm2, %v7439_v20, 0  ;;  %v1163_v8 = vor.u32 %v1162_v48, %v1158_v41  ;;  %v1148_v61 = vshll.u32 %v7428_v37, 16  ;;  %v13322_v56 = vshll.u32 %v7484_v12, 16 }
 0x174   : > { %13302 = vst [vmem:[#allocation50_spill] sm:$0xff] %v7447_v10  ;;  %v12884_v13 = vshll.u32 %v7447_v10, 16  ;;  %v2616_v55 = vshrl.u32 %v7447_v10, 16  ;;  %v7456_v35 = vpop.permute.xlu1 %1019  ;;  %v7461_v62 = vrot.slane %v2625_v39, 1  ;;  %v7465_v52 = vrot.slane %v13305_v54, 2 }
 0x175   : > { %v1165_v39 = vshll.u32 %v1121_v3, 16  ;;  %v12890_v3 = vshll.u32 %v7394_v44, 16  ;;  %v1150_v58 = vrot.slane %v1148_v61, 1  ;;  %v1153_v61 = vshll.u32 %v7451_v14, 16 }
 0x176   : > { %13304 = vst [vmem:[#allocation52_spill] sm:$0xff] %v7461_v62  ;;  %13306 = vst [vmem:[#allocation53_spill] sm:$0xff] %v7465_v52  ;;  %2822 = vrot.lane.b32.xlu1 %v7459_v1, %s12932_s21  ;;  %1485 = vrot.lane.b32.xlu0 %v7428_v37, %s12909_s24  ;;  %v7471_v42 = vrot.slane %v2616_v55, 1  ;;  %v7475_v51 = vrot.slane %v12884_v13, 2  ;;  %v1018_v36 = vpop.permute.xlu0 %1017  ;;  %v1361_v13 = vsel %vm1356_vm4, %v1359_v18, %v1360_v26  ;;  %v2414_v45 = vrot.slane %v13322_v56, 1 }
 0x177   : > { %v1167_v17 = vrot.slane %v1165_v39, 1  ;;  %v2384_v18 = vrot.slane %v12890_v3, 1  ;;  %v12898_v3 = vshrl.u32 %v7394_v44, 16  ;;  %v13325_v38 = vshll.u32 %v7433_v43, 16 }
 0x178   : > { %13307 = vst [vmem:[#allocation54_spill] sm:$0xff] %v7471_v42  ;;  %13308 = vst [vmem:[#allocation55_spill] sm:$0xff] %v7475_v51  ;;  %v7486_v55 = vpop.permute.xlu1 %1015 }
 0x179   : > { %v1168_v0 = vsel %vm1136_vm6, %v1163_v8, %v1167_v17  ;;  %v7512_v17 = vsel %vm1356_vm4, %v2557_v34, %v2558_v21  ;;  %v2385_v26 = vor.u32 %v2384_v18, %v12898_v3  ;;  %v1146_v18 = vshrl.u32 %v7428_v37, 16 }
 0x17a   : > { %1455 = vrot.lane.b32.xlu1 %v1361_v13, %s12938_s23  ;;  %1457 = vrot.lane.b32.xlu0 %v1364_v27, %s12938_s23  ;;  %v1014_v54 = vpop.permute.xlu0 %1013  ;;  %13311 = vst [vmem:[#allocation58_spill] sm:$0xff] %v7512_v17  ;;  %v1155_v3 = vrot.slane %v1153_v61, 1  ;;  %v2418_v32 = vrot.slane %v13325_v38, 1  ;;  %v7644_v38 = vsel %vm1101_vm2, 0, %v7439_v20 }
 0x17b   : > { %v1151_v14 = vor.u32 %v1150_v58, %v1146_v18  ;;  %13327 = vst [vmem:[#allocation66_spill] sm:$0xff] %v7644_v38 }
 0x17c   : > { %v7494_v7 = vpop.permute.xlu1 %2309 }
 0x17d   : > { %v7502_v48 = vsel %vm1101_vm2, %v7494_v7, 0 }
 0x17e   : > { %13310 = vst [vmem:[#allocation57_spill] sm:$0xff] %v7502_v48  ;;  %1519 = vrot.lane.b32.xlu1 %v1168_v0, %s12982_s20  ;;  %1645 = vrot.lane.b32.xlu0 %v1364_v27, %s12964_s22  ;;  %v7506_v39 = vpop.permute.xlu0 %2307  ;;  %v2643_v41 = vshrl.u32 %v7502_v48, 16  ;;  %v13314_v34 = vshll.u32 %v7502_v48, 16 }
 0x17f   : > { %v7517_v47 = vsel %vm1101_vm2, %v7506_v39, 0 }
 0x180   : > { %13312 = vst [vmem:[#allocation59_spill] sm:$0xff] %v7517_v47  ;;  %v2634_v27 = vshrl.u32 %v7517_v47, 16  ;;  %v7521_v2 = vpop.permute.xlu1 %1027  ;;  %v7525_v8 = vrot.slane %v2643_v41, 1  ;;  %v7529_v21 = vrot.slane %v13314_v34, 2  ;;  %v13316_v59 = vshll.u32 %v7517_v47, 16 }
 0x181   : > { %v13317_v41 = vshll.u32 %v7397_v60, 16 }
 0x182   : > { %13313 = vst [vmem:[#allocation60_spill] sm:$0xff] %v7525_v8  ;;  %13315 = vst [vmem:[#allocation61_spill] sm:$0xff] %v7529_v21  ;;  %2854 = vrot.lane.b32.xlu1 %v7512_v17, %s12938_s23  ;;  %1549 = vrot.lane.b32.xlu0 %v1361_v13, %s12934_s16  ;;  %v7534_v46 = vrot.slane %v2634_v27, 1  ;;  %v7538_v53 = vrot.slane %v13316_v59, 2  ;;  %v7540_v11 = vpop.permute.xlu0 %1025  ;;  %v7554_v59 = vsel %vm7389_vm5, 0, %v1018_v36  ;;  %v7568_v13 = vsel %vm7389_vm5, %v7456_v35, 0 }
 0x183   : > { %v2388_v34 = vrot.slane %v13317_v41, 1  ;;  %13318 = vst [vmem:[#allocation62_spill] sm:$0xff] %v7554_v59  ;;  %v1369_v16 = vrot.slane %v7568_v13, 1  ;;  %v1184_v25 = vshll.u32 %v7554_v59, 16 }
 0x184   : > { %v7550_v27 = vpop.permute.xlu1 %1023 }
 0x185   : > { %v7557_v6 = vsel %vm1136_vm6, %v2385_v26, %v2388_v34  ;;  %v1156_v26 = vsel %vm1136_vm6, %v1151_v14, %v1155_v3  ;;  %v1368_v14 = vrot.slane %v7554_v59, 1  ;;  %v7597_v34 = vsel %vm7389_vm5, 0, %v1014_v54 }
 0x186   : > { %13319 = vst [vmem:[#allocation63_spill] sm:$0xff] %v7557_v6  ;;  %1491 = vrot.lane.b32.xlu1 %v7554_v59, %s12909_s24  ;;  %2820 = vrot.lane.b32.xlu0 %v7557_v6, %s12932_s21  ;;  %v7563_v41 = vpop.permute.xlu0 %1021  ;;  %13321 = vst [vmem:[#allocation65_spill] sm:$0xff] %v7597_v34  ;;  %s13324_s24 = smov 28   ;;  %v1186_v43 = vrot.slane %v1184_v25, 1  ;;  %v7718_v25 = vsel %vm1101_vm2, 0, %v7494_v7  ;;  %v1170_v52 = vshrl.u32 %v7597_v34, 16 }
 0x187   : > { %13334 = vst [vmem:[#allocation71_spill] sm:$0xff] %v7718_v25  ;;  %v2563_v62 = vrot.slane %v7718_v25, 1 }
 0x188   : > { %v7570_v36 = vpop.permute.xlu1 %2313 }
 0x189   : > { %v7576_v18 = vsel %vm1101_vm2, %v7570_v36, 0 }
 0x18a   : > { %13320 = vst [vmem:[#allocation64_spill] sm:$0xff] %v7576_v18  ;;  %1423 = vrot.lane.b32.xlu1 %v1156_v26, %s12932_s21  ;;  %1425 = vrot.lane.b32.xlu0 %v1168_v0, %s12932_s21  ;;  %v7580_v61 = vpop.permute.xlu0 %2311  ;;  %v2661_v35 = vshrl.u32 %v7576_v18, 16  ;;  %v13323_v50 = vshll.u32 %v7576_v18, 16 }
 0x18b   : > { %v7587_v3 = vsel %vm1101_vm2, %v7580_v61, 0 }
 0x18c   : > { %v12914_v58 = vshll.u32 %v7587_v3, 16  ;;  %v2652_v5 = vshrl.u32 %v7587_v3, 16  ;;  %v7593_v23 = vpop.permute.xlu1 %1035  ;;  %v7601_v63 = vrot.slane %v2661_v35, 1  ;;  %v7605_v33 = vrot.slane %v13323_v50, 2 }
 0x18e   : > { %1583 = vrot.lane.b32.xlu1 %v7597_v34, %s13298_s30  ;;  %1613 = vrot.lane.b32.xlu0 %v1168_v0, %s13324_s24  ;;  %v7610_v30 = vrot.slane %v2652_v5, 1  ;;  %v7614_v54 = vrot.slane %v12914_v58, 2  ;;  %v7616_v29 = vpop.permute.xlu0 %1033  ;;  %v7629_v5 = vsel %vm7389_vm5, %v7486_v55, 0  ;;  %v7632_v0 = vsel %vm1356_vm4, %v1368_v14, %v1369_v16 }
 0x18f   : > { %v13326_v58 = vshrl.u32 %v7484_v12, 16  ;;  %v2555_v55 = vrot.slane %v7447_v10, 1  ;;  %v1366_v16 = vrot.slane %v7629_v5, 1  ;;  %v1365_v14 = vrot.slane %v7597_v34, 1 }
 0x190   : > { %v7622_v35 = vpop.permute.xlu1 %1031 }
 0x191   : > { %v2415_v17 = vor.u32 %v2414_v45, %v13326_v58  ;;  %v2554_v58 = vrot.slane %v7644_v38, 1  ;;  %v1367_v31 = vsel %vm1356_vm4, %v1365_v14, %v1366_v16 }
 0x192   : > { %1555 = vrot.lane.b32.xlu1 %v7632_v0, %s12934_s16  ;;  %1585 = vrot.lane.b32.xlu0 %v7554_v59, %s13298_s30  ;;  %v7640_v56 = vpop.permute.xlu0 %1029  ;;  %s13344_s16 = smov 20  }
 0x193   : > { %v7652_v45 = vsel %vm1136_vm6, %v2415_v17, %v2418_v32  ;;  %v1189_v17 = vshll.u32 %v7568_v13, 16  ;;  %v7679_v4 = vsel %vm1356_vm4, %v2554_v58, %v2555_v55  ;;  %v7703_v58 = vld [vmem:[%s12826_s4 + $0x10] ss:$0 sps:$4 sm:$0x33]  }
 0x194   : > { %v7649_v50 = vpop.permute.xlu1 %2317  ;;  %13328 = vst [vmem:[#allocation67_spill] sm:$0xff] %v7652_v45  ;;  %13330 = vst [vmem:[#allocation69_spill] sm:$0xff] %v7679_v4  ;;  %6691 = vmatprep.subr.msk.bf16.mxu1 %vm602_vm0, %v7703_v58 }
 0x195   : > { %v7658_v24 = vsel %vm1101_vm2, %v7649_v50, 0 }
 0x196   : > { %2826 = vrot.lane.b32.xlu1 %v7652_v45, %s12932_s21  ;;  %1517 = vrot.lane.b32.xlu0 %v1156_v26, %s12982_s20  ;;  %v7663_v20 = vpop.permute.xlu0 %2315  ;;  %v2679_v32 = vshrl.u32 %v7658_v24, 16  ;;  %v1182_v26 = vshrl.u32 %v7554_v59, 16  ;;  %v13331_v13 = vshll.u32 %v7658_v24, 16  ;;  %s13335_s21 = smov 8  }
 0x197   : > { %v7670_v40 = vsel %vm1101_vm2, %v7663_v20, 0 }
 0x198   : > { %13329 = vst [vmem:[#allocation68_spill] sm:$0xff] %v7670_v40  ;;  %v12940_v6 = vshll.u32 %v7670_v40, 16  ;;  %v2670_v45 = vshrl.u32 %v7670_v40, 16  ;;  %v7676_v1 = vpop.permute.xlu1 %1043  ;;  %v7681_v8 = vrot.slane %v2679_v32, 1  ;;  %v7685_v21 = vrot.slane %v13331_v13, 2 }
 0x199   : > { %v2564_v32 = vrot.slane %v7502_v48, 1 }
 0x19a   : > { %1459 = vrot.lane.b32.xlu1 %v1367_v31, %s12938_s23  ;;  %2852 = vrot.lane.b32.xlu0 %v7679_v4, %s12938_s23  ;;  %v7690_v16 = vrot.slane %v2670_v45, 1  ;;  %v7694_v14 = vrot.slane %v12940_v6, 2  ;;  %v7696_v55 = vpop.permute.xlu0 %1041  ;;  %v1191_v45 = vrot.slane %v1189_v17, 1  ;;  %v1187_v4 = vor.u32 %v1186_v43, %v1182_v26  ;;  %s13333_s23 = smov 12  }
 0x19b   : > { %v1172_v26 = vshll.u32 %v7597_v34, 16  ;;  %v7745_v42 = vsel %vm1356_vm4, %v2563_v62, %v2564_v32 }
 0x19c   : > { %v7707_v13 = vpop.permute.xlu1 %1039  ;;  %v1192_v43 = vsel %vm1136_vm6, %v1187_v4, %v1191_v45  ;;  %v1177_v4 = vshll.u32 %v7629_v5, 16  ;;  %13337 = vst [vmem:[#allocation73_spill] sm:$0xff] %v7745_v42  ;;  %v13338_v5 = vshll.u32 %v7644_v38, 16 }
 0x19d   : > { %13332 = vst [vmem:[#allocation70_spill] sm:$0xff] %v7707_v13  ;;  %v1174_v57 = vrot.slane %v1172_v26, 1  ;;  %v13340_v26 = vshll.u32 %v7447_v10, 16 }
 0x19e   : > { %1647 = vrot.lane.b32.xlu1 %v1367_v31, %s12964_s22  ;;  %1489 = vrot.lane.b32.xlu0 %v7597_v34, %s13333_s23  ;;  %v7714_v6 = vpop.permute.xlu0 %1037  ;;  %v2404_v37 = vrot.slane %v13338_v5, 1 }
 0x19f   : > { %v2408_v5 = vrot.slane %v13340_v26, 1 }
 0x1a0   : > { %v7722_v17 = vpop.permute.xlu1 %2321 }
 0x1a1   : > { %v7729_v12 = vsel %vm1101_vm2, %v7722_v17, 0 }
 0x1a2   : > { %1523 = vrot.lane.b32.xlu1 %v1192_v43, %s12982_s20  ;;  %1461 = vrot.lane.b32.xlu0 %v7632_v0, %s13335_s21  ;;  %v7734_v7 = vpop.permute.xlu0 %2319  ;;  %v2697_v28 = vshrl.u32 %v7729_v12, 16  ;;  %v13339_v13 = vshll.u32 %v7729_v12, 16 }
 0x1a3   : > { %v7741_v45 = vsel %vm1101_vm2, %v7734_v7, 0 }
 0x1a4   : > { %13336 = vst [vmem:[#allocation72_spill] sm:$0xff] %v7741_v45  ;;  %v12961_v51 = vshll.u32 %v7741_v45, 16  ;;  %v2688_v44 = vshrl.u32 %v7741_v45, 16  ;;  %v7750_v19 = vpop.permute.xlu1 %1051  ;;  %v7754_v40 = vrot.slane %v2697_v28, 1  ;;  %v7758_v34 = vrot.slane %v13339_v13, 2 }
 0x1a6   : > { %2858 = vrot.lane.b32.xlu1 %v7745_v42, %s13335_s21  ;;  %1649 = vrot.lane.b32.xlu0 %v7632_v0, %s12964_s22  ;;  %v7764_v62 = vrot.slane %v2688_v44, 1  ;;  %v7768_v32 = vrot.slane %v12961_v51, 2  ;;  %v1179_v42 = vrot.slane %v1177_v4, 1  ;;  %v7781_v44 = vsel %vm7389_vm5, 0, %v7540_v11  ;;  %s13347_s22 = smov 4  }
 0x1a7   : > { %13342 = vst [vmem:[#allocation75_spill] sm:$0xff] %v7781_v44  ;;  %v1175_v0 = vor.u32 %v1174_v57, %v1170_v52  ;;  %v13343_v51 = vshrl.u32 %v7644_v38, 16  ;;  %v1125_v52 = vsel %vm7389_vm5, %v7521_v2, 0  ;;  %v7822_v2 = vsel %vm7389_vm5, 0, %v7563_v41 }
 0x1a8   : > { %v7776_v59 = vpop.permute.xlu1 %1047  ;;  %13348 = vst [vmem:[#allocation78_spill] sm:$0xff] %v7822_v2  ;;  %v1124_v41 = vsel %vm7389_vm5, %v7550_v27, 0  ;;  %v1371_v27 = vrot.slane %v7822_v2, 1 }
 0x1a9   : > { %13341 = vst [vmem:[#allocation74_spill] sm:$0xff] %v7776_v59  ;;  %v2405_v45 = vor.u32 %v2404_v37, %v13343_v51  ;;  %v1180_v28 = vsel %vm1136_vm6, %v1175_v0, %v1179_v42  ;;  %v12974_v42 = vshll.u32 %v7718_v25, 16  ;;  %v1375_v0 = vrot.slane %v1125_v52, 1 }
 0x1aa   : > { %1495 = vrot.lane.b32.xlu1 %v7781_v44, %s13333_s23  ;;  %1553 = vrot.lane.b32.xlu0 %v1367_v31, %s13344_s16 }
 0x1ab   : > { %v7792_v4 = vsel %vm1136_vm6, %v2405_v45, %v2408_v5  ;;  %v7813_v45 = vpop.permute.xlu0 %1049  ;;  %v2434_v13 = vrot.slane %v12974_v42, 1  ;;  %v13349_v5 = vshll.u32 %v7502_v48, 16  ;;  %v1372_v42 = vrot.slane %v1124_v41, 1 }
 0x1ac   : > { %v7788_v26 = vpop.permute.xlu1 %2325  ;;  %13345 = vst [vmem:[#allocation76_spill] sm:$0xff] %v7792_v4 }
 0x1ad   : > { %v7796_v11 = vsel %vm1101_vm2, %v7788_v26, 0  ;;  %v2438_v10 = vrot.slane %v13349_v5, 1  ;;  %v2561_v5 = vrot.slane %v7517_v47, 1 }
 0x1ae   : > { %13346 = vst [vmem:[#allocation77_spill] sm:$0xff] %v7796_v11  ;;  %1427 = vrot.lane.b32.xlu1 %v1180_v28, %s13347_s22  ;;  %2824 = vrot.lane.b32.xlu0 %v7792_v4, %s13347_s22  ;;  %v12966_v37 = vshll.u32 %v7796_v11, 16  ;;  %v2715_v51 = vshrl.u32 %v7796_v11, 16 }
 0x1af   : > { %v7831_v4 = vpop.permute.xlu0 %1045 }
 0x1b0   : > { %v7806_v31 = vrot.slane %v2715_v51, 1  ;;  %v7810_v57 = vrot.slane %v12966_v37, 2  ;;  %v1374_v51 = vrot.slane %v7781_v44, 1  ;;  %v12976_v37 = vshrl.u32 %v7718_v25, 16 }
 0x1b1   : > { %v1373_v25 = vsel %vm1356_vm4, %v1371_v27, %v1372_v42  ;;  %v7887_v27 = vsel %vm1101_vm2, 0, %v7570_v36  ;;  %v2598_v36 = vshrl.u32 %v7397_v60, 16 }
 0x1b2   : > { %1615 = vrot.lane.b32.xlu1 %v1180_v28, %s13324_s24  ;;  %1429 = vrot.lane.b32.xlu0 %v1192_v43, %s13347_s22  ;;  %v1376_v38 = vsel %vm1356_vm4, %v1374_v51, %v1375_v0  ;;  %v2435_v11 = vor.u32 %v2434_v13, %v12976_v37  ;;  %v1208_v13 = vshll.u32 %v7781_v44, 16  ;;  %v1213_v37 = vshll.u32 %v1125_v52, 16  ;;  %13358 = vst [vmem:[#allocation86_spill] sm:$0xff] %v7887_v27 }
 0x1b3   : > { %v7855_v51 = vpop.permute.xlu0 %2323 }
 0x1b4   : > { %v7850_v48 = vsel %vm1136_vm6, %v2435_v11, %v2438_v10  ;;  %13352 = vst [vmem:[#allocation81_spill] sm:$0xff] %v7855_v51  ;;  %v7863_v10 = vpop.permute.xlu1 %1059  ;;  %v1994_v11 = vsel %vm602_vm0, %v7703_v58, 0  ;;  %v1206_v51 = vshrl.u32 %v7781_v44, 16  ;;  %v1215_v52 = vrot.slane %v1213_v37, 1 }
 0x1b5   : > { %13351 = vst [vmem:[#allocation80_spill] sm:$0xff] %v7850_v48  ;;  %13353 = vst [vmem:[#allocation82_spill] sm:$0xff] %v7863_v10  ;;  %6573 = vmatpush3.bf16.msra.mxu1 %v1994_v11  ;;  %v1196_v37 = vshll.u32 %v7822_v2, 16  ;;  %v1201_v11 = vshll.u32 %v1124_v41, 16  ;;  %v13363_v41 = vshll.u32 %v7397_v60, 16  ;;  %v7990_v60 = vsel %vm1101_vm2, 0, %v7649_v50 }
 0x1b6   : > { %1587 = vrot.lane.b32.xlu1 %v7822_v2, %s13298_s30  ;;  %1617 = vrot.lane.b32.xlu0 %v1192_v43, %s13324_s24  ;;  %v7846_v43 = vsel %vm1101_vm2, 0, %v7506_v39  ;;  %v6786_v39 = vld [vmem:[%s12826_s4 + $0x8] sm:$0xff]  }
 0x1b7   : > { %13350 = vst [vmem:[#allocation79_spill] sm:$0xff] %v7846_v43  ;;  %v2560_v0 = vrot.slane %v7846_v43, 1  ;;  %6574 = vmatprep.subr.bf16.mxu1 %v6786_v39  ;;  %v7878_v58 = vpop.permute.xlu0 %1057  ;;  %v7916_v10 = vrot.slane %v13363_v41, 2 }
 0x1b8   : > { %13355 = vst [vmem:[#allocation84_spill] sm:$0xff] %v7878_v58 }
 0x1b9   : > { %v7869_v59 = vsel %vm1356_vm4, %v2560_v0, %v2561_v5  ;;  %6575 = vmatpush3.bf16.msra.mxu1 %v6786_v39  ;;  %v7880_v5 = vpop.permute.xlu1 %1055  ;;  %v2570_v0 = vrot.slane %v7576_v18, 1  ;;  %13364 = vst [vmem:[#allocation90_spill] sm:$0xff] %v7916_v10 }
 0x1ba   : > { %1559 = vrot.lane.b32.xlu1 %v1376_v38, %s13344_s16  ;;  %1589 = vrot.lane.b32.xlu0 %v7781_v44, %s13298_s30  ;;  %13354 = vst [vmem:[#allocation83_spill] sm:$0xff] %v7869_v59  ;;  %13356 = vst [vmem:[#allocation85_spill] sm:$0xff] %v7880_v5  ;;  %v1198_v44 = vrot.slane %v1196_v37, 1  ;;  %v7925_v37 = vsel %vm7389_vm5, 0, %v7616_v29  ;;  %v7941_v29 = vsel %vm7389_vm5, %v7593_v23, 0 }
 0x1bb   : > { %v7896_v39 = vpop.permute.xlu0 %1053 }
 0x1bc   : > { %13359 = vst [vmem:[#allocation87_spill] sm:$0xff] %v7896_v39  ;;  %v7912_v39 = vrot.slane %v2598_v36, 1 }
 0x1be   : > { %2830 = vrot.lane.b32.xlu1 %v7850_v48, %s13347_s22  ;;  %1521 = vrot.lane.b32.xlu0 %v1180_v28, %s12982_s20  ;;  %v1210_v48 = vrot.slane %v1208_v13, 1  ;;  %v6787_v28 = vld [vmem:[%s12826_s4] sm:$0xff]   ;;  %s13357_s20 = smov 32   ;;  %13362 = vst [vmem:[#allocation89_spill] sm:$0xff] %v7912_v39 }
 0x1bf   : > { %6576 = vmatprep.subr.bf16.mxu1 %v6787_v28 }
 0x1c0   : > { %v1211_v42 = vor.u32 %v1210_v48, %v1206_v51  ;;  %v2569_v48 = vrot.slane %v7887_v27, 1  ;;  %v2422_v51 = vshll.u32 %v7846_v43, 16  ;;  %6577 = vmatpush3.bf16.msra.mxu1 %v6787_v28  ;;  %v2420_v28 = vshrl.u32 %v7846_v43, 16 }
 0x1c2   : > { %1463 = vrot.lane.b32.xlu1 %v1373_v25, %s13335_s21  ;;  %2856 = vrot.lane.b32.xlu0 %v7869_v59, %s13335_s21  ;;  %v7891_v13 = vsel %vm1136_vm6, %v1211_v42, %v1215_v52  ;;  %v7902_v59 = vpop.permute.xlu1 %2329  ;;  %v1194_v52 = vshrl.u32 %v7822_v2, 16  ;;  %v7906_v42 = vsel %vm1356_vm4, %v2569_v48, %v2570_v0  ;;  %v2424_v5 = vrot.slane %v2422_v51, 1  ;;  %v7920_v0 = vpop.permute.xlu0 %2327 }
 0x1c3   : > { %13361 = vst [vmem:[#allocation88_spill] sm:$0xff] %v7906_v42  ;;  %13366 = vst [vmem:[#allocation91_spill] sm:$0xff] %v7920_v0  ;;  %v1203_v48 = vrot.slane %v1201_v11, 1  ;;  %v7959_v11 = vsel %vm1101_vm2, 0, %v7663_v20  ;;  %v1381_v20 = vrot.slane %v7941_v29, 1 }
 0x1c4   : > { %v2425_v43 = vor.u32 %v2424_v5, %v2420_v28  ;;  %13371 = vst [vmem:[#allocation95_spill] sm:$0xff] %v7959_v11 }
 0x1c6   : > { %1651 = vrot.lane.b32.xlu1 %v1373_v25, %s13357_s20  ;;  %1493 = vrot.lane.b32.xlu0 %v7822_v2, %s13333_s23  ;;  %v13365_v2 = vshll.u32 %v7517_v47, 16  ;;  %v7928_v36 = vpop.permute.xlu1 %1067  ;;  %v7961_v23 = vpop.permute.xlu0 %1065 }
 0x1c8   : > { %v2428_v58 = vrot.slane %v13365_v2, 1  ;;  %v7935_v2 = vsel %vm1101_vm2, 0, %v7580_v61  ;;  %v13370_v61 = vshll.u32 %v7384_v15, 16 }
 0x1c9   : > { %13367 = vst [vmem:[#allocation92_spill] sm:$0xff] %v7935_v2  ;;  %v13373_v0 = vshrl.u32 %v7935_v2, 16 }
 0x1ca   : > { %1527 = vrot.lane.b32.xlu1 %v7891_v13, %s13360_s0  ;;  %1465 = vrot.lane.b32.xlu0 %v1376_v38, %s13335_s21  ;;  %v7947_v5 = vsel %vm1136_vm6, %v2425_v43, %v2428_v58  ;;  %v7955_v41 = vrot.slane %v13370_v61, 2  ;;  %v12997_v43 = vshll.u32 %v7935_v2, 16  ;;  %v7970_v58 = vsel %vm1101_vm2, 0, %v7734_v7  ;;  %v7974_v61 = vpop.permute.xlu1 %1063  ;;  %v8010_v10 = vpop.permute.xlu0 %1061 }
 0x1cb   : > { %13368 = vst [vmem:[#allocation93_spill] sm:$0xff] %v7947_v5  ;;  %13372 = vst [vmem:[#allocation96_spill] sm:$0xff] %v7970_v58  ;;  %v2649_v47 = vrot.slane %v13373_v0, 1  ;;  %v7984_v7 = vsel %vm7389_vm5, 0, %v7640_v56  ;;  %v2450_v0 = vshrl.u32 %v7887_v27, 16  ;;  %v13383_v56 = vshll.u32 %v7576_v18, 16 }
 0x1ce   : > { %2862 = vrot.lane.b32.xlu1 %v7906_v42, %s13335_s21  ;;  %1653 = vrot.lane.b32.xlu0 %v1376_v38, %s13357_s20  ;;  %v1199_v42 = vor.u32 %v1198_v44, %v1194_v52  ;;  %v2607_v38 = vshrl.u32 %v7384_v15, 16  ;;  %v13377_v15 = vshll.u32 %v7959_v11, 16 }
 0x1d0   : > { %v7944_v44 = vsel %vm1136_vm6, %v1199_v42, %v1203_v48  ;;  %v7951_v52 = vrot.slane %v2607_v38, 1  ;;  %v2631_v48 = vrot.slane %v2420_v28, 1  ;;  %v2632_v38 = vrot.slane %v2422_v51, 2 }
 0x1d1   : > { %v2452_v28 = vshll.u32 %v7887_v27, 16  ;;  %v2668_v39 = vrot.slane %v13377_v15, 2  ;;  %v8026_v15 = vsel %vm1101_vm2, 0, %v7722_v17  ;;  %v13386_v17 = vshrl.u32 %v7990_v60, 16 }
 0x1d2   : > { %1499 = vrot.lane.b32.xlu1 %v7925_v37, %s13333_s23  ;;  %1557 = vrot.lane.b32.xlu0 %v1373_v25, %s13344_s16  ;;  %13369 = vst [vmem:[#allocation94_spill] sm:$0xff] %v7951_v52  ;;  %v2633_v42 = vor.u32 %v2632_v38, %v2631_v48  ;;  %v13374_v48 = vor.u32 %v7538_v53, %v7534_v46  ;;  %v13376_v38 = vshrl.u32 %v7959_v11, 16  ;;  %v2458_v52 = vrot.slane %v13383_v56, 1 }
 0x1d3   : > { %v13379_v53 = vor.u32 %v7614_v54, %v7610_v30  ;;  %v8034_v30 = vsel %vm1101_vm2, 0, %v7788_v26  ;;  %v13004_v54 = vshll.u32 %v7990_v60, 16  ;;  %v2658_v56 = vrot.slane %v2450_v0, 1 }
 0x1d4   : > { %v8004_v50 = vsel %vm2590_vm7, %v2633_v42, %v13374_v48  ;;  %v2667_v51 = vrot.slane %v13376_v38, 1  ;;  %v13381_v42 = vshrl.u32 %v7970_v58, 16  ;;  %v2454_v38 = vrot.slane %v2452_v28, 1 }
 0x1d5   : > { %13375 = vst [vmem:[#allocation97_spill] sm:$0xff] %v8004_v50 }
 0x1d6   : > { %1431 = vrot.lane.b32.xlu1 %v7944_v44, %s13347_s22  ;;  %2828 = vrot.lane.b32.xlu0 %v7947_v5, %s13347_s22  ;;  %v2650_v5 = vrot.slane %v12997_v43, 2  ;;  %v2685_v48 = vrot.slane %v13381_v42, 1  ;;  %v2669_v25 = vor.u32 %v2668_v39, %v2667_v51  ;;  %v13005_v42 = vshll.u32 %v8026_v15, 16 }
 0x1d7   : > { %v2659_v39 = vrot.slane %v2452_v28, 2  ;;  %v13009_v28 = vshll.u32 %v8034_v30, 16 }
 0x1d8   : > { %v2651_v43 = vor.u32 %v2650_v5, %v2649_v47  ;;  %v1380_v5 = vrot.slane %v7925_v37, 1 }
 0x1d9   : > { %v2713_v18 = vrot.slane %v13009_v28, 2 }
 0x1da   : > { %1619 = vrot.lane.b32.xlu1 %v7944_v44, %s13324_s24  ;;  %1433 = vrot.lane.b32.xlu0 %v7891_v13, %s13347_s22  ;;  %v8020_v46 = vsel %vm2590_vm7, %v2651_v43, %v13379_v53  ;;  %v13384_v43 = vor.u32 %v7694_v14, %v7690_v16  ;;  %v2676_v16 = vrot.slane %v13386_v17, 1  ;;  %v8062_v14 = vsel %vm1356_vm4, %v1380_v5, %v1381_v20 }
 0x1db   : > { %v8012_v47 = vpop.permute.xlu1 %2850  ;;  %13380 = vst [vmem:[#allocation99_spill] sm:$0xff] %v8020_v46  ;;  %v2660_v20 = vor.u32 %v2659_v39, %v2658_v56  ;;  %v1377_v39 = vrot.slane %v7984_v7, 1  ;;  %v13392_v56 = vor.u32 %v7605_v33, %v7601_v63  ;;  %v8111_v33 = vsel %vm1101_vm2, %v7902_v59, 0 }
 0x1dc   : > { %13378 = vst [vmem:[#allocation98_spill] sm:$0xff] %v8012_v47  ;;  %v13382_v47 = vshll.u32 %v7970_v58, 16  ;;  %v8047_v51 = vsel %vm2590_vm7, %v2669_v25, %v13384_v43  ;;  %v13387_v25 = vor.u32 %v7768_v32, %v7764_v62  ;;  %v2695_v62 = vrot.slane %v13005_v42, 2  ;;  %13397 = vst [vmem:[#allocation106_spill] sm:$0xff] %v8111_v33 }
 0x1dd   : > { %13385 = vst [vmem:[#allocation100_spill] sm:$0xff] %v8047_v51  ;;  %v2567_v32 = vrot.slane %v7587_v3, 1  ;;  %v13390_v43 = vshrl.u32 %v8034_v30, 16  ;;  %v13398_v63 = vor.u32 %v7758_v34, %v7754_v40  ;;  %v13008_v40 = vshll.u32 %v8111_v33, 16 }
 0x1de   : > { %v2686_v27 = vrot.slane %v13382_v47, 2  ;;  %1591 = vrot.lane.b32.xlu1 %v7984_v7, %s13298_s30  ;;  %1621 = vrot.lane.b32.xlu0 %v7891_v13, %s13324_s24  ;;  %v8052_v47 = vsel %vm7389_vm5, %v7622_v35, 0 }
 0x1e0   : > { %v2687_v26 = vor.u32 %v2686_v27, %v2685_v48  ;;  %v8054_v13 = vpop.permute.xlu1 %1487  ;;  %v8056_v53 = vpop.permute.xlu0 %1581  ;;  %v2455_v27 = vor.u32 %v2454_v38, %v2450_v0  ;;  %v2677_v48 = vrot.slane %v13004_v54, 2  ;;  %v13389_v0 = vshrl.u32 %v8026_v15, 16 }
 0x1e1   : > { %v1378_v38 = vrot.slane %v8052_v47, 1 }
 0x1e2   : > { %v8068_v35 = vsel %vm2590_vm7, %v2687_v26, %v13387_v25  ;;  %1563 = vrot.lane.b32.xlu1 %v8062_v14, %s13344_s16  ;;  %1593 = vrot.lane.b32.xlu0 %v7925_v37, %s13298_s30  ;;  %v2694_v5 = vrot.slane %v13389_v0, 1  ;;  %v2678_v17 = vor.u32 %v2677_v48, %v2676_v16  ;;  %v2712_v26 = vrot.slane %v13390_v43, 1 }
 0x1e3   : > { %13388 = vst [vmem:[#allocation101_spill] sm:$0xff] %v8068_v35  ;;  %v8094_v0 = vsel %vm2590_vm7, %v2660_v20, %v13392_v56  ;;  %v8099_v16 = vsel %vm1136_vm6, %v2455_v27, %v2458_v52  ;;  %v2566_v48 = vrot.slane %v7935_v2, 1  ;;  %v1232_v43 = vshll.u32 %v7925_v37, 16 }
 0x1e4   : > { %v8085_v25 = vpop.permute.xlu1 %1551  ;;  %v8087_v54 = vpop.permute.xlu0 %2848  ;;  %13393 = vst [vmem:[#allocation103_spill] sm:$0xff] %v8094_v0  ;;  %v2696_v42 = vor.u32 %v2695_v62, %v2694_v5  ;;  %13394 = vst [vmem:[#allocation104_spill] sm:$0xff] %v8099_v16  ;;  %v1379_v20 = vsel %vm1356_vm4, %v1377_v39, %v1378_v38  ;;  %v1230_v5 = vshrl.u32 %v7925_v37, 16  ;;  %v2576_v56 = vrot.slane %v7658_v24, 1 }
 0x1e5   : > { %13391 = vst [vmem:[#allocation102_spill] sm:$0xff] %v8087_v54  ;;  %v13395_v54 = vor.u32 %v7685_v21, %v7681_v8  ;;  %v2714_v8 = vor.u32 %v2713_v18, %v2712_v26  ;;  %v1237_v21 = vshll.u32 %v7941_v29, 16  ;;  %v2811_v18 = vshrl.u32 %v8111_v33, 16 }
 0x1e6   : > { %2834 = vrot.lane.b32.xlu1 %v8099_v16, %s13347_s22  ;;  %1525 = vrot.lane.b32.xlu0 %v7944_v44, %s13360_s0  ;;  %v8121_v52 = vsel %vm2590_vm7, %v2696_v42, %v13398_v63  ;;  %v13401_v44 = vor.u32 %v7810_v57, %v7806_v31  ;;  %v8139_v34 = vsel %vm1356_vm4, %v2566_v48, %v2567_v32  ;;  %v1234_v29 = vrot.slane %v1232_v43, 1 }
 0x1e7   : > { %v8107_v35 = vsel %vm2590_vm7, %v2678_v17, %v13395_v54  ;;  %13399 = vst [vmem:[#allocation107_spill] sm:$0xff] %v8121_v52  ;;  %13403 = vst [vmem:[#allocation110_spill] sm:$0xff] %v8139_v34  ;;  %v8146_v42 = vsel %vm1101_vm2, 0, %v7902_v59  ;;  %v1239_v38 = vrot.slane %v1237_v21, 1  ;;  %v2813_v17 = vrot.slane %v2811_v18, 1 }
 0x1e8   : > { %13396 = vst [vmem:[#allocation105_spill] sm:$0xff] %v8107_v35  ;;  %v8124_v54 = vpop.permute.xlu1 %2822  ;;  %v8126_v27 = vpop.permute.xlu0 %1485  ;;  %v8134_v62 = vsel %vm2590_vm7, %v2714_v8, %v13401_v44  ;;  %13404 = vst [vmem:[#allocation111_spill] sm:$0xff] %v8146_v42  ;;  %v2814_v32 = vrot.slane %v13008_v40, 2  ;;  %v1235_v26 = vor.u32 %v1234_v29, %v1230_v5  ;;  %v13010_v39 = vshrl.u32 %v8146_v42, 16 }
 0x1e9   : > { %13400 = vst [vmem:[#allocation108_spill] sm:$0xff] %v8124_v54  ;;  %13402 = vst [vmem:[#allocation109_spill] sm:$0xff] %v8134_v62  ;;  %v13011_v59 = vshll.u32 %v8146_v42, 16  ;;  %v2575_v63 = vrot.slane %v7990_v60, 1  ;;  %v1220_v8 = vshll.u32 %v7984_v7, 16  ;;  %v1225_v40 = vshll.u32 %v8052_v47, 16 }
 0x1ea   : > { %1467 = vrot.lane.b32.xlu1 %v1379_v20, %s13335_s21  ;;  %2860 = vrot.lane.b32.xlu0 %v8139_v34, %s13335_s21  ;;  %v1240_v21 = vsel %vm1136_vm6, %v1235_v26, %v1239_v38  ;;  %v2808_v5 = vrot.slane %v13010_v39, 1  ;;  %v2815_v18 = vor.u32 %v2814_v32, %v2813_v17  ;;  %v1218_v38 = vshrl.u32 %v7984_v7, 16 }
 0x1eb   : > { %v2809_v44 = vrot.slane %v13011_v59, 2  ;;  %v8179_v26 = vsel %vm1356_vm4, %v2575_v63, %v2576_v56  ;;  %v1222_v39 = vrot.slane %v1220_v8, 1  ;;  %v13407_v59 = vshll.u32 %v7935_v2, 16 }
 0x1ec   : > { %v8148_v31 = vpop.permute.xlu1 %1455  ;;  %v8150_v57 = vpop.permute.xlu0 %1457  ;;  %13406 = vst [vmem:[#allocation113_spill] sm:$0xff] %v8179_v26  ;;  %v13409_v47 = vshll.u32 %v7587_v3, 16  ;;  %v1227_v63 = vrot.slane %v1225_v40, 1  ;;  %v2581_v34 = vrot.slane %v8026_v15, 1 }
 0x1ed   : > { %v2810_v29 = vor.u32 %v2809_v44, %v2808_v5  ;;  %v2444_v17 = vrot.slane %v13407_v59, 1  ;;  %v8199_v59 = vsel %vm7389_vm5, 0, %v7696_v55  ;;  %v1223_v8 = vor.u32 %v1222_v39, %v1218_v38 }
 0x1ee   : > { %1655 = vrot.lane.b32.xlu1 %v1379_v20, %s13357_s20  ;;  %1497 = vrot.lane.b32.xlu0 %v7984_v7, %s13333_s23  ;;  %v2448_v5 = vrot.slane %v13409_v47, 1  ;;  %v1678_v38 = vsel %vm553_vm1, 0, %v7374_v22 }
 0x1ef   : > { %v8184_v32 = vsel %vm2590_vm7, %v2810_v29, %v2815_v18  ;;  %v13411_v18 = vshrl.u32 %v7935_v2, 16  ;;  %v1228_v40 = vsel %vm1136_vm6, %v1223_v8, %v1227_v63  ;;  %v8233_v8 = vsel %vm7389_vm5, 0, %v7714_v6  ;;  %v13416_v6 = vld [vmem:[#allocation70_spill] sm:$0xff] }
 0x1f0   : > { %v8160_v48 = vpop.permute.xlu1 %1519  ;;  %v8162_v43 = vpop.permute.xlu0 %1645  ;;  %13408 = vst [vmem:[#allocation114_spill] sm:$0xff] %v8184_v32  ;;  %v8243_v22 = vsel %vm1709_vm8, %v1678_v38, %v7378_v49  ;;  %v8250_v33 = vsel %vm7389_vm5, %v13416_v6, 0 }
 0x1f1   : > { %v2445_v29 = vor.u32 %v2444_v17, %v13411_v18  ;;  %v13413_v18 = vshll.u32 %v7990_v60, 16  ;;  %13414 = vst [vmem:[#allocation117_spill] sm:$0xff] %v8243_v22 }
 0x1f2   : > { %1531 = vrot.lane.b32.xlu1 %v1240_v21, %s13360_s0  ;;  %1469 = vrot.lane.b32.xlu0 %v8062_v14, %s13335_s21 }
 0x1f4   : > { %v8175_v28 = vpop.permute.xlu1 %2854  ;;  %v1550_v54 = vpop.permute.xlu0 %1549 }
 0x1f5   : > { %13405 = vst [vmem:[#allocation112_spill] sm:$0xff] %v8175_v28  ;;  %v8212_v28 = vsel %vm1136_vm6, %v2445_v29, %v2448_v5  ;;  %v2474_v29 = vrot.slane %v13413_v18, 1  ;;  %v1744_v18 = vsel %vm1742_vm9, %v8243_v22, %v8126_v27  ;;  %v13419_v27 = vld [vmem:[#allocation68_spill] sm:$0xff] }
 0x1f6   : > { %2866 = vrot.lane.b32.xlu1 %v8179_v26, %s13335_s21  ;;  %1657 = vrot.lane.b32.xlu0 %v8062_v14, %s13357_s20  ;;  %13412 = vst [vmem:[#allocation116_spill] sm:$0xff] %v8212_v28  ;;  %v2573_v22 = vrot.slane %v13419_v27, 1 }
 0x1f8   : > { %v8192_v44 = vpop.permute.xlu1 %1491  ;;  %v8194_v56 = vpop.permute.xlu0 %2820 }
 0x1f9   : > { %13410 = vst [vmem:[#allocation115_spill] sm:$0xff] %v8194_v56  ;;  %v13415_v56 = vshll.u32 %v7658_v24, 16 }
 0x1fa   : > { %1503 = vrot.lane.b32.xlu1 %v8199_v59, %s13333_s23  ;;  %1561 = vrot.lane.b32.xlu0 %v1379_v20, %s13344_s16  ;;  %v1129_v20 = vsel %vm7389_vm5, %v7676_v1, 0  ;;  %v1386_v1 = vrot.slane %v8199_v59, 1 }
 0x1fb   : > { %v1387_v17 = vrot.slane %v1129_v20, 1  ;;  %v2478_v32 = vrot.slane %v13415_v56, 1  ;;  %v13418_v56 = vshrl.u32 %v7990_v60, 16 }
 0x1fc   : > { %v8206_v14 = vpop.permute.xlu1 %1423  ;;  %v8208_v47 = vpop.permute.xlu0 %1425 }
 0x1fd   : > { %v1388_v38 = vsel %vm1356_vm4, %v1386_v1, %v1387_v17  ;;  %v2475_v26 = vor.u32 %v2474_v29, %v13418_v56  ;;  %v1384_v17 = vrot.slane %v8250_v33, 1 }
 0x1fe   : > { %1435 = vrot.lane.b32.xlu1 %v1228_v40, %s13347_s22  ;;  %2832 = vrot.lane.b32.xlu0 %v8212_v28, %s13347_s22 }
 0x200   : > { %v8217_v55 = vpop.permute.xlu1 %1583  ;;  %v1614_v39 = vpop.permute.xlu0 %1613 }
 0x202   : > { %1623 = vrot.lane.b32.xlu1 %v1228_v40, %s13324_s24  ;;  %1437 = vrot.lane.b32.xlu0 %v1240_v21, %s13347_s22 }
 0x204   : > { %v8226_v5 = vpop.permute.xlu1 %1555  ;;  %v8228_v63 = vpop.permute.xlu0 %1585 }
 0x206   : > { %1595 = vrot.lane.b32.xlu1 %v8233_v8, %s13298_s30  ;;  %1625 = vrot.lane.b32.xlu0 %v1240_v21, %s13324_s24 }
 0x208   : > { %v8255_v42 = vpop.permute.xlu1 %2826  ;;  %v1518_v21 = vpop.permute.xlu0 %1517 }
 0x209   : > { %13417 = vst [vmem:[#allocation70_spill] sm:$0xff] %v8255_v42  ;;  %v1777_v49 = vsel %vm1775_vm10, %v1744_v18, %v1518_v21  ;;  %v2572_v42 = vrot.slane %v7959_v11, 1 }
 0x20a   : > { %v1810_v6 = vsel %vm1808_vm11, %v1777_v49, %v1550_v54  ;;  %1567 = vrot.lane.b32.xlu1 %v1388_v38, %s13344_s16  ;;  %1597 = vrot.lane.b32.xlu0 %v8199_v59, %s13298_s30  ;;  %v1383_v54 = vrot.slane %v8233_v8, 1  ;;  %v8276_v49 = vsel %vm1136_vm6, %v2475_v26, %v2478_v32 }
 0x20b   : > { %v1843_v18 = vsel %vm1841_vm13, %v1810_v6, %v8056_v53  ;;  %13421 = vst [vmem:[#allocation118_spill] sm:$0xff] %v8276_v49  ;;  %v1256_v53 = vshll.u32 %v8199_v59, 16  ;;  %v8290_v32 = vsel %vm1356_vm4, %v2572_v42, %v2573_v22 }
 0x20c   : > { %v8269_v1 = vpop.permute.xlu1 %1459  ;;  %v8271_v29 = vpop.permute.xlu0 %2852  ;;  %v1876_v21 = vsel %vm1874_vm12, %v1843_v18, %v1614_v39  ;;  %v1261_v39 = vshll.u32 %v1129_v20, 16  ;;  %v1385_v26 = vsel %vm1356_vm4, %v1383_v54, %v1384_v17  ;;  %13422 = vst [vmem:[#allocation119_spill] sm:$0xff] %v8290_v32 }
 0x20d   : > { %13420 = vst [vmem:[#allocation68_spill] sm:$0xff] %v8271_v29  ;;  %v1909_v56 = vsel %vm13243_vm14, %v1876_v21, %v8162_v43  ;;  %v1254_v43 = vshrl.u32 %v8199_v59, 16  ;;  %v1258_v21 = vrot.slane %v1256_v53, 1  ;;  %v13423_v29 = vld [vmem:[#allocation48_spill] sm:$0xff] }
 0x20e   : > { %2838 = vrot.lane.b32.xlu1 %v8276_v49, %s13347_s22  ;;  %1529 = vrot.lane.b32.xlu0 %v1228_v40, %s13360_s0  ;;  %v1263_v20 = vrot.slane %v1261_v39, 1  ;;  %v1680_v17 = vsel %vm553_vm1, %v13423_v29, %v8206_v14  ;;  %v1244_v14 = vshll.u32 %v8233_v8, 16 }
 0x20f   : > { %6578 = vmatprep.mubr.msk.bf16.mxu1 %vm1960_vm15, %v1909_v56  ;;  %v1259_v54 = vor.u32 %v1258_v21, %v1254_v43  ;;  %v1713_v42 = vsel %vm1709_vm8, %v1680_v17, %v8148_v31  ;;  %v1249_v31 = vshll.u32 %v8250_v33, 16 }
 0x210   : > { %v1648_v6 = vpop.permute.xlu1 %1647  ;;  %v8286_v18 = vpop.permute.xlu0 %1489  ;;  %v1746_v29 = vsel %vm1742_vm9, %v1713_v42, %v8054_v13  ;;  %v13427_v13 = vshll.u32 %v13419_v27, 16 }
 0x211   : > { %v1264_v39 = vsel %vm1136_vm6, %v1259_v54, %v1263_v20  ;;  %v1242_v20 = vshrl.u32 %v8233_v8, 16  ;;  %v1246_v54 = vrot.slane %v1244_v14, 1  ;;  %v1779_v49 = vsel %vm1775_vm10, %v1746_v29, %v8160_v48 }
 0x212   : > { %1471 = vrot.lane.b32.xlu1 %v1385_v26, %s13335_s21  ;;  %2864 = vrot.lane.b32.xlu0 %v8290_v32, %s13335_s21  ;;  %v2582_v32 = vrot.slane %v7729_v12, 1  ;;  %v2468_v33 = vrot.slane %v13427_v13, 1  ;;  %v1251_v42 = vrot.slane %v1249_v31, 1  ;;  %v1812_v48 = vsel %vm1808_vm11, %v1779_v49, %v8085_v25 }
 0x213   : > { %v1247_v14 = vor.u32 %v1246_v54, %v1242_v20  ;;  %v13430_v29 = vshrl.u32 %v7959_v11, 16  ;;  %v1845_v31 = vsel %vm1841_vm13, %v1812_v48, %v8217_v55  ;;  %v13432_v20 = vld [vmem:[#allocation46_spill] sm:$0xff]  ;;  %v8383_v48 = vsel %vm7389_vm5, 0, %v7831_v4 }
 0x214   : > { %v8296_v40 = vpop.permute.xlu1 %1523  ;;  %v8298_v56 = vpop.permute.xlu0 %1461  ;;  %v8324_v17 = vsel %vm1356_vm4, %v2581_v34, %v2582_v32  ;;  %v1682_v54 = vsel %vm553_vm1, %v13432_v20, %v8208_v47  ;;  %13433 = vst [vmem:[#allocation46_spill] sm:$0xff] %v8383_v48 }
 0x215   : > { %13425 = vst [vmem:[#allocation120_spill] sm:$0xff] %v8324_v17  ;;  %v1715_v47 = vsel %vm1709_vm8, %v1682_v54, %v8150_v57 }
 0x216   : > { %1659 = vrot.lane.b32.xlu1 %v1385_v26, %s13357_s20  ;;  %1501 = vrot.lane.b32.xlu0 %v8233_v8, %s13333_s23  ;;  %v1748_v4 = vsel %vm1742_vm9, %v1715_v47, %v8286_v18  ;;  %v13439_v47 = vld [vmem:[#allocation72_spill] sm:$0xff] }
 0x218   : > { %v8308_v22 = vpop.permute.xlu1 %2858  ;;  %v8310_v53 = vpop.permute.xlu0 %1649 }
 0x219   : > { %13424 = vst [vmem:[#allocation48_spill] sm:$0xff] %v8308_v22  ;;  %v13426_v22 = vshll.u32 %v7959_v11, 16 }
 0x21a   : > { %1535 = vrot.lane.b32.xlu1 %v1264_v39, %s13360_s0  ;;  %1473 = vrot.lane.b32.xlu0 %v1388_v38, %s13335_s21 }
 0x21b   : > { %v2464_v28 = vrot.slane %v13426_v22, 1  ;;  %v8343_v22 = vsel %vm7389_vm5, 0, %v7813_v45 }
 0x21c   : > { %v8321_v43 = vpop.permute.xlu1 %1495  ;;  %v1554_v21 = vpop.permute.xlu0 %1553  ;;  %13429 = vst [vmem:[#allocation122_spill] sm:$0xff] %v8343_v22 }
 0x21e   : > { %2870 = vrot.lane.b32.xlu1 %v8324_v17, %s13335_s21  ;;  %1661 = vrot.lane.b32.xlu0 %v1388_v38, %s13357_s20  ;;  %v2465_v38 = vor.u32 %v2464_v28, %v13430_v29  ;;  %v1252_v17 = vsel %vm1136_vm6, %v1247_v14, %v1251_v42  ;;  %v13434_v14 = vshll.u32 %v8026_v15, 16 }
 0x220   : > { %v8336_v34 = vpop.permute.xlu1 %1427  ;;  %v8338_v32 = vpop.permute.xlu0 %2824  ;;  %v8359_v25 = vsel %vm1136_vm6, %v2465_v38, %v2468_v33  ;;  %v2494_v29 = vrot.slane %v13434_v14, 1  ;;  %v13435_v38 = vshll.u32 %v7729_v12, 16 }
 0x221   : > { %13428 = vst [vmem:[#allocation121_spill] sm:$0xff] %v8338_v32  ;;  %13431 = vst [vmem:[#allocation123_spill] sm:$0xff] %v8359_v25 }
 0x222   : > { %1507 = vrot.lane.b32.xlu1 %v8343_v22, %s13333_s23  ;;  %1565 = vrot.lane.b32.xlu0 %v1385_v26, %s13344_s16  ;;  %v1131_v26 = vsel %vm7389_vm5, %v7750_v19, 0  ;;  %v1392_v19 = vrot.slane %v8343_v22, 1 }
 0x223   : > { %v1393_v42 = vrot.slane %v1131_v26, 1 }
 0x224   : > { %v1616_v13 = vpop.permute.xlu1 %1615  ;;  %v8354_v32 = vpop.permute.xlu0 %1429 }
 0x225   : > { %v1878_v45 = vsel %vm1874_vm12, %v1845_v31, %v1616_v13  ;;  %v2498_v31 = vrot.slane %v13435_v38, 1  ;;  %v2579_v38 = vrot.slane %v13439_v47, 1 }
 0x226   : > { %1439 = vrot.lane.b32.xlu1 %v1252_v17, %s13347_s22  ;;  %2836 = vrot.lane.b32.xlu0 %v8359_v25, %s13347_s22  ;;  %v1911_v28 = vsel %vm13243_vm14, %v1878_v45, %v1648_v6  ;;  %v13438_v25 = vshrl.u32 %v8026_v15, 16 }
 0x227   : > { %6579 = vmatmul.mubr.msk.bf16.vlgmr.msra.gmra.mxu1 %vm1960_vm15, %v1911_v28  ;;  %v13437_v28 = vld [vmem:[#allocation74_spill] sm:$0xff] }
 0x228   : > { %v8366_v55 = vpop.permute.xlu1 %1587  ;;  %v1618_v49 = vpop.permute.xlu0 %1617  ;;  %v1130_v20 = vsel %vm7389_vm5, %v13437_v28, 0  ;;  %v2495_v57 = vor.u32 %v2494_v29, %v13438_v25  ;;  %v1389_v25 = vrot.slane %v8383_v48, 1  ;;  %v2578_v29 = vrot.slane %v7970_v58, 1 }
 0x229   : > { %v1390_v28 = vrot.slane %v1130_v20, 1 }
 0x22a   : > { %1627 = vrot.lane.b32.xlu1 %v1252_v17, %s13324_s24  ;;  %1441 = vrot.lane.b32.xlu0 %v1264_v39, %s13347_s22 }
 0x22c   : > { %v8376_v33 = vpop.permute.xlu1 %1559  ;;  %v8378_v6 = vpop.permute.xlu0 %1589 }
 0x22e   : > { %1599 = vrot.lane.b32.xlu1 %v8383_v48, %s13298_s30  ;;  %1629 = vrot.lane.b32.xlu0 %v1264_v39, %s13324_s24  ;;  %v1394_v39 = vsel %vm1356_vm4, %v1392_v19, %v1393_v42 }
 0x230   : > { %v8397_v13 = vpop.permute.xlu1 %2830  ;;  %v1522_v45 = vpop.permute.xlu0 %1521 }
 0x231   : > { %13436 = vst [vmem:[#allocation124_spill] sm:$0xff] %v8397_v13  ;;  %v1781_v14 = vsel %vm1775_vm10, %v1748_v4, %v1522_v45 }
 0x232   : > { %v1814_v54 = vsel %vm1808_vm11, %v1781_v14, %v1554_v21  ;;  %1571 = vrot.lane.b32.xlu1 %v1394_v39, %s13344_s16  ;;  %1601 = vrot.lane.b32.xlu0 %v8343_v22, %s13298_s30  ;;  %v8420_v21 = vsel %vm1136_vm6, %v2495_v57, %v2498_v31  ;;  %v1391_v31 = vsel %vm1356_vm4, %v1389_v25, %v1390_v28  ;;  %v1273_v25 = vshll.u32 %v1130_v20, 16  ;;  %v13445_v20 = vld [vmem:[#allocation84_spill] sm:$0xff] }
 0x233   : > { %v1847_v18 = vsel %vm1841_vm13, %v1814_v54, %v8228_v63  ;;  %13441 = vst [vmem:[#allocation125_spill] sm:$0xff] %v8420_v21  ;;  %v1280_v63 = vshll.u32 %v8343_v22, 16  ;;  %v8434_v57 = vsel %vm1356_vm4, %v2578_v29, %v2579_v38  ;;  %v13443_v38 = vld [vmem:[#allocation65_spill] sm:$0xff] }
 0x234   : > { %v8413_v13 = vpop.permute.xlu1 %1463  ;;  %v8415_v4 = vpop.permute.xlu0 %2856  ;;  %v1880_v42 = vsel %vm1874_vm12, %v1847_v18, %v1618_v49  ;;  %v1285_v49 = vshll.u32 %v1131_v26, 16  ;;  %13442 = vst [vmem:[#allocation126_spill] sm:$0xff] %v8434_v57  ;;  %v1684_v28 = vsel %vm553_vm1, %v13443_v38, %v8336_v34  ;;  %v8466_v38 = vsel %vm7389_vm5, 0, %v13445_v20 }
 0x235   : > { %13440 = vst [vmem:[#allocation74_spill] sm:$0xff] %v8415_v4  ;;  %v1913_v19 = vsel %vm13243_vm14, %v1880_v42, %v8310_v53  ;;  %v1278_v53 = vshrl.u32 %v8343_v22, 16  ;;  %v1282_v54 = vrot.slane %v1280_v63, 1  ;;  %13446 = vst [vmem:[#allocation84_spill] sm:$0xff] %v8466_v38  ;;  %v13449_v20 = vshll.u32 %v13439_v47, 16 }
 0x236   : > { %2842 = vrot.lane.b32.xlu1 %v8420_v21, %s13347_s22  ;;  %1533 = vrot.lane.b32.xlu0 %v1252_v17, %s13360_s0  ;;  %v1287_v26 = vrot.slane %v1285_v49, 1  ;;  %v1266_v49 = vshrl.u32 %v8383_v48, 16  ;;  %v13459_v22 = vshrl.u32 %v8034_v30, 16 }
 0x237   : > { %6582 = vmatprep.mubr.msk.bf16.mxu1 %vm1960_vm15, %v1913_v19  ;;  %v1283_v42 = vor.u32 %v1282_v54, %v1278_v53  ;;  %v1268_v19 = vshll.u32 %v8383_v48, 16  ;;  %v1717_v54 = vsel %vm1709_vm8, %v1684_v28, %v8269_v1  ;;  %v2488_v16 = vrot.slane %v13449_v20, 1  ;;  %v13453_v20 = vld [vmem:[#allocation87_spill] sm:$0xff] }
 0x238   : > { %v1652_v45 = vpop.permute.xlu1 %1651  ;;  %v8430_v14 = vpop.permute.xlu0 %1493 }
 0x239   : > { %v1288_v4 = vsel %vm1136_vm6, %v1283_v42, %v1287_v26  ;;  %v1270_v53 = vrot.slane %v1268_v19, 1  ;;  %v1750_v26 = vsel %vm1742_vm9, %v1717_v54, %v8192_v44  ;;  %v13447_v19 = vshll.u32 %v7970_v58, 16 }
 0x23a   : > { %1475 = vrot.lane.b32.xlu1 %v1391_v31, %s13335_s21  ;;  %2868 = vrot.lane.b32.xlu0 %v8434_v57, %s13335_s21  ;;  %v1275_v57 = vrot.slane %v1273_v25, 1  ;;  %v1783_v28 = vsel %vm1775_vm10, %v1750_v26, %v8296_v40 }
 0x23b   : > { %v1271_v42 = vor.u32 %v1270_v53, %v1266_v49  ;;  %v2484_v1 = vrot.slane %v13447_v19, 1  ;;  %v13450_v49 = vshrl.u32 %v7970_v58, 16 }
 0x23c   : > { %v8440_v17 = vpop.permute.xlu1 %1527  ;;  %v8442_v18 = vpop.permute.xlu0 %1465 }
 0x23d   : > { %v1276_v44 = vsel %vm1136_vm6, %v1271_v42, %v1275_v57  ;;  %v2485_v53 = vor.u32 %v2484_v1, %v13450_v49  ;;  %v13452_v42 = vld [vmem:[#allocation82_spill] sm:$0xff]  ;;  %v1398_v49 = vrot.slane %v8466_v38, 1 }
 0x23e   : > { %1663 = vrot.lane.b32.xlu1 %v1391_v31, %s13357_s20  ;;  %1505 = vrot.lane.b32.xlu0 %v8383_v48, %s13333_s23  ;;  %v1133_v1 = vsel %vm7389_vm5, %v13452_v42, 0  ;;  %v13456_v42 = vld [vmem:[#allocation77_spill] sm:$0xff] }
 0x23f   : > { %v8496_v57 = vsel %vm1136_vm6, %v2485_v53, %v2488_v16  ;;  %v8511_v16 = vsel %vm7389_vm5, 0, %v13453_v20  ;;  %v13454_v53 = vshll.u32 %v8034_v30, 16 }
 0x240   : > { %v8451_v29 = vpop.permute.xlu1 %2862  ;;  %v8453_v63 = vpop.permute.xlu0 %1653  ;;  %13451 = vst [vmem:[#allocation128_spill] sm:$0xff] %v8496_v57 }
 0x241   : > { %13444 = vst [vmem:[#allocation65_spill] sm:$0xff] %v8451_v29 }
 0x242   : > { %1539 = vrot.lane.b32.xlu1 %v1288_v4, %s13360_s0  ;;  %1477 = vrot.lane.b32.xlu0 %v1394_v39, %s13335_s21 }
 0x244   : > { %v8461_v21 = vpop.permute.xlu1 %1499  ;;  %v1558_v34 = vpop.permute.xlu0 %1557 }
 0x246   : > { %1511 = vrot.lane.b32.xlu1 %v8466_v38, %s13333_s23  ;;  %1665 = vrot.lane.b32.xlu0 %v1394_v39, %s13357_s20  ;;  %v1816_v39 = vsel %vm1808_vm11, %v1783_v28, %v8226_v5  ;;  %v1399_v28 = vrot.slane %v1133_v1, 1 }
 0x247   : > { %v1849_v40 = vsel %vm1841_vm13, %v1816_v39, %v8366_v55  ;;  %v2514_v39 = vrot.slane %v13454_v53, 1 }
 0x248   : > { %v8477_v25 = vpop.permute.xlu1 %1431  ;;  %v8479_v29 = vpop.permute.xlu0 %2828 }
 0x249   : > { %13448 = vst [vmem:[#allocation127_spill] sm:$0xff] %v8479_v29  ;;  %v13458_v29 = vld [vmem:[#allocation85_spill] sm:$0xff]  ;;  %v2515_v48 = vor.u32 %v2514_v39, %v13459_v22  ;;  %v1395_v22 = vrot.slane %v8511_v16, 1 }
 0x24a   : > { %1443 = vrot.lane.b32.xlu1 %v1276_v44, %s13347_s22  ;;  %1569 = vrot.lane.b32.xlu0 %v1391_v31, %s13344_s16  ;;  %v1132_v53 = vsel %vm7389_vm5, %v13458_v29, 0 }
 0x24c   : > { %v1620_v54 = vpop.permute.xlu1 %1619  ;;  %v8492_v26 = vpop.permute.xlu0 %1433 }
 0x24d   : > { %v1882_v19 = vsel %vm1874_vm12, %v1849_v40, %v1620_v54 }
 0x24e   : > { %1631 = vrot.lane.b32.xlu1 %v1276_v44, %s13324_s24  ;;  %2840 = vrot.lane.b32.xlu0 %v8496_v57, %s13347_s22  ;;  %v1915_v5 = vsel %vm13243_vm14, %v1882_v19, %v1652_v45  ;;  %v13455_v45 = vld [vmem:[#allocation62_spill] sm:$0xff]  ;;  %v1400_v57 = vsel %vm1356_vm4, %v1398_v49, %v1399_v28  ;;  %v1304_v49 = vshll.u32 %v8466_v38, 16 }
 0x24f   : > { %6583 = vmatmul.mubr.msk.bf16.gmra.mxu1 %vm1960_vm15, %v1915_v5  ;;  %v1686_v40 = vsel %vm553_vm1, %v13455_v45, %v8354_v32  ;;  %v13457_v5 = vshll.u32 %v13456_v42, 16  ;;  %v1396_v45 = vrot.slane %v1132_v53, 1 }
 0x250   : > { %v8506_v55 = vpop.permute.xlu1 %1591  ;;  %v1622_v31 = vpop.permute.xlu0 %1621  ;;  %v1719_v32 = vsel %vm1709_vm8, %v1686_v40, %v8298_v56 }
 0x251   : > { %v2518_v20 = vrot.slane %v13457_v5, 1  ;;  %v1752_v5 = vsel %vm1742_vm9, %v1719_v32, %v8430_v14  ;;  %v1309_v14 = vshll.u32 %v1133_v1, 16  ;;  %v1397_v40 = vsel %vm1356_vm4, %v1395_v22, %v1396_v45  ;;  %v13463_v45 = vld [vmem:[#allocation81_spill] sm:$0xff] }
 0x252   : > { %1603 = vrot.lane.b32.xlu1 %v8511_v16, %s13298_s30  ;;  %1445 = vrot.lane.b32.xlu0 %v1288_v4, %s13347_s22  ;;  %v1306_v32 = vrot.slane %v1304_v49, 1  ;;  %v8572_v22 = vsel %vm1101_vm2, 0, %v13463_v45 }
 0x253   : > { %v8544_v28 = vsel %vm1136_vm6, %v2515_v48, %v2518_v20  ;;  %v1302_v20 = vshrl.u32 %v8466_v38, 16  ;;  %13464 = vst [vmem:[#allocation77_spill] sm:$0xff] %v8572_v22 }
 0x254   : > { %v8522_v54 = vpop.permute.xlu1 %1563  ;;  %v8524_v19 = vpop.permute.xlu0 %1593  ;;  %13461 = vst [vmem:[#allocation87_spill] sm:$0xff] %v8544_v28 }
 0x256   : > { %1575 = vrot.lane.b32.xlu1 %v1400_v57, %s13344_s16  ;;  %1633 = vrot.lane.b32.xlu0 %v1288_v4, %s13324_s24 }
 0x258   : > { %v8540_v58 = vpop.permute.xlu1 %2834  ;;  %v1526_v47 = vpop.permute.xlu0 %1525 }
 0x259   : > { %13460 = vst [vmem:[#allocation82_spill] sm:$0xff] %v8540_v58  ;;  %v1785_v29 = vsel %vm1775_vm10, %v1752_v5, %v1526_v47  ;;  %v1311_v5 = vrot.slane %v1309_v14, 1  ;;  %v1290_v14 = vshrl.u32 %v8511_v16, 16 }
 0x25a   : > { %v1818_v4 = vsel %vm1808_vm11, %v1785_v29, %v1558_v34  ;;  %2846 = vrot.lane.b32.xlu1 %v8544_v28, %s13347_s22  ;;  %1605 = vrot.lane.b32.xlu0 %v8466_v38, %s13298_s30  ;;  %v1307_v29 = vor.u32 %v1306_v32, %v1302_v20  ;;  %v13465_v20 = vld [vmem:[#allocation78_spill] sm:$0xff] }
 0x25b   : > { %v1851_v56 = vsel %vm1841_vm13, %v1818_v4, %v8378_v6  ;;  %v1688_v32 = vsel %vm553_vm1, %v13465_v20, %v8477_v25 }
 0x25c   : > { %v8555_v47 = vpop.permute.xlu1 %1467  ;;  %v8557_v48 = vpop.permute.xlu0 %2860  ;;  %v1884_v39 = vsel %vm1874_vm12, %v1851_v56, %v1622_v31  ;;  %v1292_v31 = vshll.u32 %v8511_v16, 16  ;;  %v1312_v56 = vsel %vm1136_vm6, %v1307_v29, %v1311_v5  ;;  %v1119_v5 = vsel %vm7389_vm5, 0, %v7961_v23 }
 0x25d   : > { %13462 = vst [vmem:[#allocation62_spill] sm:$0xff] %v8557_v48  ;;  %v1917_v34 = vsel %vm13243_vm14, %v1884_v39, %v8453_v63  ;;  %v8579_v63 = vsel %vm1101_vm2, %v13463_v45, 0  ;;  %v1721_v25 = vsel %vm1709_vm8, %v1688_v32, %v8413_v13 }
 0x25e   : > { %1479 = vrot.lane.b32.xlu1 %v1397_v40, %s13335_s21  ;;  %1537 = vrot.lane.b32.xlu0 %v1276_v44, %s13360_s0  ;;  %v1297_v44 = vshll.u32 %v1132_v53, 16  ;;  %v1294_v39 = vrot.slane %v1292_v31, 1  ;;  %v13049_v53 = vshll.u32 %v8579_v63, 16  ;;  %v13048_v31 = vshrl.u32 %v8572_v22, 16 }
 0x25f   : > { %6586 = vmatprep.mubr.msk.bf16.mxu1 %vm1960_vm15, %v1917_v34  ;;  %v13047_v34 = vshll.u32 %v8572_v22, 16  ;;  %v1754_v23 = vsel %vm1742_vm9, %v1721_v25, %v8321_v43  ;;  %v1135_v43 = vsel %vm7389_vm5, %v7928_v36, 0  ;;  %v1418_v25 = vrot.slane %v1119_v5, 1 }
 0x260   : > { %v1656_v6 = vpop.permute.xlu1 %1655  ;;  %v8567_v1 = vpop.permute.xlu0 %1497  ;;  %v1299_v45 = vrot.slane %v1297_v44, 1  ;;  %v1295_v29 = vor.u32 %v1294_v39, %v1290_v14  ;;  %v1787_v13 = vsel %vm1775_vm10, %v1754_v23, %v8440_v17  ;;  %v1134_v23 = vsel %vm7389_vm5, %v7974_v61, 0  ;;  %v13469_v61 = vld [vmem:[#allocation75_spill] sm:$0xff] }
 0x261   : > { %v2504_v28 = vrot.slane %v13047_v34, 1  ;;  %v1412_v9 = vshll.u32 %v1135_v43, 16 }
 0x262   : > { %1667 = vrot.lane.b32.xlu1 %v1397_v40, %s13357_s20  ;;  %1509 = vrot.lane.b32.xlu0 %v8511_v16, %s13333_s23  ;;  %v1300_v14 = vsel %vm1136_vm6, %v1295_v29, %v1299_v45  ;;  %v8643_v29 = vsel %vm7389_vm5, 0, %v8010_v10  ;;  %vm3564_vm5 = vcmask 326656  }
 0x263   : > { %v2505_v39 = vor.u32 %v2504_v28, %v13048_v31  ;;  %v1820_v28 = vsel %vm1808_vm11, %v1787_v13, %v8376_v33  ;;  %v1402_v13 = vrot.slane %v1134_v23, 1 }
 0x264   : > { %v8581_v49 = vpop.permute.xlu1 %1531  ;;  %v8583_v4 = vpop.permute.xlu0 %1469  ;;  %v1853_v17 = vsel %vm1841_vm13, %v1820_v28, %v8506_v55 }
 0x266   : > { %1543 = vrot.lane.b32.xlu1 %v1312_v56, %s13360_s0  ;;  %1481 = vrot.lane.b32.xlu0 %v1400_v57, %s13335_s21 }
 0x268   : > { %v8594_v48 = vpop.permute.xlu1 %2866  ;;  %v8596_v58 = vpop.permute.xlu0 %1657 }
 0x269   : > { %13466 = vst [vmem:[#allocation85_spill] sm:$0xff] %v8594_v48  ;;  %v2508_v48 = vrot.slane %v13049_v53, 1 }
 0x26a   : > { %1515 = vrot.lane.b32.xlu1 %v1119_v5, %s13333_s23  ;;  %1669 = vrot.lane.b32.xlu0 %v1400_v57, %s13357_s20 }
 0x26b   : > { %v8626_v34 = vsel %vm1136_vm6, %v2505_v39, %v2508_v48  ;;  %v1419_v48 = vrot.slane %v1135_v43, 1  ;;  %v1407_v39 = vshll.u32 %v1119_v5, 16  ;;  %v1414_v43 = vrot.slane %v1412_v9, 1 }
 0x26c   : > { %v8608_v44 = vpop.permute.xlu1 %1503  ;;  %v1562_v20 = vpop.permute.xlu0 %1561  ;;  %13468 = vst [vmem:[#allocation78_spill] sm:$0xff] %v8626_v34 }
 0x26d   : > { %v1420_v28 = vsel %vm1356_vm4, %v1418_v25, %v1419_v48  ;;  %v1409_v31 = vrot.slane %v1407_v39, 1  ;;  %v1316_v48 = vshll.u32 %v8643_v29, 16  ;;  %v1321_v25 = vshll.u32 %v1134_v23, 16 }
 0x26e   : > { %1447 = vrot.lane.b32.xlu1 %v1300_v14, %s13347_s22  ;;  %1573 = vrot.lane.b32.xlu0 %v1397_v40, %s13344_s16 }
 0x270   : > { %v8621_v57 = vpop.permute.xlu1 %1435  ;;  %v8623_v32 = vpop.permute.xlu0 %2832 }
 0x271   : > { %13467 = vst [vmem:[#allocation81_spill] sm:$0xff] %v8623_v32 }
 0x272   : > { %1635 = vrot.lane.b32.xlu1 %v1300_v14, %s13324_s24  ;;  %2844 = vrot.lane.b32.xlu0 %v8626_v34, %s13347_s22  ;;  %v1318_v34 = vrot.slane %v1316_v48, 1 }
 0x274   : > { %v1624_v40 = vpop.permute.xlu1 %1623  ;;  %v8638_v45 = vpop.permute.xlu0 %1437 }
 0x275   : > { %v1886_v36 = vsel %vm1874_vm12, %v1853_v17, %v1624_v40  ;;  %v1401_v17 = vrot.slane %v8643_v29, 1 }
 0x276   : > { %1607 = vrot.lane.b32.xlu1 %v8643_v29, %s13298_s30  ;;  %1449 = vrot.lane.b32.xlu0 %v1312_v56, %s13347_s22  ;;  %v1919_v33 = vsel %vm13243_vm14, %v1886_v36, %v1656_v6  ;;  %v1690_v6 = vsel %vm553_vm1, %v13469_v61, %v8492_v26 }
 0x277   : > { %6587 = vmatmul.mubr.msk.bf16.gmra.mxu1 %vm1960_vm15, %v1919_v33  ;;  %v1405_v33 = vshrl.u32 %v1119_v5, 16  ;;  %v1403_v53 = vsel %vm1356_vm4, %v1401_v17, %v1402_v13  ;;  %v1314_v17 = vshrl.u32 %v8643_v29, 16 }
 0x278   : > { %v8654_v55 = vpop.permute.xlu1 %1595  ;;  %v1626_v10 = vpop.permute.xlu0 %1625 }
 0x279   : > { %v1410_v13 = vor.u32 %v1409_v31, %v1405_v33  ;;  %v13472_v33 = vld [vmem:[#allocation43_spill] sm:$0xff] }
 0x27a   : > { %1579 = vrot.lane.b32.xlu1 %v1420_v28, %s13344_s16  ;;  %1637 = vrot.lane.b32.xlu0 %v1312_v56, %s13324_s24  ;;  %v1723_v56 = vsel %vm1709_vm8, %v1690_v6, %v8442_v18  ;;  %v2587_v6 = vrot.slane %v8034_v30, 1  ;;  %v13473_v48 = vshrl.u32 %v13472_v33, 16 }
 0x27b   : > { %v1756_v26 = vsel %vm1742_vm9, %v1723_v56, %v8567_v1  ;;  %v1415_v31 = vsel %vm1136_vm6, %v1410_v13, %v1414_v43  ;;  %v13474_v43 = vshll.u32 %v13472_v33, 16 }
 0x27c   : > { %v8663_v40 = vpop.permute.xlu1 %1567  ;;  %v8665_v36 = vpop.permute.xlu0 %1597  ;;  %v2595_v56 = vrot.slane %v13473_v48, 1  ;;  %v13480_v48 = vld [vmem:[#allocation90_spill] sm:$0xff] }
 0x27e   : > { %1483 = vrot.lane.b32.xlu1 %v1403_v53, %s13335_s21  ;;  %1609 = vrot.lane.b32.xlu0 %v1119_v5, %s13298_s30 }
 0x280   : > { %v8675_v61 = vpop.permute.xlu1 %2838  ;;  %v1530_v32 = vpop.permute.xlu0 %1529 }
 0x281   : > { %13470 = vst [vmem:[#allocation75_spill] sm:$0xff] %v8675_v61  ;;  %v1789_v39 = vsel %vm1775_vm10, %v1756_v26, %v1530_v32  ;;  %v1323_v32 = vrot.slane %v1321_v25, 1  ;;  %v2596_v25 = vrot.slane %v13474_v43, 2 }
 0x282   : > { %v1822_v38 = vsel %vm1808_vm11, %v1789_v39, %v1562_v20  ;;  %1671 = vrot.lane.b32.xlu1 %v1403_v53, %s13357_s20  ;;  %1541 = vrot.lane.b32.xlu0 %v1300_v14, %s13360_s0  ;;  %v1319_v20 = vor.u32 %v1318_v34, %v1314_v17  ;;  %v2588_v34 = vrot.slane %v13456_v42, 1 }
 0x283   : > { %v1855_v18 = vsel %vm1841_vm13, %v1822_v38, %v8524_v19  ;;  %v2597_v17 = vor.u32 %v2596_v25, %v2595_v56  ;;  %v13481_v56 = vld [vmem:[#allocation89_spill] sm:$0xff] }
 0x284   : > { %v8684_v5 = vpop.permute.xlu1 %1471  ;;  %v8686_v1 = vpop.permute.xlu0 %2864  ;;  %v1888_v23 = vsel %vm1874_vm12, %v1855_v18, %v1626_v10  ;;  %v1324_v14 = vsel %vm1136_vm6, %v1319_v20, %v1323_v32  ;;  %v8721_v13 = vsel %vm1356_vm4, %v2587_v6, %v2588_v34  ;;  %v13477_v18 = vld [vmem:[#allocation66_spill] sm:$0xff]  ;;  %v13482_v43 = vor.u32 %v13480_v48, %v13481_v56 }
 0x285   : > { %13471 = vst [vmem:[#allocation129_spill] sm:$0xff] %v8686_v1  ;;  %v1921_v9 = vsel %vm13243_vm14, %v1888_v23, %v8596_v58  ;;  %13476 = vst [vmem:[#allocation131_spill] sm:$0xff] %v8721_v13  ;;  %v13478_v23 = vshrl.u32 %v13477_v18, 16  ;;  %v13488_v48 = vld [vmem:[#allocation54_spill] sm:$0xff] }
 0x286   : > { %1547 = vrot.lane.b32.xlu1 %v1415_v31, %s13360_s0  ;;  %1513 = vrot.lane.b32.xlu0 %v8643_v29, %s13333_s23  ;;  %v8741_v25 = vsel %vm2590_vm7, %v2597_v17, %v13482_v43  ;;  %v13487_v17 = vld [vmem:[#allocation55_spill] sm:$0xff]  ;;  %v13492_v43 = vld [vmem:[#allocation41_spill] sm:$0xff] }
 0x287   : > { %6590 = vmatprep.mubr.msk.bf16.mxu1 %vm1960_vm15, %v1921_v9  ;;  %v2613_v32 = vrot.slane %v13478_v23, 1  ;;  %v13479_v9 = vshll.u32 %v13477_v18, 16  ;;  %13483 = vst [vmem:[#allocation90_spill] sm:$0xff] %v8741_v25  ;;  %v13484_v23 = vmov 0   ;;  %v13493_v1 = vshrl.u32 %v13492_v43, 16 }
 0x288   : > { %v1660_v38 = vpop.permute.xlu1 %1659  ;;  %v8696_v19 = vpop.permute.xlu0 %1501 }
 0x289   : > { %v2614_v20 = vrot.slane %v13479_v9, 2  ;;  %v8745_v9 = vrot.slane %v13484_v23, 2 }
 0x28a   : > { %1451 = vrot.lane.b32.xlu1 %v1324_v14, %s13347_s22  ;;  %1673 = vrot.lane.b32.xlu0 %v1420_v28, %s13357_s20  ;;  %v1692_v28 = vsel %vm553_vm1, %v7984_v7, %v8621_v57  ;;  %v2585_v7 = vrot.slane %v8579_v63, 1 }
 0x28b   : > { %13485 = vst [vmem:[#allocation89_spill] sm:$0xff] %v8745_v9 }
 0x28c   : > { %v8701_v10 = vpop.permute.xlu1 %1535  ;;  %v8703_v58 = vpop.permute.xlu0 %1473 }
 0x28e   : > { %1639 = vrot.lane.b32.xlu1 %v1324_v14, %s13324_s24  ;;  %1577 = vrot.lane.b32.xlu0 %v1403_v53, %s13344_s16  ;;  %v1725_v53 = vsel %vm1709_vm8, %v1692_v28, %v8555_v47  ;;  %v2615_v47 = vor.u32 %v2614_v20, %v2613_v32  ;;  %v2584_v28 = vrot.slane %v8572_v22, 1  ;;  %v13489_v32 = vor.u32 %v13487_v17, %v13488_v48 }
 0x28f   : > { %v1758_v6 = vsel %vm1742_vm9, %v1725_v53, %v8461_v21 }
 0x290   : > { %v8716_v26 = vpop.permute.xlu1 %2870  ;;  %v8718_v39 = vpop.permute.xlu0 %1661  ;;  %v1791_v21 = vsel %vm1775_vm10, %v1758_v6, %v8581_v49  ;;  %v8760_v20 = vsel %vm2590_vm7, %v2615_v47, %v13489_v32  ;;  %v8763_v56 = vsel %vm1356_vm4, %v2584_v28, %v2585_v7  ;;  %v13495_v49 = vld [vmem:[#allocation5_spill] sm:$0xff]  ;;  %v13497_v32 = vld [vmem:[#allocation56_spill] sm:$0xff] }
 0x291   : > { %13475 = vst [vmem:[#allocation130_spill] sm:$0xff] %v8716_v26  ;;  %13490 = vst [vmem:[#allocation55_spill] sm:$0xff] %v8760_v20  ;;  %v2604_v26 = vrot.slane %v13493_v1, 1  ;;  %v8775_v6 = vor.u32 %v8745_v9, %v13495_v49  ;;  %v1824_v7 = vsel %vm1808_vm11, %v1791_v21, %v8522_v54 }
 0x292   : > { %2874 = vrot.lane.b32.xlu1 %v8721_v13, %s13335_s21  ;;  %1641 = vrot.lane.b32.xlu0 %v1415_v31, %s13324_s24  ;;  %13491 = vst [vmem:[#allocation54_spill] sm:$0xff] %v8763_v56  ;;  %v1857_v47 = vsel %vm1841_vm13, %v1824_v7, %v8654_v55  ;;  %v13499_v13 = vshll.u32 %v13497_v32, 16  ;;  %v2706_v55 = vshrl.u32 %v8579_v63, 16 }
 0x293   : > { %13496 = vst [vmem:[#allocation133_spill] sm:$0xff] %v8775_v6 }
 0x294   : > { %v8733_v57 = vpop.permute.xlu1 %1507  ;;  %v1566_v34 = vpop.permute.xlu0 %1565 }
 0x296   : > { %2878 = vrot.lane.b32.xlu1 %v8741_v25, %s13333_s23  ;;  %1545 = vrot.lane.b32.xlu0 %v1324_v14, %s13360_s0  ;;  %v13494_v14 = vshll.u32 %v13492_v43, 16 }
 0x298   : > { %v8752_v31 = vpop.permute.xlu1 %1439  ;;  %v8754_v53 = vpop.permute.xlu0 %2836  ;;  %v2605_v61 = vrot.slane %v13494_v14, 2  ;;  %v13498_v14 = vshrl.u32 %v13497_v32, 16 }
 0x299   : > { %13486 = vst [vmem:[#allocation132_spill] sm:$0xff] %v8754_v53 }
 0x29a   : > { %2882 = vrot.lane.b32.xlu1 %v8760_v20, %s13333_s23  ;;  %2872 = vrot.lane.b32.xlu0 %v8763_v56, %s13335_s21  ;;  %v2606_v48 = vor.u32 %v2605_v61, %v2604_v26  ;;  %v2622_v53 = vrot.slane %v13498_v14, 1  ;;  %v2623_v20 = vrot.slane %v13499_v13, 2  ;;  %v13500_v26 = vld [vmem:[#allocation94_spill] sm:$0xff] }
 0x29b   : > { %v13501_v7 = vor.u32 %v7955_v41, %v13500_v26  ;;  %v13507_v26 = vld [vmem:[#allocation53_spill] sm:$0xff] }
 0x29c   : > { %v1628_v1 = vpop.permute.xlu1 %1627  ;;  %v8781_v28 = vpop.permute.xlu0 %1441 }
 0x29d   : > { %v1890_v17 = vsel %vm1874_vm12, %v1857_v47, %v1628_v1  ;;  %v8801_v13 = vsel %vm2590_vm7, %v2606_v48, %v13501_v7  ;;  %v2624_v47 = vor.u32 %v2623_v20, %v2622_v53  ;;  %v13503_v1 = vld [vmem:[#allocation71_spill] sm:$0xff]  ;;  %v1694_v53 = vsel %vm553_vm1, %v7925_v37, %v8638_v45 }
 0x29e   : > { %2886 = vrot.lane.b32.xlu1 %v8004_v50, %s13333_s23  ;;  %2876 = vrot.lane.b32.xlu0 %v8775_v6, %s13333_s23  ;;  %v1923_v54 = vsel %vm13243_vm14, %v1890_v17, %v1660_v38  ;;  %13502 = vst [vmem:[#allocation94_spill] sm:$0xff] %v8801_v13  ;;  %v13504_v14 = vshrl.u32 %v13503_v1, 16  ;;  %v13505_v6 = vshll.u32 %v13503_v1, 16  ;;  %v2708_v17 = vrot.slane %v2706_v55, 1 }
 0x29f   : > { %6591 = vmatmul.mubr.msk.bf16.gmra.mxu1 %vm1960_vm15, %v1923_v54  ;;  %v13506_v54 = vshll.u32 %v8579_v63, 16  ;;  %v13511_v55 = vshrl.u32 %v8572_v22, 16  ;;  %v1727_v37 = vsel %vm1709_vm8, %v1694_v53, %v8583_v4  ;;  %v13518_v4 = vld [vmem:[#allocation101_spill] sm:$0xff] }
 0x2a0   : > { %v8795_v21 = vpop.permute.xlu1 %1599  ;;  %v1630_v61 = vpop.permute.xlu0 %1629  ;;  %v2640_v49 = vrot.slane %v13504_v14, 1  ;;  %v2641_v38 = vrot.slane %v13505_v6, 2  ;;  %v13508_v6 = vld [vmem:[#allocation52_spill] sm:$0xff]  ;;  %v1760_v45 = vsel %vm1742_vm9, %v1727_v37, %v8696_v19 }
 0x2a1   : > { %v2709_v41 = vrot.slane %v13506_v54, 2  ;;  %v13509_v7 = vor.u32 %v13507_v26, %v13508_v6  ;;  %v13512_v54 = vshll.u32 %v8572_v22, 16  ;;  %v13514_v6 = vld [vmem:[#allocation61_spill] sm:$0xff] }
 0x2a2   : > { %2890 = vrot.lane.b32.xlu1 %v8020_v46, %s13333_s23  ;;  %2880 = vrot.lane.b32.xlu0 %v8801_v13, %s13333_s23  ;;  %v2642_v46 = vor.u32 %v2641_v38, %v2640_v49  ;;  %v2703_v13 = vrot.slane %v13511_v55, 1 }
 0x2a3   : > { %v8824_v14 = vsel %vm2590_vm7, %v2624_v47, %v13509_v7  ;;  %v2704_v50 = vrot.slane %v13512_v54, 2  ;;  %v2710_v38 = vor.u32 %v2709_v41, %v2708_v17  ;;  %v13515_v7 = vld [vmem:[#allocation60_spill] sm:$0xff] }
 0x2a4   : > { %v8816_v20 = vpop.permute.xlu1 %1571  ;;  %v8818_v48 = vpop.permute.xlu0 %1601  ;;  %13510 = vst [vmem:[#allocation53_spill] sm:$0xff] %v8824_v14  ;;  %v13516_v55 = vor.u32 %v13514_v6, %v13515_v7  ;;  %v2733_v6 = vrot.slane %v13497_v32, 2 }
 0x2a6   : > { %2894 = vrot.lane.b32.xlu1 %v8047_v51, %s13333_s23  ;;  %2884 = vrot.lane.b32.xlu0 %v8824_v14, %s13333_s23  ;;  %v8845_v54 = vsel %vm2590_vm7, %v2642_v46, %v13516_v55  ;;  %v2705_v51 = vor.u32 %v2704_v50, %v2703_v13  ;;  %v13525_v55 = vld [vmem:[#allocation57_spill] sm:$0xff] }
 0x2a7   : > { %13517 = vst [vmem:[#allocation61_spill] sm:$0xff] %v8845_v54 }
 0x2a8   : > { %v8838_v47 = vpop.permute.xlu1 %2842  ;;  %v1534_v49 = vpop.permute.xlu0 %1533  ;;  %v8860_v46 = vsel %vm2590_vm7, %v2705_v51, %v2710_v38 }
 0x2a9   : > { %13513 = vst [vmem:[#allocation52_spill] sm:$0xff] %v8838_v47  ;;  %v1793_v26 = vsel %vm1775_vm10, %v1760_v45, %v1534_v49  ;;  %13520 = vst [vmem:[#allocation134_spill] sm:$0xff] %v8860_v46  ;;  %v13522_v49 = vld [vmem:[#allocation49_spill] sm:$0xff] }
 0x2aa   : > { %v1826_v14 = vsel %vm1808_vm11, %v1793_v26, %v1566_v34  ;;  %2898 = vrot.lane.b32.xlu1 %v13518_v4, %s13333_s23  ;;  %2888 = vrot.lane.b32.xlu0 %v8845_v54, %s13333_s23  ;;  %v2734_v38 = vrot.slane %v13522_v49, 2 }
 0x2ab   : > { %v1859_v19 = vsel %vm1841_vm13, %v1826_v14, %v8665_v36  ;;  %v6764_v36 = vpack.i.bf16 %v13484_v23, %v8745_v9  ;;  %v2727_v14 = vrot.slane %v13492_v43, 2 }
 0x2ac   : > { %v8854_v17 = vpop.permute.xlu1 %1475  ;;  %v8856_v41 = vpop.permute.xlu0 %2868  ;;  %v1892_v53 = vsel %vm1874_vm12, %v1859_v19, %v1630_v61  ;;  %v13521_v61 = vld [vmem:[#allocation42_spill] sm:$0xff]  ;;  %v2740_v19 = vrot.slane %v13525_v55, 2 }
 0x2ad   : > { %13519 = vst [vmem:[#allocation60_spill] sm:$0xff] %v8856_v41  ;;  %v1925_v50 = vsel %vm13243_vm14, %v1892_v53, %v8718_v39  ;;  %v2728_v51 = vrot.slane %v13521_v61, 2  ;;  %v1696_v39 = vsel %vm553_vm1, %v8233_v8, %v8752_v31  ;;  %v13524_v8 = vld [vmem:[#allocation44_spill] sm:$0xff]  ;;  %v8905_v61 = vsel %vm13242_vm3, %v2733_v6, %v2734_v38  ;;  %v13528_v38 = vld [vmem:[#allocation86_spill] sm:$0xff] }
 0x2ae   : > { %2902 = vrot.lane.b32.xlu1 %v8860_v46, %s13333_s23  ;;  %2892 = vrot.lane.b32.xlu0 %v8094_v0, %s13333_s23  ;;  %v1729_v7 = vsel %vm1709_vm8, %v1696_v39, %v8684_v5  ;;  %v2725_v31 = vrot.slane %v13524_v8, 2  ;;  %13526 = vst [vmem:[#allocation49_spill] sm:$0xff] %v8905_v61  ;;  %v2739_v5 = vrot.slane %v13503_v1, 2  ;;  %v2745_v6 = vrot.slane %v13528_v38, 2 }
 0x2af   : > { %6594 = vmatprep.mubr.msk.bf16.mxu1 %vm1960_vm15, %v1925_v50  ;;  %v8887_v26 = vsel %vm13242_vm3, %v2727_v14, %v2728_v51  ;;  %v2724_v51 = vrot.slane %v13472_v33, 2  ;;  %v13527_v14 = vld [vmem:[#allocation64_spill] sm:$0xff] }
 0x2b0   : > { %v1664_v34 = vpop.permute.xlu1 %1663  ;;  %v8871_v13 = vpop.permute.xlu0 %1505  ;;  %13523 = vst [vmem:[#allocation42_spill] sm:$0xff] %v8887_v26  ;;  %v2746_v39 = vrot.slane %v13527_v14, 2  ;;  %v8921_v41 = vsel %vm13242_vm3, %v2739_v5, %v2740_v19 }
 0x2b1   : > { %13530 = vst [vmem:[#allocation44_spill] sm:$0xff] %v8921_v41  ;;  %v8924_v47 = vsel %vm13242_vm3, %v2724_v51, %v2725_v31 }
 0x2b2   : > { %6765 = vrot.lane.b32.xlu1 %v6764_v36, %s13360_s0  ;;  %2896 = vrot.lane.b32.xlu0 %v8107_v35, %s13333_s23  ;;  %v1762_v36 = vsel %vm1742_vm9, %v1729_v7, %v8608_v44  ;;  %v13529_v7 = vld [vmem:[#allocation50_spill] sm:$0xff]  ;;  %v8940_v51 = vsel %vm13242_vm3, %v2745_v6, %v2746_v39  ;;  %v2758_v39 = vrot.slane %v7729_v12, 2  ;;  %v2749_v12 = vrot.slane %v13419_v27, 2 }
 0x2b3   : > { %v1795_v49 = vsel %vm1775_vm10, %v1762_v36, %v8701_v10  ;;  %v2731_v55 = vrot.slane %v13529_v7, 2  ;;  %v13531_v36 = vld [vmem:[#allocation59_spill] sm:$0xff]  ;;  %v2752_v7 = vrot.slane %v7658_v24, 2  ;;  %v1698_v27 = vsel %vm553_vm1, %v8199_v59, %v8781_v28 }
 0x2b4   : > { %v8881_v37 = vpop.permute.xlu1 %1539  ;;  %v8883_v45 = vpop.permute.xlu0 %1477  ;;  %v1828_v10 = vsel %vm1808_vm11, %v1795_v49, %v8663_v40  ;;  %v2737_v14 = vrot.slane %v13531_v36, 2  ;;  %v2751_v40 = vrot.slane %v7990_v60, 2  ;;  %v13533_v49 = vld [vmem:[#allocation79_spill] sm:$0xff]  ;;  %v1731_v59 = vsel %vm1709_vm8, %v1698_v27, %v8703_v58 }
 0x2b5   : > { %v1861_v19 = vsel %vm1841_vm13, %v1828_v10, %v8795_v21  ;;  %v2736_v36 = vrot.slane %v13533_v49, 2  ;;  %v2743_v21 = vrot.slane %v7587_v3, 2  ;;  %v2764_v3 = vrot.slane %v13456_v42, 2 }
 0x2b6   : > { %2910 = vrot.lane.b32.xlu1 %v8887_v26, %s13360_s0  ;;  %2900 = vrot.lane.b32.xlu0 %v8121_v52, %s13333_s23  ;;  %v1764_v28 = vsel %vm1742_vm9, %v1731_v59, %v8871_v13 }
 0x2b7   : > { %v8964_v10 = vsel %vm13242_vm3, %v2736_v36, %v2737_v14  ;;  %v2748_v36 = vrot.slane %v7959_v11, 2 }
 0x2b8   : > { %v8898_v53 = vpop.permute.xlu1 %1511  ;;  %v8900_v50 = vpop.permute.xlu0 %1665 }
 0x2ba   : > { %2914 = vrot.lane.b32.xlu1 %v8905_v61, %s13360_s0  ;;  %2904 = vrot.lane.b32.xlu0 %v8134_v62, %s13333_s23  ;;  %v2730_v61 = vrot.slane %v13477_v18, 2 }
 0x2bc   : > { %v8916_v8 = vpop.permute.xlu1 %1443  ;;  %v1570_v44 = vpop.permute.xlu0 %1569  ;;  %v8944_v26 = vsel %vm13242_vm3, %v2730_v61, %v2731_v55  ;;  %v8961_v55 = vsel %vm13242_vm3, %v2751_v40, %v2752_v7  ;;  %v2763_v40 = vrot.slane %v8034_v30, 2 }
 0x2bd   : > { %13534 = vst [vmem:[#allocation64_spill] sm:$0xff] %v8961_v55 }
 0x2be   : > { %2918 = vrot.lane.b32.xlu1 %v8921_v41, %s13360_s0  ;;  %2908 = vrot.lane.b32.xlu0 %v8924_v47, %s13360_s0 }
 0x2c0   : > { %v1632_v31 = vpop.permute.xlu1 %1631  ;;  %v8937_v5 = vpop.permute.xlu0 %2840 }
 0x2c1   : > { %13532 = vst [vmem:[#allocation57_spill] sm:$0xff] %v8937_v5  ;;  %v1894_v41 = vsel %vm1874_vm12, %v1861_v19, %v1632_v31  ;;  %v2757_v19 = vrot.slane %v8026_v15, 2  ;;  %v13540_v5 = vld [vmem:[#allocation96_spill] sm:$0xff] }
 0x2c2   : > { %2922 = vrot.lane.b32.xlu1 %v8940_v51, %s13360_s0  ;;  %2912 = vrot.lane.b32.xlu0 %v8944_v26, %s13360_s0  ;;  %v1927_v24 = vsel %vm13243_vm14, %v1894_v41, %v1664_v34  ;;  %v2742_v41 = vrot.slane %v7935_v2, 2 }
 0x2c3   : > { %6595 = vmatmul.mubr.msk.bf16.gmra.mxu1 %vm1960_vm15, %v1927_v24  ;;  %v8977_v14 = vsel %vm13242_vm3, %v2757_v19, %v2758_v39  ;;  %v8997_v19 = vsel %vm13242_vm3, %v2763_v40, %v2764_v3 }
 0x2c4   : > { %v8956_v61 = vpop.permute.xlu1 %1603  ;;  %v8958_v6 = vpop.permute.xlu0 %1445  ;;  %13535 = vst [vmem:[#allocation50_spill] sm:$0xff] %v8977_v14  ;;  %v8980_v31 = vsel %vm13242_vm3, %v2742_v41, %v2743_v21  ;;  %v13537_v21 = vld [vmem:[#allocation72_spill] sm:$0xff]  ;;  %v9000_v41 = vsel %vm13242_vm3, %v2748_v36, %v2749_v12  ;;  %v2761_v12 = vrot.slane %v8579_v63, 2 }
 0x2c5   : > { %v2755_v39 = vrot.slane %v13537_v21, 2  ;;  %13538 = vst [vmem:[#allocation72_spill] sm:$0xff] %v8997_v19  ;;  %13539 = vst [vmem:[#allocation135_spill] sm:$0xff] %v9000_v41 }
 0x2c6   : > { %2926 = vrot.lane.b32.xlu1 %v8961_v55, %s13360_s0  ;;  %2916 = vrot.lane.b32.xlu0 %v8964_v10, %s13360_s0 }
 0x2c8   : > { %v8974_v34 = vpop.permute.xlu1 %1575  ;;  %v1634_v7 = vpop.permute.xlu0 %1633 }
 0x2ca   : > { %2930 = vrot.lane.b32.xlu1 %v8977_v14, %s13360_s0  ;;  %2920 = vrot.lane.b32.xlu0 %v8980_v31, %s13360_s0  ;;  %v2754_v14 = vrot.slane %v13540_v5, 2 }
 0x2cc   : > { %v8991_v42 = vpop.permute.xlu1 %2846  ;;  %v8993_v24 = vpop.permute.xlu0 %1605  ;;  %v9016_v36 = vsel %vm13242_vm3, %v2754_v14, %v2755_v39 }
 0x2cd   : > { %13536 = vst [vmem:[#allocation59_spill] sm:$0xff] %v8991_v42  ;;  %13541 = vst [vmem:[#allocation96_spill] sm:$0xff] %v9016_v36  ;;  %v2760_v42 = vrot.slane %v8572_v22, 2 }
 0x2ce   : > { %2934 = vrot.lane.b32.xlu1 %v8997_v19, %s13360_s0  ;;  %2924 = vrot.lane.b32.xlu0 %v9000_v41, %s13360_s0 }
 0x2cf   : > { %v9028_v14 = vsel %vm13242_vm3, %v2760_v42, %v2761_v12 }
 0x2d0   : > { %v9011_v21 = vpop.permute.xlu1 %1479  ;;  %v1538_v3 = vpop.permute.xlu0 %1537  ;;  %13542 = vst [vmem:[#allocation136_spill] sm:$0xff] %v9028_v14 }
 0x2d1   : > { %v1797_v40 = vsel %vm1775_vm10, %v1764_v28, %v1538_v3 }
 0x2d2   : > { %v1830_v19 = vsel %vm1808_vm11, %v1797_v40, %v1570_v44  ;;  %2938 = vrot.lane.b32.xlu1 %v13472_v33, %s13344_s16  ;;  %2928 = vrot.lane.b32.xlu0 %v9016_v36, %s13360_s0  ;;  %v13543_v44 = vld [vmem:[#allocation46_spill] sm:$0xff] }
 0x2d3   : > { %v1863_v58 = vsel %vm1841_vm13, %v1830_v19, %v8818_v48  ;;  %v1700_v48 = vsel %vm553_vm1, %v13543_v44, %v8916_v8 }
 0x2d4   : > { %v1668_v13 = vpop.permute.xlu1 %1667  ;;  %v1510_v63 = vpop.permute.xlu0 %1509  ;;  %v1896_v27 = vsel %vm1874_vm12, %v1863_v58, %v1634_v7  ;;  %v1733_v42 = vsel %vm1709_vm8, %v1700_v48, %v8854_v17  ;;  %v13545_v48 = vld [vmem:[#allocation91_spill] sm:$0xff] }
 0x2d5   : > { %v1929_v39 = vsel %vm13243_vm14, %v1896_v27, %v8900_v50  ;;  %v1766_v28 = vsel %vm1742_vm9, %v1733_v42, %v8733_v57  ;;  %v9079_v42 = vsel %vm1101_vm2, 0, %v13545_v48 }
 0x2d6   : > { %2942 = vrot.lane.b32.xlu1 %v13477_v18, %s13344_s16  ;;  %2932 = vrot.lane.b32.xlu0 %v9028_v14, %s13360_s0  ;;  %v1799_v17 = vsel %vm1775_vm10, %v1766_v28, %v8881_v37  ;;  %13546 = vst [vmem:[#allocation91_spill] sm:$0xff] %v9079_v42 }
 0x2d7   : > { %6598 = vmatprep.mubr.msk.bf16.mxu1 %vm1960_vm15, %v1929_v39  ;;  %v1832_v57 = vsel %vm1808_vm11, %v1799_v17, %v8816_v20 }
 0x2d8   : > { %v1544_v19 = vpop.permute.xlu1 %1543  ;;  %v9040_v7 = vpop.permute.xlu0 %1481  ;;  %v1865_v12 = vsel %vm1841_vm13, %v1832_v57, %v8956_v61 }
 0x2da   : > { %2946 = vrot.lane.b32.xlu1 %v13533_v49, %s13344_s16  ;;  %2936 = vrot.lane.b32.xlu0 %v13484_v23, %s13344_s16 }
 0x2dc   : > { %v1516_v50 = vpop.permute.xlu1 %1515  ;;  %v1670_v59 = vpop.permute.xlu0 %1669 }
 0x2de   : > { %2950 = vrot.lane.b32.xlu1 %v7935_v2, %s13344_s16  ;;  %2940 = vrot.lane.b32.xlu0 %v13492_v43, %s13344_s16 }
 0x2e0   : > { %v1448_v8 = vpop.permute.xlu1 %1447  ;;  %v1574_v3 = vpop.permute.xlu0 %1573 }
 0x2e2   : > { %2954 = vrot.lane.b32.xlu1 %v7959_v11, %s13344_s16  ;;  %2944 = vrot.lane.b32.xlu0 %v13497_v32, %s13344_s16 }
 0x2e4   : > { %v1636_v40 = vpop.permute.xlu1 %1635  ;;  %v9064_v58 = vpop.permute.xlu0 %2844 }
 0x2e5   : > { %13544 = vst [vmem:[#allocation46_spill] sm:$0xff] %v9064_v58  ;;  %v1898_v27 = vsel %vm1874_vm12, %v1865_v12, %v1636_v40  ;;  %v13548_v12 = vld [vmem:[#allocation51_spill] sm:$0xff] }
 0x2e6   : > { %2958 = vrot.lane.b32.xlu1 %v13540_v5, %s13344_s16  ;;  %2948 = vrot.lane.b32.xlu0 %v13503_v1, %s13344_s16  ;;  %v1931_v37 = vsel %vm13243_vm14, %v1898_v27, %v1668_v13  ;;  %v13547_v13 = vld [vmem:[#allocation122_spill] sm:$0xff]  ;;  %v1704_v27 = vsel %vm553_vm1, %v8511_v16, %v1448_v8 }
 0x2e7   : > { %6599 = vmatmul.mubr.msk.bf16.gmra.mxu1 %vm1960_vm15, %v1931_v37  ;;  %v1702_v28 = vsel %vm553_vm1, %v13547_v13, %v8958_v6  ;;  %v1737_v13 = vsel %vm1709_vm8, %v1704_v27, %v9011_v21 }
 0x2e8   : > { %v1608_v39 = vpop.permute.xlu1 %1607  ;;  %v1450_v20 = vpop.permute.xlu0 %1449  ;;  %v1735_v40 = vsel %vm1709_vm8, %v1702_v28, %v8883_v45  ;;  %v13551_v28 = vld [vmem:[#allocation63_spill] sm:$0xff] }
 0x2e9   : > { %v1768_v37 = vsel %vm1742_vm9, %v1735_v40, %v1510_v63 }
 0x2ea   : > { %2962 = vrot.lane.b32.xlu1 %v8572_v22, %s13344_s16  ;;  %2952 = vrot.lane.b32.xlu0 %v13528_v38, %s13344_s16 }
 0x2ec   : > { %v1580_v61 = vpop.permute.xlu1 %1579  ;;  %v1638_v44 = vpop.permute.xlu0 %1637 }
 0x2ee   : > { %2966 = vrot.lane.b32.xlu1 %v9079_v42, %s13344_s16  ;;  %2956 = vrot.lane.b32.xlu0 %v7990_v60, %s13344_s16 }
 0x2f0   : > { %v1484_v17 = vpop.permute.xlu1 %1483  ;;  %v1610_v57 = vpop.permute.xlu0 %1609 }
 0x2f2   : > { %2972 = vrot.lane.b32.xlu1 %v13548_v12, %s13298_s30  ;;  %2960 = vrot.lane.b32.xlu0 %v8026_v15, %s13344_s16  ;;  %v13549_v12 = vld [vmem:[#allocation67_spill] sm:$0xff] }
 0x2f4   : > { %v1672_v23 = vpop.permute.xlu1 %1671  ;;  %v1542_v58 = vpop.permute.xlu0 %1541 }
 0x2f5   : > { %v1801_v6 = vsel %vm1775_vm10, %v1768_v37, %v1542_v58  ;;  %v1770_v58 = vsel %vm1742_vm9, %v1737_v13, %v8898_v53  ;;  %v13552_v53 = vld [vmem:[#allocation104_spill] sm:$0xff] }
 0x2f6   : > { %v1834_v22 = vsel %vm1808_vm11, %v1801_v6, %v1574_v3  ;;  %2976 = vrot.lane.b32.xlu1 %v13549_v12, %s13298_s30  ;;  %2964 = vrot.lane.b32.xlu0 %v8034_v30, %s13344_s16  ;;  %v13550_v3 = vld [vmem:[#allocation80_spill] sm:$0xff]  ;;  %v1803_v40 = vsel %vm1775_vm10, %v1770_v58, %v1544_v19 }
 0x2f7   : > { %v1867_v16 = vsel %vm1841_vm13, %v1834_v22, %v8993_v24  ;;  %v1836_v37 = vsel %vm1808_vm11, %v1803_v40, %v8974_v34  ;;  %v13556_v34 = vld [vmem:[#allocation84_spill] sm:$0xff] }
 0x2f8   : > { %v1548_v45 = vpop.permute.xlu1 %1547  ;;  %v1514_v63 = vpop.permute.xlu0 %1513  ;;  %v1900_v8 = vsel %vm1874_vm12, %v1867_v16, %v1638_v44  ;;  %v1869_v6 = vsel %vm1841_vm13, %v1836_v37, %v1608_v39  ;;  %v1706_v39 = vsel %vm553_vm1, %v13556_v34, %v1450_v20  ;;  %v13560_v37 = vld [vmem:[#allocation38_spill] sm:$0xff]  ;;  %v13562_v34 = vld [vmem:[#allocation39_spill] sm:$0xff] }
 0x2f9   : > { %v1933_v21 = vsel %vm13243_vm14, %v1900_v8, %v1670_v59  ;;  %v13553_v59 = vld [vmem:[#allocation76_spill] sm:$0xff] }
 0x2fa   : > { %2980 = vrot.lane.b32.xlu1 %v13550_v3, %s13298_s30  ;;  %2970 = vrot.lane.b32.xlu0 %v13551_v28, %s13298_s30 }
 0x2fb   : > { %6602 = vmatprep.mubr.msk.bf16.mxu1 %vm1960_vm15, %v1933_v21 }
 0x2fc   : > { %v1452_v22 = vpop.permute.xlu1 %1451  ;;  %v1674_v24 = vpop.permute.xlu0 %1673 }
 0x2fd   : > { %v1708_v44 = vsel %vm553_vm1, %v8643_v29, %v1452_v22  ;;  %v13554_v29 = vld [vmem:[#allocation118_spill] sm:$0xff]  ;;  %v13558_v22 = vld [vmem:[#allocation125_spill] sm:$0xff] }
 0x2fe   : > { %v1741_v27 = vsel %vm1709_vm8, %v1708_v44, %v1484_v17  ;;  %2984 = vrot.lane.b32.xlu1 %v13552_v53, %s13298_s30  ;;  %2974 = vrot.lane.b32.xlu0 %v13553_v59, %s13298_s30  ;;  %v13555_v17 = vld [vmem:[#allocation93_spill] sm:$0xff]  ;;  %v13559_v44 = vld [vmem:[#allocation116_spill] sm:$0xff] }
 0x2ff   : > { %v1774_v19 = vsel %vm1742_vm9, %v1741_v27, %v1516_v50 }
 0x300   : > { %v1640_v13 = vpop.permute.xlu1 %1639  ;;  %v1578_v16 = vpop.permute.xlu0 %1577  ;;  %v1807_v21 = vsel %vm1775_vm10, %v1774_v19, %v1548_v45  ;;  %v1739_v45 = vsel %vm1709_vm8, %v1706_v39, %v9040_v7  ;;  %v13563_v7 = vld [vmem:[#allocation87_spill] sm:$0xff] }
 0x301   : > { %v1902_v8 = vsel %vm1874_vm12, %v1869_v6, %v1640_v13  ;;  %v1840_v27 = vsel %vm1808_vm11, %v1807_v21, %v1580_v61  ;;  %v1772_v6 = vsel %vm1742_vm9, %v1739_v45, %v1514_v63  ;;  %v9157_v61 = vsel %vm1101_vm2, %v13545_v48, 0  ;;  %v13564_v63 = vld [vmem:[#allocation123_spill] sm:$0xff] }
 0x302   : > { %2988 = vrot.lane.b32.xlu1 %v13554_v29, %s13298_s30  ;;  %2978 = vrot.lane.b32.xlu0 %v13555_v17, %s13298_s30  ;;  %v1935_v58 = vsel %vm13243_vm14, %v1902_v8, %v1672_v23  ;;  %v6757_v23 = vunpack.i.l.bf16 %v13560_v37  ;;  %v13084_v48 = vshll.u32 %v9157_v61, 16 }
 0x303   : > { %6603 = vmatmul.mubr.msk.bf16.gmra.mxu1 %vm1960_vm15, %v1935_v58  ;;  %v13082_v58 = vshll.u32 %v9079_v42, 16 }
 0x304   : > { %v9138_v50 = vpop.permute.xlu1 %2874  ;;  %v1642_v40 = vpop.permute.xlu0 %1641  ;;  %v1873_v8 = vsel %vm1841_vm13, %v1840_v27, %v6757_v23 }
 0x305   : > { %13557 = vst [vmem:[#allocation122_spill] sm:$0xff] %v9138_v50  ;;  %v6762_v50 = vunpack.i.l.bf16 %v13562_v34 }
 0x306   : > { %2992 = vrot.lane.b32.xlu1 %v13558_v22, %s13298_s30  ;;  %2982 = vrot.lane.b32.xlu0 %v13559_v44, %s13298_s30 }
 0x308   : > { %v9149_v19 = vpop.permute.xlu1 %2878  ;;  %v1546_v20 = vpop.permute.xlu0 %1545 }
 0x309   : > { %13561 = vst [vmem:[#allocation63_spill] sm:$0xff] %v9149_v19  ;;  %v1805_v13 = vsel %vm1775_vm10, %v1772_v6, %v1546_v20  ;;  %v1906_v6 = vsel %vm1874_vm12, %v1873_v8, %v6762_v50  ;;  %v13083_v20 = vshrl.u32 %v9079_v42, 16  ;;  %v13567_v19 = vld [vmem:[#allocation47_spill] sm:$0xff] }
 0x30a   : > { %v1838_v21 = vsel %vm1808_vm11, %v1805_v13, %v1578_v16  ;;  %2996 = vrot.lane.b32.xlu1 %v13563_v7, %s13298_s30  ;;  %2986 = vrot.lane.b32.xlu0 %v13564_v63, %s13298_s30  ;;  %v2770_v13 = vrot.slane %v13082_v58, 1 }
 0x30b   : > { %v1871_v39 = vsel %vm1841_vm13, %v1838_v21, %v1610_v57  ;;  %v13568_v57 = vld [vmem:[#allocation128_spill] sm:$0xff] }
 0x30c   : > { %v9165_v45 = vpop.permute.xlu1 %2882  ;;  %v9167_v27 = vpop.permute.xlu0 %2872  ;;  %v1904_v23 = vsel %vm1874_vm12, %v1871_v39, %v1642_v40  ;;  %v13569_v40 = vld [vmem:[#allocation40_spill] sm:$0xff]  ;;  %v2771_v21 = vor.u32 %v2770_v13, %v13083_v20  ;;  %v2774_v39 = vrot.slane %v13084_v48, 1  ;;  %v13580_v48 = vld [vmem:[#allocation110_spill] sm:$0xff] }
 0x30d   : > { %13565 = vst [vmem:[#allocation84_spill] sm:$0xff] %v9165_v45  ;;  %13566 = vst [vmem:[#allocation137_spill] sm:$0xff] %v9167_v27  ;;  %v1937_v16 = vsel %vm13243_vm14, %v1904_v23, %v1674_v24  ;;  %v1939_v50 = vsel %vm13243_vm14, %v1906_v6, %v13569_v40  ;;  %v13572_v23 = vld [vmem:[#allocation69_spill] sm:$0xff]  ;;  %v2778_v27 = vrot.slane %v9079_v42, 1 }
 0x30e   : > { %3002 = vrot.lane.b32.xlu1 %v13567_v19, %s13324_s24  ;;  %2990 = vrot.lane.b32.xlu0 %v13568_v57, %s13298_s30  ;;  %v9201_v40 = vsel %vm1136_vm6, %v2771_v21, %v2774_v39  ;;  %v13584_v39 = vld [vmem:[#allocation119_spill] sm:$0xff]  ;;  %v13589_v45 = vld [vmem:[#allocation73_spill] sm:$0xff] }
 0x30f   : > { %6606 = vmatprep.mubr.msk.bf16.mxu1 %vm1960_vm15, %v1937_v16  ;;  %v13573_v16 = vld [vmem:[#allocation78_spill] sm:$0xff]  ;;  %13576 = vst [vmem:[#allocation139_spill] sm:$0xff] %v9201_v40 }
 0x310   : > { %6607 = vmatmul.mubr.msk.bf16.gmra.mxu1 %vm1960_vm15, %v1939_v50  ;;  %v9184_v8 = vpop.permute.xlu1 %2886  ;;  %v9186_v24 = vpop.permute.xlu0 %2876  ;;  %v13577_v50 = vld [vmem:[#allocation83_spill] sm:$0xff] }
 0x311   : > { %13570 = vst [vmem:[#allocation47_spill] sm:$0xff] %v9184_v8  ;;  %13571 = vst [vmem:[#allocation40_spill] sm:$0xff] %v9186_v24  ;;  %v13585_v24 = vld [vmem:[#allocation58_spill] sm:$0xff] }
 0x312   : > { %3006 = vrot.lane.b32.xlu1 %v13572_v23, %s13324_s24  ;;  %2994 = vrot.lane.b32.xlu0 %v13573_v16, %s13298_s30 }
 0x314   : > { %v9196_v58 = vpop.permute.xlu1 %2890  ;;  %v9198_v6 = vpop.permute.xlu0 %2880 }
 0x315   : > { %13574 = vst [vmem:[#allocation69_spill] sm:$0xff] %v9196_v58  ;;  %13575 = vst [vmem:[#allocation138_spill] sm:$0xff] %v9198_v6  ;;  %v13581_v58 = vld [vmem:[#allocation45_spill] sm:$0xff] }
 0x316   : > { %3010 = vrot.lane.b32.xlu1 %v13577_v50, %s13324_s24  ;;  %2998 = vrot.lane.b32.xlu0 %v9201_v40, %s13298_s30 }
 0x318   : > { %v9207_v13 = vpop.permute.xlu1 %2894  ;;  %v9209_v20 = vpop.permute.xlu0 %2884 }
 0x319   : > { %13578 = vst [vmem:[#allocation140_spill] sm:$0xff] %v9207_v13  ;;  %13579 = vst [vmem:[#allocation141_spill] sm:$0xff] %v9209_v20  ;;  %v13588_v20 = vld [vmem:[#allocation126_spill] sm:$0xff] }
 0x31a   : > { %3014 = vrot.lane.b32.xlu1 %v13580_v48, %s13324_s24  ;;  %3004 = vrot.lane.b32.xlu0 %v13581_v58, %s13324_s24 }
 0x31c   : > { %v9215_v6 = vpop.permute.xlu1 %2898  ;;  %v9217_v21 = vpop.permute.xlu0 %2888 }
 0x31d   : > { %13582 = vst [vmem:[#allocation45_spill] sm:$0xff] %v9215_v6  ;;  %13583 = vst [vmem:[#allocation142_spill] sm:$0xff] %v9217_v21  ;;  %v2779_v21 = vrot.slane %v9157_v61, 1 }
 0x31e   : > { %3018 = vrot.lane.b32.xlu1 %v13584_v39, %s13324_s24  ;;  %3008 = vrot.lane.b32.xlu0 %v13585_v24, %s13324_s24 }
 0x320   : > { %v9223_v8 = vpop.permute.xlu1 %2902  ;;  %v9225_v13 = vpop.permute.xlu0 %2892 }
 0x321   : > { %13586 = vst [vmem:[#allocation58_spill] sm:$0xff] %v9223_v8  ;;  %13587 = vst [vmem:[#allocation143_spill] sm:$0xff] %v9225_v13  ;;  %v13592_v8 = vld [vmem:[#allocation88_spill] sm:$0xff] }
 0x322   : > { %3022 = vrot.lane.b32.xlu1 %v13588_v20, %s13324_s24  ;;  %3012 = vrot.lane.b32.xlu0 %v13589_v45, %s13324_s24  ;;  %v9246_v20 = vsel %vm1356_vm4, %v2778_v27, %v2779_v21  ;;  %v13602_v21 = vld [vmem:[#allocation55_spill] sm:$0xff] }
 0x323   : > { %13595 = vst [vmem:[#allocation148_spill] sm:$0xff] %v9246_v20 }
 0x324   : > { %v9231_v34 = vpop.permute.xlu1 %6765  ;;  %v9233_v37 = vpop.permute.xlu0 %2896 }
 0x325   : > { %13590 = vst [vmem:[#allocation144_spill] sm:$0xff] %v9231_v34  ;;  %13591 = vst [vmem:[#allocation145_spill] sm:$0xff] %v9233_v37  ;;  %v13596_v34 = vld [vmem:[#allocation113_spill] sm:$0xff] }
 0x326   : > { %3026 = vrot.lane.b32.xlu1 %v8763_v56, %s13324_s24  ;;  %3016 = vrot.lane.b32.xlu0 %v13592_v8, %s13324_s24 }
 0x328   : > { %v9241_v13 = vpop.permute.xlu1 %2910  ;;  %v9243_v6 = vpop.permute.xlu0 %2900 }
 0x329   : > { %13593 = vst [vmem:[#allocation146_spill] sm:$0xff] %v9241_v13  ;;  %13594 = vst [vmem:[#allocation147_spill] sm:$0xff] %v9243_v6  ;;  %v13599_v13 = vld [vmem:[#allocation120_spill] sm:$0xff] }
 0x32a   : > { %3030 = vrot.lane.b32.xlu1 %v9246_v20, %s13324_s24  ;;  %3020 = vrot.lane.b32.xlu0 %v13596_v34, %s13324_s24  ;;  %v13603_v20 = vld [vmem:[#allocation131_spill] sm:$0xff] }
 0x32c   : > { %v9252_v37 = vpop.permute.xlu1 %2914  ;;  %v9254_v39 = vpop.permute.xlu0 %2904 }
 0x32d   : > { %13597 = vst [vmem:[#allocation149_spill] sm:$0xff] %v9252_v37  ;;  %13598 = vst [vmem:[#allocation150_spill] sm:$0xff] %v9254_v39  ;;  %v13606_v39 = vld [vmem:[#allocation97_spill] sm:$0xff] }
 0x32e   : > { %3034 = vrot.lane.b32.xlu1 %v8741_v25, %s13357_s20  ;;  %3024 = vrot.lane.b32.xlu0 %v13599_v13, %s13324_s24  ;;  %v13607_v25 = vld [vmem:[#allocation133_spill] sm:$0xff]  ;;  %v13618_v13 = vshll.u32 %v9157_v61, 16 }
 0x330   : > { %v9260_v6 = vpop.permute.xlu1 %2918  ;;  %v9262_v27 = vpop.permute.xlu0 %2908 }
 0x331   : > { %13600 = vst [vmem:[#allocation151_spill] sm:$0xff] %v9260_v6  ;;  %13601 = vst [vmem:[#allocation152_spill] sm:$0xff] %v9262_v27  ;;  %v13610_v27 = vld [vmem:[#allocation99_spill] sm:$0xff] }
 0x332   : > { %3038 = vrot.lane.b32.xlu1 %v13602_v21, %s13357_s20  ;;  %3028 = vrot.lane.b32.xlu0 %v13603_v20, %s13324_s24  ;;  %v13611_v21 = vld [vmem:[#allocation94_spill] sm:$0xff] }
 0x334   : > { %v9268_v56 = vpop.permute.xlu1 %2922  ;;  %v9270_v37 = vpop.permute.xlu0 %2912 }
 0x335   : > { %13604 = vst [vmem:[#allocation153_spill] sm:$0xff] %v9268_v56  ;;  %13605 = vst [vmem:[#allocation154_spill] sm:$0xff] %v9270_v37  ;;  %v2784_v37 = vshrl.u32 %v9157_v61, 16 }
 0x336   : > { %3042 = vrot.lane.b32.xlu1 %v13606_v39, %s13357_s20  ;;  %3032 = vrot.lane.b32.xlu0 %v13607_v25, %s13357_s20  ;;  %v13614_v39 = vld [vmem:[#allocation100_spill] sm:$0xff]  ;;  %v13615_v25 = vld [vmem:[#allocation53_spill] sm:$0xff] }
 0x338   : > { %v9276_v48 = vpop.permute.xlu1 %2926  ;;  %v9278_v6 = vpop.permute.xlu0 %2916 }
 0x339   : > { %13608 = vst [vmem:[#allocation155_spill] sm:$0xff] %v9276_v48  ;;  %13609 = vst [vmem:[#allocation156_spill] sm:$0xff] %v9278_v6 }
 0x33a   : > { %3046 = vrot.lane.b32.xlu1 %v13610_v27, %s13357_s20  ;;  %3036 = vrot.lane.b32.xlu0 %v13611_v21, %s13357_s20  ;;  %v2786_v27 = vrot.slane %v2784_v37, 1  ;;  %v2787_v21 = vrot.slane %v13618_v13, 2 }
 0x33c   : > { %v9284_v20 = vpop.permute.xlu1 %2930  ;;  %v9286_v56 = vpop.permute.xlu0 %2920 }
 0x33d   : > { %13612 = vst [vmem:[#allocation157_spill] sm:$0xff] %v9284_v20  ;;  %13613 = vst [vmem:[#allocation158_spill] sm:$0xff] %v9286_v56  ;;  %v13619_v20 = vshrl.u32 %v9079_v42, 16  ;;  %v13620_v56 = vshll.u32 %v9079_v42, 16 }
 0x33e   : > { %3050 = vrot.lane.b32.xlu1 %v13614_v39, %s13357_s20  ;;  %3040 = vrot.lane.b32.xlu0 %v13615_v25, %s13357_s20 }
 0x33f   : > { %v2781_v50 = vrot.slane %v13619_v20, 1  ;;  %v2782_v34 = vrot.slane %v13620_v56, 2 }
 0x340   : > { %v9293_v48 = vpop.permute.xlu1 %2934  ;;  %v9295_v6 = vpop.permute.xlu0 %2924 }
 0x341   : > { %13616 = vst [vmem:[#allocation159_spill] sm:$0xff] %v9293_v48  ;;  %13617 = vst [vmem:[#allocation160_spill] sm:$0xff] %v9295_v6  ;;  %v2783_v37 = vor.u32 %v2782_v34, %v2781_v50  ;;  %v2788_v6 = vor.u32 %v2787_v21, %v2786_v27 }
 0x342   : > { %3054 = vrot.lane.b32.xlu1 %v13518_v4, %s13357_s20  ;;  %3044 = vrot.lane.b32.xlu0 %v8845_v54, %s13357_s20 }
 0x343   : > { %v9320_v13 = vsel %vm2590_vm7, %v2783_v37, %v2788_v6  ;;  %vm13149_vm7 = vcmask 392192  }
 0x344   : > { %v9307_v39 = vpop.permute.xlu1 %2938  ;;  %v9309_v48 = vpop.permute.xlu0 %2928  ;;  %13625 = vst [vmem:[#allocation165_spill] sm:$0xff] %v9320_v13 }
 0x345   : > { %13621 = vst [vmem:[#allocation161_spill] sm:$0xff] %v9307_v39  ;;  %13622 = vst [vmem:[#allocation162_spill] sm:$0xff] %v9309_v48  ;;  %v2790_v48 = vrot.slane %v9079_v42, 2 }
 0x346   : > { %3058 = vrot.lane.b32.xlu1 %v8860_v46, %s13357_s20  ;;  %3048 = vrot.lane.b32.xlu0 %v8094_v0, %s13357_s20 }
 0x348   : > { %v9315_v20 = vpop.permute.xlu1 %2942  ;;  %v9317_v56 = vpop.permute.xlu0 %2932 }
 0x349   : > { %13623 = vst [vmem:[#allocation163_spill] sm:$0xff] %v9315_v20  ;;  %13624 = vst [vmem:[#allocation164_spill] sm:$0xff] %v9317_v56 }
 0x34a   : > { %3062 = vrot.lane.b32.xlu1 %v9320_v13, %s13357_s20  ;;  %3052 = vrot.lane.b32.xlu0 %v8107_v35, %s13357_s20 }
 0x34c   : > { %v9326_v34 = vpop.permute.xlu1 %2946  ;;  %v9328_v50 = vpop.permute.xlu0 %2936 }
 0x34d   : > { %13626 = vst [vmem:[#allocation166_spill] sm:$0xff] %v9326_v34  ;;  %13627 = vst [vmem:[#allocation167_spill] sm:$0xff] %v9328_v50 }
 0x34e   : > { %3066 = vrot.lane.b32.xlu1 %v8924_v47, %s6900_s1  ;;  %3056 = vrot.lane.b32.xlu0 %v8121_v52, %s13357_s20 }
 0x350   : > { %v9334_v27 = vpop.permute.xlu1 %2950  ;;  %v9336_v6 = vpop.permute.xlu0 %2940 }
 0x351   : > { %13628 = vst [vmem:[#allocation168_spill] sm:$0xff] %v9334_v27  ;;  %13629 = vst [vmem:[#allocation169_spill] sm:$0xff] %v9336_v6  ;;  %v13633_v6 = vld [vmem:[#allocation42_spill] sm:$0xff] }
 0x352   : > { %3070 = vrot.lane.b32.xlu1 %v8944_v26, %s6900_s1  ;;  %3060 = vrot.lane.b32.xlu0 %v8134_v62, %s13357_s20 }
 0x354   : > { %v9342_v21 = vpop.permute.xlu1 %2954  ;;  %v9344_v37 = vpop.permute.xlu0 %2944 }
 0x355   : > { %13630 = vst [vmem:[#allocation170_spill] sm:$0xff] %v9342_v21  ;;  %13631 = vst [vmem:[#allocation171_spill] sm:$0xff] %v9344_v37  ;;  %v13636_v37 = vld [vmem:[#allocation49_spill] sm:$0xff] }
 0x356   : > { %3074 = vrot.lane.b32.xlu1 %v8964_v10, %s6900_s1  ;;  %3064 = vrot.lane.b32.xlu0 %v8745_v9, %s6900_s1 }
 0x358   : > { %v9350_v34 = vpop.permute.xlu1 %2958  ;;  %v9352_v27 = vpop.permute.xlu0 %2948 }
 0x359   : > { %13632 = vst [vmem:[#allocation172_spill] sm:$0xff] %v9352_v27  ;;  %v13639_v27 = vld [vmem:[#allocation44_spill] sm:$0xff] }
 0x35a   : > { %3078 = vrot.lane.b32.xlu1 %v8980_v31, %s6900_s1  ;;  %3068 = vrot.lane.b32.xlu0 %v13633_v6, %s6900_s1 }
 0x35c   : > { %v9358_v20 = vpop.permute.xlu1 %2962  ;;  %v9360_v21 = vpop.permute.xlu0 %2952 }
 0x35d   : > { %13634 = vst [vmem:[#allocation42_spill] sm:$0xff] %v9358_v20  ;;  %13635 = vst [vmem:[#allocation173_spill] sm:$0xff] %v9360_v21  ;;  %v2791_v21 = vrot.slane %v9157_v61, 2 }
 0x35e   : > { %3082 = vrot.lane.b32.xlu1 %v9000_v41, %s6900_s1  ;;  %3072 = vrot.lane.b32.xlu0 %v13636_v37, %s6900_s1 }
 0x35f   : > { %v9389_v20 = vsel %vm13242_vm3, %v2790_v48, %v2791_v21  ;;  %v13649_v21 = vld [vmem:[#allocation72_spill] sm:$0xff] }
 0x360   : > { %v9366_v39 = vpop.permute.xlu1 %2966  ;;  %v9368_v50 = vpop.permute.xlu0 %2956 }
 0x361   : > { %13637 = vst [vmem:[#allocation49_spill] sm:$0xff] %v9366_v39  ;;  %13638 = vst [vmem:[#allocation174_spill] sm:$0xff] %v9368_v50 }
 0x362   : > { %3086 = vrot.lane.b32.xlu1 %v9016_v36, %s6900_s1  ;;  %3076 = vrot.lane.b32.xlu0 %v13639_v27, %s6900_s1 }
 0x364   : > { %v9374_v9 = vpop.permute.xlu1 %2972  ;;  %v9376_v56 = vpop.permute.xlu0 %2960 }
 0x365   : > { %13640 = vst [vmem:[#allocation44_spill] sm:$0xff] %v9374_v9  ;;  %13641 = vst [vmem:[#allocation175_spill] sm:$0xff] %v9376_v56 }
 0x366   : > { %3090 = vrot.lane.b32.xlu1 %v9028_v14, %s6900_s1  ;;  %3080 = vrot.lane.b32.xlu0 %v8940_v51, %s6900_s1 }
 0x368   : > { %v9384_v50 = vpop.permute.xlu1 %2976  ;;  %v9386_v39 = vpop.permute.xlu0 %2964 }
 0x369   : > { %13642 = vst [vmem:[#allocation176_spill] sm:$0xff] %v9384_v50  ;;  %13643 = vst [vmem:[#allocation177_spill] sm:$0xff] %v9386_v39  ;;  %v13646_v50 = vld [vmem:[#allocation50_spill] sm:$0xff] }
 0x36a   : > { %3094 = vrot.lane.b32.xlu1 %v9389_v20, %s6900_s1  ;;  %3084 = vrot.lane.b32.xlu0 %v8961_v55, %s6900_s1 }
 0x36c   : > { %v9395_v61 = vpop.permute.xlu1 %2980  ;;  %v9397_v9 = vpop.permute.xlu0 %2970 }
 0x36d   : > { %13644 = vst [vmem:[#allocation178_spill] sm:$0xff] %v9395_v61  ;;  %13645 = vst [vmem:[#allocation179_spill] sm:$0xff] %v9397_v9 }
 0x36e   : > { %3098 = vrot.lane.b32.xlu1 %v13492_v43, %s6901_s2  ;;  %3088 = vrot.lane.b32.xlu0 %v13646_v50, %s6900_s1 }
 0x370   : > { %v9403_v39 = vpop.permute.xlu1 %2984  ;;  %v9405_v48 = vpop.permute.xlu0 %2974 }
 0x371   : > { %13647 = vst [vmem:[#allocation180_spill] sm:$0xff] %v9403_v39  ;;  %13648 = vst [vmem:[#allocation181_spill] sm:$0xff] %v9405_v48 }
 0x372   : > { %3102 = vrot.lane.b32.xlu1 %v13497_v32, %s6901_s2  ;;  %3092 = vrot.lane.b32.xlu0 %v13649_v21, %s6900_s1  ;;  %s6902_s1 = smov 44   ;;  %v13663_v32 = vld [vmem:[#allocation77_spill] sm:$0xff] }
 0x374   : > { %v9411_v61 = vpop.permute.xlu1 %2988  ;;  %v9413_v9 = vpop.permute.xlu0 %2978 }
 0x375   : > { %13650 = vst [vmem:[#allocation182_spill] sm:$0xff] %v9411_v61  ;;  %13651 = vst [vmem:[#allocation183_spill] sm:$0xff] %v9413_v9 }
 0x376   : > { %3106 = vrot.lane.b32.xlu1 %v13503_v1, %s6901_s2  ;;  %3096 = vrot.lane.b32.xlu0 %v13472_v33, %s6901_s2 }
 0x378   : > { %v9419_v56 = vpop.permute.xlu1 %2992  ;;  %v9421_v39 = vpop.permute.xlu0 %2982 }
 0x379   : > { %13652 = vst [vmem:[#allocation184_spill] sm:$0xff] %v9419_v56  ;;  %13653 = vst [vmem:[#allocation185_spill] sm:$0xff] %v9421_v39  ;;  %v13662_v56 = vld [vmem:[#allocation51_spill] sm:$0xff] }
 0x37a   : > { %3110 = vrot.lane.b32.xlu1 %v13528_v38, %s6901_s2  ;;  %3100 = vrot.lane.b32.xlu0 %v13477_v18, %s6901_s2 }
 0x37c   : > { %v9427_v48 = vpop.permute.xlu1 %2996  ;;  %v9429_v61 = vpop.permute.xlu0 %2986 }
 0x37d   : > { %13654 = vst [vmem:[#allocation186_spill] sm:$0xff] %v9427_v48  ;;  %13655 = vst [vmem:[#allocation187_spill] sm:$0xff] %v9429_v61  ;;  %v13659_v48 = vld [vmem:[#allocation111_spill] sm:$0xff] }
 0x37e   : > { %3114 = vrot.lane.b32.xlu1 %v7990_v60, %s6901_s2  ;;  %3104 = vrot.lane.b32.xlu0 %v13533_v49, %s6901_s2 }
 0x380   : > { %v9435_v9 = vpop.permute.xlu1 %3002  ;;  %v9437_v33 = vpop.permute.xlu0 %2990 }
 0x381   : > { %13656 = vst [vmem:[#allocation188_spill] sm:$0xff] %v9435_v9 }
 0x382   : > { %3118 = vrot.lane.b32.xlu1 %v8026_v15, %s6901_s2  ;;  %3108 = vrot.lane.b32.xlu0 %v7935_v2, %s6901_s2 }
 0x384   : > { %v9443_v39 = vpop.permute.xlu1 %3006  ;;  %v9445_v38 = vpop.permute.xlu0 %2994 }
 0x385   : > { %13657 = vst [vmem:[#allocation189_spill] sm:$0xff] %v9443_v39 }
 0x386   : > { %3122 = vrot.lane.b32.xlu1 %v8034_v30, %s6901_s2  ;;  %3112 = vrot.lane.b32.xlu0 %v7959_v11, %s6901_s2 }
 0x388   : > { %v9451_v61 = vpop.permute.xlu1 %3010  ;;  %v9453_v9 = vpop.permute.xlu0 %2998 }
 0x389   : > { %13658 = vst [vmem:[#allocation190_spill] sm:$0xff] %v9451_v61 }
 0x38a   : > { %3126 = vrot.lane.b32.xlu1 %v13659_v48, %s6901_s2  ;;  %3116 = vrot.lane.b32.xlu0 %v13540_v5, %s6901_s2 }
 0x38c   : > { %v9459_v1 = vpop.permute.xlu1 %3014  ;;  %v9461_v39 = vpop.permute.xlu0 %3004 }
 0x38d   : > { %13660 = vst [vmem:[#allocation111_spill] sm:$0xff] %v9459_v1  ;;  %13661 = vst [vmem:[#allocation191_spill] sm:$0xff] %v9461_v39 }
 0x38e   : > { %3130 = vrot.lane.b32.xlu1 %v13662_v56, %s6902_s1  ;;  %3120 = vrot.lane.b32.xlu0 %v13663_v32, %s6901_s2 }
 0x390   : > { %v9467_v61 = vpop.permute.xlu1 %3018  ;;  %v9469_v11 = vpop.permute.xlu0 %3008 }
 0x391   : > { %13664 = vst [vmem:[#allocation77_spill] sm:$0xff] %v9467_v61  ;;  %13665 = vst [vmem:[#allocation192_spill] sm:$0xff] %v9469_v11 }
 0x392   : > { %3134 = vrot.lane.b32.xlu1 %v13549_v12, %s6902_s1  ;;  %3124 = vrot.lane.b32.xlu0 %v9079_v42, %s6901_s2  ;;  %s6903_s2 = smov 48  }
 0x394   : > { %v9475_v1 = vpop.permute.xlu1 %3022  ;;  %v9477_v39 = vpop.permute.xlu0 %3012 }
 0x395   : > { %13666 = vst [vmem:[#allocation193_spill] sm:$0xff] %v9477_v39 }
 0x396   : > { %3138 = vrot.lane.b32.xlu1 %v13550_v3, %s6902_s1  ;;  %3128 = vrot.lane.b32.xlu0 %v13551_v28, %s6902_s1 }
 0x398   : > { %v9483_v56 = vpop.permute.xlu1 %3026  ;;  %v9485_v61 = vpop.permute.xlu0 %3016 }
 0x399   : > { %13667 = vst [vmem:[#allocation194_spill] sm:$0xff] %v9485_v61  ;;  %v13670_v61 = vshll.u32 %v13659_v48, 16 }
 0x39a   : > { %3142 = vrot.lane.b32.xlu1 %v13552_v53, %s6902_s1  ;;  %3132 = vrot.lane.b32.xlu0 %v13553_v59, %s6902_s1  ;;  %v13673_v59 = vld [vmem:[#allocation106_spill] sm:$0xff] }
 0x39b   : > { %v2797_v53 = vrot.slane %v13670_v61, 1 }
 0x39c   : > { %v9491_v11 = vpop.permute.xlu1 %3030  ;;  %v9493_v12 = vpop.permute.xlu0 %3020 }
 0x39d   : > { %13668 = vst [vmem:[#allocation195_spill] sm:$0xff] %v9493_v12 }
 0x39e   : > { %3146 = vrot.lane.b32.xlu1 %v13554_v29, %s6902_s1  ;;  %3136 = vrot.lane.b32.xlu0 %v13555_v17, %s6902_s1  ;;  %v13672_v29 = vshrl.u32 %v13659_v48, 16 }
 0x3a0   : > { %v9499_v28 = vpop.permute.xlu1 %3034  ;;  %v9501_v39 = vpop.permute.xlu0 %3024  ;;  %v2798_v17 = vor.u32 %v2797_v53, %v13672_v29 }
 0x3a1   : > { %13669 = vst [vmem:[#allocation196_spill] sm:$0xff] %v9499_v28  ;;  %v13674_v28 = vshll.u32 %v13673_v59, 16 }
 0x3a2   : > { %3150 = vrot.lane.b32.xlu1 %v13558_v22, %s6902_s1  ;;  %3140 = vrot.lane.b32.xlu0 %v13559_v44, %s6902_s1 }
 0x3a3   : > { %v2801_v42 = vrot.slane %v13674_v28, 1 }
 0x3a4   : > { %v9509_v12 = vpop.permute.xlu1 %3038  ;;  %v9511_v3 = vpop.permute.xlu0 %3028 }
 0x3a5   : > { %13671 = vst [vmem:[#allocation197_spill] sm:$0xff] %v9509_v12  ;;  %v9526_v12 = vsel %vm1136_vm6, %v2798_v17, %v2801_v42  ;;  %vm3597_vm6 = vcmask 359424  }
 0x3a6   : > { %3154 = vrot.lane.b32.xlu1 %v13563_v7, %s6902_s1  ;;  %3144 = vrot.lane.b32.xlu0 %v13564_v63, %s6902_s1  ;;  %13677 = vst [vmem:[#allocation199_spill] sm:$0xff] %v9526_v12  ;;  %v13691_v63 = vld [vmem:[#allocation131_spill] sm:$0xff] }
 0x3a8   : > { %v9521_v61 = vpop.permute.xlu1 %3042  ;;  %v9523_v22 = vpop.permute.xlu0 %3032 }
 0x3a9   : > { %13675 = vst [vmem:[#allocation106_spill] sm:$0xff] %v9521_v61  ;;  %13676 = vst [vmem:[#allocation198_spill] sm:$0xff] %v9523_v22  ;;  %v13686_v61 = vld [vmem:[#allocation83_spill] sm:$0xff] }
 0x3aa   : > { %3158 = vrot.lane.b32.xlu1 %v9526_v12, %s6902_s1  ;;  %3148 = vrot.lane.b32.xlu0 %v13568_v57, %s6902_s1  ;;  %v13689_v12 = vld [vmem:[#allocation110_spill] sm:$0xff]  ;;  %v2805_v57 = vrot.slane %v13659_v48, 1 }
 0x3ac   : > { %v9532_v53 = vpop.permute.xlu1 %3046  ;;  %v9534_v29 = vpop.permute.xlu0 %3036 }
 0x3ad   : > { %13678 = vst [vmem:[#allocation200_spill] sm:$0xff] %v9532_v53  ;;  %13679 = vst [vmem:[#allocation201_spill] sm:$0xff] %v9534_v29 }
 0x3ae   : > { %3162 = vrot.lane.b32.xlu1 %v13581_v58, %s6903_s2  ;;  %3152 = vrot.lane.b32.xlu0 %v13573_v16, %s6902_s1 }
 0x3b0   : > { %v9540_v28 = vpop.permute.xlu1 %3050  ;;  %v9542_v42 = vpop.permute.xlu0 %3040 }
 0x3b1   : > { %13680 = vst [vmem:[#allocation202_spill] sm:$0xff] %v9540_v28  ;;  %13681 = vst [vmem:[#allocation203_spill] sm:$0xff] %v9542_v42 }
 0x3b2   : > { %3166 = vrot.lane.b32.xlu1 %v13585_v24, %s6903_s2  ;;  %3156 = vrot.lane.b32.xlu0 %v9201_v40, %s6902_s1  ;;  %s6904_s1 = smov 52  }
 0x3b4   : > { %v9548_v17 = vpop.permute.xlu1 %3054  ;;  %v9550_v29 = vpop.permute.xlu0 %3044 }
 0x3b5   : > { %13682 = vst [vmem:[#allocation204_spill] sm:$0xff] %v9550_v29  ;;  %v13685_v29 = vld [vmem:[#allocation113_spill] sm:$0xff] }
 0x3b6   : > { %3170 = vrot.lane.b32.xlu1 %v13589_v45, %s6903_s2  ;;  %3160 = vrot.lane.b32.xlu0 %v13567_v19, %s6903_s2 }
 0x3b8   : > { %v9556_v53 = vpop.permute.xlu1 %3058  ;;  %v9558_v28 = vpop.permute.xlu0 %3048 }
 0x3b9   : > { %13683 = vst [vmem:[#allocation205_spill] sm:$0xff] %v9558_v28  ;;  %v13688_v28 = vld [vmem:[#allocation120_spill] sm:$0xff] }
 0x3ba   : > { %3174 = vrot.lane.b32.xlu1 %v13592_v8, %s6903_s2  ;;  %3164 = vrot.lane.b32.xlu0 %v13572_v23, %s6903_s2 }
 0x3bc   : > { %v9564_v42 = vpop.permute.xlu1 %3062  ;;  %v9566_v22 = vpop.permute.xlu0 %3052 }
 0x3bd   : > { %13684 = vst [vmem:[#allocation206_spill] sm:$0xff] %v9566_v22  ;;  %v2806_v22 = vrot.slane %v13673_v59, 1 }
 0x3be   : > { %3178 = vrot.lane.b32.xlu1 %v13685_v29, %s6903_s2  ;;  %3168 = vrot.lane.b32.xlu0 %v13686_v61, %s6903_s2 }
 0x3bf   : > { %v9595_v29 = vsel %vm1356_vm4, %v2805_v57, %v2806_v22  ;;  %v13703_v57 = vld [vmem:[#allocation148_spill] sm:$0xff] }
 0x3c0   : > { %v9572_v19 = vpop.permute.xlu1 %3066  ;;  %v9574_v40 = vpop.permute.xlu0 %3056  ;;  %13695 = vst [vmem:[#allocation208_spill] sm:$0xff] %v9595_v29 }
 0x3c1   : > { %13687 = vst [vmem:[#allocation83_spill] sm:$0xff] %v9572_v19  ;;  %v13692_v19 = vld [vmem:[#allocation119_spill] sm:$0xff] }
 0x3c2   : > { %3182 = vrot.lane.b32.xlu1 %v13688_v28, %s6903_s2  ;;  %3172 = vrot.lane.b32.xlu0 %v13689_v12, %s6903_s2 }
 0x3c4   : > { %v9580_v16 = vpop.permute.xlu1 %3070  ;;  %v9582_v7 = vpop.permute.xlu0 %3060 }
 0x3c5   : > { %13690 = vst [vmem:[#allocation110_spill] sm:$0xff] %v9580_v16  ;;  %v13696_v16 = vld [vmem:[#allocation126_spill] sm:$0xff] }
 0x3c6   : > { %3186 = vrot.lane.b32.xlu1 %v13691_v63, %s6903_s2  ;;  %3176 = vrot.lane.b32.xlu0 %v13692_v19, %s6903_s2  ;;  %v13699_v63 = vld [vmem:[#allocation94_spill] sm:$0xff] }
 0x3c8   : > { %v9590_v44 = vpop.permute.xlu1 %3074  ;;  %v9592_v28 = vpop.permute.xlu0 %3064 }
 0x3c9   : > { %13693 = vst [vmem:[#allocation119_spill] sm:$0xff] %v9590_v44  ;;  %13694 = vst [vmem:[#allocation207_spill] sm:$0xff] %v9592_v28  ;;  %v13700_v44 = vld [vmem:[#allocation54_spill] sm:$0xff] }
 0x3ca   : > { %3190 = vrot.lane.b32.xlu1 %v9595_v29, %s6903_s2  ;;  %3180 = vrot.lane.b32.xlu0 %v13696_v16, %s6903_s2  ;;  %v13705_v29 = vld [vmem:[#allocation90_spill] sm:$0xff] }
 0x3cc   : > { %v9601_v8 = vpop.permute.xlu1 %3078  ;;  %v9603_v45 = vpop.permute.xlu0 %3068 }
 0x3cd   : > { %13697 = vst [vmem:[#allocation126_spill] sm:$0xff] %v9601_v8  ;;  %13698 = vst [vmem:[#allocation209_spill] sm:$0xff] %v9603_v45 }
 0x3ce   : > { %3194 = vrot.lane.b32.xlu1 %v13699_v63, %s6904_s1  ;;  %3184 = vrot.lane.b32.xlu0 %v13700_v44, %s6903_s2 }
 0x3d0   : > { %v9609_v28 = vpop.permute.xlu1 %3082  ;;  %v9611_v22 = vpop.permute.xlu0 %3072 }
 0x3d1   : > { %13701 = vst [vmem:[#allocation54_spill] sm:$0xff] %v9609_v28  ;;  %13702 = vst [vmem:[#allocation210_spill] sm:$0xff] %v9611_v22  ;;  %v13707_v22 = vld [vmem:[#allocation55_spill] sm:$0xff] }
 0x3d2   : > { %3198 = vrot.lane.b32.xlu1 %v13615_v25, %s6904_s1  ;;  %3188 = vrot.lane.b32.xlu0 %v13703_v57, %s6903_s2  ;;  %s6905_s2 = smov 56  }
 0x3d4   : > { %v9617_v8 = vpop.permute.xlu1 %3086  ;;  %v9619_v45 = vpop.permute.xlu0 %3076 }
 0x3d5   : > { %13704 = vst [vmem:[#allocation211_spill] sm:$0xff] %v9619_v45  ;;  %v13709_v45 = vld [vmem:[#allocation97_spill] sm:$0xff] }
 0x3d6   : > { %3202 = vrot.lane.b32.xlu1 %v8845_v54, %s6904_s1  ;;  %3192 = vrot.lane.b32.xlu0 %v13705_v29, %s6904_s1 }
 0x3d8   : > { %v9625_v63 = vpop.permute.xlu1 %3090  ;;  %v9627_v28 = vpop.permute.xlu0 %3080 }
 0x3d9   : > { %13706 = vst [vmem:[#allocation90_spill] sm:$0xff] %v9627_v28  ;;  %v13711_v28 = vld [vmem:[#allocation99_spill] sm:$0xff] }
 0x3da   : > { %3206 = vrot.lane.b32.xlu1 %v8094_v0, %s6904_s1  ;;  %3196 = vrot.lane.b32.xlu0 %v13707_v22, %s6904_s1 }
 0x3dc   : > { %v9633_v57 = vpop.permute.xlu1 %3094  ;;  %v9635_v25 = vpop.permute.xlu0 %3084 }
 0x3dd   : > { %13708 = vst [vmem:[#allocation212_spill] sm:$0xff] %v9635_v25  ;;  %v13713_v25 = vld [vmem:[#allocation100_spill] sm:$0xff] }
 0x3de   : > { %3210 = vrot.lane.b32.xlu1 %v8107_v35, %s6904_s1  ;;  %3200 = vrot.lane.b32.xlu0 %v13709_v45, %s6904_s1  ;;  %v13716_v45 = vld [vmem:[#allocation114_spill] sm:$0xff] }
 0x3e0   : > { %v9641_v29 = vpop.permute.xlu1 %3098  ;;  %v9643_v54 = vpop.permute.xlu0 %3088 }
 0x3e1   : > { %13710 = vst [vmem:[#allocation213_spill] sm:$0xff] %v9641_v29 }
 0x3e2   : > { %3214 = vrot.lane.b32.xlu1 %v8121_v52, %s6904_s1  ;;  %3204 = vrot.lane.b32.xlu0 %v13711_v28, %s6904_s1 }
 0x3e4   : > { %v9649_v0 = vpop.permute.xlu1 %3102  ;;  %v9651_v22 = vpop.permute.xlu0 %3092 }
 0x3e5   : > { %13712 = vst [vmem:[#allocation99_spill] sm:$0xff] %v9649_v0 }
 0x3e6   : > { %3218 = vrot.lane.b32.xlu1 %v8134_v62, %s6904_s1  ;;  %3208 = vrot.lane.b32.xlu0 %v13713_v25, %s6904_s1  ;;  %v13733_v25 = vld [vmem:[#allocation145_spill] sm:$0xff] }
 0x3e8   : > { %v9657_v35 = vpop.permute.xlu1 %3106  ;;  %v9659_v29 = vpop.permute.xlu0 %3096 }
 0x3e9   : > { %13714 = vst [vmem:[#allocation214_spill] sm:$0xff] %v9657_v35  ;;  %13715 = vst [vmem:[#allocation215_spill] sm:$0xff] %v9659_v29 }
 0x3ea   : > { %3222 = vrot.lane.b32.xlu1 %v13716_v45, %s6904_s1  ;;  %3212 = vrot.lane.b32.xlu0 %v13518_v4, %s6904_s1 }
 0x3ec   : > { %v9665_v52 = vpop.permute.xlu1 %3110  ;;  %v9667_v0 = vpop.permute.xlu0 %3100 }
 0x3ed   : > { %13717 = vst [vmem:[#allocation216_spill] sm:$0xff] %v9665_v52  ;;  %13718 = vst [vmem:[#allocation217_spill] sm:$0xff] %v9667_v0 }
 0x3ee   : > { %3226 = vrot.lane.b32.xlu1 %v13633_v6, %s6905_s2  ;;  %3216 = vrot.lane.b32.xlu0 %v8860_v46, %s6904_s1  ;;  %v2817_v46 = vrot.slane %v13659_v48, 2 }
 0x3f0   : > { %v9673_v35 = vpop.permute.xlu1 %3114  ;;  %v9675_v29 = vpop.permute.xlu0 %3104 }
 0x3f1   : > { %13719 = vst [vmem:[#allocation218_spill] sm:$0xff] %v9673_v35  ;;  %13720 = vst [vmem:[#allocation219_spill] sm:$0xff] %v9675_v29 }
 0x3f2   : > { %3230 = vrot.lane.b32.xlu1 %v13636_v37, %s6905_s2  ;;  %3220 = vrot.lane.b32.xlu0 %v9320_v13, %s6904_s1  ;;  %s6906_s1 = smov 60  }
 0x3f4   : > { %v3119_v52 = vpop.permute.xlu1 %3118  ;;  %v9681_v45 = vpop.permute.xlu0 %3108 }
 0x3f5   : > { %13721 = vst [vmem:[#allocation220_spill] sm:$0xff] %v9681_v45 }
 0x3f6   : > { %3234 = vrot.lane.b32.xlu1 %v13639_v27, %s6905_s2  ;;  %3224 = vrot.lane.b32.xlu0 %v8924_v47, %s6905_s2 }
 0x3f8   : > { %v9687_v0 = vpop.permute.xlu1 %3122  ;;  %v9689_v35 = vpop.permute.xlu0 %3112 }
 0x3f9   : > { %13722 = vst [vmem:[#allocation221_spill] sm:$0xff] %v9689_v35 }
 0x3fa   : > { %3238 = vrot.lane.b32.xlu1 %v8940_v51, %s6905_s2  ;;  %3228 = vrot.lane.b32.xlu0 %v8944_v26, %s6905_s2 }
 0x3fc   : > { %v9695_v29 = vpop.permute.xlu1 %3126  ;;  %v9697_v13 = vpop.permute.xlu0 %3116 }
 0x3fd   : > { %13723 = vst [vmem:[#allocation222_spill] sm:$0xff] %v9697_v13  ;;  %v2818_v13 = vrot.slane %v13673_v59, 2 }
 0x3fe   : > { %3242 = vrot.lane.b32.xlu1 %v8961_v55, %s6905_s2  ;;  %3232 = vrot.lane.b32.xlu0 %v8964_v10, %s6905_s2 }
 0x3ff   : > { %v9729_v59 = vsel %vm13242_vm3, %v2817_v46, %v2818_v13  ;;  %v13735_v13 = vld [vmem:[#allocation155_spill] sm:$0xff] }
 0x400   : > { %v9703_v47 = vpop.permute.xlu1 %3130  ;;  %v9705_v45 = vpop.permute.xlu0 %3120  ;;  %13729 = vst [vmem:[#allocation226_spill] sm:$0xff] %v9729_v59 }
 0x401   : > { %13724 = vst [vmem:[#allocation223_spill] sm:$0xff] %v9703_v47 }
 0x402   : > { %3246 = vrot.lane.b32.xlu1 %v13646_v50, %s6905_s2  ;;  %3236 = vrot.lane.b32.xlu0 %v8980_v31, %s6905_s2  ;;  %v13727_v50 = vld [vmem:[#allocation75_spill] sm:$0xff] }
 0x403   : > { %v3307_v4 = vsel %vm553_vm1, %v7990_v60, %v13727_v50 }
 0x404   : > { %v9711_v35 = vpop.permute.xlu1 %3134  ;;  %v9714_v62 = vpop.permute.xlu0 %3124 }
 0x405   : > { %13725 = vst [vmem:[#allocation224_spill] sm:$0xff] %v9711_v35  ;;  %v13730_v35 = vld [vmem:[#allocation85_spill] sm:$0xff] }
 0x406   : > { %3250 = vrot.lane.b32.xlu1 %v13649_v21, %s6905_s2  ;;  %3240 = vrot.lane.b32.xlu0 %v9000_v41, %s6905_s2  ;;  %v3335_v21 = vsel %vm1709_vm8, %v3307_v4, %v13730_v35  ;;  %v13736_v4 = vld [vmem:[#allocation130_spill] sm:$0xff] }
 0x408   : > { %v9721_v47 = vpop.permute.xlu1 %3138  ;;  %v9726_v55 = vpop.permute.xlu0 %3128 }
 0x409   : > { %13726 = vst [vmem:[#allocation225_spill] sm:$0xff] %v9721_v47  ;;  %13728 = vst [vmem:[#allocation75_spill] sm:$0xff] %v9726_v55  ;;  %v13732_v47 = vld [vmem:[#allocation52_spill] sm:$0xff]  ;;  %v3365_v55 = vsel %vm1742_vm9, %v3335_v21, %v13733_v25 }
 0x40a   : > { %3254 = vrot.lane.b32.xlu1 %v9729_v59, %s6905_s2  ;;  %3244 = vrot.lane.b32.xlu0 %v9016_v36, %s6905_s2  ;;  %v3311_v50 = vsel %vm553_vm1, %v8026_v15, %v13732_v47  ;;  %v3395_v59 = vsel %vm1775_vm10, %v3365_v55, %v13735_v13 }
 0x40b   : > { %v3427_v35 = vsel %vm1808_vm11, %v3395_v59, %v9350_v34  ;;  %v3339_v47 = vsel %vm1709_vm8, %v3311_v50, %v13736_v4  ;;  %v13742_v50 = vld [vmem:[#allocation42_spill] sm:$0xff] }
 0x40c   : > { %v9737_v41 = vpop.permute.xlu1 %3142  ;;  %v9744_v46 = vpop.permute.xlu0 %3132  ;;  %v3459_v25 = vsel %vm1841_vm13, %v3427_v35, %v9437_v33  ;;  %v13741_v33 = vld [vmem:[#allocation59_spill] sm:$0xff] }
 0x40d   : > { %13731 = vst [vmem:[#allocation85_spill] sm:$0xff] %v9737_v41  ;;  %13734 = vst [vmem:[#allocation52_spill] sm:$0xff] %v9744_v46  ;;  %v13738_v46 = vld [vmem:[#allocation147_spill] sm:$0xff]  ;;  %v3491_v13 = vsel %vm1874_vm12, %v3459_v25, %v9475_v1  ;;  %v3315_v59 = vsel %vm553_vm1, %v8034_v30, %v13741_v33  ;;  %v13744_v25 = vld [vmem:[#allocation150_spill] sm:$0xff] }
 0x40e   : > { %3258 = vrot.lane.b32.xlu1 %v13477_v18, %s6906_s1  ;;  %3248 = vrot.lane.b32.xlu0 %v9028_v14, %s6905_s2  ;;  %v3369_v55 = vsel %vm1742_vm9, %v3339_v47, %v13738_v46  ;;  %v13740_v14 = vld [vmem:[#allocation157_spill] sm:$0xff]  ;;  %v3523_v34 = vsel %vm13243_vm14, %v3491_v13, %v9548_v17 }
 0x40f   : > { %v3399_v36 = vsel %vm1775_vm10, %v3369_v55, %v13740_v14  ;;  %v3555_v46 = vsel %vm1960_vm15, %v3523_v34, %v9617_v8  ;;  %v13743_v14 = vld [vmem:[#allocation122_spill] sm:$0xff]  ;;  %v13746_v34 = vld [vmem:[#allocation57_spill] sm:$0xff] }
 0x410   : > { %v9758_v21 = vpop.permute.xlu1 %3146  ;;  %v9764_v41 = vpop.permute.xlu0 %3136  ;;  %v3431_v1 = vsel %vm1808_vm11, %v3399_v36, %v13742_v50  ;;  %v3343_v17 = vsel %vm1709_vm8, %v3315_v59, %v13743_v14  ;;  %v3588_v4 = vsel %vm3564_vm5, %v3555_v46, %v3119_v52  ;;  %v3309_v33 = vsel %vm553_vm1, %v13540_v5, %v13746_v34  ;;  %v13754_v34 = vld [vmem:[#allocation162_spill] sm:$0xff] }
 0x411   : > { %13737 = vst [vmem:[#allocation145_spill] sm:$0xff] %v9758_v21  ;;  %13739 = vst [vmem:[#allocation155_spill] sm:$0xff] %v9764_v41  ;;  %v3463_v35 = vsel %vm1841_vm13, %v3431_v1, %v9445_v38  ;;  %v3373_v55 = vsel %vm1742_vm9, %v3343_v17, %v13744_v25  ;;  %v13747_v38 = vld [vmem:[#allocation159_spill] sm:$0xff]  ;;  %v13862_v41 = vld [vmem:[#allocation109_spill] sm:$0xff] }
 0x412   : > { %3262 = vrot.lane.b32.xlu1 %v13533_v49, %s6906_s1  ;;  %3252 = vrot.lane.b32.xlu0 %v9389_v20, %s6905_s2  ;;  %v3495_v36 = vsel %vm1874_vm12, %v3463_v35, %v9483_v56  ;;  %v3403_v52 = vsel %vm1775_vm10, %v3373_v55, %v13747_v38  ;;  %v13748_v56 = vld [vmem:[#allocation49_spill] sm:$0xff]  ;;  %v13755_v38 = vld [vmem:[#allocation46_spill] sm:$0xff]  ;;  %s6909_s2 = smov [#allocation2]  }
 0x413   : > { %v3527_v59 = vsel %vm13243_vm14, %v3495_v36, %v9556_v53  ;;  %v3435_v50 = vsel %vm1808_vm11, %v3403_v52, %v13748_v56  ;;  %v13749_v53 = vld [vmem:[#allocation60_spill] sm:$0xff]  ;;  %v13751_v55 = vld [vmem:[#allocation45_spill] sm:$0xff]  ;;  %v13752_v36 = vld [vmem:[#allocation95_spill] sm:$0xff]  ;;  %v3313_v52 = vsel %vm553_vm1, %v13663_v32, %v13755_v38 }
 0x414   : > { %v3151_v47 = vpop.permute.xlu1 %3150  ;;  %v9793_v8 = vpop.permute.xlu0 %3140  ;;  %v3559_v1 = vsel %vm1960_vm15, %v3527_v59, %v9625_v63  ;;  %v3467_v46 = vsel %vm1841_vm13, %v3435_v50, %v9453_v9  ;;  %v3337_v35 = vsel %vm1709_vm8, %v3309_v33, %v13749_v53  ;;  %v13756_v59 = vld [vmem:[#allocation175_spill] sm:$0xff] }
 0x415   : > { %v9791_v13 = vsel %vm3597_vm6, %v3588_v4, %v3151_v47  ;;  %13745 = vst [vmem:[#allocation130_spill] sm:$0xff] %v9793_v8  ;;  %v3592_v14 = vsel %vm3564_vm5, %v3559_v1, %v9687_v0  ;;  %v3499_v4 = vsel %vm1874_vm12, %v3467_v46, %v9491_v11  ;;  %v3367_v63 = vsel %vm1742_vm9, %v3337_v35, %v13751_v55  ;;  %v13753_v0 = vld [vmem:[#allocation56_spill] sm:$0xff]  ;;  %v13757_v1 = vld [vmem:[#allocation137_spill] sm:$0xff]  ;;  %v13760_v35 = vld [vmem:[#allocation58_spill] sm:$0xff] }
 0x416   : > { %3266 = vrot.lane.b32.xlu1 %v7935_v2, %s6906_s1  ;;  %3256 = vrot.lane.b32.xlu0 %v13492_v43, %s6906_s1  ;;  %v3531_v9 = vsel %vm13243_vm14, %v3499_v4, %v9564_v42  ;;  %v3397_v33 = vsel %vm1775_vm10, %v3367_v63, %v13754_v34  ;;  %v3341_v46 = vsel %vm1709_vm8, %v3313_v52, %v13757_v1  ;;  %v13762_v63 = vld [vmem:[#allocation164_spill] sm:$0xff]  ;;  %v13766_v1 = vld [vmem:[#allocation86_spill] sm:$0xff]  ;;  %v13860_v8 = vld [vmem:[#allocation131_spill] sm:$0xff] }
 0x417   : > { %v3563_v11 = vsel %vm1960_vm15, %v3531_v9, %v9633_v57  ;;  %v3429_v56 = vsel %vm1808_vm11, %v3397_v33, %v13756_v59  ;;  %v3371_v4 = vsel %vm1742_vm9, %v3341_v46, %v13760_v35  ;;  %v13763_v33 = vld [vmem:[#allocation177_spill] sm:$0xff]  ;;  %v13768_v35 = vld [vmem:[#allocation91_spill] sm:$0xff] }
 0x418   : > { %v3155_v17 = vpop.permute.xlu1 %3154  ;;  %v9819_v25 = vpop.permute.xlu0 %3144  ;;  %v3596_v42 = vsel %vm3564_vm5, %v3563_v11, %v9695_v29  ;;  %v13761_v29 = vld [vmem:[#allocation71_spill] sm:$0xff]  ;;  %v3401_v9 = vsel %vm1775_vm10, %v3371_v4, %v13762_v63 }
 0x419   : > { %v3625_v47 = vsel %vm3597_vm6, %v3592_v14, %v3155_v17  ;;  %13750 = vst [vmem:[#allocation147_spill] sm:$0xff] %v9819_v25  ;;  %v13758_v14 = vld [vmem:[#allocation184_spill] sm:$0xff]  ;;  %v3433_v11 = vsel %vm1808_vm11, %v3401_v9, %v13763_v33 }
 0x41a   : > { %3270 = vrot.lane.b32.xlu1 %v13752_v36, %s6906_s1  ;;  %3260 = vrot.lane.b32.xlu0 %v13753_v0, %s6906_s1  ;;  %v3461_v17 = vsel %vm1841_vm13, %v3429_v56, %v13758_v14 }
 0x41b   : > { %v3493_v55 = vsel %vm1874_vm12, %v3461_v17, %v9501_v39  ;;  %v13765_v39 = vld [vmem:[#allocation186_spill] sm:$0xff] }
 0x41c   : > { %v3159_v50 = vpop.permute.xlu1 %3158  ;;  %v9845_v57 = vpop.permute.xlu0 %3148  ;;  %v3525_v34 = vsel %vm13243_vm14, %v3493_v55, %v9574_v40  ;;  %v3465_v59 = vsel %vm1841_vm13, %v3433_v11, %v13765_v39 }
 0x41d   : > { %v3629_v53 = vsel %vm3597_vm6, %v3596_v42, %v3159_v50  ;;  %13759 = vst [vmem:[#allocation157_spill] sm:$0xff] %v9845_v57  ;;  %v3557_v38 = vsel %vm1960_vm15, %v3525_v34, %v9643_v54  ;;  %v3497_v50 = vsel %vm1874_vm12, %v3465_v59, %v9511_v3  ;;  %v13858_v57 = vld [vmem:[#allocation87_spill] sm:$0xff] }
 0x41e   : > { %3274 = vrot.lane.b32.xlu1 %v13540_v5, %s6906_s1  ;;  %3264 = vrot.lane.b32.xlu0 %v13761_v29, %s6906_s1  ;;  %v3590_v56 = vsel %vm3564_vm5, %v3557_v38, %v9705_v45  ;;  %v3529_v54 = vsel %vm13243_vm14, %v3497_v50, %v9582_v7 }
 0x41f   : > { %v3561_v46 = vsel %vm1960_vm15, %v3529_v54, %v9651_v22  ;;  %v13771_v22 = vmov 0  }
 0x420   : > { %v9863_v52 = vpop.permute.xlu1 %3162  ;;  %v3153_v42 = vpop.permute.xlu0 %3152  ;;  %v3594_v45 = vsel %vm3564_vm5, %v3561_v46, %v9714_v62  ;;  %v13781_v46 = vld [vmem:[#allocation88_spill] sm:$0xff] }
 0x421   : > { %13764 = vst [vmem:[#allocation59_spill] sm:$0xff] %v9863_v52  ;;  %v3623_v40 = vsel %vm3597_vm6, %v3590_v56, %v3153_v42 }
 0x422   : > { %3278 = vrot.lane.b32.xlu1 %v13663_v32, %s6906_s1  ;;  %3268 = vrot.lane.b32.xlu0 %v13766_v1, %s6906_s1 }
 0x424   : > { %v9880_v14 = vpop.permute.xlu1 %3166  ;;  %v3157_v3 = vpop.permute.xlu0 %3156 }
 0x425   : > { %13767 = vst [vmem:[#allocation42_spill] sm:$0xff] %v9880_v14  ;;  %v3627_v17 = vsel %vm3597_vm6, %v3594_v45, %v3157_v3 }
 0x426   : > { %3282 = vrot.lane.b32.xlu1 %v13768_v35, %s6906_s1  ;;  %3272 = vrot.lane.b32.xlu0 %v7990_v60, %s6906_s1 }
 0x428   : > { %v9889_v4 = vpop.permute.xlu1 %3170  ;;  %v9891_v7 = vpop.permute.xlu0 %3160 }
 0x429   : > { %13769 = vst [vmem:[#allocation122_spill] sm:$0xff] %v9889_v4  ;;  %13770 = vst [vmem:[#allocation150_spill] sm:$0xff] %v9891_v7  ;;  %v13855_v4 = vld [vmem:[#allocation136_spill] sm:$0xff] }
 0x42a   : > { %3286 = vrot.lane.b32.xlu1 %v13771_v22, %s6906_s1  ;;  %3276 = vrot.lane.b32.xlu0 %v8026_v15, %s6906_s1  ;;  %v13783_v22 = vld [vmem:[#allocation55_spill] sm:$0xff] }
 0x42c   : > { %v9897_v62 = vpop.permute.xlu1 %3174  ;;  %v9899_v55 = vpop.permute.xlu0 %3164 }
 0x42d   : > { %13772 = vst [vmem:[#allocation57_spill] sm:$0xff] %v9897_v62  ;;  %13773 = vst [vmem:[#allocation159_spill] sm:$0xff] %v9899_v55  ;;  %v13853_v55 = vld [vmem:[#allocation134_spill] sm:$0xff] }
 0x42e   : > { %3764 = vrot.lane.b32.xlu1 %v13572_v23, %s13347_s22  ;;  %3280 = vrot.lane.b32.xlu0 %v8034_v30, %s6906_s1 }
 0x430   : > { %v9905_v63 = vpop.permute.xlu1 %3178  ;;  %v9907_v9 = vpop.permute.xlu0 %3168 }
 0x431   : > { %13774 = vst [vmem:[#allocation49_spill] sm:$0xff] %v9905_v63  ;;  %13775 = vst [vmem:[#allocation60_spill] sm:$0xff] %v9907_v9  ;;  %v13851_v63 = vld [vmem:[#allocation50_spill] sm:$0xff] }
 0x432   : > { %3768 = vrot.lane.b32.xlu1 %v13686_v61, %s13347_s22  ;;  %3284 = vrot.lane.b32.xlu0 %v13659_v48, %s6906_s1 }
 0x434   : > { %v3183_v34 = vpop.permute.xlu1 %3182  ;;  %v9915_v11 = vpop.permute.xlu0 %3172 }
 0x435   : > { %v3654_v33 = vsel %vm13149_vm7, %v9791_v13, %v3183_v34  ;;  %13776 = vst [vmem:[#allocation45_spill] sm:$0xff] %v9915_v11  ;;  %v13784_v34 = vld [vmem:[#allocation113_spill] sm:$0xff]  ;;  %v13849_v11 = vld [vmem:[#allocation128_spill] sm:$0xff] }
 0x436   : > { %3772 = vrot.lane.b32.xlu1 %v13689_v12, %s13347_s22  ;;  %3762 = vrot.lane.b32.xlu0 %v13581_v58, %s13347_s22  ;;  %v13779_v58 = vld [vmem:[#allocation73_spill] sm:$0xff] }
 0x438   : > { %v3187_v38 = vpop.permute.xlu1 %3186  ;;  %v9922_v59 = vpop.permute.xlu0 %3176 }
 0x439   : > { %v3658_v39 = vsel %vm13149_vm7, %v3625_v47, %v3187_v38  ;;  %13777 = vst [vmem:[#allocation162_spill] sm:$0xff] %v9922_v59  ;;  %v13848_v59 = vld [vmem:[#allocation107_spill] sm:$0xff] }
 0x43a   : > { %3776 = vrot.lane.b32.xlu1 %v13692_v19, %s13347_s22  ;;  %3766 = vrot.lane.b32.xlu0 %v13585_v24, %s13347_s22 }
 0x43c   : > { %v3191_v13 = vpop.permute.xlu1 %3190  ;;  %v9929_v42 = vpop.permute.xlu0 %3180 }
 0x43d   : > { %v3662_v56 = vsel %vm13149_vm7, %v3629_v53, %v3191_v13  ;;  %13778 = vst [vmem:[#allocation46_spill] sm:$0xff] %v9929_v42  ;;  %v13787_v13 = vld [vmem:[#allocation120_spill] sm:$0xff]  ;;  %v13796_v42 = vld [vmem:[#allocation53_spill] sm:$0xff] }
 0x43e   : > { %3780 = vrot.lane.b32.xlu1 %v13696_v16, %s13347_s22  ;;  %3770 = vrot.lane.b32.xlu0 %v13779_v58, %s13347_s22 }
 0x440   : > { %v9935_v47 = vpop.permute.xlu1 %3194  ;;  %v3185_v50 = vpop.permute.xlu0 %3184 }
 0x441   : > { %13780 = vst [vmem:[#allocation175_spill] sm:$0xff] %v9935_v47  ;;  %v3656_v54 = vsel %vm13149_vm7, %v3623_v40, %v3185_v50 }
 0x442   : > { %3784 = vrot.lane.b32.xlu1 %v13700_v44, %s13347_s22  ;;  %3774 = vrot.lane.b32.xlu0 %v13781_v46, %s13347_s22 }
 0x444   : > { %v9942_v53 = vpop.permute.xlu1 %3198  ;;  %v3189_v45 = vpop.permute.xlu0 %3188 }
 0x445   : > { %13782 = vst [vmem:[#allocation137_spill] sm:$0xff] %v9942_v53  ;;  %v3660_v3 = vsel %vm13149_vm7, %v3627_v17, %v3189_v45  ;;  %v13790_v17 = vld [vmem:[#allocation94_spill] sm:$0xff]  ;;  %vm13150_vm7 = vcmask 424960  }
 0x446   : > { %3796 = vrot.lane.b32.xlu1 %v13783_v22, %s13335_s21  ;;  %3778 = vrot.lane.b32.xlu0 %v13784_v34, %s13347_s22 }
 0x448   : > { %v9949_v38 = vpop.permute.xlu1 %3202  ;;  %v9951_v40 = vpop.permute.xlu0 %3192 }
 0x449   : > { %13785 = vst [vmem:[#allocation184_spill] sm:$0xff] %v9949_v38  ;;  %13786 = vst [vmem:[#allocation58_spill] sm:$0xff] %v9951_v40  ;;  %v13793_v40 = vld [vmem:[#allocation67_spill] sm:$0xff] }
 0x44a   : > { %3828 = vrot.lane.b32.xlu1 %v8944_v26, %s13333_s23  ;;  %3782 = vrot.lane.b32.xlu0 %v13787_v13, %s13347_s22 }
 0x44c   : > { %v9957_v50 = vpop.permute.xlu1 %3206  ;;  %v9959_v53 = vpop.permute.xlu0 %3196 }
 0x44d   : > { %13788 = vst [vmem:[#allocation164_spill] sm:$0xff] %v9957_v50  ;;  %13789 = vst [vmem:[#allocation177_spill] sm:$0xff] %v9959_v53 }
 0x44e   : > { %3860 = vrot.lane.b32.xlu1 %v13753_v0, %s13360_s0  ;;  %3794 = vrot.lane.b32.xlu0 %v13790_v17, %s13335_s21 }
 0x450   : > { %v9965_v45 = vpop.permute.xlu1 %3210  ;;  %v9967_v38 = vpop.permute.xlu0 %3200 }
 0x451   : > { %13791 = vst [vmem:[#allocation186_spill] sm:$0xff] %v9965_v45  ;;  %13792 = vst [vmem:[#allocation91_spill] sm:$0xff] %v9967_v38 }
 0x452   : > { %3890 = vrot.lane.b32.xlu1 %v13793_v40, %s13344_s16  ;;  %3826 = vrot.lane.b32.xlu0 %v13633_v6, %s13333_s23  ;;  %v13797_v6 = vld [vmem:[#allocation76_spill] sm:$0xff] }
 0x454   : > { %v3215_v50 = vpop.permute.xlu1 %3214  ;;  %v9974_v47 = vpop.permute.xlu0 %3204 }
 0x455   : > { %v3687_v53 = vsel %vm13150_vm7, %v3654_v33, %v3215_v50  ;;  %13794 = vst [vmem:[#allocation73_spill] sm:$0xff] %v9974_v47 }
 0x456   : > { %3920 = vrot.lane.b32.xlu1 %v13585_v24, %s13298_s30  ;;  %3858 = vrot.lane.b32.xlu0 %v13477_v18, %s13360_s0 }
 0x458   : > { %v3219_v17 = vpop.permute.xlu1 %3218  ;;  %v9981_v45 = vpop.permute.xlu0 %3208 }
 0x459   : > { %v3691_v38 = vsel %vm13150_vm7, %v3658_v39, %v3219_v17  ;;  %13795 = vst [vmem:[#allocation88_spill] sm:$0xff] %v9981_v45  ;;  %v13800_v45 = vld [vmem:[#allocation97_spill] sm:$0xff] }
 0x45a   : > { %3950 = vrot.lane.b32.xlu1 %v13796_v42, %s13324_s24  ;;  %3888 = vrot.lane.b32.xlu0 %v13797_v6, %s13344_s16 }
 0x45c   : > { %v3223_v33 = vpop.permute.xlu1 %3222  ;;  %v9988_v47 = vpop.permute.xlu0 %3212 }
 0x45d   : > { %v3695_v50 = vsel %vm13150_vm7, %v3662_v56, %v3223_v33  ;;  %13798 = vst [vmem:[#allocation55_spill] sm:$0xff] %v9988_v47 }
 0x45e   : > { %3980 = vrot.lane.b32.xlu1 %v13636_v37, %s13357_s20  ;;  %3918 = vrot.lane.b32.xlu0 %v13572_v23, %s13298_s30 }
 0x460   : > { %v9994_v24 = vpop.permute.xlu1 %3226  ;;  %v3217_v39 = vpop.permute.xlu0 %3216 }
 0x461   : > { %13799 = vst [vmem:[#allocation113_spill] sm:$0xff] %v9994_v24  ;;  %v3689_v17 = vsel %vm13150_vm7, %v3656_v54, %v3217_v39 }
 0x462   : > { %3800 = vrot.lane.b32.xlu1 %v13800_v45, %s13335_s21  ;;  %3948 = vrot.lane.b32.xlu0 %v13783_v22, %s13324_s24 }
 0x464   : > { %v10001_v56 = vpop.permute.xlu1 %3230  ;;  %v3221_v33 = vpop.permute.xlu0 %3220 }
 0x465   : > { %13801 = vst [vmem:[#allocation120_spill] sm:$0xff] %v10001_v56  ;;  %v3693_v47 = vsel %vm13150_vm7, %v3660_v3, %v3221_v33  ;;  %v13806_v3 = vld [vmem:[#allocation80_spill] sm:$0xff]  ;;  %vm13151_vm7 = vcmask 457728   ;;  %v13847_v56 = vld [vmem:[#allocation125_spill] sm:$0xff] }
 0x466   : > { %3832 = vrot.lane.b32.xlu1 %v8964_v10, %s13333_s23  ;;  %3978 = vrot.lane.b32.xlu0 %v8944_v26, %s13357_s20 }
 0x468   : > { %v10008_v23 = vpop.permute.xlu1 %3234  ;;  %v10010_v54 = vpop.permute.xlu0 %3224 }
 0x469   : > { %13802 = vst [vmem:[#allocation94_spill] sm:$0xff] %v10008_v23  ;;  %13803 = vst [vmem:[#allocation53_spill] sm:$0xff] %v10010_v54  ;;  %v13810_v54 = vld [vmem:[#allocation61_spill] sm:$0xff] }
 0x46a   : > { %3864 = vrot.lane.b32.xlu1 %v13761_v29, %s13360_s0  ;;  %3798 = vrot.lane.b32.xlu0 %v13796_v42, %s13335_s21 }
 0x46c   : > { %v10016_v22 = vpop.permute.xlu1 %3238  ;;  %v10018_v39 = vpop.permute.xlu0 %3228 }
 0x46d   : > { %13804 = vst [vmem:[#allocation76_spill] sm:$0xff] %v10016_v22  ;;  %13805 = vst [vmem:[#allocation97_spill] sm:$0xff] %v10018_v39 }
 0x46e   : > { %3894 = vrot.lane.b32.xlu1 %v13806_v3, %s13344_s16  ;;  %3830 = vrot.lane.b32.xlu0 %v13636_v37, %s13333_s23  ;;  %v13811_v37 = vld [vmem:[#allocation93_spill] sm:$0xff] }
 0x470   : > { %v10024_v26 = vpop.permute.xlu1 %3242  ;;  %v10026_v33 = vpop.permute.xlu0 %3232 }
 0x471   : > { %13807 = vst [vmem:[#allocation227_spill] sm:$0xff] %v10024_v26  ;;  %13808 = vst [vmem:[#allocation228_spill] sm:$0xff] %v10026_v33 }
 0x472   : > { %3924 = vrot.lane.b32.xlu1 %v13779_v58, %s13298_s30  ;;  %3862 = vrot.lane.b32.xlu0 %v13533_v49, %s13360_s0  ;;  %v6811_v49 = vld [vmem:[%s7039_s15] sm:$0xff]  }
 0x473   : > { %v4715_v29 = vunpack.c.l.bf16 %v6811_v49  ;;  %v4716_v18 = vunpack.c.h.bf16 %v6811_v49  ;;  %v13878_v49 = vld [vmem:[#allocation208_spill] sm:$0xff] }
 0x474   : > { %v3247_v42 = vpop.permute.xlu1 %3246  ;;  %v10033_v22 = vpop.permute.xlu0 %3236 }
 0x475   : > { %v3720_v39 = vsel %vm13151_vm7, %v3687_v53, %v3247_v42  ;;  %13809 = vst [vmem:[#allocation229_spill] sm:$0xff] %v10033_v22  ;;  %v4779_v43 = vrot.slane %v4715_v29, 7 }
 0x476   : > { %3954 = vrot.lane.b32.xlu1 %v13810_v54, %s13324_s24  ;;  %3892 = vrot.lane.b32.xlu0 %v13811_v37, %s13344_s16 }
 0x478   : > { %v3251_v26 = vpop.permute.xlu1 %3250  ;;  %v10040_v23 = vpop.permute.xlu0 %3240 }
 0x479   : > { %v3724_v33 = vsel %vm13151_vm7, %v3691_v38, %v3251_v26  ;;  %13812 = vst [vmem:[#allocation61_spill] sm:$0xff] %v10040_v23 }
 0x47a   : > { %3984 = vrot.lane.b32.xlu1 %v13639_v27, %s13357_s20  ;;  %3922 = vrot.lane.b32.xlu0 %v13686_v61, %s13298_s30 }
 0x47c   : > { %v3255_v58 = vpop.permute.xlu1 %3254  ;;  %v10047_v42 = vpop.permute.xlu0 %3244 }
 0x47d   : > { %v3728_v53 = vsel %vm13151_vm7, %v3695_v50, %v3255_v58  ;;  %13813 = vst [vmem:[#allocation93_spill] sm:$0xff] %v10047_v42 }
 0x47e   : > { %3804 = vrot.lane.b32.xlu1 %v13711_v28, %s13335_s21  ;;  %3952 = vrot.lane.b32.xlu0 %v13800_v45, %s13324_s24 }
 0x480   : > { %v10053_v38 = vpop.permute.xlu1 %3258  ;;  %v3249_v26 = vpop.permute.xlu0 %3248 }
 0x481   : > { %13814 = vst [vmem:[#allocation230_spill] sm:$0xff] %v10053_v38  ;;  %v3722_v23 = vsel %vm13151_vm7, %v3689_v17, %v3249_v26  ;;  %v13818_v26 = vld [vmem:[#allocation104_spill] sm:$0xff] }
 0x482   : > { %3836 = vrot.lane.b32.xlu1 %v8980_v31, %s13333_s23  ;;  %3982 = vrot.lane.b32.xlu0 %v8964_v10, %s13357_s20  ;;  %v13845_v38 = vld [vmem:[#allocation96_spill] sm:$0xff] }
 0x484   : > { %v10060_v61 = vpop.permute.xlu1 %3262  ;;  %v3253_v50 = vpop.permute.xlu0 %3252 }
 0x485   : > { %13815 = vst [vmem:[#allocation231_spill] sm:$0xff] %v10060_v61  ;;  %v3726_v58 = vsel %vm13151_vm7, %v3693_v47, %v3253_v50  ;;  %v13823_v50 = vld [vmem:[#allocation103_spill] sm:$0xff]  ;;  %vm3729_vm7 = vcmask 490496  }
 0x486   : > { %3868 = vrot.lane.b32.xlu1 %v13766_v1, %s13360_s0  ;;  %3802 = vrot.lane.b32.xlu0 %v13810_v54, %s13335_s21 }
 0x488   : > { %v10067_v45 = vpop.permute.xlu1 %3266  ;;  %v10069_v17 = vpop.permute.xlu0 %3256 }
 0x489   : > { %13816 = vst [vmem:[#allocation232_spill] sm:$0xff] %v10067_v45  ;;  %13817 = vst [vmem:[#allocation233_spill] sm:$0xff] %v10069_v17  ;;  %v13824_v17 = vld [vmem:[#allocation116_spill] sm:$0xff] }
 0x48a   : > { %3898 = vrot.lane.b32.xlu1 %v13818_v26, %s13344_s16  ;;  %3834 = vrot.lane.b32.xlu0 %v13639_v27, %s13333_s23  ;;  %v13829_v45 = vld [vmem:[#allocation100_spill] sm:$0xff] }
 0x48c   : > { %v10075_v10 = vpop.permute.xlu1 %3270  ;;  %v10077_v61 = vpop.permute.xlu0 %3260 }
 0x48d   : > { %13819 = vst [vmem:[#allocation234_spill] sm:$0xff] %v10075_v10  ;;  %13820 = vst [vmem:[#allocation235_spill] sm:$0xff] %v10077_v61 }
 0x48e   : > { %3928 = vrot.lane.b32.xlu1 %v13781_v46, %s13298_s30  ;;  %3866 = vrot.lane.b32.xlu0 %v7935_v2, %s13360_s0  ;;  %v13870_v2 = vld [vmem:[#allocation72_spill] sm:$0xff] }
 0x490   : > { %v10083_v47 = vpop.permute.xlu1 %3274  ;;  %v10085_v54 = vpop.permute.xlu0 %3264 }
 0x491   : > { %13821 = vst [vmem:[#allocation236_spill] sm:$0xff] %v10083_v47  ;;  %13822 = vst [vmem:[#allocation237_spill] sm:$0xff] %v10085_v54 }
 0x492   : > { %3958 = vrot.lane.b32.xlu1 %v13823_v50, %s13324_s24  ;;  %3896 = vrot.lane.b32.xlu0 %v13824_v17, %s13344_s16 }
 0x494   : > { %v3279_v27 = vpop.permute.xlu1 %3278  ;;  %v10094_v10 = vpop.permute.xlu0 %3268 }
 0x495   : > { %v10092_v61 = vsel %vm3729_vm7, %v3720_v39, %v3279_v27  ;;  %13826 = vst [vmem:[#allocation116_spill] sm:$0xff] %v10094_v10 }
 0x496   : > { %13825 = vst [vmem:[#allocation103_spill] sm:$0xff] %v10092_v61  ;;  %3988 = vrot.lane.b32.xlu1 %v8940_v51, %s13357_s20  ;;  %3926 = vrot.lane.b32.xlu0 %v13689_v12, %s13298_s30  ;;  %v13832_v12 = vld [vmem:[#allocation135_spill] sm:$0xff] }
 0x498   : > { %v3283_v46 = vpop.permute.xlu1 %3282  ;;  %v10103_v47 = vpop.permute.xlu0 %3272 }
 0x499   : > { %v10101_v54 = vsel %vm3729_vm7, %v3724_v33, %v3283_v46  ;;  %13828 = vst [vmem:[#allocation239_spill] sm:$0xff] %v10103_v47 }
 0x49a   : > { %13827 = vst [vmem:[#allocation238_spill] sm:$0xff] %v10101_v54  ;;  %3808 = vrot.lane.b32.xlu1 %v13829_v45, %s13335_s21  ;;  %3956 = vrot.lane.b32.xlu0 %v13711_v28, %s13324_s24 }
 0x49c   : > { %v3287_v39 = vpop.permute.xlu1 %3286  ;;  %v10112_v61 = vpop.permute.xlu0 %3276 }
 0x49d   : > { %v10110_v27 = vsel %vm3729_vm7, %v3728_v53, %v3287_v39  ;;  %13831 = vst [vmem:[#allocation240_spill] sm:$0xff] %v10112_v61  ;;  %v13843_v61 = vld [vmem:[#allocation101_spill] sm:$0xff] }
 0x49e   : > { %13830 = vst [vmem:[#allocation100_spill] sm:$0xff] %v10110_v27  ;;  %3840 = vrot.lane.b32.xlu1 %v13832_v12, %s13333_s23  ;;  %3986 = vrot.lane.b32.xlu0 %v8980_v31, %s13357_s20  ;;  %v13835_v31 = vld [vmem:[#allocation118_spill] sm:$0xff]  ;;  %v13840_v27 = vld [vmem:[#allocation64_spill] sm:$0xff] }
 0x4a0   : > { %v10118_v33 = vpop.permute.xlu1 %3764  ;;  %v3281_v46 = vpop.permute.xlu0 %3280 }
 0x4a1   : > { %v10121_v54 = vsel %vm3729_vm7, %v3722_v23, %v3281_v46 }
 0x4a2   : > { %13833 = vst [vmem:[#allocation135_spill] sm:$0xff] %v10121_v54  ;;  %3872 = vrot.lane.b32.xlu1 %v7990_v60, %s13360_s0  ;;  %3806 = vrot.lane.b32.xlu0 %v13823_v50, %s13335_s21  ;;  %v13836_v50 = vld [vmem:[#allocation105_spill] sm:$0xff] }
 0x4a4   : > { %v10127_v28 = vpop.permute.xlu1 %3768  ;;  %v3285_v53 = vpop.permute.xlu0 %3284 }
 0x4a5   : > { %v10130_v39 = vsel %vm3729_vm7, %v3726_v58, %v3285_v53  ;;  %v13837_v53 = vld [vmem:[#allocation123_spill] sm:$0xff] }
 0x4a6   : > { %13834 = vst [vmem:[#allocation241_spill] sm:$0xff] %v10130_v39  ;;  %3902 = vrot.lane.b32.xlu1 %v13835_v31, %s13344_s16  ;;  %3838 = vrot.lane.b32.xlu0 %v8940_v51, %s13333_s23  ;;  %v13874_v31 = vld [vmem:[#allocation199_spill] sm:$0xff] }
 0x4a8   : > { %v10136_v23 = vpop.permute.xlu1 %3772  ;;  %v10138_v46 = vpop.permute.xlu0 %3762 }
 0x4aa   : > { %3932 = vrot.lane.b32.xlu1 %v13784_v34, %s13298_s30  ;;  %3870 = vrot.lane.b32.xlu0 %v13752_v36, %s13360_s0 }
 0x4ac   : > { %v10144_v60 = vpop.permute.xlu1 %3776  ;;  %v10146_v58 = vpop.permute.xlu0 %3766 }
 0x4ae   : > { %3962 = vrot.lane.b32.xlu1 %v13836_v50, %s13324_s24  ;;  %3900 = vrot.lane.b32.xlu0 %v13837_v53, %s13344_s16 }
 0x4b0   : > { %v10152_v51 = vpop.permute.xlu1 %3780  ;;  %v10154_v39 = vpop.permute.xlu0 %3770 }
 0x4b1   : > { %13838 = vst [vmem:[#allocation105_spill] sm:$0xff] %v10152_v51  ;;  %13839 = vst [vmem:[#allocation123_spill] sm:$0xff] %v10154_v39  ;;  %v6812_v51 = vld [vmem:[%s7039_s15 + $0x10] sm:$0xff]  }
 0x4b2   : > { %3992 = vrot.lane.b32.xlu1 %v13840_v27, %s13357_s20  ;;  %3930 = vrot.lane.b32.xlu0 %v13692_v19, %s13298_s30  ;;  %v4719_v26 = vunpack.c.l.bf16 %v6812_v51 }
 0x4b4   : > { %v10160_v34 = vpop.permute.xlu1 %3784  ;;  %v10162_v54 = vpop.permute.xlu0 %3774 }
 0x4b5   : > { %13841 = vst [vmem:[#allocation64_spill] sm:$0xff] %v10160_v34  ;;  %13842 = vst [vmem:[#allocation242_spill] sm:$0xff] %v10162_v54  ;;  %v4720_v54 = vunpack.c.h.bf16 %v6812_v51  ;;  %v10335_v51 = vsel %vm1101_vm2, -inf, %v4779_v43 }
 0x4b6   : > { %3812 = vrot.lane.b32.xlu1 %v13843_v61, %s13335_s21  ;;  %3960 = vrot.lane.b32.xlu0 %v13829_v45, %s13324_s24 }
 0x4b8   : > { %v10168_v47 = vpop.permute.xlu1 %3796  ;;  %v10170_v10 = vpop.permute.xlu0 %3778 }
 0x4b9   : > { %13844 = vst [vmem:[#allocation101_spill] sm:$0xff] %v10170_v10 }
 0x4ba   : > { %3844 = vrot.lane.b32.xlu1 %v13845_v38, %s13333_s23  ;;  %3990 = vrot.lane.b32.xlu0 %v13832_v12, %s13357_s20 }
 0x4bc   : > { %v10176_v19 = vpop.permute.xlu1 %3828  ;;  %v10178_v42 = vpop.permute.xlu0 %3782 }
 0x4bd   : > { %13846 = vst [vmem:[#allocation96_spill] sm:$0xff] %v10178_v42 }
 0x4be   : > { %3876 = vrot.lane.b32.xlu1 %v8026_v15, %s13360_s0  ;;  %3810 = vrot.lane.b32.xlu0 %v13836_v50, %s13335_s21 }
 0x4c0   : > { %v10184_v45 = vpop.permute.xlu1 %3860  ;;  %v10186_v22 = vpop.permute.xlu0 %3794 }
 0x4c2   : > { %3906 = vrot.lane.b32.xlu1 %v13847_v56, %s13344_s16  ;;  %3842 = vrot.lane.b32.xlu0 %v13840_v27, %s13333_s23  ;;  %v13866_v56 = vld [vmem:[#allocation148_spill] sm:$0xff] }
 0x4c4   : > { %v10192_v12 = vpop.permute.xlu1 %3890  ;;  %v10194_v24 = vpop.permute.xlu0 %3826 }
 0x4c6   : > { %3936 = vrot.lane.b32.xlu1 %v13787_v13, %s13298_s30  ;;  %3874 = vrot.lane.b32.xlu0 %v13540_v5, %s13360_s0 }
 0x4c8   : > { %v10200_v15 = vpop.permute.xlu1 %3920  ;;  %v10202_v50 = vpop.permute.xlu0 %3858 }
 0x4ca   : > { %3966 = vrot.lane.b32.xlu1 %v13848_v59, %s13324_s24  ;;  %3904 = vrot.lane.b32.xlu0 %v13849_v11, %s13344_s16  ;;  %v10315_v11 = vpop.f32.mrf.mxu1 }
 0x4cb   : > { %13876 = vst [vmem:[#allocation249_spill] sm:$0xff] %v10315_v11 }
 0x4cc   : > { %v10208_v27 = vpop.permute.xlu1 %3950  ;;  %v10210_v9 = vpop.permute.xlu0 %3888 }
 0x4cd   : > { %13850 = vst [vmem:[#allocation107_spill] sm:$0xff] %v10210_v9  ;;  %v6816_v9 = vld [vmem:[%s7039_s15 + $0x28] sm:$0xff]  }
 0x4ce   : > { %3996 = vrot.lane.b32.xlu1 %v13851_v63, %s13357_s20  ;;  %3934 = vrot.lane.b32.xlu0 %v13696_v16, %s13298_s30  ;;  %v4726_v40 = vunpack.c.h.bf16 %v6816_v9 }
 0x4d0   : > { %v10216_v5 = vpop.permute.xlu1 %3980  ;;  %v10218_v13 = vpop.permute.xlu0 %3918 }
 0x4d1   : > { %13852 = vst [vmem:[#allocation50_spill] sm:$0xff] %v10218_v13  ;;  %v6815_v13 = vld [vmem:[%s7039_s15 + $0x20] sm:$0xff]  }
 0x4d2   : > { %3816 = vrot.lane.b32.xlu1 %v13853_v55, %s13335_s21  ;;  %3964 = vrot.lane.b32.xlu0 %v13843_v61, %s13324_s24 }
 0x4d4   : > { %v10224_v62 = vpop.permute.xlu1 %3800  ;;  %v10226_v7 = vpop.permute.xlu0 %3948 }
 0x4d5   : > { %13854 = vst [vmem:[#allocation134_spill] sm:$0xff] %v10226_v7 }
 0x4d6   : > { %3848 = vrot.lane.b32.xlu1 %v13855_v4, %s13333_s23  ;;  %3994 = vrot.lane.b32.xlu0 %v13845_v38, %s13357_s20 }
 0x4d8   : > { %v10232_v16 = vpop.permute.xlu1 %3832  ;;  %v10234_v14 = vpop.permute.xlu0 %3978 }
 0x4d9   : > { %13856 = vst [vmem:[#allocation136_spill] sm:$0xff] %v10234_v14 }
 0x4da   : > { %3880 = vrot.lane.b32.xlu1 %v8034_v30, %s13360_s0  ;;  %3814 = vrot.lane.b32.xlu0 %v13848_v59, %s13335_s21 }
 0x4dc   : > { %v10240_v61 = vpop.permute.xlu1 %3864  ;;  %v10242_v52 = vpop.permute.xlu0 %3798 }
 0x4dd   : > { %13857 = vst [vmem:[#allocation243_spill] sm:$0xff] %v10242_v52 }
 0x4de   : > { %3910 = vrot.lane.b32.xlu1 %v13858_v57, %s13344_s16  ;;  %3846 = vrot.lane.b32.xlu0 %v13851_v63, %s13333_s23  ;;  %v13863_v57 = vld [vmem:[#allocation78_spill] sm:$0xff] }
 0x4e0   : > { %v10248_v38 = vpop.permute.xlu1 %3894  ;;  %v10250_v25 = vpop.permute.xlu0 %3830 }
 0x4e1   : > { %13859 = vst [vmem:[#allocation244_spill] sm:$0xff] %v10250_v25 }
 0x4e2   : > { %3940 = vrot.lane.b32.xlu1 %v13860_v8, %s13298_s30  ;;  %3878 = vrot.lane.b32.xlu0 %v13663_v32, %s13360_s0 }
 0x4e4   : > { %v10256_v30 = vpop.permute.xlu1 %3924  ;;  %v10258_v59 = vpop.permute.xlu0 %3862 }
 0x4e5   : > { %13861 = vst [vmem:[#allocation131_spill] sm:$0xff] %v10258_v59 }
 0x4e6   : > { %3970 = vrot.lane.b32.xlu1 %v13862_v41, %s13324_s24  ;;  %3908 = vrot.lane.b32.xlu0 %v13863_v57, %s13344_s16 }
 0x4e8   : > { %v10264_v63 = vpop.permute.xlu1 %3954  ;;  %v10266_v21 = vpop.permute.xlu0 %3892 }
 0x4e9   : > { %13864 = vst [vmem:[#allocation109_spill] sm:$0xff] %v10266_v21  ;;  %v6813_v21 = vld [vmem:[%s7039_s15 + $0x8] sm:$0xff]  }
 0x4ea   : > { %3786 = vrot.lane.b32.xlu1 %v13860_v8, %s13347_s22  ;;  %3938 = vrot.lane.b32.xlu0 %v13700_v44, %s13298_s30  ;;  %v13868_v8 = vld [vmem:[#allocation165_spill] sm:$0xff]  ;;  %v4718_v3 = vunpack.c.h.bf16 %v6813_v21 }
 0x4ec   : > { %v10272_v32 = vpop.permute.xlu1 %3984  ;;  %v10274_v34 = vpop.permute.xlu0 %3922 }
 0x4ed   : > { %13865 = vst [vmem:[#allocation245_spill] sm:$0xff] %v10274_v34  ;;  %v13884_v34 = vld [vmem:[#allocation114_spill] sm:$0xff] }
 0x4ee   : > { %3788 = vrot.lane.b32.xlu1 %v13866_v56, %s13347_s22  ;;  %3968 = vrot.lane.b32.xlu0 %v13853_v55, %s13324_s24 }
 0x4f0   : > { %v10280_v57 = vpop.permute.xlu1 %3804  ;;  %v10282_v42 = vpop.permute.xlu0 %3952 }
 0x4f1   : > { %13867 = vst [vmem:[#allocation148_spill] sm:$0xff] %v10282_v42 }
 0x4f2   : > { %3820 = vrot.lane.b32.xlu1 %v13868_v8, %s13335_s21  ;;  %3998 = vrot.lane.b32.xlu0 %v13855_v4, %s13357_s20 }
 0x4f4   : > { %v10288_v44 = vpop.permute.xlu1 %3836  ;;  %v10290_v36 = vpop.permute.xlu0 %3982 }
 0x4f5   : > { %13869 = vst [vmem:[#allocation165_spill] sm:$0xff] %v10290_v36  ;;  %v6907_v36 = vmov -inf  }
 0x4f6   : > { %3852 = vrot.lane.b32.xlu1 %v9389_v20, %s13333_s23  ;;  %4000 = vrot.lane.b32.xlu0 %v13870_v2, %s13357_s20  ;;  %v10344_v42 = vrot.slane %v6907_v36, 2 }
 0x4f8   : > { %v10296_v55 = vpop.permute.xlu1 %3868  ;;  %v10298_v1 = vpop.permute.xlu0 %3802  ;;  %13883 = vst [vmem:[#allocation254_spill] sm:$0xff] %v10344_v42 }
 0x4f9   : > { %13871 = vst [vmem:[#allocation72_spill] sm:$0xff] %v10298_v1  ;;  %v4785_v1 = vrot.slane %v4719_v26, 7 }
 0x4fa   : > { %3884 = vrot.lane.b32.xlu1 %v13659_v48, %s13360_s0  ;;  %3818 = vrot.lane.b32.xlu0 %v13862_v41, %s13335_s21  ;;  %v4780_v48 = vrot.slane %v4716_v18, 7 }
 0x4fc   : > { %v10304_v4 = vpop.permute.xlu1 %3898  ;;  %v10307_v0 = vpop.permute.xlu0 %3834  ;;  %v10332_v29 = vsel %vm1101_vm2, %v4779_v43, %v4780_v48  ;;  %v4891_v11 = vsel %vm1101_vm2, %v4780_v48, -inf  ;;  %v13885_v43 = vld [vmem:[#allocation139_spill] sm:$0xff]  ;;  %v4717_v48 = vunpack.c.l.bf16 %v6813_v21 }
 0x4fd   : > { %13872 = vst [vmem:[#allocation246_spill] sm:$0xff] %v10304_v4  ;;  %13873 = vst [vmem:[#allocation247_spill] sm:$0xff] %v10307_v0  ;;  %v10342_v0 = vrot.slane %v6907_v36, 1  ;;  %v4942_v36 = vrot.slane %v10332_v29, 1  ;;  %v5081_v14 = vrot.slane %v10332_v29, 2 }
 0x4fe   : > { %3914 = vrot.lane.b32.xlu1 %v13874_v31, %s13344_s16  ;;  %3850 = vrot.lane.b32.xlu0 %v13870_v2, %s13333_s23  ;;  %v6788_v2 = vld [vmem:[%s12829_s7 + $0x30] ss:$0 sps:$4 sm:$0x33]  }
 0x4ff   : > { %6692 = vmatprep.subr.msk.bf16.mxu0 %vm602_vm0, %v6788_v2  ;;  %v4442_v18 = vsel %vm602_vm0, %v6788_v2, 0  ;;  %13882 = vst [vmem:[#allocation253_spill] sm:$0xff] %v10342_v0  ;;  %v4786_v2 = vrot.slane %v4720_v54, 7 }
 0x500   : > { %v10313_v10 = vpop.permute.xlu1 %3928  ;;  %v10317_v41 = vpop.permute.xlu0 %3866  ;;  %6611 = vmatpush3.bf16.msra.mxu0 %v4442_v18  ;;  %v6789_v18 = vld [vmem:[%s12829_s7 + $0x28] sm:$0xff]  }
 0x501   : > { %13875 = vst [vmem:[#allocation248_spill] sm:$0xff] %v10313_v10  ;;  %13877 = vst [vmem:[#allocation250_spill] sm:$0xff] %v10317_v41  ;;  %6612 = vmatprep.subr.bf16.mxu0 %v6789_v18  ;;  %v10365_v21 = vsel %vm1101_vm2, %v4785_v1, %v4786_v2  ;;  %v10368_v59 = vsel %vm1101_vm2, %v4786_v2, -inf }
 0x502   : > { %3944 = vrot.lane.b32.xlu1 %v13878_v49, %s13298_s30  ;;  %3882 = vrot.lane.b32.xlu0 %v13768_v35, %s13360_s0  ;;  %v10338_v35 = vpop.f32.mrf.mxu1  ;;  %13889 = vst [vmem:[#allocation257_spill] sm:$0xff] %v10365_v21 }
 0x503   : > { %13880 = vst [vmem:[#allocation251_spill] sm:$0xff] %v10338_v35  ;;  %v4941_v35 = vrot.slane %v10335_v51, 1 }
 0x504   : > { %v10327_v31 = vpop.permute.xlu1 %3958  ;;  %v10340_v41 = vpop.permute.xlu0 %3896  ;;  %6613 = vmatpush3.bf16.msra.mxu0 %v6789_v18 }
 0x505   : > { %13879 = vst [vmem:[#allocation208_spill] sm:$0xff] %v10327_v31  ;;  %13881 = vst [vmem:[#allocation252_spill] sm:$0xff] %v10340_v41  ;;  %v4944_v41 = vrot.slane %v4891_v11, 1  ;;  %v10358_v54 = vpop.f32.mrf.mxu1 }
 0x506   : > { %3974 = vrot.lane.b32.xlu1 %v13884_v34, %s13324_s24  ;;  %3912 = vrot.lane.b32.xlu0 %v13885_v43, %s13344_s16  ;;  %13887 = vst [vmem:[#allocation255_spill] sm:$0xff] %v10358_v54  ;;  %v5186_v43 = vmax.f32 %v10342_v0, %v10344_v42  ;;  %v5080_v54 = vrot.slane %v10335_v51, 2  ;;  %v6790_v42 = vld [vmem:[%s12829_s7 + $0x20] sm:$0xff]   ;;  %v4943_v0 = vsel %vm1356_vm4, %v4941_v35, %v4942_v36 }
 0x507   : > { %v4945_v2 = vsel %vm1356_vm4, %v4942_v36, %v4944_v41  ;;  %v10388_v18 = vpop.f32.mrf.mxu1  ;;  %6614 = vmatprep.subr.bf16.mxu0 %v6790_v42 }
 0x508   : > { %v10356_v26 = vpop.permute.xlu1 %3988  ;;  %v10360_v39 = vpop.permute.xlu0 %3926  ;;  %13891 = vst [vmem:[#allocation259_spill] sm:$0xff] %v10388_v18  ;;  %v5217_v35 = vmax.f32 %v5186_v43, %v10335_v51  ;;  %v5218_v41 = vmax.f32 %v5186_v43, %v10332_v29  ;;  %v6791_v18 = vld [vmem:[%s12829_s7 + $0x18] sm:$0xff]   ;;  %6615 = vmatpush3.bf16.msra.mxu0 %v6790_v42  ;;  %v5093_v42 = vrot.slane %v10368_v59, 2 }
 0x509   : > { %13886 = vst [vmem:[#allocation114_spill] sm:$0xff] %v10356_v26  ;;  %13888 = vst [vmem:[#allocation256_spill] sm:$0xff] %v10360_v39  ;;  %v4782_v26 = vrot.slane %v4717_v48, 7  ;;  %v4783_v39 = vrot.slane %v4718_v3, 7  ;;  %v4952_v3 = vrot.slane %v10365_v21, 1  ;;  %v4954_v48 = vrot.slane %v10368_v59, 1  ;;  %6616 = vmatprep.subr.bf16.mxu0 %v6791_v18 }
 0x50a   : > { %3790 = vrot.lane.b32.xlu1 %v13878_v49, %s13347_s22  ;;  %3942 = vrot.lane.b32.xlu0 %v13866_v56, %s13298_s30  ;;  %v5083_v49 = vrot.slane %v4891_v11, 2  ;;  %v10384_v56 = vsel %vm1101_vm2, -inf, %v4785_v1  ;;  %v6814_v11 = vld [vmem:[%s7039_s15 + $0x18] sm:$0xff]   ;;  %v13893_v1 = vld [vmem:[#allocation5_spill] sm:$0xff] }
 0x50b   : > { %v4721_v36 = vunpack.c.l.bf16 %v6814_v11  ;;  %v4722_v7 = vunpack.c.h.bf16 %v6814_v11  ;;  %v10405_v43 = vsel %vm1101_vm2, %v4782_v26, %v4783_v39  ;;  %v10408_v10 = vsel %vm1101_vm2, -inf, %v4782_v26  ;;  %v10410_v11 = vpop.f32.mrf.mxu1 }
 0x50c   : > { %v10381_v31 = vpop.permute.xlu1 %3808  ;;  %v10390_v25 = vpop.permute.xlu0 %3956  ;;  %13894 = vst [vmem:[#allocation5_spill] sm:$0xff] %v10405_v43  ;;  %13895 = vst [vmem:[#allocation261_spill] sm:$0xff] %v10408_v10  ;;  %v10416_v52 = vsel %vm13242_vm3, %v5081_v14, %v5083_v49  ;;  %v10423_v26 = vsel %vm1356_vm4, %v4952_v3, %v4954_v48  ;;  %v4723_v10 = vunpack.c.l.bf16 %v6815_v13  ;;  %6617 = vmatpush3.bf16.msra.mxu0 %v6791_v18  ;;  %v13906_v18 = vrot.slane %v10365_v21, 2 }
 0x50d   : > { %13890 = vst [vmem:[#allocation258_spill] sm:$0xff] %v10381_v31  ;;  %13892 = vst [vmem:[#allocation260_spill] sm:$0xff] %v10390_v25  ;;  %v5047_v25 = vmax.f32 %v10335_v51, %v4943_v0  ;;  %v5048_v31 = vmax.f32 %v10332_v29, %v4945_v2  ;;  %v4951_v51 = vrot.slane %v10384_v56, 1  ;;  %v4724_v29 = vunpack.c.h.bf16 %v6815_v13 }
 0x50e   : > { %3792 = vrot.lane.b32.xlu1 %v13893_v1, %s13347_s22  ;;  %3972 = vrot.lane.b32.xlu0 %v13868_v8, %s13324_s24  ;;  %13896 = vst [vmem:[#allocation262_spill] sm:$0xff] %v10410_v11  ;;  %v10413_v8 = vsel %vm13242_vm3, %v5080_v54, %v5081_v14  ;;  %13899 = vst [vmem:[#allocation265_spill] sm:$0xff] %v10423_v26  ;;  %v10429_v11 = vmax.f32 %v5217_v35, %v4943_v0  ;;  %v10432_v14 = vsel %vm1101_vm2, %v4783_v39, -inf  ;;  %v10447_v39 = vpop.f32.mrf.mxu1 }
 0x50f   : > { %13897 = vst [vmem:[#allocation263_spill] sm:$0xff] %v10413_v8  ;;  %13901 = vst [vmem:[#allocation267_spill] sm:$0xff] %v10432_v14  ;;  %v4789_v49 = vrot.slane %v4722_v7, 7  ;;  %v10440_v48 = vmax.f32 %v5047_v25, %v10413_v8  ;;  %v10443_v13 = vmax.f32 %v5048_v31, %v10416_v52  ;;  %v10445_v0 = vmax.f32 %v5218_v41, %v4945_v2  ;;  %v6792_v7 = vld [vmem:[%s12829_s7 + $0x10] sm:$0xff]   ;;  %v13909_v41 = vld [vmem:[#allocation89_spill] sm:$0xff] }
 0x510   : > { %v10420_v4 = vpop.permute.xlu1 %3840  ;;  %v10427_v54 = vpop.permute.xlu0 %3986  ;;  %13900 = vst [vmem:[#allocation266_spill] sm:$0xff] %v10429_v11  ;;  %v4788_v59 = vrot.slane %v4721_v36, 7  ;;  %13905 = vst [vmem:[#allocation269_spill] sm:$0xff] %v10447_v39  ;;  %v10453_v35 = vsel %vm1356_vm4, %v4951_v51, %v4952_v3  ;;  %v4792_v25 = vrot.slane %v4724_v29, 7  ;;  %v4725_v31 = vunpack.c.l.bf16 %v6816_v9  ;;  %6618 = vmatprep.subr.bf16.mxu0 %v6792_v7  ;;  %v6817_v29 = vld [vmem:[%s7039_s15 + $0x30] sm:$0xff]  }
 0x511   : > { %13898 = vst [vmem:[#allocation264_spill] sm:$0xff] %v10420_v4  ;;  %v13902_v4 = vld [vmem:[#allocation133_spill] sm:$0xff]  ;;  %13904 = vst [vmem:[#allocation268_spill] sm:$0xff] %v10443_v13  ;;  %v10464_v36 = vsel %vm13242_vm3, %v13906_v18, %v5093_v42  ;;  %v4791_v13 = vrot.slane %v4723_v10, 7  ;;  %v10471_v9 = vsel %vm1101_vm2, %v4789_v49, -inf  ;;  %v4795_v51 = vrot.slane %v4726_v40, 7  ;;  %6619 = vmatpush3.bf16.msra.mxu0 %v6792_v7 }
 0x512   : > { %3824 = vrot.lane.b32.xlu1 %v13902_v4, %s13335_s21  ;;  %4002 = vrot.lane.b32.xlu0 %v9389_v20, %s13357_s20  ;;  %13903 = vst [vmem:[#allocation133_spill] sm:$0xff] %v10440_v48  ;;  %v5052_v20 = vmax.f32 %v10365_v21, %v10423_v26  ;;  %13907 = vst [vmem:[#allocation270_spill] sm:$0xff] %v10464_v36  ;;  %v4728_v2 = vunpack.c.h.bf16 %v6817_v29  ;;  %v13910_v26 = vld [vmem:[#allocation226_spill] sm:$0xff]  ;;  %v4727_v3 = vunpack.c.l.bf16 %v6817_v29  ;;  %v10486_v21 = vpop.f32.mrf.mxu1  ;;  %v10492_v8 = vsel %vm1101_vm2, -inf, %v4788_v59 }
 0x513   : > { %13908 = vst [vmem:[#allocation271_spill] sm:$0xff] %v10471_v9  ;;  %v6793_v10 = vld [vmem:[%s12829_s7 + $0x8] sm:$0xff]   ;;  %v10495_v11 = vsel %vm1101_vm2, %v4792_v25, -inf  ;;  %v4794_v39 = vrot.slane %v4725_v31, 7  ;;  %v10500_v18 = vsel %vm1101_vm2, %v4788_v59, %v4789_v49  ;;  %v10513_v31 = vsel %vm1101_vm2, %v4795_v51, -inf  ;;  %v6794_v59 = vld [vmem:[%s12829_s7] sm:$0xff]  }
 0x514   : > { %v10457_v43 = vpop.permute.xlu1 %3872  ;;  %v10466_v48 = vpop.permute.xlu0 %3806  ;;  %v10489_v14 = vmax.f32 %v5052_v20, %v10464_v36  ;;  %13912 = vst [vmem:[#allocation226_spill] sm:$0xff] %v10495_v11  ;;  %6620 = vmatprep.subr.bf16.mxu0 %v6793_v10  ;;  %v10505_v20 = vsel %vm1101_vm2, -inf, %v4791_v13  ;;  %13915 = vst [vmem:[#allocation274_spill] sm:$0xff] %v10513_v31  ;;  %v4798_v36 = vrot.slane %v4728_v2, 7  ;;  %v4013_v49 = vsel %vm553_vm1, %v13797_v6, %v10118_v33  ;;  %v14046_v11 = vld [vmem:[#allocation156_spill] sm:$0xff] }
 0x515   : > { %13913 = vst [vmem:[#allocation272_spill] sm:$0xff] %v10505_v20  ;;  %v4797_v2 = vrot.slane %v4727_v3, 7  ;;  %v10527_v7 = vpop.f32.mrf.mxu1  ;;  %v4059_v6 = vsel %vm1709_vm8, %v4013_v49, %v10168_v47  ;;  %6621 = vmatpush3.bf16.msra.mxu0 %v6793_v10  ;;  %v10532_v33 = vsel %vm1101_vm2, -inf, %v4794_v39  ;;  %v10540_v3 = vsel %vm1101_vm2, %v4794_v39, %v4795_v51 }
 0x516   : > { %3856 = vrot.lane.b32.xlu1 %v13909_v41, %s13333_s23  ;;  %4004 = vrot.lane.b32.xlu0 %v13910_v26, %s13357_s20  ;;  %13911 = vst [vmem:[#allocation89_spill] sm:$0xff] %v10489_v14  ;;  %v10510_v14 = vsel %vm1101_vm2, %v4791_v13, %v4792_v25  ;;  %13916 = vst [vmem:[#allocation275_spill] sm:$0xff] %v10532_v33  ;;  %v4091_v20 = vsel %vm1742_vm9, %v4059_v6, %v10176_v19  ;;  %v10544_v13 = vld [vmem:[%s7039_s15 + $0x40] sm:$0xff]   ;;  %v10555_v6 = vsel %vm1101_vm2, %v4798_v36, -inf  ;;  %v14034_v33 = vld [vmem:[#allocation143_spill] sm:$0xff] }
 0x517   : > { %13914 = vst [vmem:[#allocation273_spill] sm:$0xff] %v10510_v14  ;;  %6622 = vmatprep.subr.bf16.mxu0 %v6794_v59  ;;  %13917 = vst [vmem:[#allocation276_spill] sm:$0xff] %v10540_v3  ;;  %v4731_v47 = vunpack.c.l.bf16 %v10544_v13  ;;  %v10547_v10 = vpop.f32.mrf.mxu1  ;;  %v4123_v49 = vsel %vm1775_vm10, %v4091_v20, %v10184_v45  ;;  %v4019_v39 = vsel %vm553_vm1, %v13811_v37, %v10127_v28  ;;  %v10570_v20 = vsel %vm1101_vm2, -inf, %v4797_v2  ;;  %v14033_v3 = vld [vmem:[#allocation142_spill] sm:$0xff] }
 0x518   : > { %v10497_v42 = vpop.permute.xlu1 %3902  ;;  %v10507_v40 = vpop.permute.xlu0 %3838  ;;  %13918 = vst [vmem:[#allocation277_spill] sm:$0xff] %v10555_v6  ;;  %v4154_v51 = vsel %vm1808_vm11, %v4123_v49, %v10192_v12  ;;  %v10567_v45 = vsel %vm1101_vm2, %v4797_v2, %v4798_v36  ;;  %13920 = vst [vmem:[#allocation279_spill] sm:$0xff] %v10570_v20  ;;  %v4063_v37 = vsel %vm1709_vm8, %v4019_v39, %v10224_v62  ;;  %v4732_v49 = vunpack.c.h.bf16 %v10544_v13  ;;  %v13965_v2 = vld [vmem:[#allocation128_spill] sm:$0xff] }
 0x519   : > { %13919 = vst [vmem:[#allocation278_spill] sm:$0xff] %v10567_v45  ;;  %v4185_v19 = vsel %vm1841_vm13, %v4154_v51, %v10200_v15  ;;  %6623 = vmatpush3.bf16.msra.mxu0 %v6794_v59  ;;  %v10584_v25 = vpop.f32.mrf.mxu1  ;;  %v14028_v20 = vld [vmem:[#allocation144_spill] sm:$0xff] }
 0x51a   : > { %3946 = vrot.lane.b32.xlu1 %v13893_v1, %s13298_s30  ;;  %3822 = vrot.lane.b32.xlu0 %v13884_v34, %s13335_s21  ;;  %v6818_v34 = vld [vmem:[%s7039_s15 + $0x38] sm:$0xff]   ;;  %v6767_v31 = vunpack.i.l.bf16 %v14028_v20 }
 0x51b   : > { %v4729_v29 = vunpack.c.l.bf16 %v6818_v34  ;;  %v4730_v14 = vunpack.c.h.bf16 %v6818_v34 }
 0x51c   : > { %v10537_v9 = vpop.permute.xlu1 %3932  ;;  %v10551_v34 = vpop.permute.xlu0 %3870 }
 0x51d   : > { %v4800_v28 = vrot.slane %v4729_v29, 7  ;;  %v4801_v12 = vrot.slane %v4730_v14, 7  ;;  %v13921_v29 = vld [vmem:[#allocation51_spill] sm:$0xff] }
 0x51e   : > { %4006 = vrot.lane.b32.xlu1 %v13909_v41, %s13357_s20  ;;  %3854 = vrot.lane.b32.xlu0 %v13910_v26, %s13333_s23  ;;  %v4216_v41 = vsel %vm1874_vm12, %v4185_v19, %v10208_v27  ;;  %v4095_v26 = vsel %vm1742_vm9, %v4063_v37, %v10232_v16  ;;  %v4025_v16 = vsel %vm553_vm1, %v13824_v17, %v10136_v23  ;;  %s6908_s23 = smov 64   ;;  %v13924_v37 = vld [vmem:[#allocation67_spill] sm:$0xff]  ;;  %v13964_v27 = vld [vmem:[#allocation105_spill] sm:$0xff] }
 0x51f   : > { %v4247_v62 = vsel %vm13243_vm14, %v4216_v41, %v10216_v5  ;;  %v4127_v15 = vsel %vm1775_vm10, %v4095_v26, %v10240_v61  ;;  %v4010_v59 = vsel %vm553_vm1, %v13921_v29, %v10138_v46  ;;  %v10604_v5 = vrot.slane %v4731_v47, 7  ;;  %v13925_v26 = vld [vmem:[#allocation107_spill] sm:$0xff] }
 0x520   : > { %v10580_v36 = vpop.permute.xlu1 %3962  ;;  %v10590_v14 = vpop.permute.xlu0 %3900  ;;  %v4158_v13 = vsel %vm1808_vm11, %v4127_v15, %v10248_v38  ;;  %v4057_v61 = vsel %vm1709_vm8, %v4010_v59, %v10186_v22  ;;  %v4067_v23 = vsel %vm1709_vm8, %v4025_v16, %v10280_v57  ;;  %v10613_v46 = vsel %vm1101_vm2, %v4800_v28, %v4801_v12  ;;  %v13929_v15 = vld [vmem:[#allocation248_spill] sm:$0xff]  ;;  %v13930_v16 = vld [vmem:[#allocation258_spill] sm:$0xff] }
 0x521   : > { %v4189_v17 = vsel %vm1841_vm13, %v4158_v13, %v10256_v30  ;;  %13922 = vst [vmem:[#allocation51_spill] sm:$0xff] %v10613_v46  ;;  %v4089_v38 = vsel %vm1742_vm9, %v4057_v61, %v10194_v24  ;;  %v4099_v47 = vsel %vm1742_vm9, %v4067_v23, %v10288_v44  ;;  %v10621_v22 = vpop.f32.mrf.mxu1  ;;  %v4031_v30 = vsel %vm553_vm1, %v13837_v53, %v10144_v60  ;;  %v13926_v53 = vld [vmem:[#allocation246_spill] sm:$0xff]  ;;  %v13932_v61 = vld [vmem:[#allocation244_spill] sm:$0xff] }
 0x522   : > { %4293 = vrot.lane.b32.xlu1 %v4247_v62, %s6908_s23  ;;  %3916 = vrot.lane.b32.xlu0 %v13893_v1, %s13344_s16  ;;  %v4220_v19 = vsel %vm1874_vm12, %v4189_v17, %v10264_v63  ;;  %v4121_v57 = vsel %vm1775_vm10, %v4089_v38, %v10202_v50  ;;  %v4131_v24 = vsel %vm1775_vm10, %v4099_v47, %v10296_v55  ;;  %v10635_v44 = vsel %vm1101_vm2, -inf, %v4800_v28  ;;  %v13928_v28 = vld [vmem:[#allocation243_spill] sm:$0xff]  ;;  %v13931_v59 = vld [vmem:[#allocation134_spill] sm:$0xff]  ;;  %v13933_v23 = vld [vmem:[#allocation208_spill] sm:$0xff] }
 0x523   : > { %v4251_v51 = vsel %vm13243_vm14, %v4220_v19, %v10272_v32  ;;  %13923 = vst [vmem:[#allocation280_spill] sm:$0xff] %v10635_v44  ;;  %v4016_v41 = vsel %vm553_vm1, %v13924_v37, %v10146_v58  ;;  %v4152_v60 = vsel %vm1808_vm11, %v4121_v57, %v13925_v26  ;;  %v4162_v50 = vsel %vm1808_vm11, %v4131_v24, %v13926_v53  ;;  %v13927_v32 = vld [vmem:[#allocation50_spill] sm:$0xff]  ;;  %v13934_v38 = vld [vmem:[#allocation264_spill] sm:$0xff]  ;;  %v10665_v57 = vpop.f32.mrf.mxu1  ;;  %v13936_v24 = vld [vmem:[#allocation131_spill] sm:$0xff] }
 0x524   : > { %v3993_v39 = vpop.permute.xlu1 %3992  ;;  %v10632_v63 = vpop.permute.xlu0 %3930  ;;  %v4183_v55 = vsel %vm1841_vm13, %v4152_v60, %v13927_v32  ;;  %v4061_v62 = vsel %vm1709_vm8, %v4016_v41, %v13928_v28  ;;  %v4193_v58 = vsel %vm1841_vm13, %v4162_v50, %v13929_v15  ;;  %v4071_v29 = vsel %vm1709_vm8, %v4031_v30, %v13930_v16  ;;  %v13937_v41 = vld [vmem:[#allocation114_spill] sm:$0xff]  ;;  %v13939_v32 = vld [vmem:[#allocation123_spill] sm:$0xff]  ;;  %v14016_v46 = vld [vmem:[#allocation48_spill] sm:$0xff] }
 0x525   : > { %v4214_v13 = vsel %vm1874_vm12, %v4183_v55, %v13931_v59  ;;  %v4093_v17 = vsel %vm1742_vm9, %v4061_v62, %v13932_v61  ;;  %v4103_v19 = vsel %vm1742_vm9, %v4071_v29, %v13934_v38  ;;  %v10676_v50 = vsel %vm1101_vm2, %v4801_v12, -inf  ;;  %v13940_v55 = vld [vmem:[#allocation80_spill] sm:$0xff]  ;;  %v13941_v62 = vld [vmem:[#allocation109_spill] sm:$0xff]  ;;  %v6820_v16 = vld [vmem:[%s7039_s15 + $0x48] sm:$0xff]   ;;  %v10688_v29 = vpop.f32.mrf.mxu1 }
 0x526   : > { %4297 = vrot.lane.b32.xlu1 %v4251_v51, %s6908_s23  ;;  %3976 = vrot.lane.b32.xlu0 %v13902_v4, %s13324_s24  ;;  %v4224_v4 = vsel %vm1874_vm12, %v4193_v58, %v13933_v23  ;;  %v13935_v51 = vld [vmem:[#allocation136_spill] sm:$0xff]  ;;  %v4125_v37 = vsel %vm1775_vm10, %v4093_v17, %v13936_v24  ;;  %v4135_v60 = vsel %vm1775_vm10, %v4103_v19, %v10457_v43  ;;  %v4734_v43 = vunpack.c.h.bf16 %v6820_v16  ;;  %v13942_v12 = vld [vmem:[#allocation245_spill] sm:$0xff]  ;;  %v13945_v38 = vld [vmem:[#allocation247_spill] sm:$0xff] }
 0x527   : > { %v4245_v30 = vsel %vm13243_vm14, %v4214_v13, %v13935_v51  ;;  %v4255_v26 = vsel %vm13243_vm14, %v4224_v4, %v13937_v41  ;;  %13938 = vst [vmem:[#allocation67_spill] sm:$0xff] %v10676_v50  ;;  %v4022_v28 = vsel %vm553_vm1, %v13940_v55, %v13939_v32  ;;  %v4156_v15 = vsel %vm1808_vm11, %v4125_v37, %v13941_v62  ;;  %v13943_v13 = vld [vmem:[#allocation72_spill] sm:$0xff]  ;;  %v13946_v37 = vld [vmem:[#allocation165_spill] sm:$0xff]  ;;  %v6821_v55 = vld [vmem:[%s7039_s15 + $0x50] sm:$0xff]  }
 0x528   : > { %v10663_v47 = vpop.permute.xlu1 %3812  ;;  %v3961_v53 = vpop.permute.xlu0 %3960  ;;  %v4166_v58 = vsel %vm1808_vm11, %v4135_v60, %v10497_v42  ;;  %v4187_v59 = vsel %vm1841_vm13, %v4156_v15, %v13942_v12  ;;  %v4065_v61 = vsel %vm1709_vm8, %v4022_v28, %v13943_v13  ;;  %v4804_v23 = vrot.slane %v4732_v49, 7  ;;  %v13944_v42 = vld [vmem:[#allocation148_spill] sm:$0xff]  ;;  %v13948_v62 = vld [vmem:[#allocation242_spill] sm:$0xff] }
 0x529   : > { %v4197_v17 = vsel %vm1841_vm13, %v4166_v58, %v10537_v9  ;;  %v4218_v4 = vsel %vm1874_vm12, %v4187_v59, %v13944_v42  ;;  %v4097_v19 = vsel %vm1742_vm9, %v4065_v61, %v13945_v38  ;;  %v4733_v24 = vunpack.c.l.bf16 %v6820_v16  ;;  %v13949_v15 = vld [vmem:[#allocation104_spill] sm:$0xff] }
 0x52a   : > { %4301 = vrot.lane.b32.xlu1 %v4255_v26, %s6908_s23  ;;  %4291 = vrot.lane.b32.xlu0 %v4245_v30, %s6908_s23  ;;  %v4228_v51 = vsel %vm1874_vm12, %v4197_v17, %v10580_v36  ;;  %v4249_v41 = vsel %vm13243_vm14, %v4218_v4, %v13946_v37  ;;  %v13947_v26 = vld [vmem:[#allocation250_spill] sm:$0xff]  ;;  %v4736_v28 = vunpack.c.h.bf16 %v6821_v55  ;;  %v4028_v36 = vsel %vm553_vm1, %v13949_v15, %v13948_v62  ;;  %v13950_v58 = vld [vmem:[#allocation252_spill] sm:$0xff] }
 0x52b   : > { %v4129_v60 = vsel %vm1775_vm10, %v4097_v19, %v13947_v26  ;;  %v4259_v9 = vsel %vm13243_vm14, %v4228_v51, %v3993_v39  ;;  %v4807_v12 = vrot.slane %v4734_v43, 7  ;;  %v4735_v59 = vunpack.c.l.bf16 %v6821_v55  ;;  %v10718_v39 = vpop.f32.mrf.mxu1  ;;  %v13951_v13 = vld [vmem:[#allocation256_spill] sm:$0xff] }
 0x52c   : > { %v10702_v30 = vpop.permute.xlu1 %3844  ;;  %v3991_v49 = vpop.permute.xlu0 %3990  ;;  %v4160_v16 = vsel %vm1808_vm11, %v4129_v60, %v13950_v58  ;;  %v4069_v17 = vsel %vm1709_vm8, %v4028_v36, %v10466_v48  ;;  %v10726_v4 = vsel %vm1101_vm2, %v4804_v23, -inf  ;;  %v13953_v38 = vld [vmem:[#allocation260_spill] sm:$0xff]  ;;  %v4806_v37 = vrot.slane %v4733_v24, 7 }
 0x52d   : > { %v4191_v61 = vsel %vm1841_vm13, %v4160_v16, %v13951_v13  ;;  %13952 = vst [vmem:[#allocation107_spill] sm:$0xff] %v10726_v4  ;;  %v4101_v43 = vsel %vm1742_vm9, %v4069_v17, %v10507_v40  ;;  %v10743_v55 = vsel %vm1101_vm2, -inf, %v10604_v5  ;;  %v4810_v62 = vrot.slane %v4736_v28, 7  ;;  %v10755_v36 = vpop.f32.mrf.mxu1  ;;  %v14005_v50 = vld [vmem:[#allocation132_spill] sm:$0xff] }
 0x52e   : > { %4305 = vrot.lane.b32.xlu1 %v4259_v9, %s6908_s23  ;;  %4295 = vrot.lane.b32.xlu0 %v4249_v41, %s6908_s23  ;;  %v4222_v19 = vsel %vm1874_vm12, %v4191_v61, %v13953_v38  ;;  %v6822_v41 = vld [vmem:[%s7039_s15 + $0x58] sm:$0xff]   ;;  %v4133_v60 = vsel %vm1775_vm10, %v4101_v43, %v10551_v34  ;;  %13954 = vst [vmem:[#allocation246_spill] sm:$0xff] %v10743_v55  ;;  %v4809_v34 = vrot.slane %v4735_v59, 7  ;;  %v10767_v59 = vsel %vm1101_vm2, -inf, %v4806_v37 }
 0x52f   : > { %v4737_v26 = vunpack.c.l.bf16 %v6822_v41  ;;  %v4253_v48 = vsel %vm13243_vm14, %v4222_v19, %v10427_v54  ;;  %v4738_v40 = vunpack.c.h.bf16 %v6822_v41  ;;  %v4164_v24 = vsel %vm1808_vm11, %v4133_v60, %v10590_v14  ;;  %v6823_v14 = vld [vmem:[%s7039_s15 + $0x60] sm:$0xff]   ;;  %13958 = vst [vmem:[#allocation258_spill] sm:$0xff] %v10767_v59  ;;  %v10782_v60 = vpop.f32.mrf.mxu1  ;;  %v14001_v59 = vld [vmem:[#allocation86_spill] sm:$0xff] }
 0x530   : > { %v10732_v51 = vpop.permute.xlu1 %3876  ;;  %v10739_v9 = vpop.permute.xlu0 %3810  ;;  %v10750_v15 = vsel %vm1101_vm2, %v10604_v5, %v4804_v23  ;;  %v10753_v54 = vsel %vm1101_vm2, %v4807_v12, -inf  ;;  %v4195_v58 = vsel %vm1841_vm13, %v4164_v24, %v10632_v63  ;;  %v4740_v13 = vunpack.c.h.bf16 %v6823_v14 }
 0x531   : > { %13955 = vst [vmem:[#allocation50_spill] sm:$0xff] %v10750_v15  ;;  %13956 = vst [vmem:[#allocation243_spill] sm:$0xff] %v10753_v54  ;;  %v4226_v61 = vsel %vm1874_vm12, %v4195_v58, %v3961_v53  ;;  %v10764_v23 = vsel %vm1101_vm2, %v4806_v37, %v4807_v12  ;;  %v4812_v17 = vrot.slane %v4737_v26, 7  ;;  %v10774_v43 = vsel %vm1101_vm2, %v4810_v62, -inf  ;;  %v6824_v26 = vld [vmem:[%s7039_s15 + $0x68] sm:$0xff]   ;;  %v10793_v32 = vpop.f32.mrf.mxu1  ;;  %v14003_v15 = vld [vmem:[#allocation92_spill] sm:$0xff] }
 0x532   : > { %4299 = vrot.lane.b32.xlu0 %v4253_v48, %s6908_s23  ;;  %13957 = vst [vmem:[#allocation248_spill] sm:$0xff] %v10764_v23  ;;  %v4257_v63 = vsel %vm13243_vm14, %v4226_v61, %v3991_v49  ;;  %13959 = vst [vmem:[#allocation134_spill] sm:$0xff] %v10774_v43  ;;  %v4813_v53 = vrot.slane %v4738_v40, 7  ;;  %v4739_v41 = vunpack.c.l.bf16 %v6823_v14  ;;  %v10779_v37 = vsel %vm1101_vm2, -inf, %v4809_v34  ;;  %v6825_v61 = vld [vmem:[%s7039_s15 + $0x70] sm:$0xff]   ;;  %v6826_v40 = vld [vmem:[%s7039_s15 + $0x78] sm:$0xff]  }
 0x533   : > { %13960 = vst [vmem:[#allocation244_spill] sm:$0xff] %v10779_v37  ;;  %v4741_v48 = vunpack.c.l.bf16 %v6824_v26  ;;  %v4742_v49 = vunpack.c.h.bf16 %v6824_v26  ;;  %v10785_v24 = vsel %vm1101_vm2, %v4809_v34, %v4810_v62  ;;  %v4816_v58 = vrot.slane %v4740_v13, 7  ;;  %v13989_v23 = vld [vmem:[#allocation251_spill] sm:$0xff] }
 0x534   : > { %v3907_v5 = vpop.permute.xlu1 %3906  ;;  %v10770_v38 = vpop.permute.xlu0 %3842  ;;  %13961 = vst [vmem:[#allocation208_spill] sm:$0xff] %v10785_v24  ;;  %v4744_v19 = vunpack.c.h.bf16 %v6825_v61  ;;  %v4745_v14 = vunpack.c.l.bf16 %v6826_v40  ;;  %v10791_v12 = vsel %vm1101_vm2, -inf, %v4812_v17  ;;  %v4743_v28 = vunpack.c.l.bf16 %v6825_v61 }
 0x535   : > { %13962 = vst [vmem:[#allocation264_spill] sm:$0xff] %v10791_v12  ;;  %v4746_v42 = vunpack.c.h.bf16 %v6826_v40  ;;  %v10799_v34 = vsel %vm1101_vm2, %v4813_v53, -inf  ;;  %v4815_v13 = vrot.slane %v4739_v41, 7  ;;  %v4037_v24 = vsel %vm553_vm1, %v13965_v2, %v13964_v27 }
 0x536   : > { %4303 = vrot.lane.b32.xlu0 %v4257_v63, %s6908_s23  ;;  %13963 = vst [vmem:[#allocation136_spill] sm:$0xff] %v10799_v34  ;;  %v10805_v63 = vsel %vm1101_vm2, %v4812_v17, %v4813_v53  ;;  %v4818_v12 = vrot.slane %v4741_v48, 7  ;;  %v4819_v61 = vrot.slane %v4742_v49, 7  ;;  %v4075_v40 = vsel %vm1709_vm8, %v4037_v24, %v10663_v47  ;;  %v10815_v17 = vpop.f32.mrf.mxu1  ;;  %v13980_v47 = vld [vmem:[#allocation101_spill] sm:$0xff]  ;;  %v13999_v34 = vld [vmem:[#allocation79_spill] sm:$0xff] }
 0x537   : > { %13966 = vst [vmem:[#allocation131_spill] sm:$0xff] %v10805_v63  ;;  %v10810_v37 = vsel %vm1101_vm2, %v4816_v58, -inf  ;;  %v4822_v62 = vrot.slane %v4744_v19, 7  ;;  %v4824_v43 = vrot.slane %v4745_v14, 7  ;;  %v4107_v41 = vsel %vm1742_vm9, %v4075_v40, %v10702_v30 }
 0x538   : > { %v3937_v16 = vpop.permute.xlu1 %3936  ;;  %v10795_v26 = vpop.permute.xlu0 %3874  ;;  %13967 = vst [vmem:[#allocation114_spill] sm:$0xff] %v10810_v37  ;;  %v4821_v2 = vrot.slane %v4743_v28, 7  ;;  %v4825_v27 = vrot.slane %v4746_v42, 7  ;;  %v4139_v53 = vsel %vm1775_vm10, %v4107_v41, %v10732_v51  ;;  %v10821_v49 = vsel %vm1101_vm2, %v4815_v13, %v4816_v58 }
 0x539   : > { %13968 = vst [vmem:[#allocation123_spill] sm:$0xff] %v10821_v49  ;;  %v10824_v19 = vsel %vm1101_vm2, -inf, %v4815_v13  ;;  %v4170_v30 = vsel %vm1808_vm11, %v4139_v53, %v3907_v5  ;;  %v10830_v28 = vsel %vm1101_vm2, %v4819_v61, -inf  ;;  %v10834_v14 = vsel %vm1101_vm2, %v4818_v12, %v4819_v61  ;;  %v10852_v61 = vpop.f32.mrf.mxu1 }
 0x53a   : > { %13969 = vst [vmem:[#allocation80_spill] sm:$0xff] %v10824_v19  ;;  %13970 = vst [vmem:[#allocation109_spill] sm:$0xff] %v10830_v28  ;;  %v4201_v51 = vsel %vm1841_vm13, %v4170_v30, %v3937_v16  ;;  %v10837_v58 = vsel %vm1101_vm2, %v4822_v62, -inf  ;;  %v10840_v13 = vsel %vm1101_vm2, -inf, %v4824_v43  ;;  %v10844_v41 = vsel %vm1101_vm2, -inf, %v4818_v12  ;;  %v13978_v12 = vld [vmem:[#allocation108_spill] sm:$0xff] }
 0x53b   : > { %13971 = vst [vmem:[#allocation245_spill] sm:$0xff] %v10834_v14  ;;  %13972 = vst [vmem:[#allocation72_spill] sm:$0xff] %v10837_v58  ;;  %v10847_v53 = vsel %vm1101_vm2, %v4821_v2, %v4822_v62  ;;  %v10850_v16 = vsel %vm1101_vm2, %v4825_v27, -inf  ;;  %v13985_v28 = vld [vmem:[#allocation98_spill] sm:$0xff]  ;;  %v13998_v19 = vld [vmem:[#allocation127_spill] sm:$0xff] }
 0x53c   : > { %v3967_v54 = vpop.permute.xlu1 %3966  ;;  %v3905_v48 = vpop.permute.xlu0 %3904  ;;  %13973 = vst [vmem:[#allocation148_spill] sm:$0xff] %v10840_v13  ;;  %13974 = vst [vmem:[#allocation247_spill] sm:$0xff] %v10844_v41  ;;  %v13984_v13 = vld [vmem:[#allocation39_spill] sm:$0xff]  ;;  %v3297_v63 = vsel %vm553_vm1, %v13999_v34, %v13998_v19 }
 0x53d   : > { %v4232_v5 = vsel %vm1874_vm12, %v4201_v51, %v3967_v54  ;;  %13975 = vst [vmem:[#allocation165_spill] sm:$0xff] %v10847_v53  ;;  %13976 = vst [vmem:[#allocation250_spill] sm:$0xff] %v10850_v16  ;;  %v10858_v54 = vsel %vm1101_vm2, -inf, %v4821_v2  ;;  %v13979_v51 = vld [vmem:[#allocation41_spill] sm:$0xff]  ;;  %v13981_v2 = vld [vmem:[#allocation118_spill] sm:$0xff] }
 0x53e   : > { %13977 = vst [vmem:[#allocation242_spill] sm:$0xff] %v10858_v54  ;;  %v3291_v62 = vsel %vm553_vm1, %v13979_v51, %v13978_v12  ;;  %v4034_v24 = vsel %vm553_vm1, %v13981_v2, %v13980_v47  ;;  %v10876_v54 = vsel %vm1101_vm2, %v4824_v43, %v4825_v27  ;;  %v13983_v53 = vld [vmem:[#allocation38_spill] sm:$0xff]  ;;  %v10890_v47 = vpop.f32.mrf.mxu1  ;;  %v13986_v2 = vld [vmem:[#allocation115_spill] sm:$0xff]  ;;  %v13991_v16 = vld [vmem:[#allocation56_spill] sm:$0xff] }
 0x53f   : > { %13982 = vst [vmem:[#allocation104_spill] sm:$0xff] %v10876_v54  ;;  %v4073_v51 = vsel %vm1709_vm8, %v4034_v24, %v10739_v9  ;;  %v10888_v14 = vsel %vm1709_vm8, %v3291_v62, %v13985_v28  ;;  %v13987_v12 = vld [vmem:[#allocation43_spill] sm:$0xff]  ;;  %v13988_v24 = vld [vmem:[#allocation249_spill] sm:$0xff]  ;;  %v13990_v62 = vld [vmem:[#allocation70_spill] sm:$0xff] }
 0x540   : > { %v3997_v40 = vpop.permute.xlu1 %3996  ;;  %v3935_v42 = vpop.permute.xlu0 %3934  ;;  %v4105_v43 = vsel %vm1742_vm9, %v4073_v51, %v10770_v38  ;;  %v3289_v9 = vsel %vm553_vm1, %v13987_v12, %v13986_v2  ;;  %v3295_v54 = vsel %vm553_vm1, %v13991_v16, %v13990_v62  ;;  %v10909_v38 = vld [vmem:[%s12828_s6] ss:$0 sm:$0xff]  ;;  %v13992_v12 = vld [vmem:[#allocation255_spill] sm:$0xff]  ;;  %v13996_v16 = vld [vmem:[#allocation124_spill] sm:$0xff] }
 0x541   : > { %v4263_v30 = vsel %vm13243_vm14, %v4232_v5, %v3997_v40  ;;  %v10870_v40 = vld [vmem:[%s12827_s5] ss:$0 sm:$0xff]  ;;  %v4137_v28 = vsel %vm1775_vm10, %v4105_v43, %v10795_v26  ;;  %v13993_v2 = vld [vmem:[#allocation259_spill] sm:$0xff]  ;;  %v10915_v41 = vpop.f32.mrf.mxu1  ;;  %v13995_v43 = vld [vmem:[#allocation66_spill] sm:$0xff] }
 0x542   : > { %4309 = vrot.lane.b32.xlu1 %v4263_v30, %s6908_s23  ;;  %v2166_v30 = vmul.f32 %v13988_v24, %v10870_v40  ;;  %v2164_v58 = vmul.f32 %v10870_v40, %v13989_v23  ;;  %v2167_v51 = vmul.f32 %v13992_v12, %v10870_v40  ;;  %v2165_v24 = vmul.f32 %v10870_v40, %v13993_v2  ;;  %v13994_v26 = vld [vmem:[#allocation121_spill] sm:$0xff]  ;;  %v13997_v62 = vld [vmem:[#allocation71_spill] sm:$0xff]  ;;  %v14000_v2 = vld [vmem:[#allocation82_spill] sm:$0xff] }
 0x543   : > { %v4168_v23 = vsel %vm1808_vm11, %v4137_v28, %v3905_v48  ;;  %v3293_v37 = vsel %vm553_vm1, %v13995_v43, %v13994_v26  ;;  %v3299_v49 = vsel %vm553_vm1, %v13997_v62, %v13996_v16  ;;  %v3303_v48 = vsel %vm553_vm1, %v14001_v59, %v14000_v2  ;;  %v14002_v28 = vld [vmem:[#allocation81_spill] sm:$0xff]  ;;  %v14004_v43 = vld [vmem:[#allocation262_spill] sm:$0xff]  ;;  %v14006_v34 = vld [vmem:[#allocation95_spill] sm:$0xff] }
 0x544   : > { %v10882_v5 = vpop.permute.xlu1 %3816  ;;  %v3965_v27 = vpop.permute.xlu0 %3964  ;;  %v4199_v12 = vsel %vm1841_vm13, %v4168_v23, %v3935_v42  ;;  %v3301_v26 = vsel %vm553_vm1, %v14003_v15, %v14002_v28  ;;  %v2170_v55 = vmul.f32 %v14004_v43, %v10870_v40  ;;  %v3305_v19 = vsel %vm553_vm1, %v14006_v34, %v14005_v50  ;;  %v14012_v43 = vld [vmem:[#allocation68_spill] sm:$0xff] }
 0x545   : > { %v4230_v16 = vsel %vm1874_vm12, %v4199_v12, %v3965_v27  ;;  %v10943_v42 = vadd.f32 %v10909_v38, %v2166_v30  ;;  %v10946_v23 = vadd.f32 %v10909_v38, %v2164_v58  ;;  %v10950_v15 = vadd.f32 %v10909_v38, %v2167_v51  ;;  %v14010_v27 = vld [vmem:[#allocation269_spill] sm:$0xff]  ;;  %v10959_v28 = vpop.f32.mrf.mxu1  ;;  %v14011_v58 = vld [vmem:[#allocation102_spill] sm:$0xff] }
 0x546   : > { %v10953_v2 = vadd.f32 %v10909_v38, %v2165_v24  ;;  %v2168_v12 = vmul.f32 %v10870_v40, %v14010_v27  ;;  %v2171_v50 = vmul.f32 %v10486_v21, %v10870_v40  ;;  %v3317_v30 = vsel %vm1709_vm8, %v3289_v9, %v14011_v58  ;;  %v14015_v27 = vld [vmem:[#allocation74_spill] sm:$0xff]  ;;  %v14017_v58 = vld [vmem:[#allocation65_spill] sm:$0xff] }
 0x547   : > { %14007 = vst [vmem:[#allocation252_spill] sm:$0xff] %v10943_v42  ;;  %14008 = vst [vmem:[#allocation256_spill] sm:$0xff] %v10946_v23  ;;  %v3321_v51 = vsel %vm1709_vm8, %v3293_v37, %v14012_v43  ;;  %v2169_v24 = vmul.f32 %v10870_v40, %v10527_v7  ;;  %v10973_v21 = vadd.f32 %v10909_v38, %v2170_v55  ;;  %v14019_v55 = vld [vmem:[#allocation129_spill] sm:$0xff] }
 0x548   : > { %v10928_v4 = vpop.permute.xlu1 %3848  ;;  %v3995_v62 = vpop.permute.xlu0 %3994  ;;  %14009 = vst [vmem:[#allocation260_spill] sm:$0xff] %v10950_v15  ;;  %v3327_v9 = vsel %vm1709_vm8, %v3299_v49, %v14016_v46  ;;  %v3331_v37 = vsel %vm1709_vm8, %v3303_v48, %v14017_v58  ;;  %v3333_v6 = vsel %vm1709_vm8, %v3305_v19, %v14019_v55  ;;  %v10992_v46 = vadd.f32 %v10909_v38, %v2168_v12  ;;  %v14022_v58 = vld [vmem:[#allocation63_spill] sm:$0xff]  ;;  %v14063_v23 = vld [vmem:[#allocation125_spill] sm:$0xff] }
 0x549   : > { %v4261_v59 = vsel %vm13243_vm14, %v4230_v16, %v3995_v62  ;;  %v14013_v16 = vld [vmem:[#allocation112_spill] sm:$0xff]  ;;  %14014 = vst [vmem:[#allocation105_spill] sm:$0xff] %v10973_v21  ;;  %v10995_v49 = vadd.f32 %v10909_v38, %v2171_v50  ;;  %v10997_v48 = vpop.f32.mrf.mxu1  ;;  %v3347_v7 = vsel %vm1742_vm9, %v3317_v30, %v14022_v58  ;;  %v11006_v55 = vadd.f32 %v10909_v38, %v2169_v24  ;;  %v14030_v24 = vld [vmem:[#allocation138_spill] sm:$0xff] }
 0x54a   : > { %4307 = vrot.lane.b32.xlu0 %v4261_v59, %s6908_s23  ;;  %v3323_v62 = vsel %vm1709_vm8, %v3295_v54, %v14013_v16  ;;  %v3325_v59 = vsel %vm1709_vm8, %v3297_v63, %v14015_v27  ;;  %v14018_v16 = vld [vmem:[#allocation62_spill] sm:$0xff]  ;;  %14020 = vst [vmem:[#allocation128_spill] sm:$0xff] %v10992_v46  ;;  %v14023_v54 = vld [vmem:[#allocation84_spill] sm:$0xff]  ;;  %v14027_v27 = vld [vmem:[#allocation117_spill] sm:$0xff]  ;;  %v2174_v30 = vmul.f32 %v10547_v10, %v10870_v40 }
 0x54b   : > { %v3329_v44 = vsel %vm1709_vm8, %v3301_v26, %v14018_v16  ;;  %14021 = vst [vmem:[#allocation108_spill] sm:$0xff] %v10995_v49  ;;  %v3351_v26 = vsel %vm1742_vm9, %v3321_v51, %v14023_v54  ;;  %v14024_v16 = vld [vmem:[#allocation47_spill] sm:$0xff]  ;;  %14025 = vst [vmem:[#allocation41_spill] sm:$0xff] %v11006_v55  ;;  %v14026_v50 = vld [vmem:[#allocation40_spill] sm:$0xff]  ;;  %v3349_v58 = vsel %vm1742_vm9, %v10888_v14, %v14030_v24 }
 0x54c   : > { %v10970_v34 = vpop.permute.xlu1 %3880  ;;  %v10981_v43 = vpop.permute.xlu0 %3814  ;;  %v3355_v19 = vsel %vm1742_vm9, %v3325_v59, %v14024_v16  ;;  %v3345_v45 = vsel %vm1742_vm9, %v14027_v27, %v14026_v50  ;;  %v14029_v54 = vld [vmem:[#allocation69_spill] sm:$0xff]  ;;  %v2172_v16 = vmul.f32 %v10870_v40, %v10584_v25  ;;  %v2175_v27 = vmul.f32 %v10621_v22, %v10870_v40  ;;  %v14031_v10 = vld [vmem:[#allocation140_spill] sm:$0xff] }
 0x54d   : > { %v3359_v59 = vsel %vm1742_vm9, %v3329_v44, %v14029_v54  ;;  %v3363_v21 = vsel %vm1742_vm9, %v3333_v6, %v14031_v10  ;;  %v2173_v44 = vmul.f32 %v10870_v40, %v10665_v57  ;;  %v11034_v54 = vpop.f32.mrf.mxu1  ;;  %v14032_v24 = vld [vmem:[#allocation141_spill] sm:$0xff]  ;;  %v3357_v22 = vsel %vm1742_vm9, %v3327_v9, %v14033_v3  ;;  %v14035_v10 = vld [vmem:[#allocation146_spill] sm:$0xff] }
 0x54e   : > { %v3353_v25 = vsel %vm1742_vm9, %v3323_v62, %v14032_v24  ;;  %v3361_v50 = vsel %vm1742_vm9, %v3331_v37, %v14034_v33  ;;  %v5439_v6 = vld [vmem:[%s12832_s10] sm:$0x3]  ;;  %v3379_v14 = vsel %vm1775_vm10, %v3349_v58, %v14035_v10  ;;  %v11052_v49 = vadd.f32 %v10909_v38, %v2174_v30  ;;  %v14038_v24 = vld [vmem:[#allocation151_spill] sm:$0xff]  ;;  %v14041_v58 = vld [vmem:[#allocation152_spill] sm:$0xff] }
 0x54f   : > { %v3375_v62 = vsel %vm1775_vm10, %v3345_v45, %v6767_v31  ;;  %v11055_v3 = vpop.f32.mrf.mxu1  ;;  %6693 = vmatprep.subr.msk.bf16.mxu1 %vm602_vm0, %v5439_v6  ;;  %v14037_v33 = vld [vmem:[#allocation149_spill] sm:$0xff]  ;;  %v3387_v57 = vsel %vm1775_vm10, %v3357_v22, %v14038_v24  ;;  %v11065_v46 = vadd.f32 %v10909_v38, %v2172_v16  ;;  %v11068_v30 = vadd.f32 %v10909_v38, %v2175_v27  ;;  %v14043_v10 = vld [vmem:[#allocation167_spill] sm:$0xff] }
 0x550   : > { %v11008_v63 = vpop.permute.xlu1 %3910  ;;  %v11017_v51 = vpop.permute.xlu0 %3846  ;;  %14036 = vst [vmem:[#allocation101_spill] sm:$0xff] %v11052_v49  ;;  %v3383_v37 = vsel %vm1775_vm10, %v3353_v25, %v14037_v33  ;;  %v3377_v31 = vsel %vm1775_vm10, %v3347_v7, %v14041_v58  ;;  %v11073_v45 = vadd.f32 %v10909_v38, %v2173_v44  ;;  %v3405_v55 = vsel %vm1808_vm11, %v3375_v62, %v14043_v10  ;;  %v14044_v33 = vld [vmem:[#allocation153_spill] sm:$0xff]  ;;  %v14045_v44 = vld [vmem:[#allocation154_spill] sm:$0xff] }
 0x551   : > { %14039 = vst [vmem:[#allocation118_spill] sm:$0xff] %v11065_v46  ;;  %14040 = vst [vmem:[#allocation38_spill] sm:$0xff] %v11068_v30  ;;  %v2178_v25 = vmul.f32 %v10688_v29, %v10870_v40  ;;  %v3391_v22 = vsel %vm1775_vm10, %v3361_v50, %v14044_v33  ;;  %v2176_v16 = vmul.f32 %v10870_v40, %v10718_v39  ;;  %v5489_v7 = vsel %vm602_vm0, %v5439_v6, 0  ;;  %v11095_v33 = vpop.f32.mrf.mxu1  ;;  %v14047_v6 = vld [vmem:[#allocation158_spill] sm:$0xff]  ;;  %v14050_v10 = vld [vmem:[#allocation161_spill] sm:$0xff] }
 0x552   : > { %14042 = vst [vmem:[#allocation39_spill] sm:$0xff] %v11073_v45  ;;  %v2179_v27 = vmul.f32 %v10755_v36, %v10870_v40  ;;  %v3381_v58 = vsel %vm1775_vm10, %v3351_v26, %v14045_v44  ;;  %v3385_v29 = vsel %vm1775_vm10, %v3355_v19, %v14046_v11  ;;  %v2177_v50 = vmul.f32 %v10870_v40, %v10782_v60  ;;  %v14049_v19 = vld [vmem:[#allocation160_spill] sm:$0xff]  ;;  %v14051_v36 = vld [vmem:[#allocation163_spill] sm:$0xff]  ;;  %v14052_v30 = vld [vmem:[#allocation166_spill] sm:$0xff] }
 0x553   : > { %6657 = vmatpush3.bf16.msra.mxu1 %v5489_v7  ;;  %v3389_v15 = vsel %vm1775_vm10, %v3359_v59, %v14047_v6  ;;  %v14048_v26 = vunpack.i.h.bf16 %v13983_v53  ;;  %v3393_v60 = vsel %vm1775_vm10, %v3363_v21, %v14049_v19  ;;  %v3407_v49 = vsel %vm1808_vm11, %v3375_v62, %v14050_v10  ;;  %v14053_v21 = vld [vmem:[#allocation168_spill] sm:$0xff]  ;;  %v14054_v10 = vld [vmem:[#allocation169_spill] sm:$0xff]  ;;  %v14057_v19 = vld [vmem:[#allocation171_spill] sm:$0xff] }
 0x554   : > { %v11043_v12 = vpop.permute.xlu1 %3940  ;;  %v11057_v9 = vpop.permute.xlu0 %3878  ;;  %v11110_v7 = vadd.f32 %v10909_v38, %v2178_v25  ;;  %v3411_v42 = vsel %vm1808_vm11, %v3379_v14, %v14051_v36  ;;  %v3415_v59 = vsel %vm1808_vm11, %v3383_v37, %v14052_v30  ;;  %v11117_v53 = vadd.f32 %v10909_v38, %v2176_v16  ;;  %v14060_v11 = vld [vmem:[#allocation174_spill] sm:$0xff]  ;;  %v14062_v45 = vld [vmem:[#allocation96_spill] sm:$0xff] }
 0x555   : > { %v3437_v44 = vsel %vm1841_vm13, %v3405_v55, %v14048_v26  ;;  %v11120_v55 = vadd.f32 %v10909_v38, %v2179_v27  ;;  %v3419_v62 = vsel %vm1808_vm11, %v3387_v57, %v14053_v21  ;;  %v3409_v25 = vsel %vm1808_vm11, %v3377_v31, %v14054_v10  ;;  %v11136_v30 = vpop.f32.mrf.mxu1  ;;  %v14056_v27 = vld [vmem:[#allocation170_spill] sm:$0xff]  ;;  %v14058_v21 = vld [vmem:[#allocation172_spill] sm:$0xff]  ;;  %v14059_v10 = vld [vmem:[#allocation173_spill] sm:$0xff] }
 0x556   : > { %v11129_v26 = vadd.f32 %v10909_v38, %v2177_v50  ;;  %v14055_v14 = vunpack.i.h.bf16 %v13984_v13  ;;  %v3423_v36 = vsel %vm1808_vm11, %v3391_v22, %v14056_v27  ;;  %v3413_v57 = vsel %vm1808_vm11, %v3381_v58, %v14057_v19  ;;  %v14069_v27 = vld [vmem:[#allocation78_spill] sm:$0xff] }
 0x557   : > { %v3417_v31 = vsel %vm1808_vm11, %v3385_v29, %v14058_v21  ;;  %v3421_v50 = vsel %vm1808_vm11, %v3389_v15, %v14059_v10  ;;  %v4040_v22 = vsel %vm553_vm1, %v14063_v23, %v14062_v45  ;;  %v14064_v29 = vld [vmem:[#allocation176_spill] sm:$0xff]  ;;  %v2182_v23 = vmul.f32 %v10793_v32, %v10870_v40  ;;  %v11167_v45 = vpop.f32.mrf.mxu1  ;;  %v14071_v58 = vld [vmem:[#allocation182_spill] sm:$0xff] }
 0x558   : > { %v11085_v24 = vpop.permute.xlu1 %3970  ;;  %v3909_v39 = vpop.permute.xlu0 %3908  ;;  %v11134_v37 = vsel %vm1874_vm12, %v3437_v44, %v14055_v14  ;;  %v3425_v44 = vsel %vm1808_vm11, %v3393_v60, %v14060_v11  ;;  %v14061_v14 = vld [vmem:[#allocation44_spill] sm:$0xff]  ;;  %v3445_v19 = vsel %vm1841_vm13, %v3413_v57, %v14064_v29  ;;  %v4077_v15 = vsel %vm1709_vm8, %v4040_v22, %v10981_v43  ;;  %v14065_v60 = vld [vmem:[#allocation178_spill] sm:$0xff]  ;;  %v14066_v57 = vld [vmem:[#allocation179_spill] sm:$0xff] }
 0x559   : > { %v3441_v46 = vsel %vm1841_vm13, %v3409_v25, %v14061_v14  ;;  %v3449_v25 = vsel %vm1841_vm13, %v3417_v31, %v14065_v60  ;;  %v4109_v10 = vsel %vm1742_vm9, %v4077_v15, %v11017_v51  ;;  %v3439_v29 = vsel %vm1841_vm13, %v3407_v49, %v14066_v57  ;;  %v14067_v60 = vld [vmem:[#allocation180_spill] sm:$0xff]  ;;  %v11183_v51 = vpop.f32.mrf.mxu1  ;;  %v14070_v57 = vld [vmem:[#allocation181_spill] sm:$0xff] }
 0x55a   : > { %v2180_v43 = vmul.f32 %v10870_v40, %v10815_v17  ;;  %v2183_v22 = vmul.f32 %v10852_v61, %v10870_v40  ;;  %v4141_v31 = vsel %vm1775_vm10, %v4109_v10, %v11057_v9  ;;  %v3453_v32 = vsel %vm1841_vm13, %v3421_v50, %v14067_v60  ;;  %v14068_v15 = vld [vmem:[#allocation64_spill] sm:$0xff]  ;;  %v14072_v60 = vld [vmem:[#allocation183_spill] sm:$0xff] }
 0x55b   : > { %v2181_v13 = vmul.f32 %v10870_v40, %v10890_v47  ;;  %v4043_v49 = vsel %vm553_vm1, %v14069_v27, %v14068_v15  ;;  %v4172_v17 = vsel %vm1808_vm11, %v4141_v31, %v3909_v39  ;;  %v3443_v61 = vsel %vm1841_vm13, %v3411_v42, %v14070_v57  ;;  %v14074_v15 = vld [vmem:[#allocation187_spill] sm:$0xff] }
 0x55c   : > { %v11122_v6 = vpop.permute.xlu1 %3786  ;;  %v3939_v16 = vpop.permute.xlu0 %3938  ;;  %v3457_v9 = vsel %vm1841_vm13, %v3425_v44, %v14071_v58  ;;  %v4079_v50 = vsel %vm1709_vm8, %v4043_v49, %v10882_v5  ;;  %v3447_v11 = vsel %vm1841_vm13, %v3415_v59, %v14072_v60  ;;  %v11201_v27 = vadd.f32 %v10909_v38, %v2182_v23  ;;  %v14073_v58 = vld [vmem:[#allocation185_spill] sm:$0xff] }
 0x55d   : > { %v4203_v10 = vsel %vm1841_vm13, %v4172_v17, %v3939_v16  ;;  %v4111_v39 = vsel %vm1742_vm9, %v4079_v50, %v10928_v4  ;;  %v11207_v44 = vadd.f32 %v10909_v38, %v2180_v43  ;;  %v11210_v5 = vadd.f32 %v10909_v38, %v2183_v22  ;;  %v2142_v49 = vpop.f32.mrf.mxu1  ;;  %v14075_v22 = vld [vmem:[#allocation188_spill] sm:$0xff]  ;;  %v14076_v17 = vld [vmem:[#allocation189_spill] sm:$0xff] }
 0x55e   : > { %v4143_v16 = vsel %vm1775_vm10, %v4111_v39, %v10970_v34  ;;  %v3451_v23 = vsel %vm1841_vm13, %v3419_v62, %v14073_v58  ;;  %v3455_v4 = vsel %vm1841_vm13, %v3423_v36, %v14074_v15  ;;  %v3471_v34 = vsel %vm1874_vm12, %v3439_v29, %v14075_v22  ;;  %v14080_v15 = vld [vmem:[#allocation77_spill] sm:$0xff] }
 0x55f   : > { %v4174_v43 = vsel %vm1808_vm11, %v4143_v16, %v11008_v63  ;;  %v3475_v57 = vsel %vm1874_vm12, %v3443_v61, %v14076_v17  ;;  %v2186_v62 = vmul.f32 %v10915_v41, %v10870_v40  ;;  %v2184_v60 = vmul.f32 %v10870_v40, %v10959_v28  ;;  %v14078_v16 = vld [vmem:[#allocation111_spill] sm:$0xff]  ;;  %v6609_v58 = vpop.f32.mrf.mxu1  ;;  %v14082_v17 = vld [vmem:[#allocation193_spill] sm:$0xff]  ;;  %v14104_v41 = vld [vmem:[#allocation126_spill] sm:$0xff] }
 0x560   : > { %v11160_v21 = vpop.permute.xlu1 %3788  ;;  %v3969_v14 = vpop.permute.xlu0 %3968  ;;  %v4205_v36 = vsel %vm1841_vm13, %v4174_v43, %v11043_v12  ;;  %v2187_v12 = vmul.f32 %v10997_v48, %v10870_v40  ;;  %v3487_v43 = vsel %vm1874_vm12, %v3455_v4, %v14080_v15  ;;  %v14081_v48 = vld [vmem:[#allocation192_spill] sm:$0xff]  ;;  %vm14135_vm0 = vcmask 392192  }
 0x561   : > { %v4234_v42 = vsel %vm1874_vm12, %v4203_v10, %v3969_v14  ;;  %v11220_v14 = vadd.f32 %v10909_v38, %v2181_v13  ;;  %v14077_v10 = vld [vmem:[#allocation190_spill] sm:$0xff]  ;;  %v4236_v29 = vsel %vm1874_vm12, %v4205_v36, %v11085_v24  ;;  %v2185_v24 = vmul.f32 %v10870_v40, %v11034_v54  ;;  %vm14137_vm2 = vmmov %vm14135_vm0 }
 0x562   : > { %v3479_v63 = vsel %vm1874_vm12, %v3447_v11, %v14077_v10  ;;  %v3483_v11 = vsel %vm1874_vm12, %v3451_v23, %v14078_v16  ;;  %v3477_v22 = vsel %vm1874_vm12, %v3445_v19, %v14081_v48  ;;  %v3481_v36 = vsel %vm1874_vm12, %v3449_v25, %v14082_v17  ;;  %v14086_v25 = vld [vmem:[#allocation197_spill] sm:$0xff]  ;;  %vm14146_vm3 = vmmov %vm14135_vm0 }
 0x563   : > { %v11262_v23 = vadd.f32 %v10909_v38, %v2186_v62  ;;  %v11273_v16 = vadd.f32 %v10909_v38, %v2184_v60  ;;  %v3507_v62 = vsel %vm13243_vm14, %v3475_v57, %v14086_v25  ;;  %v11282_v48 = vadd.f32 %v10909_v38, %v2187_v12  ;;  %v14092_v25 = vld [vmem:[#allocation203_spill] sm:$0xff] }
 0x564   : > { %v11196_v47 = vpop.permute.xlu1 %3820  ;;  %v3999_v31 = vpop.permute.xlu0 %3998  ;;  %v11290_v60 = vadd.f32 %v10909_v38, %v2185_v24  ;;  %v2188_v17 = vmul.f32 %v10870_v40, %v11095_v33  ;;  %v2191_v57 = vmul.f32 %v11136_v30, %v10870_v40  ;;  %v2194_v33 = vmul.f32 %v11183_v51, %v10870_v40 }
 0x565   : > { %v4265_v59 = vsel %vm13243_vm14, %v4234_v42, %v3999_v31  ;;  %v2192_v30 = vmul.f32 %v10870_v40, %v2142_v49  ;;  %v3509_v51 = vsel %vm13243_vm14, %v3477_v22, %v14092_v25  ;;  %v14096_v22 = vld [vmem:[#allocation83_spill] sm:$0xff]  ;;  %v14105_v31 = vld [vmem:[#allocation209_spill] sm:$0xff] }
 0x566   : > { %4311 = vrot.lane.b32.xlu0 %v4265_v59, %s6908_s23  ;;  %v14079_v59 = vld [vmem:[#allocation191_spill] sm:$0xff]  ;;  %v11323_v49 = vadd.f32 %v10909_v38, %v2188_v17 }
 0x567   : > { %v3473_v28 = vsel %vm1874_vm12, %v3441_v46, %v14079_v59  ;;  %v14083_v46 = vld [vmem:[#allocation194_spill] sm:$0xff]  ;;  %v11345_v25 = vadd.f32 %v10909_v38, %v2192_v30  ;;  %v14112_v30 = vld [vmem:[#allocation99_spill] sm:$0xff] }
 0x568   : > { %v11233_v13 = vpop.permute.xlu1 %3852  ;;  %v4001_v61 = vpop.permute.xlu0 %4000  ;;  %v3485_v54 = vsel %vm1874_vm12, %v3453_v32, %v14083_v46  ;;  %v14087_v59 = vld [vmem:[#allocation106_spill] sm:$0xff]  ;;  %v2190_v32 = vmul.f32 %v11055_v3, %v10870_v40  ;;  %v14089_v46 = vld [vmem:[#allocation200_spill] sm:$0xff]  ;;  %v14090_v3 = vld [vmem:[#allocation201_spill] sm:$0xff] }
 0x569   : > { %v4267_v42 = vsel %vm13243_vm14, %v4236_v29, %v4001_v61  ;;  %v14084_v29 = vld [vmem:[#allocation195_spill] sm:$0xff]  ;;  %v3511_v15 = vsel %vm13243_vm14, %v3479_v63, %v14087_v59  ;;  %v2145_v63 = vpop.f32.mrf.mxu1  ;;  %v2195_v59 = vmul.f32 %v6609_v58, %v10870_v40  ;;  %v11326_v58 = vadd.f32 %v10909_v38, %v2191_v57  ;;  %14098 = vst [vmem:[#allocation115_spill] sm:$0xff] %v11345_v25  ;;  %v14116_v25 = vld [vmem:[#allocation217_spill] sm:$0xff] }
 0x56a   : > { %4313 = vrot.lane.b32.xlu1 %v4267_v42, %s6908_s23  ;;  %v3489_v61 = vsel %vm1874_vm12, %v3457_v9, %v14084_v29  ;;  %v14085_v42 = vld [vmem:[#allocation196_spill] sm:$0xff]  ;;  %v14088_v9 = vld [vmem:[#allocation198_spill] sm:$0xff]  ;;  %v3515_v29 = vsel %vm13243_vm14, %v3483_v11, %v14089_v46  ;;  %v11342_v57 = vadd.f32 %v10909_v38, %v2194_v33 }
 0x56b   : > { %v3503_v4 = vsel %vm13243_vm14, %v3471_v34, %v14085_v42  ;;  %v3501_v34 = vsel %vm13243_vm14, %v11134_v37, %v14088_v9  ;;  %v3505_v42 = vsel %vm13243_vm14, %v3473_v28, %v14090_v3  ;;  %v2189_v37 = vmul.f32 %v10870_v40, %v11167_v45  ;;  %v14091_v46 = vld [vmem:[#allocation202_spill] sm:$0xff]  ;;  %v14093_v11 = vld [vmem:[#allocation204_spill] sm:$0xff] }
 0x56c   : > { %v11264_v10 = vpop.permute.xlu1 %3884  ;;  %v11275_v19 = vpop.permute.xlu0 %3818  ;;  %v3519_v28 = vsel %vm13243_vm14, %v3487_v43, %v14091_v46  ;;  %v11316_v45 = vadd.f32 %v10909_v38, %v2190_v32  ;;  %v2193_v3 = vmul.f32 %v10870_v40, %v2145_v63  ;;  %v3513_v50 = vsel %vm13243_vm14, %v3481_v36, %v14093_v11  ;;  %v14094_v43 = vld [vmem:[#allocation205_spill] sm:$0xff]  ;;  %v14095_v46 = vld [vmem:[#allocation206_spill] sm:$0xff]  ;;  %14097 = vst [vmem:[#allocation98_spill] sm:$0xff] %v11342_v57 }
 0x56d   : > { %v3517_v32 = vsel %vm13243_vm14, %v3485_v54, %v14094_v43  ;;  %v3521_v40 = vsel %vm13243_vm14, %v3489_v61, %v14095_v46  ;;  %v11335_v63 = vadd.f32 %v10909_v38, %v2189_v37  ;;  %v3535_v17 = vsel %vm1960_vm15, %v3503_v4, %v14096_v22  ;;  %v14100_v11 = vld [vmem:[#allocation110_spill] sm:$0xff]  ;;  %v14101_v43 = vld [vmem:[#allocation119_spill] sm:$0xff] }
 0x56e   : > { %v11348_v36 = vadd.f32 %v10909_v38, %v2195_v59  ;;  %v3539_v37 = vsel %vm1960_vm15, %v3507_v62, %v14100_v11  ;;  %v3543_v46 = vsel %vm1960_vm15, %v3511_v15, %v14101_v43  ;;  %v11356_v4 = vadd.f32 %v10909_v38, %v2193_v3  ;;  %v14103_v22 = vld [vmem:[#allocation207_spill] sm:$0xff]  ;;  %v14106_v11 = vld [vmem:[#allocation54_spill] sm:$0xff] }
 0x56f   : > { %v3533_v59 = vsel %vm1960_vm15, %v3501_v34, %v14103_v22  ;;  %v3547_v39 = vsel %vm1960_vm15, %v3515_v29, %v14104_v41  ;;  %v3537_v62 = vsel %vm1960_vm15, %v3505_v42, %v14105_v31  ;;  %v3551_v15 = vsel %vm1960_vm15, %v3519_v28, %v14106_v11  ;;  %v14107_v38 = vld [vmem:[#allocation210_spill] sm:$0xff]  ;;  %v14108_v41 = vld [vmem:[#allocation211_spill] sm:$0xff]  ;;  %v14110_v11 = vld [vmem:[#allocation212_spill] sm:$0xff] }
 0x570   : > { %v11303_v24 = vpop.permute.xlu1 %3914  ;;  %v11310_v9 = vpop.permute.xlu0 %3850  ;;  %14099 = vst [vmem:[#allocation43_spill] sm:$0xff] %v11348_v36  ;;  %14102 = vst [vmem:[#allocation249_spill] sm:$0xff] %v11356_v4  ;;  %v3541_v3 = vsel %vm1960_vm15, %v3509_v51, %v14107_v38  ;;  %v3545_v29 = vsel %vm1960_vm15, %v3513_v50, %v14108_v41  ;;  %v14109_v42 = vld [vmem:[#allocation90_spill] sm:$0xff]  ;;  %v3553_v51 = vsel %vm1960_vm15, %v3521_v40, %v14110_v11  ;;  %v14111_v38 = vld [vmem:[#allocation213_spill] sm:$0xff] }
 0x571   : > { %v3549_v28 = vsel %vm1960_vm15, %v3517_v32, %v14109_v42  ;;  %v3568_v61 = vsel %vm3564_vm5, %v3535_v17, %v14111_v38  ;;  %v3572_v34 = vsel %vm3564_vm5, %v3539_v37, %v14112_v30  ;;  %v14113_v57 = vld [vmem:[#allocation214_spill] sm:$0xff]  ;;  %v14114_v36 = vld [vmem:[#allocation215_spill] sm:$0xff]  ;;  %v14115_v41 = vld [vmem:[#allocation216_spill] sm:$0xff]  ;;  %v3570_v32 = vsel %vm3564_vm5, %v3537_v62, %v14116_v25 }
 0x572   : > { %v3576_v22 = vsel %vm3564_vm5, %v3543_v46, %v14113_v57  ;;  %v3566_v50 = vsel %vm3564_vm5, %v3533_v59, %v14114_v36  ;;  %v3580_v31 = vsel %vm3564_vm5, %v3547_v39, %v14115_v41  ;;  %v14117_v42 = vld [vmem:[#allocation218_spill] sm:$0xff]  ;;  %v14118_v11 = vld [vmem:[#allocation219_spill] sm:$0xff]  ;;  %v14119_v38 = vld [vmem:[#allocation220_spill] sm:$0xff] }
 0x573   : > { %v3584_v40 = vsel %vm3564_vm5, %v3551_v15, %v14117_v42  ;;  %v3574_v17 = vsel %vm3564_vm5, %v3541_v3, %v14118_v11  ;;  %v3578_v37 = vsel %vm3564_vm5, %v3545_v29, %v14119_v38  ;;  %v14120_v57 = vld [vmem:[#allocation221_spill] sm:$0xff]  ;;  %v14121_v46 = vld [vmem:[#allocation222_spill] sm:$0xff]  ;;  %v14122_v59 = vld [vmem:[#allocation223_spill] sm:$0xff] }
 0x574   : > { %v11337_v12 = vpop.permute.xlu1 %3944  ;;  %v3883_v54 = vpop.permute.xlu0 %3882  ;;  %v3582_v36 = vsel %vm3564_vm5, %v3549_v28, %v14120_v57  ;;  %v3586_v39 = vsel %vm3564_vm5, %v3553_v51, %v14121_v46  ;;  %v3601_v25 = vsel %vm3597_vm6, %v3568_v61, %v14122_v59  ;;  %v14123_v62 = vld [vmem:[#allocation224_spill] sm:$0xff]  ;;  %v14124_v42 = vld [vmem:[#allocation225_spill] sm:$0xff]  ;;  %v14125_v11 = vld [vmem:[#allocation75_spill] sm:$0xff] }
 0x575   : > { %v3605_v15 = vsel %vm3597_vm6, %v3572_v34, %v14123_v62  ;;  %v3609_v3 = vsel %vm3597_vm6, %v3576_v22, %v14124_v42  ;;  %v3599_v29 = vsel %vm3597_vm6, %v3566_v50, %v14125_v11  ;;  %v14126_v38 = vld [vmem:[#allocation85_spill] sm:$0xff]  ;;  %v14127_v28 = vld [vmem:[#allocation52_spill] sm:$0xff]  ;;  %v14129_v61 = vld [vmem:[#allocation155_spill] sm:$0xff] }
 0x576   : > { %v3613_v4 = vsel %vm3597_vm6, %v3580_v31, %v14126_v38  ;;  %v3603_v57 = vsel %vm3597_vm6, %v3570_v32, %v14127_v28  ;;  %v14128_v51 = vld [vmem:[#allocation145_spill] sm:$0xff]  ;;  %v3607_v59 = vsel %vm3597_vm6, %v3574_v17, %v14129_v61  ;;  %v14130_v34 = vld [vmem:[#allocation130_spill] sm:$0xff]  ;;  %v14131_v22 = vld [vmem:[#allocation87_spill] sm:$0xff] }
 0x577   : > { %v3617_v46 = vsel %vm3597_vm6, %v3584_v40, %v14128_v51  ;;  %v3611_v62 = vsel %vm3597_vm6, %v3578_v37, %v14130_v34  ;;  %v4046_v42 = vsel %vm553_vm1, %v14131_v22, %v11122_v6  ;;  %v14132_v50 = vld [vmem:[#allocation147_spill] sm:$0xff]  ;;  %v14133_v31 = vld [vmem:[#allocation157_spill] sm:$0xff]  ;;  %v14136_v51 = vld [vmem:[#allocation42_spill] sm:$0xff] }
 0x578   : > { %v11371_v43 = vpop.permute.xlu1 %3974  ;;  %v3913_v33 = vpop.permute.xlu0 %3912  ;;  %v3615_v11 = vsel %vm3597_vm6, %v3582_v36, %v14132_v50  ;;  %v3619_v38 = vsel %vm3597_vm6, %v3586_v39, %v14133_v31  ;;  %v14134_v32 = vld [vmem:[#allocation59_spill] sm:$0xff]  ;;  %v4081_v40 = vsel %vm1709_vm8, %v4046_v42, %v11275_v19  ;;  %v3638_v37 = vsel %vm14137_vm2, %v3605_v15, %v14136_v51  ;;  %v14138_v61 = vld [vmem:[#allocation122_spill] sm:$0xff]  ;;  %vm14139_vm15 = vmmov %vm14135_vm0 }
 0x579   : > { %v3634_v28 = vsel %vm14135_vm0, %v3601_v25, %v14134_v32  ;;  %v3642_v34 = vsel %vm14139_vm15, %v3609_v3, %v14138_v61  ;;  %v14140_v6 = vld [vmem:[#allocation150_spill] sm:$0xff]  ;;  %vm14141_vm5 = vmmov %vm14135_vm0  ;;  %v4113_v36 = vsel %vm1742_vm9, %v4081_v40, %v11310_v9  ;;  %v14142_v50 = vld [vmem:[#allocation57_spill] sm:$0xff] }
 0x57a   : > { %v3632_v22 = vsel %vm14141_vm5, %v3599_v29, %v14140_v6  ;;  %vm14143_vm6 = vmmov %vm14135_vm0  ;;  %v14144_v31 = vld [vmem:[#allocation159_spill] sm:$0xff]  ;;  %v14145_v42 = vld [vmem:[#allocation49_spill] sm:$0xff]  ;;  %v4145_v15 = vsel %vm1775_vm10, %v4113_v36, %v3883_v54 }
 0x57b   : > { %v3646_v25 = vsel %vm14143_vm6, %v3613_v4, %v14142_v50  ;;  %v3636_v19 = vsel %vm14135_vm0, %v3603_v57, %v14144_v31  ;;  %v3650_v32 = vsel %vm14146_vm3, %v3617_v46, %v14145_v42  ;;  %v14147_v51 = vld [vmem:[#allocation60_spill] sm:$0xff]  ;;  %vm14148_vm2 = vmmov %vm14135_vm0  ;;  %v14149_v61 = vld [vmem:[#allocation45_spill] sm:$0xff]  ;;  %v4176_v4 = vsel %vm1808_vm11, %v4145_v15, %v3913_v33 }
 0x57c   : > { %v11401_v30 = vpop.permute.xlu1 %3790  ;;  %v3943_v41 = vpop.permute.xlu0 %3942  ;;  %v3640_v3 = vsel %vm14148_vm2, %v3607_v59, %v14147_v51  ;;  %vm14150_vm15 = vmmov %vm14135_vm0  ;;  %v14151_v9 = vld [vmem:[#allocation139_spill] sm:$0xff]  ;;  %v14152_v6 = vld [vmem:[#allocation162_spill] sm:$0xff]  ;;  %vm14157_vm3 = vcmask 424960  }
 0x57d   : > { %v3644_v29 = vsel %vm14150_vm15, %v3611_v62, %v14149_v61  ;;  %v4049_v40 = vsel %vm553_vm1, %v14151_v9, %v11160_v21  ;;  %vm14153_vm5 = vmmov %vm14135_vm0  ;;  %v14154_v50 = vld [vmem:[#allocation46_spill] sm:$0xff]  ;;  %v4207_v59 = vsel %vm1841_vm13, %v4176_v4, %v3943_v41  ;;  %v14156_v31 = vld [vmem:[#allocation175_spill] sm:$0xff] }
 0x57e   : > { %v3648_v57 = vsel %vm14153_vm5, %v3615_v11, %v14152_v6  ;;  %vm14155_vm6 = vmmov %vm14135_vm0  ;;  %v4083_v54 = vsel %vm1709_vm8, %v4049_v40, %v11196_v47  ;;  %v3667_v62 = vsel %vm14157_vm3, %v3634_v28, %v14156_v31  ;;  %v14158_v42 = vld [vmem:[#allocation137_spill] sm:$0xff]  ;;  %v14160_v51 = vld [vmem:[#allocation184_spill] sm:$0xff] }
 0x57f   : > { %v3652_v46 = vsel %vm14155_vm6, %v3619_v38, %v14154_v50  ;;  %vm14159_vm0 = vmmov %vm14157_vm3  ;;  %v4115_v33 = vsel %vm1742_vm9, %v4083_v54, %v11233_v13  ;;  %v14162_v61 = vld [vmem:[#allocation58_spill] sm:$0xff]  ;;  %v14164_v9 = vld [vmem:[#allocation164_spill] sm:$0xff] }
 0x580   : > { %v3793_v17 = vpop.permute.xlu1 %3792  ;;  %v3973_v39 = vpop.permute.xlu0 %3972  ;;  %v3671_v21 = vsel %vm14159_vm0, %v3638_v37, %v14158_v42  ;;  %vm14161_vm2 = vmmov %vm14159_vm0  ;;  %v4147_v41 = vsel %vm1775_vm10, %v4115_v33, %v11264_v10  ;;  %v14166_v40 = vld [vmem:[#allocation177_spill] sm:$0xff]  ;;  %v14170_v10 = vld [vmem:[#allocation91_spill] sm:$0xff] }
 0x581   : > { %v4238_v11 = vsel %vm1874_vm12, %v4207_v59, %v3973_v39  ;;  %v3675_v38 = vsel %vm14161_vm2, %v3642_v34, %v14160_v51  ;;  %vm14163_vm15 = vmmov %vm14159_vm0  ;;  %v4178_v39 = vsel %vm1808_vm11, %v4147_v41, %v11303_v24  ;;  %v4055_v34 = vsel %vm553_vm1, %v13893_v1, %v3793_v17  ;;  %v14171_v50 = vld [vmem:[#allocation73_spill] sm:$0xff]  ;;  %v14173_v59 = vld [vmem:[#allocation88_spill] sm:$0xff] }
 0x582   : > { %v3665_v47 = vsel %vm14163_vm15, %v3632_v22, %v14162_v61  ;;  %vm14165_vm5 = vmmov %vm14159_vm0  ;;  %v14168_v22 = vld [vmem:[#allocation186_spill] sm:$0xff]  ;;  %v3673_v6 = vsel %vm14159_vm0, %v3640_v3, %v14170_v10  ;;  %v14175_v31 = vld [vmem:[#allocation55_spill] sm:$0xff] }
 0x583   : > { %v3679_v37 = vsel %vm14165_vm5, %v3646_v25, %v14164_v9  ;;  %vm14167_vm6 = vmmov %vm14159_vm0  ;;  %v14177_v17 = vld [vmem:[#allocation113_spill] sm:$0xff]  ;;  %v14179_v33 = vld [vmem:[#allocation120_spill] sm:$0xff] }
 0x584   : > { %v3825_v36 = vpop.permute.xlu1 %3824  ;;  %v4003_v15 = vpop.permute.xlu0 %4002  ;;  %v3669_v13 = vsel %vm14167_vm6, %v3636_v19, %v14166_v40  ;;  %vm14169_vm3 = vmmov %vm14159_vm0  ;;  %v4209_v19 = vsel %vm1841_vm13, %v4178_v39, %v11337_v12  ;;  %vm14178_vm6 = vcmask 457728   ;;  %v14183_v51 = vld [vmem:[#allocation53_spill] sm:$0xff]  ;;  %v14185_v61 = vld [vmem:[#allocation76_spill] sm:$0xff] }
 0x585   : > { %v4269_v28 = vsel %vm13243_vm14, %v4238_v11, %v4003_v15  ;;  %v3683_v4 = vsel %vm14169_vm3, %v3650_v32, %v14168_v22  ;;  %vm14172_vm2 = vmmov %vm14159_vm0  ;;  %v3700_v42 = vsel %vm14178_vm6, %v3667_v62, %v14177_v17  ;;  %v4240_v32 = vsel %vm1874_vm12, %v4209_v19, %v11371_v43  ;;  %v14181_v11 = vld [vmem:[#allocation94_spill] sm:$0xff]  ;;  %v14187_v41 = vld [vmem:[#allocation97_spill] sm:$0xff] }
 0x586   : > { %4315 = vrot.lane.b32.xlu0 %v4269_v28, %s6908_s23  ;;  %v3677_v25 = vsel %vm14172_vm2, %v3644_v29, %v14171_v50  ;;  %vm14174_vm15 = vmmov %vm14159_vm0  ;;  %v4087_v15 = vsel %vm1709_vm8, %v4055_v34, %v3825_v36  ;;  %v14189_v28 = vld [vmem:[#allocation227_spill] sm:$0xff]  ;;  %v14193_v36 = vld [vmem:[#allocation229_spill] sm:$0xff] }
 0x587   : > { %v3681_v24 = vsel %vm14174_vm15, %v3648_v57, %v14173_v59  ;;  %vm14176_vm5 = vmmov %vm14159_vm0  ;;  %v14194_v39 = vld [vmem:[#allocation61_spill] sm:$0xff]  ;;  %v14198_v10 = vld [vmem:[#allocation230_spill] sm:$0xff] }
 0x588   : > { %v3857_v54 = vpop.permute.xlu1 %3856  ;;  %v3685_v1 = vsel %vm14176_vm5, %v3652_v46, %v14175_v31  ;;  %v4005_v3 = vpop.permute.xlu0 %4004  ;;  %vm14180_vm3 = vmmov %vm14178_vm6  ;;  %v14196_v34 = vld [vmem:[#allocation93_spill] sm:$0xff]  ;;  %v14199_v50 = vld [vmem:[#allocation231_spill] sm:$0xff] }
 0x589   : > { %v3704_v29 = vsel %vm14180_vm3, %v3671_v21, %v14179_v33  ;;  %vm14182_vm0 = vmmov %vm14180_vm3  ;;  %v4271_v57 = vsel %vm13243_vm14, %v4240_v32, %v4005_v3  ;;  %v14191_v21 = vld [vmem:[#allocation228_spill] sm:$0xff]  ;;  %v14201_v31 = vld [vmem:[#allocation233_spill] sm:$0xff] }
 0x58a   : > { %v3708_v12 = vsel %vm14182_vm0, %v3675_v38, %v14181_v11  ;;  %vm14184_vm2 = vmmov %vm14182_vm0  ;;  %4317 = vrot.lane.b32.xlu1 %v4271_v57, %s6908_s23  ;;  %v3710_v40 = vsel %vm14182_vm0, %v3677_v25, %v14193_v36  ;;  %v14200_v19 = vld [vmem:[#allocation232_spill] sm:$0xff]  ;;  %v14202_v17 = vld [vmem:[#allocation234_spill] sm:$0xff] }
 0x58b   : > { %v3698_v46 = vsel %vm14184_vm2, %v3665_v47, %v14183_v51  ;;  %vm14186_vm15 = vmmov %vm14182_vm0  ;;  %v11534_v59 = vsel %vm3729_vm7, %v3708_v12, %v14200_v19  ;;  %v14203_v32 = vld [vmem:[#allocation235_spill] sm:$0xff]  ;;  %v14204_v3 = vld [vmem:[#allocation236_spill] sm:$0xff] }
 0x58c   : > { %v3712_v62 = vsel %vm14186_vm15, %v3679_v37, %v14185_v61  ;;  %vm14188_vm5 = vmmov %vm14182_vm0  ;;  %v3947_v22 = vpop.permute.xlu1 %3946  ;;  %v3823_v25 = vpop.permute.xlu0 %3822  ;;  %v14206_v11 = vld [vmem:[#allocation116_spill] sm:$0xff]  ;;  %v14208_v51 = vld [vmem:[#allocation199_spill] sm:$0xff] }
 0x58d   : > { %v3702_v43 = vsel %vm14188_vm5, %v3669_v13, %v14187_v41  ;;  %vm14190_vm6 = vmmov %vm14182_vm0  ;;  %v3733_v13 = vsel %vm3729_vm7, %v3700_v42, %v14198_v10  ;;  %v11559_v12 = vsel %vm3729_vm7, %v3710_v40, %v14206_v11  ;;  %v14209_v61 = vld [vmem:[#allocation240_spill] sm:$0xff]  ;;  %v14210_v41 = vunpack.i.h.bf16 %v14028_v20  ;;  %v14212_v40 = vld [vmem:[#allocation5_spill] sm:$0xff] }
 0x58e   : > { %v3716_v9 = vsel %vm14190_vm6, %v3683_v4, %v14189_v28  ;;  %vm14192_vm3 = vmmov %vm14182_vm0  ;;  %v3737_v4 = vsel %vm3729_vm7, %v3704_v29, %v14199_v50  ;;  %v11547_v42 = vsel %vm3729_vm7, %v3702_v43, %v14203_v32  ;;  %v14205_v29 = vld [vmem:[#allocation237_spill] sm:$0xff]  ;;  %v14214_v50 = vld [vmem:[#allocation268_spill] sm:$0xff]  ;;  %vm14229_vm5 = vcmask 261120  }
 0x58f   : > { %v3706_v38 = vsel %vm14192_vm3, %v3673_v6, %v14191_v21  ;;  %vm14195_vm14 = vmmov %vm14182_vm0  ;;  %v4119_v6 = vsel %vm1742_vm9, %v4087_v15, %v3857_v54  ;;  %v11551_v33 = vsel %vm3729_vm7, %v3716_v9, %v14204_v3  ;;  %v14207_v15 = vld [vmem:[#allocation239_spill] sm:$0xff]  ;;  %v5220_v19 = vmax.f32 %v14214_v50, %v14212_v40 }
 0x590   : > { %v3714_v47 = vsel %vm14195_vm14, %v3681_v24, %v14194_v39  ;;  %vm14197_vm2 = vmmov %vm14182_vm0  ;;  %v11539_v24 = vsel %vm3729_vm7, %v3698_v46, %v14201_v31  ;;  %v11555_v54 = vsel %vm3729_vm7, %v3706_v38, %v14205_v29  ;;  %v4052_v46 = vsel %vm553_vm1, %v14208_v51, %v11401_v30  ;;  %v4007_v9 = vpop.permute.xlu1 %4006  ;;  %v3855_v21 = vpop.permute.xlu0 %3854  ;;  %v14211_v38 = vld [vmem:[#allocation261_spill] sm:$0xff]  ;;  %v14219_v11 = vld [vmem:[#allocation267_spill] sm:$0xff] }
 0x591   : > { %v3718_v37 = vsel %vm14197_vm2, %v3685_v1, %v14196_v34  ;;  %v11543_v1 = vsel %vm3729_vm7, %v3712_v62, %v14202_v17  ;;  %v11563_v57 = vsel %vm3729_vm7, %v3714_v47, %v14207_v15  ;;  %v4150_v43 = vsel %vm1775_vm10, %v4119_v6, %v14210_v41  ;;  %v14215_v6 = vld [vmem:[#allocation266_spill] sm:$0xff]  ;;  %vm14230_vm6 = vmmov %vm14229_vm5 }
 0x592   : > { %v11570_v62 = vsel %vm3729_vm7, %v3718_v37, %v14209_v61  ;;  %v4085_v28 = vsel %vm1709_vm8, %v4052_v46, %v3823_v25  ;;  %vm4323_vm14 = vcmask 523264   ;;  %v4946_v36 = vrot.slane %v14211_v38, 1  ;;  %v14213_v37 = vld [vmem:[#allocation133_spill] sm:$0xff]  ;;  %v14216_v25 = vld [vmem:[#allocation263_spill] sm:$0xff] }
 0x593   : > { %v4947_v39 = vrot.slane %v14212_v40, 1  ;;  %v5085_v47 = vrot.slane %v14211_v38, 2  ;;  %v5086_v30 = vrot.slane %v14212_v40, 2  ;;  %v4117_v34 = vsel %vm1742_vm9, %v4085_v28, %v3855_v21 }
 0x594   : > { %v5219_v10 = vmax.f32 %v14213_v37, %v14211_v38  ;;  %v14217_v31 = vmax.f32 %v14215_v6, %v14216_v25  ;;  %v14218_v32 = vmov %v14210_v41  ;;  %v14220_v15 = vrot.slane %v14219_v11, 1  ;;  %v4294_v61 = vpop.permute.xlu1 %4293 }
 0x595   : > { %v4149_v3 = vsel %vm1775_vm10, %v4117_v34, %v14218_v32  ;;  %v4948_v29 = vsel %vm1356_vm4, %v4946_v36, %v4947_v39  ;;  %vm14221_vm9 = vcmask 1045504   ;;  %vm4408_vm7 = vcmask 818176   ;;  %v3917_v36 = vpop.permute.xlu0 %3916 }
 0x596   : > { %v5329_v17 = vmax.f32 %v14217_v31, %v14211_v38  ;;  %v4950_v51 = vsel %vm1356_vm4, %v4947_v39, %v14220_v15  ;;  %v5087_v46 = vsel %vm14221_vm9, %v5085_v47, %v5086_v30  ;;  %v5049_v41 = vmax.f32 %v14211_v38, %v4948_v29  ;;  %vm14223_vm15 = vmmov %vm14221_vm9 }
 0x597   : > { %v5050_v28 = vmax.f32 %v14212_v40, %v4950_v51  ;;  %v14222_v21 = vrot.slane %v14219_v11, 2  ;;  %v5260_v37 = vmax.f32 %v5219_v10, %v4948_v29  ;;  %v4327_v34 = vsel %vm4323_vm14, %v3733_v13, %v4294_v61  ;;  %v14225_v61 = vld [vmem:[#allocation257_spill] sm:$0xff]  ;;  %vm14238_vm3 = vmmov %vm14221_vm9 }
 0x598   : > { %v5261_v50 = vmax.f32 %v5220_v19, %v4950_v51  ;;  %v14224_v39 = vmax.f32 %v10445_v0, %v10416_v52  ;;  %v5359_v6 = vmax.f32 %v5329_v17, %v4948_v29  ;;  %v4180_v25 = vsel %vm1808_vm11, %v4149_v3, %v3917_v36  ;;  %v4298_v15 = vpop.permute.xlu1 %4297  ;;  %vm14251_vm0 = vmmov %vm14238_vm3 }
 0x599   : > { %v5089_v20 = vsel %vm14223_vm15, %v5086_v30, %v14222_v21  ;;  %v4181_v38 = vsel %vm1808_vm11, %v4150_v43, %v3917_v36  ;;  %v5189_v31 = vmax.f32 %v5049_v41, %v5087_v46  ;;  %v4211_v11 = vsel %vm1841_vm13, %v4180_v25, %v3947_v22  ;;  %v3977_v17 = vpop.permute.xlu0 %3976  ;;  %vm14228_vm11 = vmmov %vm14221_vm9 }
 0x59a   : > { %v5330_v47 = vmax.f32 %v14224_v39, %v14212_v40  ;;  %v5190_v32 = vmax.f32 %v5050_v28, %v5089_v20  ;;  %v4212_v30 = vsel %vm1841_vm13, %v4181_v38, %v3947_v22  ;;  %v5299_v10 = vmax.f32 %v5260_v37, %v5087_v46  ;;  %v14231_v39 = vld [vmem:[#allocation265_spill] sm:$0xff]  ;;  %vm14253_vm2 = vmmov %vm14251_vm0 }
 0x59b   : > { %v5300_v13 = vmax.f32 %v5261_v50, %v5089_v20  ;;  %v5221_v19 = vmax.f32 %v5189_v31, %v10384_v56  ;;  %v5391_v0 = vmax.f32 %v5359_v6, %v5087_v46  ;;  %v11614_v40 = vsel %vm4323_vm14, %v3737_v4, %v4298_v15  ;;  %vm14268_vm15 = vmmov %vm14251_vm0 }
 0x59c   : > { %v5222_v21 = vmax.f32 %v5190_v32, %v14225_v61  ;;  %v5360_v52 = vmax.f32 %v5330_v47, %v4950_v51  ;;  %v5331_v43 = vmax.f32 %v5299_v10, %v10384_v56  ;;  %v14226_v29 = vrot.slane %v14225_v61, 2  ;;  %v4302_v6 = vpop.permute.xlu1 %4301 }
 0x59d   : > { %v5332_v3 = vmax.f32 %v5300_v13, %v14225_v61  ;;  %v14227_v22 = vrot.slane %v10384_v56, 2  ;;  %v4242_v28 = vsel %vm1874_vm12, %v4211_v11, %v3977_v17  ;;  %v4243_v37 = vsel %vm1874_vm12, %v4212_v30, %v3977_v17  ;;  %v14232_v30 = vld [vmem:[#allocation270_spill] sm:$0xff]  ;;  %vm14236_vm12 = vmmov %vm14221_vm9 }
 0x59e   : > { %v5392_v51 = vmax.f32 %v5360_v52, %v5089_v20  ;;  %v4956_v46 = vrot.slane %v10492_v8, 1  ;;  %v4274_v4 = vsel %vm14229_vm5, %v4243_v37, %v4007_v9  ;;  %v4273_v36 = vsel %vm14230_vm6, %v4242_v28, %v4007_v9  ;;  %v4292_v9 = vpop.permute.xlu0 %4291  ;;  %v14240_v37 = vld [vmem:[#allocation256_spill] sm:$0xff]  ;;  %vm14266_vm9 = vmmov %vm14251_vm0 }
 0x59f   : > { %v5092_v41 = vsel %vm14228_vm11, %v14227_v22, %v14226_v29  ;;  %v5361_v50 = vmax.f32 %v5331_v43, %v10453_v35  ;;  %v5362_v47 = vmax.f32 %v5332_v3, %v14231_v39  ;;  %4321 = vrot.lane.b32.xlu1 %v4274_v4, %s6908_s23  ;;  %4319 = vrot.lane.b32.xlu0 %v4273_v36, %s6908_s23  ;;  %v4957_v38 = vrot.slane %v10500_v18, 1  ;;  %v14242_v36 = vld [vmem:[#allocation89_spill] sm:$0xff]  ;;  %vm14282_vm11 = vmmov %vm14251_vm0  ;;  %s6461_s23 = sshll.u32 %s7002_s29, 12 }
 0x5a0   : > { %v5423_v25 = vpack.c.bf16 %v5392_v51, %v5391_v0  ;;  %v5095_v20 = vrot.slane %v10492_v8, 2  ;;  %v5096_v31 = vrot.slane %v10500_v18, 2  ;;  %v11637_v32 = vsel %vm4323_vm14, %v11534_v59, %v4302_v6  ;;  %v14234_v0 = vld [vmem:[#allocation271_spill] sm:$0xff]  ;;  %v14243_v6 = vld [vmem:[#allocation272_spill] sm:$0xff]  ;;  %vm14284_vm5 = vmmov %vm14251_vm0  ;;  %s12770_s16 = scalar_lea.hbm %s12835_s13, %s6461_s23 }
 0x5a1   : > { %v5393_v11 = vmax.f32 %v5361_v50, %v5092_v41  ;;  %v5394_v10 = vmax.f32 %v5362_v47, %v14232_v30  ;;  %v14233_v13 = vmax.f32 %v10384_v56, %v10453_v35  ;;  %v4325_v61 = vsel %vm4323_vm14, %v11539_v24, %v4292_v9  ;;  %v14244_v9 = vld [vmem:[#allocation273_spill] sm:$0xff]  ;;  %vm14292_vm6 = vmmov %vm14251_vm0 }
 0x5a2   : > { %6658 = vmatprep.mubr.msk.bf16.mxu1 %vm553_vm1, %v5423_v25  ;;  %v4958_v52 = vsel %vm1356_vm4, %v4956_v46, %v4957_v38  ;;  %v14235_v17 = vrot.slane %v14234_v0, 1  ;;  %v5097_v43 = vsel %vm14236_vm12, %v5095_v20, %v5096_v31  ;;  %6624 = vmatprep.mubr.msk.bf16.mxu0 %vm4408_vm7, %v4325_v61  ;;  %v14237_v24 = vrot.slane %v14234_v0, 2  ;;  %v4306_v46 = vpop.permute.xlu1 %4305  ;;  %v14245_v0 = vld [vmem:[#allocation260_spill] sm:$0xff]  ;;  %vm14294_vm12 = vmmov %vm14251_vm0 }
 0x5a3   : > { %v5191_v15 = vmax.f32 %v14233_v13, %v5092_v41  ;;  %v5424_v3 = vpack.c.bf16 %v5394_v10, %v5393_v11  ;;  %v5053_v56 = vmax.f32 %v10492_v8, %v4958_v52  ;;  %v14239_v28 = vmax.f32 %v10953_v2, 0.0  ;;  %6625 = vmatmul.mubr.msk.bf16.vlgmr.msra.gmra.mxu0 %vm4408_vm7, %v4327_v34 }
 0x5a4   : > { %v11650_v59 = vsel %vm1356_vm4, %v4957_v38, %v14235_v17  ;;  %v5099_v22 = vsel %vm14238_vm3, %v5096_v31, %v14237_v24  ;;  %v14241_v51 = vmax.f32 %v14240_v37, 0.0  ;;  %v5224_v50 = vmax.f32 %v14242_v36, %v10500_v18  ;;  %v4296_v38 = vpop.permute.xlu0 %4295  ;;  %vm14302_vm3 = vmmov %vm14251_vm0 }
 0x5a5   : > { %v5054_v29 = vmax.f32 %v10500_v18, %v11650_v59  ;;  %5796 = vrot.lane.b32.xlu1 %v14239_v28, %s13335_s21  ;;  %v5223_v4 = vmax.f32 %v5191_v15, %v10492_v8  ;;  %v5262_v47 = vmax.f32 %v5221_v19, %v10453_v35  ;;  %v4961_v25 = vrot.slane %v14243_v6, 1  ;;  %6659 = vmatmul.mubr.msk.bf16.vlgmr.msra.gmra.mxu1 %vm553_vm1, %v5424_v3 }
 0x5a6   : > { %5794 = vrot.lane.b32.xlu0 %v14241_v51, %s13335_s21  ;;  %v11674_v2 = vsel %vm4323_vm14, %v11543_v1, %v4306_v46  ;;  %v5193_v20 = vmax.f32 %v5053_v56, %v5097_v43  ;;  %v4962_v11 = vrot.slane %v14244_v9, 1  ;;  %v4329_v10 = vsel %vm4323_vm14, %v11547_v42, %v4296_v38  ;;  %v14247_v42 = vld [vmem:[#allocation252_spill] sm:$0xff] }
 0x5a7   : > { %v5194_v31 = vmax.f32 %v5054_v29, %v5099_v22  ;;  %v5263_v35 = vmax.f32 %v5222_v21, %v14231_v39  ;;  %v5264_v19 = vmax.f32 %v5223_v4, %v4958_v52  ;;  %v5265_v13 = vmax.f32 %v5224_v50, %v11650_v59  ;;  %6628 = vmatprep.mubr.msk.bf16.mxu0 %vm4408_vm7, %v4329_v10 }
 0x5a8   : > { %v5225_v1 = vmax.f32 %v5193_v20, %v14243_v6  ;;  %v5301_v15 = vmax.f32 %v5262_v47, %v5092_v41  ;;  %v4963_v61 = vsel %vm1356_vm4, %v4961_v25, %v4962_v11  ;;  %v14246_v17 = vmax.f32 %v14245_v0, 0.0  ;;  %v4300_v24 = vpop.permute.xlu0 %4299  ;;  %v14249_v41 = vld [vmem:[#allocation226_spill] sm:$0xff] }
 0x5a9   : > { %v5226_v34 = vmax.f32 %v5194_v31, %v14244_v9  ;;  %v14248_v3 = vmax.f32 %v14247_v42, 0.0  ;;  %v5302_v21 = vmax.f32 %v5263_v35, %v14232_v30  ;;  %v5303_v39 = vmax.f32 %v5264_v19, %v5097_v43  ;;  %v14256_v35 = vld [vmem:[#allocation128_spill] sm:$0xff] }
 0x5aa   : > { %5800 = vrot.lane.b32.xlu1 %v14246_v17, %s13335_s21  ;;  %v5304_v56 = vmax.f32 %v5265_v13, %v5099_v22  ;;  %v5100_v29 = vrot.slane %v14243_v6, 2  ;;  %v5333_v28 = vmax.f32 %v5301_v15, %v10492_v8  ;;  %v14250_v37 = vrot.slane %v14249_v41, 1 }
 0x5ab   : > { %5798 = vrot.lane.b32.xlu0 %v14248_v3, %s13335_s21  ;;  %v5055_v46 = vmax.f32 %v14243_v6, %v4963_v61  ;;  %v5101_v4 = vrot.slane %v14244_v9, 2  ;;  %v4333_v36 = vsel %vm4323_vm14, %v11555_v54, %v4300_v24  ;;  %v5334_v30 = vmax.f32 %v5302_v21, %v10500_v18  ;;  %6629 = vmatmul.mubr.msk.bf16.gmra.mxu0 %vm4408_vm7, %v11614_v40 }
 0x5ac   : > { %v4965_v51 = vsel %vm1356_vm4, %v4962_v11, %v14250_v37  ;;  %v5266_v47 = vmax.f32 %v5225_v1, %v4963_v61  ;;  %v5363_v25 = vmax.f32 %v5333_v28, %v4958_v52  ;;  %v14252_v8 = vrot.slane %v14249_v41, 2  ;;  %v14254_v11 = vld [vmem:[#allocation41_spill] sm:$0xff]  ;;  %v14258_v52 = vld [vmem:[#allocation275_spill] sm:$0xff]  ;;  %v4304_v15 = vpop.permute.xlu0 %4303  ;;  %6632 = vmatprep.mubr.msk.bf16.mxu0 %vm4408_vm7, %v4333_v36  ;;  %v14260_v37 = vld [vmem:[#allocation108_spill] sm:$0xff] }
 0x5ad   : > { %v5056_v50 = vmax.f32 %v14244_v9, %v4965_v51  ;;  %v5102_v38 = vsel %vm14251_vm0, %v5100_v29, %v5101_v4  ;;  %v5267_v31 = vmax.f32 %v5226_v34, %v4965_v51  ;;  %v14255_v10 = vmax.f32 %v14254_v11, 0.0  ;;  %v14259_v29 = vld [vmem:[#allocation276_spill] sm:$0xff] }
 0x5ae   : > { %v5104_v20 = vsel %vm14253_vm2, %v5101_v4, %v14252_v8  ;;  %v14257_v54 = vmax.f32 %v14256_v35, 0.0  ;;  %v5364_v18 = vmax.f32 %v5334_v30, %v11650_v59  ;;  %v5195_v19 = vmax.f32 %v5055_v46, %v5102_v38  ;;  %v14264_v30 = vld [vmem:[#allocation274_spill] sm:$0xff]  ;;  %vm14311_vm2 = vmmov %vm14251_vm0 }
 0x5af   : > { %5804 = vrot.lane.b32.xlu1 %v14255_v10, %s13335_s21  ;;  %v5196_v13 = vmax.f32 %v5056_v50, %v5104_v20  ;;  %v4966_v1 = vrot.slane %v14258_v52, 1  ;;  %v5395_v0 = vmax.f32 %v5363_v25, %v5097_v43  ;;  %v5305_v34 = vmax.f32 %v5266_v47, %v5102_v38 }
 0x5b0   : > { %5802 = vrot.lane.b32.xlu0 %v14257_v54, %s13335_s21  ;;  %v5306_v17 = vmax.f32 %v5267_v31, %v5104_v20  ;;  %v5335_v42 = vmax.f32 %v5303_v39, %v14243_v6  ;;  %v4337_v3 = vsel %vm4323_vm14, %v11559_v12, %v4304_v15  ;;  %v5396_v21 = vmax.f32 %v5364_v18, %v5099_v22  ;;  %v14262_v39 = vld [vmem:[#allocation105_spill] sm:$0xff]  ;;  %v14269_v18 = vld [vmem:[#allocation39_spill] sm:$0xff] }
 0x5b1   : > { %v5227_v59 = vmax.f32 %v5195_v19, %v14258_v52  ;;  %v5228_v24 = vmax.f32 %v5196_v13, %v14259_v29  ;;  %v5336_v28 = vmax.f32 %v5304_v56, %v14244_v9  ;;  %v4967_v40 = vrot.slane %v14259_v29, 1  ;;  %v14271_v13 = vld [vmem:[#allocation118_spill] sm:$0xff] }
 0x5b2   : > { %v5365_v41 = vmax.f32 %v5335_v42, %v4963_v61  ;;  %v5105_v43 = vrot.slane %v14258_v52, 2  ;;  %v14261_v6 = vmax.f32 %v14260_v37, 0.0  ;;  %v14263_v46 = vmax.f32 %v14262_v39, 0.0  ;;  %v14275_v39 = vld [vmem:[#allocation38_spill] sm:$0xff] }
 0x5b3   : > { %v5425_v12 = vpack.c.bf16 %v5396_v21, %v5395_v0  ;;  %v5106_v22 = vrot.slane %v14259_v29, 2  ;;  %v5337_v4 = vmax.f32 %v5305_v34, %v14258_v52  ;;  %v5338_v9 = vmax.f32 %v5306_v17, %v14259_v29  ;;  %v14273_v34 = vld [vmem:[#allocation279_spill] sm:$0xff]  ;;  %6633 = vmatmul.mubr.msk.bf16.gmra.mxu0 %vm4408_vm7, %v11637_v32 }
 0x5b4   : > { %5808 = vrot.lane.b32.xlu1 %v14261_v6, %s13335_s21  ;;  %5806 = vrot.lane.b32.xlu0 %v14263_v46, %s13335_s21  ;;  %v5366_v61 = vmax.f32 %v5336_v28, %v4965_v51  ;;  %v5397_v56 = vmax.f32 %v5365_v41, %v5102_v38  ;;  %v4968_v36 = vsel %vm1356_vm4, %v4966_v1, %v4967_v40  ;;  %v14265_v50 = vrot.slane %v14264_v30, 1  ;;  %v14277_v46 = vld [vmem:[#allocation101_spill] sm:$0xff] }
 0x5b5   : > { %6662 = vmatprep.mubr.msk.bf16.mxu1 %vm553_vm1, %v5425_v12  ;;  %v5057_v25 = vmax.f32 %v14258_v52, %v4968_v36  ;;  %v5107_v31 = vsel %vm14266_vm9, %v5105_v43, %v5106_v22  ;;  %v14267_v11 = vrot.slane %v14264_v30, 2  ;;  %v5268_v38 = vmax.f32 %v5227_v59, %v4968_v36  ;;  %6636 = vmatprep.mubr.msk.bf16.mxu0 %vm4408_vm7, %v4337_v3  ;;  %v14281_v30 = vld [vmem:[#allocation280_spill] sm:$0xff]  ;;  %vm14313_vm9 = vmmov %vm14251_vm0 }
 0x5b6   : > { %v4970_v47 = vsel %vm1356_vm4, %v4967_v40, %v14265_v50  ;;  %v5398_v51 = vmax.f32 %v5366_v61, %v5104_v20  ;;  %v5367_v54 = vmax.f32 %v5337_v4, %v4968_v36  ;;  %v14270_v19 = vmax.f32 %v14269_v18, 0.0  ;;  %v14279_v61 = vld [vmem:[#allocation277_spill] sm:$0xff] }
 0x5b7   : > { %v5058_v8 = vmax.f32 %v14259_v29, %v4970_v47  ;;  %v5109_v10 = vsel %vm14268_vm15, %v5106_v22, %v14267_v11  ;;  %v5269_v35 = vmax.f32 %v5228_v24, %v4970_v47  ;;  %v14272_v1 = vmax.f32 %v14271_v13, 0.0  ;;  %v14274_v24 = vld [vmem:[#allocation278_spill] sm:$0xff]  ;;  %v4310_v22 = vpop.permute.xlu1 %4309  ;;  %v14285_v13 = vld [vmem:[#allocation51_spill] sm:$0xff]  ;;  %vm14321_vm15 = vmmov %vm14251_vm0 }
 0x5b8   : > { %5812 = vrot.lane.b32.xlu1 %v14270_v19, %s13335_s21  ;;  %v5197_v52 = vmax.f32 %v5057_v25, %v5107_v31  ;;  %v5368_v0 = vmax.f32 %v5338_v9, %v4970_v47  ;;  %v4971_v17 = vrot.slane %v14273_v34, 1  ;;  %v5426_v20 = vpack.c.bf16 %v5398_v51, %v5397_v56 }
 0x5b9   : > { %5810 = vrot.lane.b32.xlu0 %v14272_v1, %s13335_s21  ;;  %v5198_v15 = vmax.f32 %v5058_v8, %v5109_v10  ;;  %v5307_v42 = vmax.f32 %v5268_v38, %v5107_v31  ;;  %v5308_v21 = vmax.f32 %v5269_v35, %v5109_v10  ;;  %v5399_v59 = vmax.f32 %v5367_v54, %v5107_v31 }
 0x5ba   : > { %v5229_v29 = vmax.f32 %v5197_v52, %v14273_v34  ;;  %v5400_v41 = vmax.f32 %v5368_v0, %v5109_v10  ;;  %v4972_v40 = vrot.slane %v14274_v24, 1  ;;  %6663 = vmatmul.mubr.msk.bf16.gmra.mxu1 %vm553_vm1, %v5426_v20  ;;  %v5110_v43 = vrot.slane %v14273_v34, 2 }
 0x5bb   : > { %v5230_v28 = vmax.f32 %v5198_v15, %v14274_v24  ;;  %v5111_v37 = vrot.slane %v14274_v24, 2  ;;  %v5339_v32 = vmax.f32 %v5307_v42, %v14273_v34  ;;  %v5340_v6 = vmax.f32 %v5308_v21, %v14274_v24  ;;  %6637 = vmatmul.mubr.msk.bf16.gmra.mxu0 %vm4408_vm7, %v11674_v2 }
 0x5bc   : > { %v14276_v3 = vmax.f32 %v14275_v39, 0.0  ;;  %v14278_v12 = vmax.f32 %v14277_v46, 0.0  ;;  %v5427_v4 = vpack.c.bf16 %v5400_v41, %v5399_v59  ;;  %v4973_v9 = vsel %vm1356_vm4, %v4971_v17, %v4972_v40  ;;  %v14288_v59 = vld [vmem:[#allocation67_spill] sm:$0xff] }
 0x5bd   : > { %v14280_v56 = vrot.slane %v14279_v61, 1  ;;  %v4976_v50 = vrot.slane %v14281_v30, 1  ;;  %v4343_v47 = vsel %vm4323_vm14, %v11551_v33, %v4310_v22  ;;  %v5059_v25 = vmax.f32 %v14273_v34, %v4973_v9  ;;  %v14295_v22 = vld [vmem:[#allocation246_spill] sm:$0xff] }
 0x5be   : > { %5816 = vrot.lane.b32.xlu1 %v14276_v3, %s13335_s21  ;;  %5814 = vrot.lane.b32.xlu0 %v14278_v12, %s13335_s21  ;;  %v5112_v31 = vsel %vm14282_vm11, %v5110_v43, %v5111_v37  ;;  %v14283_v11 = vrot.slane %v14279_v61, 2  ;;  %v5270_v51 = vmax.f32 %v5229_v29, %v4973_v9  ;;  %v5369_v35 = vmax.f32 %v5339_v32, %v4973_v9  ;;  %v4308_v9 = vpop.permute.xlu0 %4307  ;;  %vm14323_vm11 = vmmov %vm14251_vm0 }
 0x5bf   : > { %v4975_v36 = vsel %vm1356_vm4, %v4972_v40, %v14280_v56  ;;  %6666 = vmatprep.mubr.msk.bf16.mxu1 %vm553_vm1, %v5427_v4  ;;  %v5199_v54 = vmax.f32 %v5059_v25, %v5112_v31  ;;  %v4977_v33 = vrot.slane %v14285_v13, 1  ;;  %v14286_v1 = vmax.f32 %v11129_v26, 0.0  ;;  %v14296_v25 = vld [vmem:[#allocation50_spill] sm:$0xff] }
 0x5c0   : > { %v5060_v8 = vmax.f32 %v14274_v24, %v4975_v36  ;;  %v5114_v10 = vsel %vm14284_vm5, %v5111_v37, %v14283_v11  ;;  %v5271_v38 = vmax.f32 %v5230_v28, %v4975_v36  ;;  %v5370_v19 = vmax.f32 %v5340_v6, %v4975_v36  ;;  %vm14333_vm5 = vmmov %vm14251_vm0 }
 0x5c1   : > { %v14287_v52 = vmax.f32 %v11117_v53, 0.0  ;;  %v5309_v15 = vmax.f32 %v5270_v51, %v5112_v31  ;;  %v5401_v34 = vmax.f32 %v5369_v35, %v5112_v31  ;;  %v5115_v17 = vrot.slane %v14281_v30, 2 }
 0x5c2   : > { %v5200_v18 = vmax.f32 %v5060_v8, %v5114_v10  ;;  %5820 = vrot.lane.b32.xlu1 %v14286_v1, %s13335_s21  ;;  %v5310_v0 = vmax.f32 %v5271_v38, %v5114_v10  ;;  %v5231_v20 = vmax.f32 %v5199_v54, %v14281_v30  ;;  %v5402_v21 = vmax.f32 %v5370_v19, %v5114_v10  ;;  %v14299_v19 = vld [vmem:[#allocation258_spill] sm:$0xff] }
 0x5c3   : > { %5818 = vrot.lane.b32.xlu0 %v14287_v52, %s13335_s21  ;;  %v4978_v26 = vsel %vm1356_vm4, %v4976_v50, %v4977_v33  ;;  %v14289_v29 = vrot.slane %v14288_v59, 1  ;;  %v5116_v28 = vrot.slane %v14285_v13, 2  ;;  %v5341_v41 = vmax.f32 %v5309_v15, %v14281_v30 }
 0x5c4   : > { %v5232_v42 = vmax.f32 %v5200_v18, %v14285_v13  ;;  %v5061_v24 = vmax.f32 %v14281_v30, %v4978_v26  ;;  %v5428_v40 = vpack.c.bf16 %v5402_v21, %v5401_v34  ;;  %v5272_v43 = vmax.f32 %v5231_v20, %v4978_v26 }
 0x5c5   : > { %v4980_v53 = vsel %vm1356_vm4, %v4977_v33, %v14289_v29  ;;  %v14290_v32 = vmax.f32 %v11120_v55, 0.0  ;;  %v14291_v6 = vmax.f32 %v11110_v7, 0.0  ;;  %v5117_v39 = vsel %vm14292_vm6, %v5115_v17, %v5116_v28  ;;  %v14300_v33 = vld [vmem:[#allocation107_spill] sm:$0xff]  ;;  %vm14335_vm6 = vmmov %vm14251_vm0 }
 0x5c6   : > { %v5062_v2 = vmax.f32 %v14285_v13, %v4980_v53  ;;  %v5273_v37 = vmax.f32 %v5232_v42, %v4980_v53  ;;  %v14293_v3 = vrot.slane %v14288_v59, 2  ;;  %v5342_v12 = vmax.f32 %v5310_v0, %v14285_v13  ;;  %6667 = vmatmul.mubr.msk.bf16.gmra.mxu1 %vm553_vm1, %v5428_v40  ;;  %v14304_v59 = vld [vmem:[#allocation248_spill] sm:$0xff] }
 0x5c7   : > { %5824 = vrot.lane.b32.xlu1 %v14290_v32, %s13335_s21  ;;  %5822 = vrot.lane.b32.xlu0 %v14291_v6, %s13335_s21  ;;  %v4981_v4 = vrot.slane %v14295_v22, 1  ;;  %v5201_v61 = vmax.f32 %v5061_v24, %v5117_v39  ;;  %v5311_v56 = vmax.f32 %v5272_v43, %v5117_v39  ;;  %v4341_v7 = vsel %vm4323_vm14, %v11563_v57, %v4308_v9 }
 0x5c8   : > { %v5119_v46 = vsel %vm14294_vm12, %v5116_v28, %v14293_v3  ;;  %v5371_v30 = vmax.f32 %v5341_v41, %v4978_v26  ;;  %v5372_v50 = vmax.f32 %v5342_v12, %v4980_v53  ;;  %v4982_v8 = vrot.slane %v14296_v25, 1  ;;  %6640 = vmatprep.mubr.msk.bf16.mxu0 %vm4408_vm7, %v4341_v7  ;;  %vm14342_vm12 = vmmov %vm14251_vm0 }
 0x5c9   : > { %v5202_v55 = vmax.f32 %v5062_v2, %v5119_v46  ;;  %v5312_v36 = vmax.f32 %v5273_v37, %v5119_v46  ;;  %v5233_v31 = vmax.f32 %v5201_v61, %v14295_v22  ;;  %v5120_v10 = vrot.slane %v14295_v22, 2  ;;  %6641 = vmatmul.mubr.msk.bf16.gmra.mxu0 %vm4408_vm7, %v4343_v47 }
 0x5ca   : > { %v5121_v51 = vrot.slane %v14296_v25, 2  ;;  %v14297_v38 = vmax.f32 %v11220_v14, 0.0  ;;  %v14298_v57 = vmax.f32 %v11207_v44, 0.0  ;;  %v5403_v35 = vmax.f32 %v5371_v30, %v5117_v39  ;;  %v14307_v39 = vld [vmem:[#allocation243_spill] sm:$0xff] }
 0x5cb   : > { %v5234_v11 = vmax.f32 %v5202_v55, %v14296_v25  ;;  %v5404_v54 = vmax.f32 %v5372_v50, %v5119_v46  ;;  %v4983_v18 = vsel %vm1356_vm4, %v4981_v4, %v4982_v8  ;;  %v4986_v13 = vrot.slane %v14299_v19, 1 }
 0x5cc   : > { %5828 = vrot.lane.b32.xlu1 %v14297_v38, %s13335_s21  ;;  %5826 = vrot.lane.b32.xlu0 %v14298_v57, %s13335_s21  ;;  %v14301_v1 = vrot.slane %v14300_v33, 1  ;;  %v5063_v15 = vmax.f32 %v14295_v22, %v4983_v18  ;;  %v5122_v14 = vsel %vm14302_vm3, %v5120_v10, %v5121_v51  ;;  %v14303_v0 = vrot.slane %v14300_v33, 2  ;;  %vm14344_vm3 = vmmov %vm14251_vm0 }
 0x5cd   : > { %v5429_v34 = vpack.c.bf16 %v5404_v54, %v5403_v35  ;;  %v5274_v20 = vmax.f32 %v5233_v31, %v4983_v18  ;;  %v5343_v47 = vmax.f32 %v5311_v56, %v14295_v22  ;;  %v5344_v26 = vmax.f32 %v5312_v36, %v14296_v25 }
 0x5ce   : > { %v4985_v52 = vsel %vm1356_vm4, %v4982_v8, %v14301_v1  ;;  %v5124_v44 = vsel %vm14251_vm0, %v5121_v51, %v14303_v0  ;;  %v5203_v21 = vmax.f32 %v5063_v15, %v5122_v14  ;;  %v4987_v29 = vrot.slane %v14304_v59, 1  ;;  %v14318_v0 = vld [vmem:[#allocation264_spill] sm:$0xff] }
 0x5cf   : > { %v5064_v17 = vmax.f32 %v14296_v25, %v4985_v52  ;;  %v5275_v42 = vmax.f32 %v5234_v11, %v4985_v52  ;;  %v14305_v53 = vmax.f32 %v11210_v5, 0.0  ;;  %v14306_v24 = vmax.f32 %v11201_v27, 0.0  ;;  %6670 = vmatprep.mubr.msk.bf16.mxu1 %vm553_vm1, %v5429_v34  ;;  %v14314_v25 = vld [vmem:[#allocation244_spill] sm:$0xff]  ;;  %v14319_v34 = vld [vmem:[#allocation134_spill] sm:$0xff] }
 0x5d0   : > { %v5313_v41 = vmax.f32 %v5274_v20, %v5122_v14  ;;  %v5125_v2 = vrot.slane %v14299_v19, 2  ;;  %v5235_v43 = vmax.f32 %v5203_v21, %v14299_v19  ;;  %v5373_v37 = vmax.f32 %v5343_v47, %v4983_v18 }
 0x5d1   : > { %5832 = vrot.lane.b32.xlu1 %v14305_v53, %s13335_s21  ;;  %5830 = vrot.lane.b32.xlu0 %v14306_v24, %s13335_s21  ;;  %v5204_v28 = vmax.f32 %v5064_v17, %v5124_v44  ;;  %v5314_v40 = vmax.f32 %v5275_v42, %v5124_v44  ;;  %v5374_v32 = vmax.f32 %v5344_v26, %v4985_v52  ;;  %v14308_v3 = vrot.slane %v14307_v39, 1 }
 0x5d2   : > { %v4988_v6 = vsel %vm1356_vm4, %v4986_v13, %v4987_v29  ;;  %v5126_v12 = vrot.slane %v14304_v59, 2  ;;  %v5405_v22 = vmax.f32 %v5373_v37, %v5122_v14  ;;  %v14309_v55 = vmax.f32 %v11290_v60, 0.0 }
 0x5d3   : > { %v5236_v5 = vmax.f32 %v5204_v28, %v14304_v59  ;;  %v4990_v27 = vsel %vm1356_vm4, %v4987_v29, %v14308_v3  ;;  %v5065_v46 = vmax.f32 %v14299_v19, %v4988_v6  ;;  %v5406_v4 = vmax.f32 %v5374_v32, %v5124_v44 }
 0x5d4   : > { %v5066_v9 = vmax.f32 %v14304_v59, %v4990_v27  ;;  %v5276_v61 = vmax.f32 %v5235_v43, %v4988_v6  ;;  %v14310_v56 = vmax.f32 %v11273_v16, 0.0  ;;  %v5127_v36 = vsel %vm14311_vm2, %v5125_v2, %v5126_v12  ;;  %v14315_v16 = vld [vmem:[#allocation208_spill] sm:$0xff]  ;;  %vm14355_vm2 = vmmov %vm14251_vm0 }
 0x5d5   : > { %5836 = vrot.lane.b32.xlu1 %v14309_v55, %s13335_s21  ;;  %v14312_v7 = vrot.slane %v14307_v39, 2  ;;  %v5277_v50 = vmax.f32 %v5236_v5, %v4990_v27  ;;  %v4991_v8 = vrot.slane %v14314_v25, 1  ;;  %v5430_v31 = vpack.c.bf16 %v5406_v4, %v5405_v22  ;;  %v14327_v22 = vld [vmem:[#allocation136_spill] sm:$0xff] }
 0x5d6   : > { %5834 = vrot.lane.b32.xlu0 %v14310_v56, %s13335_s21  ;;  %v5205_v11 = vmax.f32 %v5065_v46, %v5127_v36  ;;  %v5315_v51 = vmax.f32 %v5276_v61, %v5127_v36  ;;  %v5345_v60 = vmax.f32 %v5313_v41, %v14299_v19  ;;  %v5346_v57 = vmax.f32 %v5314_v40, %v14304_v59 }
 0x5d7   : > { %v5129_v30 = vsel %vm14313_vm9, %v5126_v12, %v14312_v7  ;;  %v4992_v35 = vrot.slane %v14315_v16, 1  ;;  %6671 = vmatmul.mubr.msk.bf16.gmra.mxu1 %vm553_vm1, %v5430_v31  ;;  %v5130_v13 = vrot.slane %v14314_v25, 2  ;;  %v5131_v33 = vrot.slane %v14315_v16, 2  ;;  %vm14361_vm9 = vmmov %vm14251_vm0 }
 0x5d8   : > { %v5206_v10 = vmax.f32 %v5066_v9, %v5129_v30  ;;  %v5316_v38 = vmax.f32 %v5277_v50, %v5129_v30  ;;  %v5237_v54 = vmax.f32 %v5205_v11, %v14314_v25  ;;  %v14316_v1 = vmax.f32 %v11282_v48, 0.0 }
 0x5d9   : > { %v14317_v19 = vmax.f32 %v11262_v23, 0.0  ;;  %v5375_v52 = vmax.f32 %v5345_v60, %v4988_v6  ;;  %v5376_v15 = vmax.f32 %v5346_v57, %v4990_v27  ;;  %v4993_v14 = vsel %vm1356_vm4, %v4991_v8, %v4992_v35  ;;  %v14326_v6 = vld [vmem:[#allocation131_spill] sm:$0xff] }
 0x5da   : > { %v5238_v18 = vmax.f32 %v5206_v10, %v14315_v16  ;;  %5840 = vrot.lane.b32.xlu1 %v14316_v1, %s13335_s21  ;;  %v4996_v44 = vrot.slane %v14318_v0, 1  ;;  %v14320_v17 = vrot.slane %v14319_v34, 1  ;;  %v5067_v42 = vmax.f32 %v14314_v25, %v4993_v14  ;;  %v14332_v60 = vld [vmem:[#allocation123_spill] sm:$0xff] }
 0x5db   : > { %5838 = vrot.lane.b32.xlu0 %v14317_v19, %s13335_s21  ;;  %v5132_v21 = vsel %vm14321_vm15, %v5130_v13, %v5131_v33  ;;  %v14322_v48 = vrot.slane %v14319_v34, 2  ;;  %v5407_v23 = vmax.f32 %v5375_v52, %v5127_v36  ;;  %v5408_v26 = vmax.f32 %v5376_v15, %v5129_v30  ;;  %v14336_v19 = vld [vmem:[#allocation249_spill] sm:$0xff]  ;;  %v14338_v15 = vld [vmem:[#allocation115_spill] sm:$0xff]  ;;  %vm14363_vm15 = vmmov %vm14251_vm0 }
 0x5dc   : > { %v4995_v20 = vsel %vm1356_vm4, %v4992_v35, %v14320_v17  ;;  %v5278_v29 = vmax.f32 %v5237_v54, %v4993_v14  ;;  %v5207_v53 = vmax.f32 %v5067_v42, %v5132_v21  ;;  %v5347_v28 = vmax.f32 %v5315_v51, %v14314_v25  ;;  %v14331_v51 = vld [vmem:[#allocation80_spill] sm:$0xff] }
 0x5dd   : > { %v5134_v47 = vsel %vm14323_vm11, %v5131_v33, %v14322_v48  ;;  %v5068_v59 = vmax.f32 %v14315_v16, %v4995_v20  ;;  %v5279_v24 = vmax.f32 %v5238_v18, %v4995_v20  ;;  %v5348_v41 = vmax.f32 %v5316_v38, %v14315_v16  ;;  %v14340_v48 = vld [vmem:[#allocation114_spill] sm:$0xff]  ;;  %vm14370_vm11 = vmmov %vm14251_vm0 }
 0x5de   : > { %v14324_v40 = vmax.f32 %v11335_v63, 0.0  ;;  %v14325_v2 = vmax.f32 %v11323_v49, 0.0  ;;  %v5431_v43 = vpack.c.bf16 %v5408_v26, %v5407_v23  ;;  %v5317_v32 = vmax.f32 %v5278_v29, %v5132_v21 }
 0x5df   : > { %v5208_v37 = vmax.f32 %v5068_v59, %v5134_v47  ;;  %v4997_v5 = vrot.slane %v14326_v6, 1  ;;  %v5239_v39 = vmax.f32 %v5207_v53, %v14318_v0  ;;  %v5318_v3 = vmax.f32 %v5279_v24, %v5134_v47 }
 0x5e0   : > { %5844 = vrot.lane.b32.xlu1 %v14324_v40, %s13335_s21  ;;  %5842 = vrot.lane.b32.xlu0 %v14325_v2, %s13335_s21  ;;  %v5377_v27 = vmax.f32 %v5347_v28, %v4993_v14  ;;  %v5378_v46 = vmax.f32 %v5348_v41, %v4995_v20  ;;  %v14328_v4 = vrot.slane %v14327_v22, 1  ;;  %v5135_v9 = vrot.slane %v14318_v0, 2  ;;  %v4312_v20 = vpop.permute.xlu0 %4311 }
 0x5e1   : > { %6674 = vmatprep.mubr.msk.bf16.mxu1 %vm553_vm1, %v5431_v43  ;;  %v5240_v12 = vmax.f32 %v5208_v37, %v14326_v6  ;;  %v4998_v63 = vsel %vm1356_vm4, %v4996_v44, %v4997_v5  ;;  %v14329_v7 = vmax.f32 %v11326_v58, 0.0  ;;  %v14330_v30 = vmax.f32 %v11316_v45, 0.0  ;;  %v14345_v37 = vld [vmem:[#allocation43_spill] sm:$0xff] }
 0x5e2   : > { %v5000_v49 = vsel %vm1356_vm4, %v4997_v5, %v14328_v4  ;;  %v5409_v61 = vmax.f32 %v5377_v27, %v5132_v21  ;;  %v5410_v55 = vmax.f32 %v5378_v46, %v5134_v47  ;;  %v5069_v56 = vmax.f32 %v14318_v0, %v4998_v63  ;;  %v14349_v27 = vld [vmem:[#allocation247_spill] sm:$0xff] }
 0x5e3   : > { %v5070_v36 = vmax.f32 %v14326_v6, %v5000_v49  ;;  %v5136_v50 = vrot.slane %v14326_v6, 2  ;;  %v5280_v25 = vmax.f32 %v5239_v39, %v4998_v63  ;;  %v5281_v8 = vmax.f32 %v5240_v12, %v5000_v49  ;;  %v4314_v12 = vpop.permute.xlu1 %4313 }
 0x5e4   : > { %5848 = vrot.lane.b32.xlu1 %v14329_v7, %s13335_s21  ;;  %5846 = vrot.lane.b32.xlu0 %v14330_v30, %s13335_s21  ;;  %v5349_v31 = vmax.f32 %v5317_v32, %v14318_v0  ;;  %v5432_v11 = vpack.c.bf16 %v5410_v55, %v5409_v61  ;;  %v5350_v10 = vmax.f32 %v5318_v3, %v14326_v6  ;;  %v5001_v38 = vrot.slane %v14331_v51, 1  ;;  %v14351_v55 = vld [vmem:[#allocation245_spill] sm:$0xff] }
 0x5e5   : > { %v5002_v57 = vrot.slane %v14332_v60, 1  ;;  %v5137_v58 = vsel %vm14333_vm5, %v5135_v9, %v5136_v50  ;;  %v14334_v16 = vrot.slane %v14327_v22, 2  ;;  %v5140_v54 = vrot.slane %v14331_v51, 2  ;;  %v14350_v9 = vld [vmem:[#allocation103_spill] sm:$0xff] }
 0x5e6   : > { %v5379_v35 = vmax.f32 %v5349_v31, %v4998_v63  ;;  %6675 = vmatmul.mubr.msk.bf16.gmra.mxu1 %vm553_vm1, %v5432_v11  ;;  %v5209_v18 = vmax.f32 %v5069_v56, %v5137_v58  ;;  %v5319_v33 = vmax.f32 %v5280_v25, %v5137_v58  ;;  %v14337_v52 = vmax.f32 %v14336_v19, 0.0 }
 0x5e7   : > { %v5139_v45 = vsel %vm14335_vm6, %v5136_v50, %v14334_v16  ;;  %v14339_v14 = vmax.f32 %v14338_v15, 0.0  ;;  %v5380_v0 = vmax.f32 %v5350_v10, %v5000_v49  ;;  %v5003_v34 = vsel %vm1356_vm4, %v5001_v38, %v5002_v57  ;;  %v14352_v10 = vld [vmem:[#allocation109_spill] sm:$0xff] }
 0x5e8   : > { %v5210_v13 = vmax.f32 %v5070_v36, %v5139_v45  ;;  %v5320_v1 = vmax.f32 %v5281_v8, %v5139_v45  ;;  %5852 = vrot.lane.b32.xlu1 %v14337_v52, %s13335_s21  ;;  %v5411_v44 = vmax.f32 %v5379_v35, %v5137_v58  ;;  %v5141_v17 = vrot.slane %v14332_v60, 2 }
 0x5e9   : > { %5850 = vrot.lane.b32.xlu0 %v14339_v14, %s13335_s21  ;;  %v5241_v42 = vmax.f32 %v5209_v18, %v14331_v51  ;;  %v14341_v47 = vrot.slane %v14340_v48, 1  ;;  %v5071_v26 = vmax.f32 %v14331_v51, %v5003_v34  ;;  %v4345_v59 = vsel %vm4323_vm14, %v11570_v62, %v4312_v20  ;;  %v14347_v62 = vld [vmem:[#allocation98_spill] sm:$0xff] }
 0x5ea   : > { %v5242_v21 = vmax.f32 %v5210_v13, %v14332_v60  ;;  %v5412_v29 = vmax.f32 %v5380_v0, %v5139_v45  ;;  %v5142_v24 = vsel %vm14342_vm12, %v5140_v54, %v5141_v17  ;;  %6644 = vmatprep.mubr.msk.bf16.mxu0 %vm4408_vm7, %v4345_v59  ;;  %v14343_v28 = vrot.slane %v14340_v48, 2 }
 0x5eb   : > { %v5005_v23 = vsel %vm1356_vm4, %v5002_v57, %v14341_v47  ;;  %v5211_v40 = vmax.f32 %v5071_v26, %v5142_v24  ;;  %v5282_v2 = vmax.f32 %v5241_v42, %v5003_v34  ;;  %v14346_v32 = vmax.f32 %v14345_v37, 0.0  ;;  %v14357_v42 = vld [vmem:[#allocation165_spill] sm:$0xff] }
 0x5ec   : > { %v5072_v53 = vmax.f32 %v14332_v60, %v5005_v23  ;;  %v5144_v41 = vsel %vm14344_vm3, %v5141_v17, %v14343_v28  ;;  %v5283_v43 = vmax.f32 %v5242_v21, %v5005_v23  ;;  %v14348_v6 = vmax.f32 %v14347_v62, 0.0  ;;  %v14358_v28 = vld [vmem:[#allocation72_spill] sm:$0xff] }
 0x5ed   : > { %5856 = vrot.lane.b32.xlu1 %v14346_v32, %s13335_s21  ;;  %v5433_v5 = vpack.c.bf16 %v5412_v29, %v5411_v44  ;;  %v5351_v3 = vmax.f32 %v5319_v33, %v14331_v51  ;;  %v5006_v46 = vrot.slane %v14349_v27, 1  ;;  %v5243_v63 = vmax.f32 %v5211_v40, %v14349_v27 }
 0x5ee   : > { %5854 = vrot.lane.b32.xlu0 %v14348_v6, %s13335_s21  ;;  %v5212_v39 = vmax.f32 %v5072_v53, %v5144_v41  ;;  %v5321_v22 = vmax.f32 %v5282_v2, %v5142_v24  ;;  %v5322_v4 = vmax.f32 %v5283_v43, %v5144_v41  ;;  %v5352_v49 = vmax.f32 %v5320_v1, %v14332_v60  ;;  %v14360_v2 = vld [vmem:[#allocation104_spill] sm:$0xff] }
 0x5ef   : > { %v4347_v61 = vsel %vm4323_vm14, %v14350_v9, %v4314_v12  ;;  %6678 = vmatprep.mubr.msk.bf16.mxu1 %vm553_vm1, %v5433_v5  ;;  %v5381_v36 = vmax.f32 %v5351_v3, %v5003_v34  ;;  %v5007_v7 = vrot.slane %v14351_v55, 1  ;;  %v5145_v50 = vrot.slane %v14349_v27, 2  ;;  %v14356_v34 = vld [vmem:[#allocation242_spill] sm:$0xff] }
 0x5f0   : > { %v5244_v56 = vmax.f32 %v5212_v39, %v14351_v55  ;;  %6645 = vmatmul.mubr.msk.bf16.gmra.mxu0 %vm4408_vm7, %v4347_v61  ;;  %v5382_v30 = vmax.f32 %v5352_v49, %v5005_v23  ;;  %v5146_v25 = vrot.slane %v14351_v55, 2  ;;  %v5353_v8 = vmax.f32 %v5321_v22, %v14349_v27  ;;  %v14364_v22 = vld [vmem:[#allocation148_spill] sm:$0xff]  ;;  %v14366_v9 = vld [vmem:[#allocation250_spill] sm:$0xff] }
 0x5f1   : > { %v5413_v31 = vmax.f32 %v5381_v36, %v5142_v24  ;;  %v5008_v11 = vsel %vm1356_vm4, %v5006_v46, %v5007_v7  ;;  %v14353_v51 = vrot.slane %v14352_v10, 1  ;;  %v5354_v60 = vmax.f32 %v5322_v4, %v14351_v55 }
 0x5f2   : > { %v5414_v57 = vmax.f32 %v5382_v30, %v5144_v41  ;;  %v5073_v58 = vmax.f32 %v14349_v27, %v5008_v11  ;;  %v5147_v45 = vsel %vm14251_vm0, %v5145_v50, %v5146_v25  ;;  %v14354_v35 = vrot.slane %v14352_v10, 2 }
 0x5f3   : > { %v5010_v38 = vsel %vm1356_vm4, %v5007_v7, %v14353_v51  ;;  %v5284_v18 = vmax.f32 %v5243_v63, %v5008_v11  ;;  %v5383_v33 = vmax.f32 %v5353_v8, %v5008_v11  ;;  %v5011_v17 = vrot.slane %v14356_v34, 1 }
 0x5f4   : > { %v5074_v16 = vmax.f32 %v14351_v55, %v5010_v38  ;;  %v5149_v54 = vsel %vm14355_vm2, %v5146_v25, %v14354_v35  ;;  %v5285_v13 = vmax.f32 %v5244_v56, %v5010_v38  ;;  %v5434_v1 = vpack.c.bf16 %v5414_v57, %v5413_v31 }
 0x5f5   : > { %v5213_v19 = vmax.f32 %v5073_v58, %v5147_v45  ;;  %v5384_v15 = vmax.f32 %v5354_v60, %v5010_v38  ;;  %v5323_v14 = vmax.f32 %v5284_v18, %v5147_v45  ;;  %v5415_v44 = vmax.f32 %v5383_v33, %v5147_v45 }
 0x5f6   : > { %v5214_v52 = vmax.f32 %v5074_v16, %v5149_v54  ;;  %v5324_v0 = vmax.f32 %v5285_v13, %v5149_v54  ;;  %6679 = vmatmul.mubr.msk.bf16.gmra.mxu1 %vm553_vm1, %v5434_v1  ;;  %v5012_v47 = vrot.slane %v14357_v42, 1  ;;  %v5150_v23 = vrot.slane %v14356_v34, 2  ;;  %v14371_v1 = vld [vmem:[#allocation253_spill] sm:$0xff] }
 0x5f7   : > { %v5245_v20 = vmax.f32 %v5213_v19, %v14356_v34  ;;  %v5416_v48 = vmax.f32 %v5384_v15, %v5149_v54  ;;  %v5151_v26 = vrot.slane %v14357_v42, 2  ;;  %v5355_v59 = vmax.f32 %v5323_v14, %v14356_v34  ;;  %v14372_v14 = vld [vmem:[#allocation254_spill] sm:$0xff] }
 0x5f8   : > { %v5246_v21 = vmax.f32 %v5214_v52, %v14357_v42  ;;  %v5356_v29 = vmax.f32 %v5324_v0, %v14357_v42  ;;  %v5013_v24 = vsel %vm1356_vm4, %v5011_v17, %v5012_v47  ;;  %v14359_v41 = vrot.slane %v14358_v28, 1  ;;  %v4316_v17 = vpop.permute.xlu0 %4315 }
 0x5f9   : > { %v5435_v53 = vpack.c.bf16 %v5416_v48, %v5415_v44  ;;  %v5252_v43 = vrot.slane %v14360_v2, 1  ;;  %v5075_v37 = vmax.f32 %v14356_v34, %v5013_v24  ;;  %v5152_v62 = vsel %vm14361_vm9, %v5150_v23, %v5151_v26  ;;  %v14374_v48 = vld [vmem:[#allocation238_spill] sm:$0xff] }
 0x5fa   : > { %v5015_v40 = vsel %vm1356_vm4, %v5012_v47, %v14359_v41  ;;  %v14362_v6 = vrot.slane %v14358_v28, 2  ;;  %v5286_v39 = vmax.f32 %v5245_v20, %v5013_v24  ;;  %v5385_v27 = vmax.f32 %v5355_v59, %v5013_v24  ;;  %v14373_v20 = vld [vmem:[#allocation135_spill] sm:$0xff]  ;;  %v14375_v59 = vld [vmem:[#allocation100_spill] sm:$0xff]  ;;  %v12047_v41 = vld [vmem:[%s12830_s8] ss:$0 sm:$0xff] }
 0x5fb   : > { %v5076_v32 = vmax.f32 %v14357_v42, %v5015_v40  ;;  %6682 = vmatprep.mubr.msk.bf16.mxu1 %vm553_vm1, %v5435_v53  ;;  %v5287_v3 = vmax.f32 %v5246_v21, %v5015_v40  ;;  %v5386_v46 = vmax.f32 %v5356_v29, %v5015_v40  ;;  %v5215_v12 = vmax.f32 %v5075_v37, %v5152_v62  ;;  %v14376_v53 = vld [vmem:[#allocation241_spill] sm:$0xff] }
 0x5fc   : > { %v5154_v5 = vsel %vm14363_vm15, %v5151_v26, %v14362_v6  ;;  %v14365_v4 = vrot.slane %v14364_v22, 1  ;;  %v14367_v61 = vrot.slane %v14366_v9, 1  ;;  %v5325_v56 = vmax.f32 %v5286_v39, %v5152_v62  ;;  %v4318_v21 = vpop.permute.xlu1 %4317 }
 0x5fd   : > { %v5216_v63 = vmax.f32 %v5076_v32, %v5154_v5  ;;  %v5326_v36 = vmax.f32 %v5287_v3, %v5154_v5  ;;  %v5417_v7 = vmax.f32 %v5385_v27, %v5152_v62  ;;  %v5418_v30 = vmax.f32 %v5386_v46, %v5154_v5  ;;  %v12056_v32 = vld [vmem:[%s12831_s9] ss:$0 sm:$0xff] }
 0x5fe   : > { %v5253_v49 = vsel %vm1356_vm4, %v14365_v4, %v5252_v43  ;;  %v5255_v55 = vsel %vm1356_vm4, %v5252_v43, %v14367_v61  ;;  %v5247_v50 = vmax.f32 %v5215_v12, %v14364_v22  ;;  %v5290_v8 = vrot.slane %v14364_v22, 2  ;;  %vm14368_vm4 = vmmov %vm14251_vm0 }
 0x5ff   : > { %v5248_v25 = vmax.f32 %v5216_v63, %v14360_v2  ;;  %v5291_v31 = vrot.slane %v14360_v2, 2  ;;  %v5436_v11 = vpack.c.bf16 %v5418_v30, %v5417_v7  ;;  %v5357_v10 = vmax.f32 %v5325_v56, %v14364_v22 }
 0x600   : > { %v5358_v51 = vmax.f32 %v5326_v36, %v14360_v2  ;;  %v5288_v38 = vmax.f32 %v5247_v50, %v5253_v49  ;;  %v14369_v58 = vrot.slane %v14366_v9, 2  ;;  %v4349_v42 = vsel %vm4323_vm14, %v14373_v20, %v4316_v17 }
 0x601   : > { %v5289_v60 = vmax.f32 %v5248_v25, %v5255_v55  ;;  %v5292_v57 = vsel %vm14368_vm4, %v5290_v8, %v5291_v31  ;;  %6683 = vmatmul.mubr.msk.bf16.gmra.mxu1 %vm553_vm1, %v5436_v11  ;;  %v5387_v45 = vmax.f32 %v5357_v10, %v5253_v49  ;;  %6648 = vmatprep.mubr.msk.bf16.mxu0 %vm4408_vm7, %v4349_v42 }
 0x602   : > { %v5294_v16 = vsel %vm14370_vm11, %v5291_v31, %v14369_v58  ;;  %v5388_v35 = vmax.f32 %v5358_v51, %v5255_v55  ;;  %v5327_v54 = vmax.f32 %v5288_v38, %v5292_v57  ;;  %v4351_v47 = vsel %vm4323_vm14, %v14374_v48, %v4318_v21 }
 0x603   : > { %v5328_v18 = vmax.f32 %v5289_v60, %v5294_v16  ;;  %v5419_v13 = vmax.f32 %v5387_v45, %v5292_v57  ;;  %6649 = vmatmul.mubr.msk.bf16.gmra.mxu0 %vm4408_vm7, %v4351_v47 }
 0x604   : > { %v5420_v33 = vmax.f32 %v5388_v35, %v5294_v16  ;;  %v5389_v19 = vmax.f32 %v5327_v54, %v14371_v1 }
 0x605   : > { %v5390_v52 = vmax.f32 %v5328_v18, %v14371_v1 }
 0x606   : > { %v5437_v15 = vpack.c.bf16 %v5420_v33, %v5419_v13  ;;  %v5421_v0 = vmax.f32 %v5389_v19, %v14372_v14 }
 0x607   : > { %v5422_v44 = vmax.f32 %v5390_v52, %v14372_v14 }
 0x608   : > { %6686 = vmatprep.mubr.msk.bf16.mxu1 %vm553_vm1, %v5437_v15 }
 0x609   : > { %v5438_v34 = vpack.c.bf16 %v5422_v44, %v5421_v0 }
 0x60b   : > { %6687 = vmatmul.mubr.msk.bf16.gmra.mxu1 %vm553_vm1, %v5438_v34  ;;  %vm14388_vm1 = vcmask 261120  }
 0x60c   : > { %vm14399_vm5 = vmmov %vm14388_vm1 }
 0x60d   : > { %vm14400_vm6 = vmmov %vm14388_vm1 }
 0x60e   : > { %vm14405_vm12 = vmmov %vm14388_vm1 }
 0x60f   : > { %vm14406_vm3 = vmmov %vm14388_vm1 }
 0x610   : > { %vm14411_vm0 = vmmov %vm14388_vm1 }
 0x611   : > { %v4322_v23 = vpop.permute.xlu1 %4321  ;;  %v4320_v26 = vpop.permute.xlu0 %4319  ;;  %vm14412_vm2 = vmmov %vm14411_vm0 }
 0x612   : > { %v4355_v29 = vsel %vm4323_vm14, %v14375_v59, %v4322_v23  ;;  %v4353_v24 = vsel %vm4323_vm14, %v14376_v53, %v4320_v26  ;;  %vm14393_vm14 = vmmov %vm14388_vm1 }
 0x613   : > { %6652 = vmatprep.mubr.msk.bf16.mxu0 %vm4408_vm7, %v4353_v24  ;;  %vm14417_vm9 = vmmov %vm14411_vm0 }
 0x614   : > { %6653 = vmatmul.mubr.msk.bf16.gmra.mxu0 %vm4408_vm7, %v4355_v29  ;;  %vm14394_vm7 = vmmov %vm14388_vm1 }
 0x615   : > { %vm14418_vm15 = vmmov %vm14411_vm0 }
 0x616   : > { %vm14423_vm4 = vmmov %vm14411_vm0 }
 0x617   : > { %vm14424_vm11 = vmmov %vm14411_vm0 }
 0x663   : > { %v6626_v28 = vpop.f32.mrf.mxu0 }
 0x664   : > { %v4614_v43 = vmul.f32 %v6626_v28, %v12047_v41 }
 0x665   : > { %v4478_v40 = vpop.f32.mrf.mxu0  ;;  %v12049_v2 = vpop.f32.mrf.mxu1 }
 0x666   : > { %v4612_v37 = vmul.f32 %v12047_v41, %v4478_v40  ;;  %v4653_v27 = vadd.f32 %v12056_v32, %v4614_v43 }
 0x667   : > { %v6627_v62 = vpop.f32.mrf.mxu0  ;;  %v12060_v3 = vpop.f32.mrf.mxu1 }
 0x668   : > { %v4651_v6 = vadd.f32 %v12056_v32, %v4612_v37  ;;  %v4615_v5 = vmul.f32 %v6627_v62, %v12047_v41  ;;  %v4685_v61 = vmax.f32 %v4653_v27, 0.0 }
 0x669   : > { %v4481_v39 = vpop.f32.mrf.mxu0  ;;  %v12067_v9 = vpop.f32.mrf.mxu1 }
 0x66a   : > { %v4683_v46 = vmax.f32 %v4651_v6, 0.0  ;;  %v4613_v12 = vmul.f32 %v12047_v41, %v4481_v39  ;;  %v4654_v4 = vadd.f32 %v12056_v32, %v4615_v5 }
 0x66b   : > { %v6630_v63 = vpop.f32.mrf.mxu0  ;;  %v12074_v8 = vpop.f32.mrf.mxu1 }
 0x66c   : > { %v4652_v22 = vadd.f32 %v12056_v32, %v4613_v12  ;;  %5922 = vrot.lane.b32.xlu0 %v4683_v46, %s13360_s0  ;;  %v4618_v56 = vmul.f32 %v6630_v63, %v12047_v41  ;;  %v4686_v50 = vmax.f32 %v4654_v4, 0.0 }
 0x66d   : > { %v4494_v49 = vpop.f32.mrf.mxu0 }
 0x66e   : > { %v4684_v55 = vmax.f32 %v4652_v22, 0.0  ;;  %v4616_v36 = vmul.f32 %v12047_v41, %v4494_v49  ;;  %v4657_v31 = vadd.f32 %v12056_v32, %v4618_v56 }
 0x66f   : > { %v6631_v7 = vpop.f32.mrf.mxu0 }
 0x670   : > { %v4655_v30 = vadd.f32 %v12056_v32, %v4616_v36  ;;  %5926 = vrot.lane.b32.xlu0 %v4685_v61, %s13360_s0  ;;  %5924 = vrot.lane.b32.xlu1 %v4684_v55, %s13360_s0  ;;  %v4619_v10 = vmul.f32 %v6631_v7, %v12047_v41  ;;  %v4689_v45 = vmax.f32 %v4657_v31, 0.0 }
 0x671   : > { %v4497_v25 = vpop.f32.mrf.mxu0 }
 0x672   : > { %v4687_v11 = vmax.f32 %v4655_v30, 0.0  ;;  %v4617_v51 = vmul.f32 %v12047_v41, %v4497_v25  ;;  %v4658_v35 = vadd.f32 %v12056_v32, %v4619_v10 }
 0x673   : > { %v6634_v38 = vpop.f32.mrf.mxu0 }
 0x674   : > { %v4656_v60 = vadd.f32 %v12056_v32, %v4617_v51  ;;  %5928 = vrot.lane.b32.xlu1 %v4686_v50, %s13360_s0  ;;  %5930 = vrot.lane.b32.xlu0 %v4687_v11, %s13360_s0  ;;  %v4622_v57 = vmul.f32 %v6634_v38, %v12047_v41  ;;  %v4690_v14 = vmax.f32 %v4658_v35, 0.0 }
 0x675   : > { %v4510_v58 = vpop.f32.mrf.mxu0 }
 0x676   : > { %v4688_v54 = vmax.f32 %v4656_v60, 0.0  ;;  %v4620_v18 = vmul.f32 %v12047_v41, %v4510_v58  ;;  %v4661_v19 = vadd.f32 %v12056_v32, %v4622_v57 }
 0x677   : > { %v6635_v13 = vpop.f32.mrf.mxu0 }
 0x678   : > { %v4659_v1 = vadd.f32 %v12056_v32, %v4620_v18  ;;  %5934 = vrot.lane.b32.xlu0 %v4689_v45, %s13360_s0  ;;  %5932 = vrot.lane.b32.xlu1 %v4688_v54, %s13360_s0  ;;  %v4623_v44 = vmul.f32 %v6635_v13, %v12047_v41  ;;  %v4693_v21 = vmax.f32 %v4661_v19, 0.0 }
 0x679   : > { %v4513_v52 = vpop.f32.mrf.mxu0 }
 0x67a   : > { %v12083_v16 = vpop.f32.mrf.mxu1  ;;  %v4691_v0 = vmax.f32 %v4659_v1, 0.0  ;;  %v4621_v34 = vmul.f32 %v12047_v41, %v4513_v52  ;;  %v4662_v47 = vadd.f32 %v12056_v32, %v4623_v44  ;;  %v12152_v52 = vpop.permute.xlu0 %5794 }
 0x67b   : > { %v6638_v17 = vpop.f32.mrf.mxu0 }
 0x67c   : > { %v12087_v33 = vpop.f32.mrf.mxu1  ;;  %v4660_v42 = vadd.f32 %v12056_v32, %v4621_v34  ;;  %5936 = vrot.lane.b32.xlu1 %v4690_v14, %s13360_s0  ;;  %5938 = vrot.lane.b32.xlu0 %v4691_v0, %s13360_s0  ;;  %v4626_v26 = vmul.f32 %v6638_v17, %v12047_v41  ;;  %v4694_v37 = vmax.f32 %v4662_v47, 0.0 }
 0x67d   : > { %v4526_v48 = vpop.f32.mrf.mxu0 }
 0x67e   : > { %v12093_v15 = vpop.f32.mrf.mxu1  ;;  %v4692_v23 = vmax.f32 %v4660_v42, 0.0  ;;  %v4624_v59 = vmul.f32 %v12047_v41, %v4526_v48  ;;  %v4665_v62 = vadd.f32 %v12056_v32, %v4626_v26  ;;  %v12158_v42 = vpop.permute.xlu1 %5796 }
 0x67f   : > { %v6639_v29 = vpop.f32.mrf.mxu0 }
 0x680   : > { %v12097_v20 = vpop.f32.mrf.mxu1  ;;  %v4663_v24 = vadd.f32 %v12056_v32, %v4624_v59  ;;  %5942 = vrot.lane.b32.xlu0 %v4693_v21, %s13360_s0  ;;  %5940 = vrot.lane.b32.xlu1 %v4692_v23, %s13360_s0  ;;  %v4627_v28 = vmul.f32 %v6639_v29, %v12047_v41  ;;  %v4697_v22 = vmax.f32 %v4665_v62, 0.0  ;;  %v12163_v23 = vpop.permute.xlu0 %5798 }
 0x681   : > { %v4529_v40 = vpop.f32.mrf.mxu0 }
 0x682   : > { %v4695_v6 = vmax.f32 %v4663_v24, 0.0  ;;  %v4625_v5 = vmul.f32 %v12047_v41, %v4529_v40  ;;  %v4666_v46 = vadd.f32 %v12056_v32, %v4627_v28  ;;  %v12174_v62 = vpop.permute.xlu1 %5800 }
 0x684   : > { %v4664_v27 = vadd.f32 %v12056_v32, %v4625_v5  ;;  %5944 = vrot.lane.b32.xlu1 %v4694_v37, %s13360_s0  ;;  %5946 = vrot.lane.b32.xlu0 %v4695_v6, %s13360_s0  ;;  %v4698_v36 = vmax.f32 %v4666_v46, 0.0  ;;  %v12179_v46 = vpop.permute.xlu0 %5802 }
 0x686   : > { %v12105_v53 = vpop.f32.mrf.mxu1  ;;  %v4696_v4 = vmax.f32 %v4664_v27, 0.0 }
 0x688   : > { %v12111_v43 = vpop.f32.mrf.mxu1  ;;  %5950 = vrot.lane.b32.xlu0 %v4697_v22, %s13360_s0  ;;  %5948 = vrot.lane.b32.xlu1 %v4696_v4, %s13360_s0  ;;  %v12185_v4 = vpop.permute.xlu1 %5804 }
 0x689   : > { %v6642_v39 = vpop.f32.mrf.mxu0 }
 0x68a   : > { %v12119_v63 = vpop.f32.mrf.mxu1  ;;  %v4630_v49 = vmul.f32 %v6642_v39, %v12047_v41 }
 0x68b   : > { %v4542_v12 = vpop.f32.mrf.mxu0 }
 0x68c   : > { %v4628_v61 = vmul.f32 %v12047_v41, %v4542_v12  ;;  %v12126_v30 = vpop.f32.mrf.mxu1  ;;  %v4669_v50 = vadd.f32 %v12056_v32, %v4630_v49  ;;  %5952 = vrot.lane.b32.xlu1 %v4698_v36, %s13360_s0  ;;  %v12196_v36 = vpop.permute.xlu1 %5808 }
 0x68d   : > { %v6643_v55 = vpop.f32.mrf.mxu0 }
 0x68e   : > { %v4667_v56 = vadd.f32 %v12056_v32, %v4628_v61  ;;  %v4631_v31 = vmul.f32 %v6643_v55, %v12047_v41  ;;  %v4701_v38 = vmax.f32 %v4669_v50, 0.0  ;;  %v12190_v61 = vpop.permute.xlu0 %5806 }
 0x68f   : > { %v4545_v7 = vpop.f32.mrf.mxu0 }
 0x690   : > { %v4699_v25 = vmax.f32 %v4667_v56, 0.0  ;;  %v4629_v11 = vmul.f32 %v12047_v41, %v4545_v7  ;;  %v4670_v60 = vadd.f32 %v12056_v32, %v4631_v31  ;;  %v12204_v31 = vpop.permute.xlu1 %5812 }
 0x692   : > { %v4668_v10 = vadd.f32 %v12056_v32, %v4629_v11  ;;  %5954 = vrot.lane.b32.xlu0 %v4699_v25, %s13360_s0  ;;  %v4702_v35 = vmax.f32 %v4670_v60, 0.0  ;;  %v12198_v7 = vpop.permute.xlu0 %5810  ;;  %v12209_v11 = vld [vmem:[%s12833_s11] ss:$0 sm:$0xff] }
 0x694   : > { %v4700_v57 = vmax.f32 %v4668_v10, 0.0 }
 0x696   : > { %5958 = vrot.lane.b32.xlu0 %v4701_v38, %s13360_s0  ;;  %5956 = vrot.lane.b32.xlu1 %v4700_v57, %s13360_s0  ;;  %v12212_v60 = vpop.permute.xlu0 %5814  ;;  %v12217_v57 = vld [vmem:[%s12834_s12] ss:$0 sm:$0xff] }
 0x697   : > { %v12134_v51 = vpop.f32.mrf.mxu1 }
 0x699   : > { %v12137_v58 = vpop.f32.mrf.mxu1 }
 0x69a   : > { %5960 = vrot.lane.b32.xlu1 %v4702_v35, %s13360_s0 }
 0x69b   : > { %v12141_v45 = vpop.f32.mrf.mxu1 }
 0x69d   : > { %v12144_v54 = vpop.f32.mrf.mxu1 }
 0x6a6   : > { %v12146_v18 = vpop.f32.mrf.mxu1 }
 0x6a8   : > { %v12148_v13 = vpop.f32.mrf.mxu1 }
 0x6aa   : > { %v12150_v1 = vpop.f32.mrf.mxu1 }
 0x6ac   : > { %v12154_v0 = vpop.f32.mrf.mxu1 }
 0x6b0   : > { %v6646_v19 = vpop.f32.mrf.mxu0 }
 0x6b1   : > { %v4634_v44 = vmul.f32 %v6646_v19, %v12047_v41 }
 0x6b2   : > { %v4558_v14 = vpop.f32.mrf.mxu0 }
 0x6b3   : > { %v4632_v34 = vmul.f32 %v12047_v41, %v4558_v14  ;;  %v4673_v26 = vadd.f32 %v12056_v32, %v4634_v44  ;;  %v12222_v44 = vpop.permute.xlu1 %5816 }
 0x6b4   : > { %v6647_v17 = vpop.f32.mrf.mxu0 }
 0x6b5   : > { %v4671_v21 = vadd.f32 %v12056_v32, %v4632_v34  ;;  %v4635_v29 = vmul.f32 %v6647_v17, %v12047_v41  ;;  %v4705_v6 = vmax.f32 %v4673_v26, 0.0 }
 0x6b6   : > { %v4561_v48 = vpop.f32.mrf.mxu0  ;;  %v12161_v47 = vpop.f32.mrf.mxu1 }
 0x6b7   : > { %v4703_v59 = vmax.f32 %v4671_v21, 0.0  ;;  %v4633_v24 = vmul.f32 %v12047_v41, %v4561_v48  ;;  %v4674_v5 = vadd.f32 %v12056_v32, %v4635_v29  ;;  %v12226_v48 = vpop.permute.xlu0 %5818 }
 0x6b8   : > { %v12168_v28 = vpop.f32.mrf.mxu1 }
 0x6b9   : > { %v4672_v40 = vadd.f32 %v12056_v32, %v4633_v24  ;;  %5962 = vrot.lane.b32.xlu0 %v4703_v59, %s13360_s0  ;;  %v4706_v12 = vmax.f32 %v4674_v5, 0.0  ;;  %v12232_v5 = vpop.permute.xlu1 %5820 }
 0x6ba   : > { %v12172_v37 = vpop.f32.mrf.mxu1 }
 0x6bb   : > { %v4704_v39 = vmax.f32 %v4672_v40, 0.0 }
 0x6bc   : > { %v12177_v27 = vpop.f32.mrf.mxu1 }
 0x6bd   : > { %5966 = vrot.lane.b32.xlu0 %v4705_v6, %s13360_s0  ;;  %5964 = vrot.lane.b32.xlu1 %v4704_v39, %s13360_s0 }
 0x6c1   : > { %v12183_v22 = vpop.f32.mrf.mxu1  ;;  %5968 = vrot.lane.b32.xlu1 %v4706_v12, %s13360_s0  ;;  %v12236_v12 = vpop.permute.xlu0 %5822 }
 0x6c3   : > { %v12188_v49 = vpop.f32.mrf.mxu1  ;;  %v6650_v35 = vpop.f32.mrf.mxu0 }
 0x6c4   : > { %v4638_v34 = vmul.f32 %v6650_v35, %v12047_v41 }
 0x6c5   : > { %v12192_v55 = vpop.f32.mrf.mxu1  ;;  %v4574_v14 = vpop.f32.mrf.mxu0 }
 0x6c6   : > { %v4636_v17 = vmul.f32 %v12047_v41, %v4574_v14  ;;  %v4677_v29 = vadd.f32 %v12056_v32, %v4638_v34  ;;  %v12241_v14 = vpop.permute.xlu1 %5824 }
 0x6c7   : > { %v12194_v56 = vpop.f32.mrf.mxu1  ;;  %v6651_v21 = vpop.f32.mrf.mxu0  ;;  %14377 = vst [vmem:[#allocation251_spill] sm:$0xff] %v12241_v14 }
 0x6c8   : > { %v4675_v26 = vadd.f32 %v12056_v32, %v4636_v17  ;;  %v4639_v40 = vmul.f32 %v6651_v21, %v12047_v41  ;;  %v12243_v17 = vpop.permute.xlu0 %5826 }
 0x6c9   : > { %v4577_v59 = vpop.f32.mrf.mxu0  ;;  %14378 = vst [vmem:[#allocation70_spill] sm:$0xff] %v12243_v17 }
 0x6ca   : > { %v4707_v24 = vmax.f32 %v4675_v26, 0.0  ;;  %v4637_v6 = vmul.f32 %v12047_v41, %v4577_v59  ;;  %v12246_v59 = vpop.permute.xlu1 %5828 }
 0x6cb   : > { %v12200_v50 = vpop.f32.mrf.mxu1  ;;  %14379 = vst [vmem:[#allocation56_spill] sm:$0xff] %v12246_v59 }
 0x6cc   : > { %v4676_v39 = vadd.f32 %v12056_v32, %v4637_v6  ;;  %5970 = vrot.lane.b32.xlu0 %v4707_v24, %s13360_s0  ;;  %v12250_v6 = vpop.permute.xlu0 %5830 }
 0x6cd   : > { %v12202_v25 = vpop.f32.mrf.mxu1  ;;  %14380 = vst [vmem:[#allocation255_spill] sm:$0xff] %v12250_v6 }
 0x6ce   : > { %v4708_v35 = vmax.f32 %v4676_v39, 0.0  ;;  %v12258_v14 = vpop.permute.xlu1 %5832 }
 0x6cf   : > { %v6689_v10 = vpop.f32.mrf.mxu1 }
 0x6d0   : > { %v5690_v38 = vmul.f32 %v6689_v10, %v12209_v11  ;;  %v4709_v10 = vmax.f32 %v4677_v29, 0.0  ;;  %5972 = vrot.lane.b32.xlu1 %v4708_v35, %s13360_s0 }
 0x6d2   : > { %v12220_v19 = vadd.f32 %v12217_v57, %v5690_v38  ;;  %v4678_v38 = vadd.f32 %v12056_v32, %v4639_v40  ;;  %5974 = vrot.lane.b32.xlu0 %v4709_v10, %s13360_s0  ;;  %v5659_v10 = vmul.f32 %v12209_v11, %v12060_v3  ;;  %v12265_v3 = vpop.permute.xlu0 %5834 }
 0x6d4   : > { %v4710_v34 = vmax.f32 %v4678_v38, 0.0  ;;  %v6654_v21 = vpop.f32.mrf.mxu0 }
 0x6d5   : > { %v4642_v29 = vmul.f32 %v6654_v21, %v12047_v41 }
 0x6d6   : > { %5976 = vrot.lane.b32.xlu1 %v4710_v34, %s13360_s0  ;;  %v4590_v26 = vpop.f32.mrf.mxu0 }
 0x6d7   : > { %v4640_v24 = vmul.f32 %v12047_v41, %v4590_v26  ;;  %v4681_v35 = vadd.f32 %v12056_v32, %v4642_v29  ;;  %v5661_v26 = vmul.f32 %v12049_v2, %v12209_v11  ;;  %v5662_v2 = vmul.f32 %v12067_v9, %v12209_v11 }
 0x6d8   : > { %v6655_v40 = vpop.f32.mrf.mxu0  ;;  %v5665_v9 = vmul.f32 %v12083_v16, %v12209_v11 }
 0x6d9   : > { %v4679_v39 = vadd.f32 %v12056_v32, %v4640_v24  ;;  %v4643_v17 = vmul.f32 %v6655_v40, %v12047_v41  ;;  %v5698_v24 = vadd.f32 %v12217_v57, %v5659_v10  ;;  %v4713_v6 = vmax.f32 %v4681_v35, 0.0  ;;  %v12275_v40 = vpop.permute.xlu1 %5836 }
 0x6da   : > { %v4593_v38 = vpop.f32.mrf.mxu0 }
 0x6db   : > { %v4711_v34 = vmax.f32 %v4679_v39, 0.0  ;;  %v4641_v59 = vmul.f32 %v12047_v41, %v4593_v38  ;;  %v4682_v29 = vadd.f32 %v12056_v32, %v4643_v17  ;;  %v5660_v41 = vmul.f32 %v12209_v11, %v12074_v8  ;;  %v12280_v17 = vpop.permute.xlu0 %5838 }
 0x6dc   : > { %v5730_v38 = vmax.f32 %v5698_v24, 0.0 }
 0x6dd   : > { %v4680_v21 = vadd.f32 %v12056_v32, %v4641_v59  ;;  %5978 = vrot.lane.b32.xlu0 %v4711_v34, %s13360_s0  ;;  %v5700_v59 = vadd.f32 %v12217_v57, %v5661_v26  ;;  %v4714_v10 = vmax.f32 %v4682_v29, 0.0  ;;  %v5699_v35 = vadd.f32 %v12217_v57, %v5660_v41  ;;  %v12290_v24 = vpop.permute.xlu1 %5840 }
 0x6de   : > { %v5663_v32 = vmul.f32 %v12209_v11, %v12087_v33  ;;  %v5664_v26 = vmul.f32 %v12209_v11, %v12097_v20  ;;  %v5666_v29 = vmul.f32 %v12093_v15, %v12209_v11  ;;  %v5704_v41 = vadd.f32 %v12217_v57, %v5665_v9 }
 0x6df   : > { %v4712_v39 = vmax.f32 %v4680_v21, 0.0  ;;  %v5732_v8 = vmax.f32 %v5700_v59, 0.0  ;;  %v5731_v34 = vmax.f32 %v5699_v35, 0.0  ;;  %v5667_v20 = vmul.f32 %v12209_v11, %v12111_v43 }
 0x6e0   : > { %v5702_v21 = vadd.f32 %v12217_v57, %v5663_v32  ;;  %v5703_v59 = vadd.f32 %v12217_v57, %v5664_v26  ;;  %v5671_v26 = vmul.f32 %v12209_v11, %v12137_v58  ;;  %v5672_v58 = vmul.f32 %v12209_v11, %v12144_v54 }
 0x6e1   : > { %5982 = vrot.lane.b32.xlu0 %v4713_v6, %s13360_s0  ;;  %5980 = vrot.lane.b32.xlu1 %v4712_v39, %s13360_s0  ;;  %v5701_v6 = vadd.f32 %v12217_v57, %v5662_v2  ;;  %v12296_v39 = vpop.permute.xlu0 %5842  ;;  %v5705_v2 = vadd.f32 %v12217_v57, %v5666_v29  ;;  %v12307_v15 = vpop.permute.xlu1 %5844  ;;  %v5706_v32 = vadd.f32 %v12217_v57, %v5667_v20 }
 0x6e2   : > { %v5734_v16 = vmax.f32 %v5702_v21, 0.0  ;;  %v5735_v35 = vmax.f32 %v5703_v59, 0.0  ;;  %v5673_v29 = vmul.f32 %v12134_v51, %v12209_v11  ;;  %v5710_v59 = vadd.f32 %v12217_v57, %v5671_v26 }
 0x6e3   : > { %v5733_v33 = vmax.f32 %v5701_v6, 0.0  ;;  %v5737_v43 = vmax.f32 %v5705_v2, 0.0  ;;  %v5738_v9 = vmax.f32 %v5706_v32, 0.0  ;;  %v5674_v2 = vmul.f32 %v12141_v45, %v12209_v11 }
 0x6e4   : > { %v5712_v20 = vadd.f32 %v12217_v57, %v5673_v29  ;;  %v5675_v32 = vmul.f32 %v12209_v11, %v12148_v13  ;;  %v5677_v45 = vmul.f32 %v12146_v18, %v12209_v11 }
 0x6e5   : > { %6050 = vrot.lane.b32.xlu0 %v5730_v38, %s13298_s30  ;;  %5984 = vrot.lane.b32.xlu1 %v4714_v10, %s13360_s0  ;;  %v5669_v10 = vmul.f32 %v12105_v53, %v12209_v11  ;;  %v5736_v38 = vmax.f32 %v5704_v41, 0.0  ;;  %v12312_v6 = vpop.permute.xlu0 %5846  ;;  %v5670_v53 = vmul.f32 %v12119_v63, %v12209_v11 }
 0x6e6   : > { %v5744_v54 = vmax.f32 %v5712_v20, 0.0  ;;  %v5716_v29 = vadd.f32 %v12217_v57, %v5677_v45 }
 0x6e8   : > { %v5748_v20 = vmax.f32 %v5716_v29, 0.0 }
 0x6e9   : > { %6054 = vrot.lane.b32.xlu0 %v5732_v8, %s13298_s30  ;;  %6052 = vrot.lane.b32.xlu1 %v5731_v34, %s13298_s30  ;;  %v5668_v8 = vmul.f32 %v12209_v11, %v12126_v30  ;;  %v5708_v34 = vadd.f32 %v12217_v57, %v5669_v10  ;;  %v12328_v41 = vpop.permute.xlu0 %5850 }
 0x6eb   : > { %v5707_v21 = vadd.f32 %v12217_v57, %v5668_v8  ;;  %v5740_v30 = vmax.f32 %v5708_v34, 0.0 }
 0x6ed   : > { %6058 = vrot.lane.b32.xlu0 %v5734_v16, %s13298_s30  ;;  %6056 = vrot.lane.b32.xlu1 %v5733_v33, %s13298_s30  ;;  %v12322_v33 = vpop.permute.xlu1 %5848  ;;  %v5709_v16 = vadd.f32 %v12217_v57, %v5670_v53  ;;  %v5739_v63 = vmax.f32 %v5707_v21, 0.0  ;;  %v12344_v8 = vpop.permute.xlu0 %5854  ;;  %v5676_v53 = vmul.f32 %v12209_v11, %v12154_v0  ;;  %v5679_v0 = vmul.f32 %v12209_v11, %v12168_v28 }
 0x6ee   : > { %14381 = vst [vmem:[#allocation259_spill] sm:$0xff] %v12344_v8  ;;  %v5680_v28 = vmul.f32 %v12209_v11, %v12177_v27 }
 0x6ef   : > { %v5741_v10 = vmax.f32 %v5709_v16, 0.0  ;;  %v5715_v16 = vadd.f32 %v12217_v57, %v5676_v53 }
 0x6f1   : > { %6062 = vrot.lane.b32.xlu0 %v5736_v38, %s13298_s30  ;;  %6060 = vrot.lane.b32.xlu1 %v5735_v35, %s13298_s30  ;;  %v12339_v51 = vpop.permute.xlu1 %5852  ;;  %v5742_v38 = vmax.f32 %v5710_v59, 0.0  ;;  %v5711_v35 = vadd.f32 %v12217_v57, %v5672_v58  ;;  %v12356_v13 = vpop.permute.xlu0 %5922  ;;  %v5681_v58 = vmul.f32 %v12161_v47, %v12209_v11  ;;  %v5682_v47 = vmul.f32 %v12172_v37, %v12209_v11 }
 0x6f3   : > { %v5743_v34 = vmax.f32 %v5711_v35, 0.0  ;;  %v5720_v35 = vadd.f32 %v12217_v57, %v5681_v58  ;;  %v5721_v53 = vadd.f32 %v12217_v57, %v5682_v47  ;;  %v5640_v58 = vpop.f32.mrf.mxu1 }
 0x6f5   : > { %6066 = vrot.lane.b32.xlu0 %v5738_v9, %s13298_s30  ;;  %6064 = vrot.lane.b32.xlu1 %v5737_v43, %s13298_s30  ;;  %v5713_v43 = vadd.f32 %v12217_v57, %v5674_v2  ;;  %v5714_v9 = vadd.f32 %v12217_v57, %v5675_v32  ;;  %v12354_v21 = vpop.permute.xlu1 %5856  ;;  %v5747_v2 = vmax.f32 %v5715_v16, 0.0  ;;  %v5752_v27 = vmax.f32 %v5720_v35, 0.0 }
 0x6f6   : > { %14382 = vst [vmem:[#allocation121_spill] sm:$0xff] %v12354_v21  ;;  %v5753_v16 = vmax.f32 %v5721_v53, 0.0  ;;  %v5688_v35 = vmul.f32 %v12209_v11, %v5640_v58 }
 0x6f7   : > { %v5745_v26 = vmax.f32 %v5713_v43, 0.0  ;;  %v5746_v18 = vmax.f32 %v5714_v9, 0.0  ;;  %v5719_v43 = vadd.f32 %v12217_v57, %v5680_v28  ;;  %v5685_v9 = vmul.f32 %v12183_v22, %v12209_v11 }
 0x6f8   : > { %v5689_v28 = vmul.f32 %v12200_v50, %v12209_v11 }
 0x6f9   : > { %6070 = vrot.lane.b32.xlu0 %v5740_v30, %s13298_s30  ;;  %6068 = vrot.lane.b32.xlu1 %v5739_v63, %s13298_s30  ;;  %v5678_v30 = vmul.f32 %v12150_v1, %v12209_v11  ;;  %v12366_v63 = vpop.permute.xlu1 %5924  ;;  %v12373_v1 = vpop.permute.xlu0 %5926 }
 0x6fa   : > { %v5728_v47 = vadd.f32 %v12217_v57, %v5689_v28 }
 0x6fb   : > { %v5717_v59 = vadd.f32 %v12217_v57, %v5678_v30  ;;  %v5684_v30 = vmul.f32 %v12209_v11, %v12194_v56  ;;  %v5687_v56 = vmul.f32 %v12209_v11, %v12202_v25 }
 0x6fd   : > { %6074 = vrot.lane.b32.xlu0 %v5742_v38, %s13298_s30  ;;  %6072 = vrot.lane.b32.xlu1 %v5741_v10, %s13298_s30  ;;  %v5718_v10 = vadd.f32 %v12217_v57, %v5679_v0  ;;  %v5749_v38 = vmax.f32 %v5717_v59, 0.0  ;;  %v12381_v32 = vpop.permute.xlu1 %5928  ;;  %v12388_v45 = vpop.permute.xlu0 %5930  ;;  %v5723_v59 = vadd.f32 %v12217_v57, %v5684_v30 }
 0x701   : > { %6078 = vrot.lane.b32.xlu0 %v5744_v54, %s13298_s30  ;;  %6076 = vrot.lane.b32.xlu1 %v5743_v34, %s13298_s30  ;;  %v5750_v54 = vmax.f32 %v5718_v10, 0.0  ;;  %v5683_v34 = vmul.f32 %v12209_v11, %v12188_v49  ;;  %v12398_v29 = vpop.permute.xlu1 %5932  ;;  %v5724_v49 = vadd.f32 %v12217_v57, %v5685_v9  ;;  %v12405_v22 = vpop.permute.xlu0 %5934 }
 0x703   : > { %v5722_v37 = vadd.f32 %v12217_v57, %v5683_v34  ;;  %v5727_v34 = vadd.f32 %v12217_v57, %v5688_v35 }
 0x705   : > { %6082 = vrot.lane.b32.xlu0 %v5746_v18, %s13298_s30  ;;  %6080 = vrot.lane.b32.xlu1 %v5745_v26, %s13298_s30  ;;  %v5751_v26 = vmax.f32 %v5719_v43, 0.0  ;;  %v5686_v18 = vmul.f32 %v12192_v55, %v12209_v11  ;;  %v5754_v0 = vmax.f32 %v5722_v37, 0.0  ;;  %v12413_v10 = vpop.permute.xlu1 %5936  ;;  %v5755_v55 = vmax.f32 %v5723_v59, 0.0 }
 0x706   : > { %v5760_v11 = vmax.f32 %v5728_v47, 0.0  ;;  %v5759_v9 = vmax.f32 %v5727_v34, 0.0 }
 0x709   : > { %6086 = vrot.lane.b32.xlu0 %v5748_v20, %s13298_s30  ;;  %6084 = vrot.lane.b32.xlu1 %v5747_v2, %s13298_s30  ;;  %v5756_v20 = vmax.f32 %v5724_v49, 0.0  ;;  %v5725_v2 = vadd.f32 %v12217_v57, %v5686_v18 }
 0x70b   : > { %v5757_v25 = vmax.f32 %v5725_v2, 0.0 }
 0x70d   : > { %6090 = vrot.lane.b32.xlu0 %v5750_v54, %s13298_s30  ;;  %6088 = vrot.lane.b32.xlu1 %v5749_v38, %s13298_s30  ;;  %v5726_v38 = vadd.f32 %v12217_v57, %v5687_v56  ;;  %v12419_v54 = vpop.permute.xlu0 %5938 }
 0x70f   : > { %v5758_v43 = vmax.f32 %v5726_v38, 0.0 }
 0x711   : > { %6094 = vrot.lane.b32.xlu0 %v5752_v27, %s13298_s30  ;;  %6092 = vrot.lane.b32.xlu1 %v5751_v26, %s13298_s30  ;;  %v12425_v27 = vpop.permute.xlu1 %5940  ;;  %v12429_v50 = vpop.permute.xlu0 %5942  ;;  %v5761_v26 = vmax.f32 %v12220_v19, 0.0 }
 0x715   : > { %6098 = vrot.lane.b32.xlu0 %v5754_v0, %s13298_s30  ;;  %6096 = vrot.lane.b32.xlu1 %v5753_v16, %s13298_s30  ;;  %v12433_v53 = vpop.permute.xlu1 %5944  ;;  %v12436_v37 = vpop.permute.xlu0 %5946 }
 0x719   : > { %6102 = vrot.lane.b32.xlu0 %v5756_v20, %s13298_s30  ;;  %6100 = vrot.lane.b32.xlu1 %v5755_v55, %s13298_s30  ;;  %v12439_v57 = vpop.permute.xlu1 %5948  ;;  %v12441_v30 = vpop.permute.xlu0 %5950 }
 0x71d   : > { %6106 = vrot.lane.b32.xlu0 %v5758_v43, %s13298_s30  ;;  %6104 = vrot.lane.b32.xlu1 %v5757_v25, %s13298_s30  ;;  %v12443_v49 = vpop.permute.xlu1 %5952  ;;  %v12445_v18 = vpop.permute.xlu0 %5954  ;;  %v14385_v43 = vld [vmem:[#allocation7_spill] sm:$0xff] }
 0x71e   : > { %v14386_v34 = vmax.f32 %v14385_v43, 0.0 }
 0x721   : > { %6110 = vrot.lane.b32.xlu0 %v5760_v11, %s13298_s30  ;;  %6108 = vrot.lane.b32.xlu1 %v5759_v9, %s13298_s30  ;;  %v12447_v16 = vpop.permute.xlu1 %5956  ;;  %v12449_v0 = vpop.permute.xlu0 %5958  ;;  %v6146_v11 = vsel %vm1709_vm8, %v14386_v34, %v12152_v52  ;;  %v14391_v34 = vld [vmem:[#allocation6_spill] sm:$0xff] }
 0x722   : > { %v6178_v9 = vsel %vm1775_vm10, %v6146_v11, %v12356_v13  ;;  %v14392_v13 = vmax.f32 %v14391_v34, 0.0 }
 0x724   : > { %v6148_v11 = vsel %vm1709_vm8, %v14392_v13, %v12163_v23 }
 0x725   : > { %6112 = vrot.lane.b32.xlu1 %v5761_v26, %s13298_s30  ;;  %v12451_v59 = vpop.permute.xlu1 %5960  ;;  %s431_s30 = sand.u32 1, %s6879_s26  }
 0x726   : > { %s6354_s0 = sshll.u32 %s431_s30, 8  ;;  %s12781_s29 = scalar_lea.sflag [#allocation3], %s431_s30 }
 0x727   : > { %s12487_s1 = scalar_lea.vmem [#allocation2], %s6354_s0  ;;  %s6831_s0 = sshll.u32 %s6909_s2, 4  ;;  %s6832_s0 = int_to_ptr.vmem [resolvable:$false] %s6831_s0 }
 0x728   : > { %s6288_s15 = sshll.u32 %s12487_s1, 4  ;;  %s6833_s23 = scalar_lea.vmem %s6832_s0, 8192  ;;  %s12774_s15 = int_to_ptr.vmem [resolvable:$true] %s6288_s15 }
 0x729   : > { %s6827_s22 = scalar_lea.vmem %s12774_s15, 4096  ;;  %p6834_p0 = scmp.lt.s32.totalorder %s12774_s15, %s6832_s0 }
 0x72a   : > { %p6828_p11 = scmp.ne.s32.totalorder %s12774_s15, %s6827_s22  ;;  %p6835_p1 = scmp.lt.s32.totalorder %s6833_s23, %s6827_s22 }
 0x72b   : > { %v12453_v19 = vpop.permute.xlu0 %5962 }
 0x72c   : > { %p6829_p12 = pnand %p6828_p11, %p7019_p5  ;;  %p6836_p2 = por %p6835_p1, %p6834_p0 }
 0x72e   : > { %p6830_p13 = pneg %p6829_p12 }
 0x72f   : > { %v12455_v56 = vpop.permute.xlu1 %5964  ;;  %v12457_v58 = vpop.permute.xlu0 %5966 }
 0x730   : > { %p6837_p3 = pnand %p6836_p2, %p6830_p13 }
 0x733   : > { %v12459_v20 = vpop.permute.xlu1 %5968 }
 0x73e   : > { %v12461_v2 = vpop.permute.xlu0 %5970 }
 0x742   : > { %v12463_v55 = vpop.permute.xlu1 %5972 }
 0x744   : > { %v12465_v28 = vpop.permute.xlu0 %5974 }
 0x748   : > { %v12467_v38 = vpop.permute.xlu1 %5976 }
 0x74f   : > { %v12469_v35 = vpop.permute.xlu0 %5978 }
 0x753   : > { %v12472_v25 = vpop.permute.xlu1 %5980  ;;  %v12474_v47 = vpop.permute.xlu0 %5982 }
 0x754   : > { %14383 = vst [vmem:[#allocation66_spill] sm:$0xff] %v12472_v25  ;;  %14384 = vst [vmem:[#allocation124_spill] sm:$0xff] %v12474_v47  ;;  %v14389_v47 = vld [vmem:[#allocation9_spill] sm:$0xff] }
 0x755   : > { %v14390_v43 = vmax.f32 %v14389_v47, 0.0 }
 0x757   : > { %v12484_v26 = vpop.permute.xlu1 %5984  ;;  %v6051_v21 = vpop.permute.xlu0 %6050  ;;  %v6147_v52 = vsel %vm1709_vm8, %v14390_v43, %v12158_v42  ;;  %v14395_v42 = vld [vmem:[#allocation8_spill] sm:$0xff]  ;;  %v14397_v43 = vld [vmem:[#allocation11_spill] sm:$0xff] }
 0x758   : > { %14387 = vst [vmem:[#allocation71_spill] sm:$0xff] %v12484_v26  ;;  %v6210_v8 = vsel %vm1841_vm13, %v6178_v9, %v6051_v21  ;;  %v6179_v21 = vsel %vm1775_vm10, %v6147_v52, %v12366_v63  ;;  %v6180_v9 = vsel %vm1775_vm10, %v6148_v11, %v12373_v1  ;;  %v14396_v23 = vmax.f32 %v14395_v42, 0.0 }
 0x759   : > { %6242 = vst.msk [vmem:[%s12487_s1] sm:$0xff] %vm14388_vm1, %v6210_v8  ;;  %v14398_v52 = vmax.f32 %v14397_v43, 0.0  ;;  %vm14429_vm1 = vmmov %vm14411_vm0 }
 0x75a   : > { %v6149_v63 = vsel %vm1709_vm8, %v14396_v23, %v12174_v62  ;;  %v14401_v62 = vld [vmem:[#allocation13_spill] sm:$0xff] }
 0x75b   : > { %v6053_v26 = vpop.permute.xlu1 %6052  ;;  %v6055_v8 = vpop.permute.xlu0 %6054  ;;  %v6150_v1 = vsel %vm1709_vm8, %v14398_v52, %v12179_v46  ;;  %v6181_v34 = vsel %vm1775_vm10, %v6149_v63, %v12381_v32  ;;  %v14402_v46 = vmax.f32 %v14401_v62, 0.0 }
 0x75c   : > { %v6211_v25 = vsel %vm1841_vm13, %v6179_v21, %v6053_v26  ;;  %v6212_v47 = vsel %vm1841_vm13, %v6180_v9, %v6055_v8  ;;  %v6182_v26 = vsel %vm1775_vm10, %v6150_v1, %v12388_v45  ;;  %v14403_v9 = vld [vmem:[#allocation10_spill] sm:$0xff]  ;;  %v14409_v1 = vld [vmem:[#allocation16_spill] sm:$0xff] }
 0x75d   : > { %6243 = vst.msk [vmem:[%s12487_s1 + $0x8] sm:$0xff] %vm14393_vm14, %v6211_v25  ;;  %v6151_v32 = vsel %vm1709_vm8, %v14402_v46, %v12185_v4  ;;  %v14404_v8 = vmax.f32 %v14403_v9, 0.0  ;;  %v14407_v4 = vld [vmem:[#allocation12_spill] sm:$0xff]  ;;  %v14415_v46 = vld [vmem:[#allocation14_spill] sm:$0xff]  ;;  %vm14430_vm14 = vmmov %vm14411_vm0 }
 0x75e   : > { %6244 = vst.msk [vmem:[%s12487_s1 + $0x10] sm:$0xff] %vm14394_vm7, %v6212_v47  ;;  %v6183_v47 = vsel %vm1775_vm10, %v6151_v32, %v12398_v29  ;;  %v14416_v32 = vmax.f32 %v14415_v46, 0.0  ;;  %v14435_v46 = vld [vmem:[#allocation24_spill] sm:$0xff]  ;;  %vm14437_vm7 = vmmov %vm14411_vm0 }
 0x75f   : > { %v6057_v25 = vpop.permute.xlu1 %6056  ;;  %v6059_v13 = vpop.permute.xlu0 %6058  ;;  %v6152_v45 = vsel %vm1709_vm8, %v14404_v8, %v12190_v61  ;;  %v14408_v61 = vmax.f32 %v14407_v4, 0.0 }
 0x760   : > { %v6213_v11 = vsel %vm1841_vm13, %v6181_v34, %v6057_v25  ;;  %v6214_v21 = vsel %vm1841_vm13, %v6182_v26, %v6059_v13  ;;  %v6184_v42 = vsel %vm1775_vm10, %v6152_v45, %v12405_v22  ;;  %v14410_v34 = vmax.f32 %v14409_v1, 0.0 }
 0x761   : > { %6245 = vst.msk [vmem:[%s12487_s1 + $0x18] sm:$0xff] %vm14399_vm5, %v6213_v11  ;;  %v6153_v29 = vsel %vm1709_vm8, %v14408_v61, %v12196_v36  ;;  %v14413_v36 = vld [vmem:[#allocation17_spill] sm:$0xff]  ;;  %vm14438_vm5 = vmmov %vm14411_vm0 }
 0x762   : > { %6246 = vst.msk [vmem:[%s12487_s1 + $0x20] sm:$0xff] %vm14400_vm6, %v6214_v21  ;;  %v6154_v22 = vsel %vm1709_vm8, %v14410_v34, %v12198_v7  ;;  %v6185_v26 = vsel %vm1775_vm10, %v6153_v29, %v12413_v10  ;;  %v14414_v7 = vmax.f32 %v14413_v36, 0.0  ;;  %vm14445_vm6 = vmmov %vm14411_vm0 }
 0x763   : > { %v6061_v23 = vpop.permute.xlu1 %6060  ;;  %v6063_v63 = vpop.permute.xlu0 %6062  ;;  %v6186_v25 = vsel %vm1775_vm10, %v6154_v22, %v12419_v54  ;;  %v6156_v54 = vsel %vm1709_vm8, %v14416_v32, %v12212_v60  ;;  %v14427_v22 = vld [vmem:[#allocation18_spill] sm:$0xff]  ;;  %v14436_v32 = vmax.f32 %v14435_v46, 0.0  ;;  %v14460_v46 = vld [vmem:[#allocation27_spill] sm:$0xff] }
 0x764   : > { %v6215_v43 = vsel %vm1841_vm13, %v6183_v47, %v6061_v23  ;;  %v6216_v52 = vsel %vm1841_vm13, %v6184_v42, %v6063_v63  ;;  %v6155_v10 = vsel %vm1709_vm8, %v14414_v7, %v12204_v31  ;;  %v6188_v8 = vsel %vm1775_vm10, %v6156_v54, %v12429_v50  ;;  %v14419_v31 = vld [vmem:[#allocation15_spill] sm:$0xff]  ;;  %v14421_v63 = vld [vmem:[#allocation20_spill] sm:$0xff] }
 0x765   : > { %6247 = vst.msk [vmem:[%s12487_s1 + $0x28] sm:$0xff] %vm14405_vm12, %v6215_v43  ;;  %v6187_v9 = vsel %vm1775_vm10, %v6155_v10, %v12425_v27  ;;  %v14420_v60 = vmax.f32 %v14419_v31, 0.0  ;;  %v14422_v43 = vmax.f32 %v14421_v63, 0.0  ;;  %v14434_v10 = vld [vmem:[#allocation70_spill] sm:$0xff]  ;;  %v14440_v31 = vld [vmem:[#allocation25_spill] sm:$0xff]  ;;  %vm14446_vm12 = vmmov %vm14411_vm0 }
 0x766   : > { %6248 = vst.msk [vmem:[%s12487_s1 + $0x30] sm:$0xff] %vm14406_vm3, %v6216_v52  ;;  %v14443_v63 = vld [vmem:[#allocation22_spill] sm:$0xff]  ;;  %vm14451_vm3 = vmmov %vm14411_vm0 }
 0x767   : > { %v6065_v13 = vpop.permute.xlu1 %6064  ;;  %v6067_v11 = vpop.permute.xlu0 %6066  ;;  %v6157_v27 = vsel %vm1709_vm8, %v14420_v60, %v12222_v44  ;;  %v6158_v50 = vsel %vm1709_vm8, %v14422_v43, %v12226_v48  ;;  %v14425_v44 = vld [vmem:[#allocation21_spill] sm:$0xff]  ;;  %v14441_v60 = vmax.f32 %v14440_v31, 0.0  ;;  %v14444_v43 = vmax.f32 %v14443_v63, 0.0 }
 0x768   : > { %v6217_v21 = vsel %vm1841_vm13, %v6185_v26, %v6065_v13  ;;  %v6218_v62 = vsel %vm1841_vm13, %v6186_v25, %v6067_v11  ;;  %v6189_v52 = vsel %vm1775_vm10, %v6157_v27, %v12433_v53  ;;  %v6190_v4 = vsel %vm1775_vm10, %v6158_v50, %v12436_v37  ;;  %v14442_v27 = vld [vmem:[#allocation255_spill] sm:$0xff] }
 0x769   : > { %6249 = vst.msk [vmem:[%s12487_s1 + $0x38] sm:$0xff] %vm14411_vm0, %v6217_v21  ;;  %v14426_v48 = vmax.f32 %v14425_v44, 0.0  ;;  %v14428_v26 = vmax.f32 %v14427_v22, 0.0 }
 0x76a   : > { %6250 = vst.msk [vmem:[%s12487_s1 + $0x40] sm:$0xff] %vm14412_vm2, %v6218_v62  ;;  %vm14456_vm2 = vmmov %vm14411_vm0 }
 0x76b   : > { %v6069_v45 = vpop.permute.xlu1 %6068  ;;  %v6071_v47 = vpop.permute.xlu0 %6070  ;;  %v6159_v53 = vsel %vm1709_vm8, %v14426_v48, %v12232_v5  ;;  %v6160_v37 = vsel %vm1709_vm8, %v14428_v26, %v12236_v12  ;;  %v14431_v5 = vld [vmem:[#allocation251_spill] sm:$0xff]  ;;  %v14449_v48 = vld [vmem:[#allocation32_spill] sm:$0xff] }
 0x76c   : > { %v6219_v42 = vsel %vm1841_vm13, %v6187_v9, %v6069_v45  ;;  %v6220_v23 = vsel %vm1841_vm13, %v6188_v8, %v6071_v47  ;;  %v6191_v25 = vsel %vm1775_vm10, %v6159_v53, %v12439_v57  ;;  %v6192_v13 = vsel %vm1775_vm10, %v6160_v37, %v12441_v30  ;;  %v14432_v12 = vld [vmem:[#allocation19_spill] sm:$0xff] }
 0x76d   : > { %6251 = vst.msk [vmem:[%s12487_s1 + $0x48] sm:$0xff] %vm14417_vm9, %v6219_v42  ;;  %v14433_v7 = vmax.f32 %v14432_v12, 0.0  ;;  %v6162_v30 = vsel %vm1709_vm8, %v14436_v32, %v14434_v10  ;;  %v14450_v53 = vmax.f32 %v14449_v48, 0.0  ;;  %vm14457_vm9 = vmmov %vm14411_vm0  ;;  %v14461_v32 = vmax.f32 %v14460_v46, 0.0 }
 0x76e   : > { %6252 = vst.msk [vmem:[%s12487_s1 + $0x50] sm:$0xff] %vm14418_vm15, %v6220_v23  ;;  %v6194_v9 = vsel %vm1775_vm10, %v6162_v30, %v12445_v18  ;;  %v14439_v23 = vld [vmem:[#allocation56_spill] sm:$0xff]  ;;  %v6164_v18 = vsel %vm1709_vm8, %v14444_v43, %v14442_v27  ;;  %vm14462_vm15 = vmmov %vm14411_vm0 }
 0x76f   : > { %v6073_v61 = vpop.permute.xlu1 %6072  ;;  %v6075_v29 = vpop.permute.xlu0 %6074  ;;  %v6161_v57 = vsel %vm1709_vm8, %v14433_v7, %v14431_v5 }
 0x770   : > { %v6221_v1 = vsel %vm1841_vm13, %v6189_v52, %v6073_v61  ;;  %v6222_v34 = vsel %vm1841_vm13, %v6190_v4, %v6075_v29  ;;  %v6193_v54 = vsel %vm1775_vm10, %v6161_v57, %v12443_v49  ;;  %v6163_v49 = vsel %vm1709_vm8, %v14441_v60, %v14439_v23 }
 0x771   : > { %6253 = vst.msk [vmem:[%s12487_s1 + $0x58] sm:$0xff] %vm14423_vm4, %v6221_v1  ;;  %v6195_v50 = vsel %vm1775_vm10, %v6163_v49, %v12447_v16  ;;  %v6196_v52 = vsel %vm1775_vm10, %v6164_v18, %v12449_v0  ;;  %v6166_v0 = vsel %vm1709_vm8, %v14450_v53, %v12265_v3  ;;  %vm14463_vm4 = vmmov %vm14411_vm0  ;;  %v14472_v18 = vld [vmem:[#allocation35_spill] sm:$0xff]  ;;  %v14481_v53 = vld [vmem:[#allocation66_spill] sm:$0xff] }
 0x772   : > { %6254 = vst.msk [vmem:[%s12487_s1 + $0x60] sm:$0xff] %vm14424_vm11, %v6222_v34  ;;  %v14447_v34 = vld [vmem:[#allocation23_spill] sm:$0xff]  ;;  %v6198_v26 = vsel %vm1775_vm10, %v6166_v0, %v12453_v19  ;;  %vm14468_vm11 = vmmov %vm14411_vm0 }
 0x773   : > { %v6077_v11 = vpop.permute.xlu1 %6076  ;;  %v6079_v21 = vpop.permute.xlu0 %6078  ;;  %v14448_v44 = vmax.f32 %v14447_v34, 0.0 }
 0x774   : > { %v6223_v62 = vsel %vm1841_vm13, %v6191_v25, %v6077_v11  ;;  %v6224_v36 = vsel %vm1841_vm13, %v6192_v13, %v6079_v21  ;;  %v14454_v21 = vld [vmem:[#allocation28_spill] sm:$0xff] }
 0x775   : > { %6255 = vst.msk [vmem:[%s12487_s1 + $0x68] sm:$0xff] %vm14429_vm1, %v6223_v62  ;;  %v6165_v16 = vsel %vm1709_vm8, %v14448_v44, %v12258_v14  ;;  %v14452_v14 = vld [vmem:[#allocation34_spill] sm:$0xff]  ;;  %v14455_v62 = vmax.f32 %v14454_v21, 0.0  ;;  %vm14469_vm1 = vmmov %vm14411_vm0  ;;  %v14478_v44 = vld [vmem:[#allocation259_spill] sm:$0xff] }
 0x776   : > { %6256 = vst.msk [vmem:[%s12487_s1 + $0x70] sm:$0xff] %vm14430_vm14, %v6224_v36  ;;  %v6197_v22 = vsel %vm1775_vm10, %v6165_v16, %v12451_v59  ;;  %v14453_v3 = vmax.f32 %v14452_v14, 0.0  ;;  %vm14474_vm14 = vmmov %vm14411_vm0  ;;  %v14486_v14 = vld [vmem:[#allocation36_spill] sm:$0xff]  ;;  %v14488_v21 = vld [vmem:[#allocation71_spill] sm:$0xff] }
 0x777   : > { %v6081_v8 = vpop.permute.xlu1 %6080  ;;  %v6083_v45 = vpop.permute.xlu0 %6082  ;;  %v6168_v19 = vsel %vm1709_vm8, %v14455_v62, %v12280_v17 }
 0x778   : > { %v6225_v47 = vsel %vm1841_vm13, %v6193_v54, %v6081_v8  ;;  %v6226_v42 = vsel %vm1841_vm13, %v6194_v9, %v6083_v45  ;;  %v6167_v59 = vsel %vm1709_vm8, %v14453_v3, %v12275_v40  ;;  %v6200_v5 = vsel %vm1775_vm10, %v6168_v19, %v12457_v58  ;;  %v14458_v40 = vld [vmem:[#allocation30_spill] sm:$0xff] }
 0x779   : > { %6257 = vst.msk [vmem:[%s12487_s1 + $0x78] sm:$0xff] %vm14437_vm7, %v6225_v47  ;;  %v6199_v36 = vsel %vm1775_vm10, %v6167_v59, %v12455_v56  ;;  %v14459_v17 = vmax.f32 %v14458_v40, 0.0  ;;  %v6170_v58 = vsel %vm1709_vm8, %v14461_v32, %v12296_v39  ;;  %vm14475_vm7 = vmmov %vm14411_vm0  ;;  %v14487_v3 = vmax.f32 %v14486_v14, 0.0 }
 0x77a   : > { %6258 = vst.msk [vmem:[%s12487_s1 + $0x80] sm:$0xff] %vm14438_vm5, %v6226_v42  ;;  %v6202_v54 = vsel %vm1775_vm10, %v6170_v58, %v12461_v2  ;;  %v14466_v42 = vld [vmem:[#allocation26_spill] sm:$0xff]  ;;  %vm14483_vm5 = vmmov %vm14411_vm0 }
 0x77b   : > { %v6085_v4 = vpop.permute.xlu1 %6084  ;;  %v6087_v61 = vpop.permute.xlu0 %6086  ;;  %v6169_v56 = vsel %vm1709_vm8, %v14459_v17, %v12290_v24  ;;  %v14464_v24 = vld [vmem:[#allocation31_spill] sm:$0xff]  ;;  %v14467_v23 = vmax.f32 %v14466_v42, 0.0 }
 0x77c   : > { %v6227_v29 = vsel %vm1841_vm13, %v6195_v50, %v6085_v4  ;;  %v6228_v1 = vsel %vm1841_vm13, %v6196_v52, %v6087_v61  ;;  %v6201_v30 = vsel %vm1775_vm10, %v6169_v56, %v12459_v20  ;;  %v14465_v39 = vmax.f32 %v14464_v24, 0.0 }
 0x77d   : > { %6259 = vst.msk [vmem:[%s12487_s1 + $0x88] sm:$0xff] %vm14445_vm6, %v6227_v29  ;;  %v6172_v2 = vsel %vm1709_vm8, %v14467_v23, %v12312_v6  ;;  %v14473_v50 = vmax.f32 %v14472_v18, 0.0  ;;  %vm14484_vm6 = vmmov %vm14411_vm0 }
 0x77e   : > { %6260 = vst.msk [vmem:[%s12487_s1 + $0x90] sm:$0xff] %vm14446_vm12, %v6228_v1  ;;  %v6171_v20 = vsel %vm1709_vm8, %v14465_v39, %v12307_v15  ;;  %v6204_v60 = vsel %vm1775_vm10, %v6172_v2, %v12465_v28  ;;  %v14470_v15 = vld [vmem:[#allocation29_spill] sm:$0xff]  ;;  %vm14489_vm12 = vmmov %vm14411_vm0 }
 0x77f   : > { %v6089_v37 = vpop.permute.xlu1 %6088  ;;  %v6091_v25 = vpop.permute.xlu0 %6090  ;;  %v6203_v31 = vsel %vm1775_vm10, %v6171_v20, %v12463_v55  ;;  %v14471_v6 = vmax.f32 %v14470_v15, 0.0  ;;  %v6174_v28 = vsel %vm1709_vm8, %v14473_v50, %v12328_v41  ;;  %v14476_v41 = vld [vmem:[#allocation37_spill] sm:$0xff] }
 0x780   : > { %v6229_v13 = vsel %vm1841_vm13, %v6197_v22, %v6089_v37  ;;  %v6230_v11 = vsel %vm1841_vm13, %v6198_v26, %v6091_v25  ;;  %v6206_v4 = vsel %vm1775_vm10, %v6174_v28, %v12469_v35  ;;  %v14477_v34 = vmax.f32 %v14476_v41, 0.0  ;;  %v14479_v35 = vld [vmem:[#allocation33_spill] sm:$0xff]  ;;  %v14482_v22 = vld [vmem:[#allocation124_spill] sm:$0xff] }
 0x781   : > { %6261 = vst.msk [vmem:[%s12487_s1 + $0x98] sm:$0xff] %vm14451_vm3, %v6229_v13  ;;  %v6173_v55 = vsel %vm1709_vm8, %v14471_v6, %v12322_v33  ;;  %v14480_v16 = vmax.f32 %v14479_v35, 0.0 }
 0x782   : > { %6262 = vst.msk [vmem:[%s12487_s1 + $0xa0] sm:$0xff] %vm14411_vm0, %v6230_v11  ;;  %v6205_v52 = vsel %vm1775_vm10, %v6173_v55, %v12467_v38  ;;  %v6175_v38 = vsel %vm1709_vm8, %v14477_v34, %v12339_v51  ;;  %v14485_v11 = vld [vmem:[#allocation121_spill] sm:$0xff] }
 0x783   : > { %v6093_v12 = vpop.permute.xlu1 %6092  ;;  %v6095_v7 = vpop.permute.xlu0 %6094  ;;  %v6176_v48 = vsel %vm1709_vm8, %v14480_v16, %v14478_v44  ;;  %v6207_v0 = vsel %vm1775_vm10, %v6175_v38, %v14481_v53  ;;  %v6177_v59 = vsel %vm1709_vm8, %v14487_v3, %v14485_v11 }
 0x784   : > { %v6231_v57 = vsel %vm1841_vm13, %v6199_v36, %v6093_v12  ;;  %v6232_v10 = vsel %vm1841_vm13, %v6200_v5, %v6095_v7  ;;  %v6208_v26 = vsel %vm1775_vm10, %v6176_v48, %v14482_v22  ;;  %v6209_v62 = vsel %vm1775_vm10, %v6177_v59, %v14488_v21 }
 0x785   : > { %6263 = vst.msk [vmem:[%s12487_s1 + $0xa8] sm:$0xff] %vm14456_vm2, %v6231_v57 }
 0x786   : > { %6264 = vst.msk [vmem:[%s12487_s1 + $0xb0] sm:$0xff] %vm14457_vm9, %v6232_v10 }
 0x787   : > { %v6097_v9 = vpop.permute.xlu1 %6096  ;;  %v6099_v8 = vpop.permute.xlu0 %6098 }
 0x788   : > { %v6233_v45 = vsel %vm1841_vm13, %v6201_v30, %v6097_v9  ;;  %v6234_v47 = vsel %vm1841_vm13, %v6202_v54, %v6099_v8 }
 0x789   : > { %6265 = vst.msk [vmem:[%s12487_s1 + $0xb8] sm:$0xff] %vm14462_vm15, %v6233_v45 }
 0x78a   : > { %6266 = vst.msk [vmem:[%s12487_s1 + $0xc0] sm:$0xff] %vm14463_vm4, %v6234_v47 }
 0x78b   : > { %v6101_v49 = vpop.permute.xlu1 %6100  ;;  %v6103_v27 = vpop.permute.xlu0 %6102 }
 0x78c   : > { %v6235_v63 = vsel %vm1841_vm13, %v6203_v31, %v6101_v49  ;;  %v6236_v43 = vsel %vm1841_vm13, %v6204_v60, %v6103_v27 }
 0x78d   : > { %6267 = vst.msk [vmem:[%s12487_s1 + $0xc8] sm:$0xff] %vm14468_vm11, %v6235_v63 }
 0x78e   : > { %6268 = vst.msk [vmem:[%s12487_s1 + $0xd0] sm:$0xff] %vm14469_vm1, %v6236_v43 }
 0x78f   : > { %v6105_v61 = vpop.permute.xlu1 %6104  ;;  %v6107_v29 = vpop.permute.xlu0 %6106 }
 0x790   : > { %v6237_v1 = vsel %vm1841_vm13, %v6205_v52, %v6105_v61  ;;  %v6238_v33 = vsel %vm1841_vm13, %v6206_v4, %v6107_v29 }
 0x791   : > { %6269 = vst.msk [vmem:[%s12487_s1 + $0xd8] sm:$0xff] %vm14474_vm14, %v6237_v1 }
 0x792   : > { %6270 = vst.msk [vmem:[%s12487_s1 + $0xe0] sm:$0xff] %vm14475_vm7, %v6238_v33 }
 0x793   : > { %v6109_v37 = vpop.permute.xlu1 %6108  ;;  %v6111_v25 = vpop.permute.xlu0 %6110 }
 0x794   : > { %v6239_v13 = vsel %vm1841_vm13, %v6207_v0, %v6109_v37  ;;  %v6240_v51 = vsel %vm1841_vm13, %v6208_v26, %v6111_v25 }
 0x795   : > { %6271 = vst.msk [vmem:[%s12487_s1 + $0xe8] sm:$0xff] %vm14483_vm5, %v6239_v13 }
 0x796   : > { %6272 = vst.msk [vmem:[%s12487_s1 + $0xf0] sm:$0xff] %vm14484_vm6, %v6240_v51 }
 0x797   : > { %v6113_v19 = vpop.permute.xlu1 %6112 }
 0x798   : > { %v6241_v36 = vsel %vm1841_vm13, %v6209_v62, %v6113_v19 }
 0x799   : > { %6273 = vst.msk [vmem:[%s12487_s1 + $0xf8] sm:$0xff] %vm14489_vm12, %v6241_v36 }
 0x79a   : > { %6840 = shalt.err (!%p6837_p3)
}
 0x79b   : > { %s6841_s30 = scalar_lea.hbm %s12770_s16, 4096  ;;  %s6845_s20 = scalar_lea.hbm %s12835_s13, 8192 }
 0x79c   : > { %p6842_p4 = scmp.ne.s32.totalorder %s12770_s16, %s6841_s30  ;;  %p6846_p9 = scmp.lt.s32.totalorder %s12770_s16, %s12835_s13 }
 0x79d   : > { %p6847_p10 = scmp.lt.s32.totalorder %s6845_s20, %s6841_s30 }
 0x79e   : > { %p6843_p7 = pnand %p6842_p4, %p7019_p5 }
 0x79f   : > { %p6848_p11 = por %p6847_p10, %p6846_p9 }
 0x7a0   : > { %p6844_p8 = pneg %p6843_p7 }
 0x7a2   : > { %p6849_p12 = pnand %p6848_p11, %p6844_p8 }
 0x7a4   : > { %6852 = shalt.err (!%p6849_p12)
}
 0x7a5   : > { %s6910_s22 = smov 128  }
 0x7a6   : > { %6694 = dma.vmem_to_hbm [thread:$0]  (%p7019_p5), %s12774_s15, 4096, %s12770_s16, %s12781_s29, %s6910_s22, %s6910_s22, %s13335_s21  }
 0x7a7 PF: > { %p6700_p13 = scmp.ge.s32.totalorder %s6887_s28, 2  ;;  %s6303_s0 = sand.u32 1, %s6875_s25  }
 0x7a8   : > { %s6304_s3 = scalar_lea.sflag [#allocation3], %s6303_s0 }
 0x7a9   : > { %p6697_p0 = pnand %p6700_p13, %p7023_p6 }
 0x7ab   : > { %p6698_p1 = pneg %p6697_p0 }
 0x7ad   : > { %6870 = dma.done.wait (%p6698_p1), %s6304_s3, 4096  }
 0x7ae   : > { %6872 = vsyncadd (%p6698_p1), %s6304_s3, 4294963200  ;;  %p23_p2 = scmp.ge.s32.totalorder %s7006_s14, 4   ;;  %s14490_s25 = smov %s6879_s26 }
 0x7af   : > { %s14491_s26 = smov %s6883_s27  ;;  %s14492_s27 = smov %s7017_s17 }
 0x7b0   : > { %s14493_s28 = smov %s7006_s14  ;;  %25 = sbr.rel (!%p23_p2) target bundleno = 8 (0x8), region = 107 }
 0x7b5   :  { %6309 = vsyncpa [#allocation3], 1 }
 0x7b6   :  { %6311 = vsyncpa [#allocation3 + $0x1], 1 }

</bundles_post_ra>
